<compile_context>
chip_gen: v6e
topology: v6e:2x2x1
jax: 0.10.0
libtpu: 0.0.40
codegen_flags: <defaults>
</compile_context>

<pallas_src>
import functools

import jax
import jax.numpy as jnp
from jax.experimental import pallas as pl
from jax.experimental.pallas import tpu as pltpu

VMEM = pl.BlockSpec(memory_space=pltpu.MemorySpace.VMEM)


# ----------------------------------------------------------------------------
# Single fused kernel: citation GAT stack + author agg/pre_conv + author GAT
# stack + LSTM + lane-batched heads + edge gathers + 5 link heads.
# ----------------------------------------------------------------------------
def _reignn_kernel(x_c_ref, adj_c_ref, c_w_ref, c_v_ref,
                   member_ref, x_a_ref, w_pre_ref,
                   adj_a_ref, a_w_ref, a_v_ref,
                   lstm_w_ref, hw1_ref, hw2_ref, hw3_ref, hh2_ref,
                   hvec_ref, misc_ref, sel_ref, oh_ref,
                   o_ref, *, n_cit_layers, n_auth_layers, hidden):
    C = hidden
    bf16 = jnp.bfloat16
    f32 = jnp.float32
    negative_slope = 0.2

    def gat(x, adj_bias, w_lr, vec):
        """Single-head dense GATv2Conv + fused ReLU.

        w_lr packs [W_l | W_r] along lanes; vec rows are [b_l, b_r, att, bias].
        bf16 only at the MXU operands, f32 everywhere else (v5e friendly).
        """
        xlr = jnp.dot(x.astype(bf16), w_lr, preferred_element_type=f32)   # (N, 2C)
        xl = xlr[:, :C] + vec[0:1]                                        # source
        xr = xlr[:, C:] + vec[1:2]                                        # target
        att = vec[2:3]
        bias = vec[3:4]
        # e[i, j, c] = leaky_relu(xl[j, c] + xr[i, c])  (i = target, j = source)
        e = xl[None, :, :] + xr[:, None, :]
        e = jnp.where(e > 0.0, e, negative_slope * e)
        scores = jnp.sum(e * att, axis=-1) + adj_bias                     # (N, N)
        m = jnp.max(scores, axis=1, keepdims=True)
        p = jnp.exp(scores - m)
        inv = pl.reciprocal(jnp.sum(p, axis=1, keepdims=True), approx=True)
        alpha = (p * inv).astype(bf16)
        out = jnp.dot(alpha, xl.astype(bf16), preferred_element_type=f32) + bias
        return jnp.maximum(out, 0.0)

    # --- citation GNN: stacked GATv2 + ReLU --------------------------------
    h_c = x_c_ref[...]
    adj_c = adj_c_ref[...]
    for l in range(n_cit_layers):
        h_c = gat(h_c, adj_c, c_w_ref[l], c_v_ref[l])

    # --- author <- sum of its papers' embeddings, then pre_conv linear -----
    # concat([x_a, collab]) @ W_pre == x_a_pad @ W_pre[:C] + collab @ W_pre[C:]
    misc = misc_ref[...]
    collab = jnp.dot(member_ref[...], h_c.astype(bf16), preferred_element_type=f32)
    w_pre = w_pre_ref[...]
    x = (jnp.dot(x_a_ref[...].astype(bf16), w_pre[:C, :], preferred_element_type=f32)
         + jnp.dot(collab.astype(bf16), w_pre[C:, :], preferred_element_type=f32)
         + misc[0:1, :C])

    # --- author GNN: stacked GATv2 + ReLU; keep the per-layer sequence live -
    adj_a = adj_a_ref[...]
    seq = [x]
    for l in range(n_auth_layers):
        x = gat(x, adj_a, a_w_ref[l], a_v_ref[l])
        seq.append(x)

    # --- LSTM over per-layer embeddings (batch_first, h0=c0=0), last h -----
    # Input projections hoisted: one ((L+1)*N_A, C) @ (C, 4C) matmul; only
    # h @ W_hh remains inside the serial recurrence.
    n_a = x.shape[0]
    lstm_w = lstm_w_ref[...]
    wih = lstm_w[:C, :]                     # (C, 4C), pre-transposed, bf16
    whh = lstm_w[C:, :]                     # (C, 4C), pre-transposed, bf16
    b_lstm = misc[1:2, :]                   # (1, 4C) = b_ih + b_hh
    xs = jnp.concatenate(seq, axis=0).astype(bf16)           # ((L+1)*N_A, C)
    gates_in = jnp.dot(xs, wih, preferred_element_type=f32) + b_lstm

    h = jnp.zeros((n_a, C), f32)
    c = jnp.zeros((n_a, C), f32)
    for t in range(len(seq)):               # static unroll over L+1 timesteps
        gates = (gates_in[t * n_a:(t + 1) * n_a, :]
                 + jnp.dot(h.astype(bf16), whh, preferred_element_type=f32))
        i_g = jax.nn.sigmoid(gates[:, 0 * C:1 * C])
        f_g = jax.nn.sigmoid(gates[:, 1 * C:2 * C])
        g_g = jnp.tanh(gates[:, 2 * C:3 * C])
        o_g = jax.nn.sigmoid(gates[:, 3 * C:4 * C])
        c = f_g * c + i_g * g_g
        h = o_g * jnp.tanh(c)
    # h is h_out (N_A, C)

    # --- 4 lane-batched prediction heads (ResLinearBlock + Linear) ---------
    eps = 1e-5
    hv = hvec_ref[...]                      # rows: b1,g1,bt1,b2,g2,bt2,b3,h2b
    n_heads = hw1_ref.shape[1] // C

    def bn_relu(r, g, bt):                  # training-mode BatchNorm1d + ReLU
        m = jnp.mean(r, axis=0, keepdims=True)
        v = jnp.mean((r - m) ** 2, axis=0, keepdims=True)
        r = (r - m) * jax.lax.rsqrt(v + eps) * g + bt
        return jnp.maximum(r, 0.0)

    xb = x.astype(bf16)
    r = jnp.dot(xb, hw1_ref[...], preferred_element_type=f32) + hv[0:1]   # (N_A, 4C)
    r = bn_relu(r, hv[1:2], hv[2:3])
    r = jnp.dot(r.astype(bf16), hw2_ref[...], preferred_element_type=f32) + hv[3:4]
    r = bn_relu(r, hv[4:5], hv[5:6])
    xt = jnp.concatenate([x] * n_heads, axis=-1)            # residual, (N_A, 4C)
    z = jnp.dot((xt + r).astype(bf16), hw3_ref[...], preferred_element_type=f32) + hv[6:7]
    z = jnp.dot(z.astype(bf16), hh2_ref[...], preferred_element_type=f32) + hv[7:8]

    # z_all lane order: [h_out | sjr | hi | if | number]  (post_lp index order)
    z_all = jnp.concatenate([h, z], axis=-1)                 # (N_A, 5C), f32

    # --- edge gathers (f32 one-hot matmuls) + 5 link heads, lane-dense out --
    oh = oh_ref[...]                                         # (2, E, N_A) f32
    zs = jnp.dot(oh[0], z_all, preferred_element_type=f32)   # (E, 5C)
    zd = jnp.dot(oh[1], z_all, preferred_element_type=f32)
    prod = zs * zd                                           # hadamard operator
    # sel is a (5C, C) stripe-selection matrix with the post_lp weights folded
    # in; result lands in lanes 0..4 of a lane-dense (E, C) slab.
    out = jnp.dot(prod, sel_ref[...], preferred_element_type=f32) + misc[2:3, :C]
    o_ref[...] = out


def reignn_forward(params, x_c, x_a_pad, adj_c_bias, adj_a_bias, member, oh_pair):
    n_cit_layers = params["c_w_lr"].shape[0]
    n_auth_layers = params["a_w_lr"].shape[0]
    hidden = params["a_w_lr"].shape[1]
    e = oh_pair.shape[1]
    kern = functools.partial(_reignn_kernel,
                             n_cit_layers=n_cit_layers,
                             n_auth_layers=n_auth_layers,
                             hidden=hidden)
    out = pl.pallas_call(
        kern,
        out_shape=jax.ShapeDtypeStruct((e, hidden), jnp.float32),
        in_specs=[VMEM] * 19,
        out_specs=VMEM,
    )(x_c, adj_c_bias, params["c_w_lr"], params["c_vec"],
      member, x_a_pad, params["w_pre"],
      adj_a_bias, params["a_w_lr"], params["a_vec"],
      params["lstm_w"], params["h_w1"], params["h_w2_bd"], params["h_w3_bd"],
      params["h_h2_bd"], params["head_vec"], params["misc"], params["sel"],
      oh_pair)
    # lane-dense (E, 128) slab -> the 5 (E,) link-prediction outputs
    return [out[:, i] for i in range(5)]


# ----------------------------------------------------------------------------
# Parameter construction (deterministic, synthetic; MXU weights bf16)
# ----------------------------------------------------------------------------
def make_params(key, f_c, f_a, c_cit, c_auth, link,
                n_cit_layers, n_auth_layers, n_heads=4):
    assert f_c == c_cit, "citation GAT stacking requires f_c == latent_size_cit"
    assert c_cit == c_auth == link, "all latent widths assumed equal (module defaults)"
    C = c_auth
    keys = iter(jax.random.split(key, 64))

    def nk():
        return next(keys)

    def u(shape, fan_in):
        s = (1.0 / fan_in) ** 0.5
        return jax.random.uniform(nk(), shape, jnp.float32, -s, s)

    p = {}

    def gat_stack(nl, fin):
        wl = u((nl, fin, C), fin)
        wr = u((nl, fin, C), fin)
        bl = u((nl, 1, C), fin)
        br = u((nl, 1, C), fin)
        att = u((nl, 1, C), C)
        bias = jnp.zeros((nl, 1, C), jnp.float32)
        w_lr = jnp.concatenate([wl, wr], axis=2).astype(jnp.bfloat16)    # (nl,fin,2C)
        vec = jnp.concatenate([bl, br, att, bias], axis=1)               # (nl,4,C)
        return w_lr, vec

    p["c_w_lr"], p["c_vec"] = gat_stack(n_cit_layers, f_c)
    p["a_w_lr"], p["a_vec"] = gat_stack(n_auth_layers, C)

    # pre_conv: concat([x_a(19), collab(C)]) @ W_pre + b.  x_a is lane-padded
    # to C on the host, so W_pre's first block gets matching zero rows.
    in_sz = c_cit + f_a
    wpa = u((f_a, C), in_sz)
    wpc = u((c_cit, C), in_sz)
    wpa_pad = jnp.zeros((C, C), jnp.float32).at[:f_a].set(wpa)
    p["w_pre"] = jnp.concatenate([wpa_pad, wpc], axis=0).astype(jnp.bfloat16)  # (2C,C)
    b_pre = u((1, C), in_sz)

    # LSTM (pre-transposed, gate order i,f,g,o); bias = b_ih + b_hh.
    wih_t = u((C, 4 * C), C)
    whh_t = u((C, 4 * C), C)
    p["lstm_w"] = jnp.concatenate([wih_t, whh_t], axis=0).astype(jnp.bfloat16)  # (2C,4C)
    lstm_b = u((1, 4 * C), C) + u((1, 4 * C), C)

    # 4 live heads, stacked order (sjr, hi, if, number).  The reference also
    # builds a 'q' head that never feeds the outputs -> dropped.
    w1 = u((n_heads, C, C), C); b1 = u((n_heads, 1, C), C)
    g1 = jnp.ones((n_heads, 1, C), jnp.float32)
    bt1 = jnp.zeros((n_heads, 1, C), jnp.float32)
    w2 = u((n_heads, C, C), C); b2 = u((n_heads, 1, C), C)
    g2 = jnp.ones((n_heads, 1, C), jnp.float32)
    bt2 = jnp.zeros((n_heads, 1, C), jnp.float32)
    w3 = u((n_heads, C, link), C); b3 = u((n_heads, 1, link), C)
    h2w = u((n_heads, link, link), link); h2b = u((n_heads, 1, link), link)

    def lane_cat(w):            # (n, A, B) -> (A, n*B)
        return jnp.concatenate([w[i] for i in range(w.shape[0])], axis=1)

    def block_diag(w):          # (n, A, B) -> (n*A, n*B) block diagonal
        n, a, b = w.shape
        out = jnp.zeros((n * a, n * b), jnp.float32)
        for i in range(n):
            out = out.at[i * a:(i + 1) * a, i * b:(i + 1) * b].set(w[i])
        return out

    p["h_w1"] = lane_cat(w1).astype(jnp.bfloat16)             # (C, 4C)
    p["h_w2_bd"] = block_diag(w2).astype(jnp.bfloat16)        # (4C, 4C)
    p["h_w3_bd"] = block_diag(w3).astype(jnp.bfloat16)        # (4C, 4C)
    p["h_h2_bd"] = block_diag(h2w).astype(jnp.bfloat16)       # (4C, 4C)
    p["head_vec"] = jnp.concatenate(
        [lane_cat(v) for v in (b1, g1, bt1, b2, g2, bt2, b3, h2b)], axis=0)  # (8,4C)

    # post_lp heads, index order [h_out, sjr, hi, if, number]; folded into a
    # lane-dense stripe-selection matrix so the 5 link heads are one matmul.
    lp_w = u((5, link), link)
    lp_b = u((1, 5), link)
    sel = jnp.zeros((5 * link, C), jnp.float32)
    for i in range(5):
        sel = sel.at[i * link:(i + 1) * link, i].set(lp_w[i])
    p["sel"] = sel

    # misc rows: [b_pre (lanes 0:C) | lstm bias | post_lp bias (lanes 0:5)]
    misc = jnp.zeros((3, 4 * C), jnp.float32)
    misc = misc.at[0, :C].set(b_pre[0])
    misc = misc.at[1, :].set(lstm_b[0])
    misc = misc.at[2, :5].set(lp_b[0])
    p["misc"] = misc
    return p


def build_adj_bias(src, dst, n):
    """Dense [target, source] adjacency with self loops as an additive mask."""
    adj = jnp.zeros((n, n), jnp.float32).at[dst, src].set(1.0)
    adj = jnp.maximum(adj, jnp.eye(n, dtype=jnp.float32))
    return jnp.where(adj > 0, 0.0, -1e9).astype(jnp.float32)


# ----------------------------------------------------------------------------
if __name__ == "__main__":
    key = jax.random.PRNGKey(0)
    N_P, F_C = 16, 128         # papers, paper feature dim (== latent_size_cit)
    N_A, F_A = 8, 19           # authors, author feature dim (module implies 19)
    C = 128                    # latent_size_cit = latent_size_auth = link_size
    N_CIT_LAYERS = 2           # module builds cit_layers + 1 citation GAT layers
    N_AUTH_LAYERS = 2          # -> LSTM sequence length = 3
    E_LABEL = 8                # edge_label_index edges

    k = jax.random.split(key, 10)
    x_c = jax.random.normal(k[0], (N_P, F_C), jnp.float32)
    x_a = jax.random.normal(k[1], (N_A, F_A), jnp.float32)
    x_a_pad = jnp.zeros((N_A, C), jnp.float32).at[:, :F_A].set(x_a)

    src_c = jax.random.randint(k[2], (40,), 0, N_P)
    dst_c = jax.random.randint(k[3], (40,), 0, N_P)
    adj_c_bias = build_adj_bias(src_c, dst_c, N_P)

    src_a = jax.random.randint(k[4], (20,), 0, N_A)
    dst_a = jax.random.randint(k[5], (20,), 0, N_A)
    adj_a_bias = build_adj_bias(src_a, dst_a, N_A)

    # authors_to_papers as a dense 0/1 membership matrix (N_A, N_P)
    member = (jax.random.uniform(k[6], (N_A, N_P)) < 0.3).astype(jnp.bfloat16)

    edge_label_index = jax.random.randint(k[7], (2, E_LABEL), 0, N_A)
    oh_pair = jax.nn.one_hot(edge_label_index, N_A, dtype=jnp.float32)  # (2,E,N_A)

    params = make_params(k[8], F_C, F_A, C, C, C, N_CIT_LAYERS, N_AUTH_LAYERS)

    fwd = jax.jit(reignn_forward)
    outs = jax.block_until_ready(
        fwd(params, x_c, x_a_pad, adj_c_bias, adj_a_bias, member, oh_pair))

    assert len(outs) == 5
    assert all(o.shape == (E_LABEL,) for o in outs)
    assert all(bool(jnp.all(jnp.isfinite(o))) for o in outs)
    print("KERNEL_OK")
</pallas_src>

<mosaic_0001>
module attributes {stable_mosaic.version = 11 : i64} {
  func.func @_reignn_kernel(%arg0: memref<16x128xf32, #tpu.memory_space<vmem>>, %arg1: memref<16x16xf32, #tpu.memory_space<vmem>>, %arg2: memref<2x128x256xbf16, #tpu.memory_space<vmem>>, %arg3: memref<2x4x128xf32, #tpu.memory_space<vmem>>, %arg4: memref<8x16xbf16, #tpu.memory_space<vmem>>, %arg5: memref<8x128xf32, #tpu.memory_space<vmem>>, %arg6: memref<256x128xbf16, #tpu.memory_space<vmem>>, %arg7: memref<8x8xf32, #tpu.memory_space<vmem>>, %arg8: memref<2x128x256xbf16, #tpu.memory_space<vmem>>, %arg9: memref<2x4x128xf32, #tpu.memory_space<vmem>>, %arg10: memref<256x512xbf16, #tpu.memory_space<vmem>>, %arg11: memref<128x512xbf16, #tpu.memory_space<vmem>>, %arg12: memref<512x512xbf16, #tpu.memory_space<vmem>>, %arg13: memref<512x512xbf16, #tpu.memory_space<vmem>>, %arg14: memref<512x512xbf16, #tpu.memory_space<vmem>>, %arg15: memref<8x512xf32, #tpu.memory_space<vmem>>, %arg16: memref<3x512xf32, #tpu.memory_space<vmem>>, %arg17: memref<640x128xf32, #tpu.memory_space<vmem>>, %arg18: memref<2x8x8xf32, #tpu.memory_space<vmem>>, %arg19: memref<8x128xf32, #tpu.memory_space<vmem>>) attributes {dimension_semantics = [], scalar_prefetch = 0 : i64, scratch_operands = 0 : i64, tpu.core_type = #tpu.core_type<tc>} {
    %c0 = arith.constant 0 : index
    %c0_0 = arith.constant 0 : index
    %0 = vector.load %arg0[%c0, %c0_0] : memref<16x128xf32, #tpu.memory_space<vmem>>, vector<16x128xf32>
    %c0_1 = arith.constant 0 : index
    %c0_2 = arith.constant 0 : index
    %1 = vector.load %arg1[%c0_1, %c0_2] : memref<16x16xf32, #tpu.memory_space<vmem>>, vector<16x16xf32>
    %c0_3 = arith.constant 0 : index
    %c0_4 = arith.constant 0 : index
    %c0_5 = arith.constant 0 : index
    %2 = vector.load %arg2[%c0_3, %c0_4, %c0_5] : memref<2x128x256xbf16, #tpu.memory_space<vmem>>, vector<1x128x256xbf16>
    %3 = vector.shape_cast %2 : vector<1x128x256xbf16> to vector<128x256xbf16>
    %c0_6 = arith.constant 0 : index
    %c0_7 = arith.constant 0 : index
    %c0_8 = arith.constant 0 : index
    %4 = vector.load %arg3[%c0_6, %c0_7, %c0_8] : memref<2x4x128xf32, #tpu.memory_space<vmem>>, vector<1x4x128xf32>
    %5 = vector.shape_cast %4 : vector<1x4x128xf32> to vector<4x128xf32>
    %6 = arith.truncf %0 : vector<16x128xf32> to vector<16x128xbf16>
    %cst = arith.constant dense<0.000000e+00> : vector<16x256xf32>
    %7 = tpu.matmul %6, %3, %cst {dimension_numbers = #tpu.dot_dimension_numbers<[1], [0], [0], [1], [0, 0, 1, 1], [], []>} : vector<16x128xbf16>, vector<128x256xbf16>, vector<16x256xf32> -> vector<16x256xf32>
    %8 = vector.extract_strided_slice %7 {offsets = [0, 0], sizes = [16, 128], strides = [1, 1]} : vector<16x256xf32> to vector<16x128xf32>
    %9 = vector.extract_strided_slice %5 {offsets = [0, 0], sizes = [1, 128], strides = [1, 1]} : vector<4x128xf32> to vector<1x128xf32>
    %10 = vector.broadcast %9 : vector<1x128xf32> to vector<16x128xf32>
    %11 = arith.addf %8, %10 : vector<16x128xf32>
    %12 = vector.extract_strided_slice %7 {offsets = [0, 128], sizes = [16, 128], strides = [1, 1]} : vector<16x256xf32> to vector<16x128xf32>
    %13 = vector.extract_strided_slice %5 {offsets = [1, 0], sizes = [1, 128], strides = [1, 1]} : vector<4x128xf32> to vector<1x128xf32>
    %14 = vector.broadcast %13 : vector<1x128xf32> to vector<16x128xf32>
    %15 = arith.addf %12, %14 : vector<16x128xf32>
    %16 = vector.extract_strided_slice %5 {offsets = [2, 0], sizes = [1, 128], strides = [1, 1]} : vector<4x128xf32> to vector<1x128xf32>
    %17 = vector.extract_strided_slice %5 {offsets = [3, 0], sizes = [1, 128], strides = [1, 1]} : vector<4x128xf32> to vector<1x128xf32>
    %18 = vector.shape_cast %11 : vector<16x128xf32> to vector<1x16x128xf32>
    %19 = vector.shape_cast %15 : vector<16x128xf32> to vector<16x1x128xf32>
    %20 = vector.broadcast %18 : vector<1x16x128xf32> to vector<16x16x128xf32>
    %21 = vector.broadcast %19 : vector<16x1x128xf32> to vector<16x16x128xf32>
    %22 = arith.addf %20, %21 : vector<16x16x128xf32>
    %cst_9 = arith.constant 0.000000e+00 : f32
    %23 = vector.broadcast %cst_9 : f32 to vector<16x16x128xf32>
    %24 = arith.cmpf ogt, %22, %23 : vector<16x16x128xf32>
    %cst_10 = arith.constant 2.000000e-01 : f32
    %25 = vector.broadcast %cst_10 : f32 to vector<16x16x128xf32>
    %26 = arith.mulf %25, %22 : vector<16x16x128xf32>
    %27 = arith.select %24, %22, %26 : vector<16x16x128xi1>, vector<16x16x128xf32>
    %28 = vector.shape_cast %16 : vector<1x128xf32> to vector<1x1x128xf32>
    %29 = vector.broadcast %28 : vector<1x1x128xf32> to vector<16x16x128xf32>
    %30 = arith.mulf %27, %29 : vector<16x16x128xf32>
    %cst_11 = arith.constant dense<0.000000e+00> : vector<16x16xf32>
    %31 = vector.multi_reduction <add>, %30, %cst_11 [2] : vector<16x16x128xf32> to vector<16x16xf32>
    %32 = arith.addf %31, %1 : vector<16x16xf32>
    %cst_12 = arith.constant dense<0xFF800000> : vector<16xf32>
    %33 = vector.multi_reduction <maximumf>, %32, %cst_12 [1] : vector<16x16xf32> to vector<16xf32>
    %34 = vector.shape_cast %33 : vector<16xf32> to vector<16x1xf32>
    %35 = vector.broadcast %34 : vector<16x1xf32> to vector<16x16xf32>
    %36 = arith.subf %32, %35 : vector<16x16xf32>
    %37 = math.exp %36 : vector<16x16xf32>
    %cst_13 = arith.constant dense<0.000000e+00> : vector<16xf32>
    %38 = vector.multi_reduction <add>, %37, %cst_13 [1] : vector<16x16xf32> to vector<16xf32>
    %39 = vector.shape_cast %38 : vector<16xf32> to vector<16x1xf32>
    %40 = tpu.reciprocal %39 {approx = true} : vector<16x1xf32> -> vector<16x1xf32>
    %41 = vector.broadcast %40 : vector<16x1xf32> to vector<16x16xf32>
    %42 = arith.mulf %37, %41 : vector<16x16xf32>
    %43 = arith.truncf %42 : vector<16x16xf32> to vector<16x16xbf16>
    %44 = arith.truncf %11 : vector<16x128xf32> to vector<16x128xbf16>
    %cst_14 = arith.constant dense<0.000000e+00> : vector<16x128xf32>
    %45 = tpu.matmul %43, %44, %cst_14 {dimension_numbers = #tpu.dot_dimension_numbers<[1], [0], [0], [1], [0, 0, 1, 1], [], []>} : vector<16x16xbf16>, vector<16x128xbf16>, vector<16x128xf32> -> vector<16x128xf32>
    %46 = vector.broadcast %17 : vector<1x128xf32> to vector<16x128xf32>
    %47 = arith.addf %45, %46 : vector<16x128xf32>
    %cst_15 = arith.constant 0.000000e+00 : f32
    %48 = vector.broadcast %cst_15 : f32 to vector<16x128xf32>
    %49 = arith.maximumf %47, %48 : vector<16x128xf32>
    %c1 = arith.constant 1 : index
    %c0_16 = arith.constant 0 : index
    %c0_17 = arith.constant 0 : index
    %50 = vector.load %arg2[%c1, %c0_16, %c0_17] : memref<2x128x256xbf16, #tpu.memory_space<vmem>>, vector<1x128x256xbf16>
    %51 = vector.shape_cast %50 : vector<1x128x256xbf16> to vector<128x256xbf16>
    %c1_18 = arith.constant 1 : index
    %c0_19 = arith.constant 0 : index
    %c0_20 = arith.constant 0 : index
    %52 = vector.load %arg3[%c1_18, %c0_19, %c0_20] : memref<2x4x128xf32, #tpu.memory_space<vmem>>, vector<1x4x128xf32>
    %53 = vector.shape_cast %52 : vector<1x4x128xf32> to vector<4x128xf32>
    %54 = arith.truncf %49 : vector<16x128xf32> to vector<16x128xbf16>
    %cst_21 = arith.constant dense<0.000000e+00> : vector<16x256xf32>
    %55 = tpu.matmul %54, %51, %cst_21 {dimension_numbers = #tpu.dot_dimension_numbers<[1], [0], [0], [1], [0, 0, 1, 1], [], []>} : vector<16x128xbf16>, vector<128x256xbf16>, vector<16x256xf32> -> vector<16x256xf32>
    %56 = vector.extract_strided_slice %55 {offsets = [0, 0], sizes = [16, 128], strides = [1, 1]} : vector<16x256xf32> to vector<16x128xf32>
    %57 = vector.extract_strided_slice %53 {offsets = [0, 0], sizes = [1, 128], strides = [1, 1]} : vector<4x128xf32> to vector<1x128xf32>
    %58 = vector.broadcast %57 : vector<1x128xf32> to vector<16x128xf32>
    %59 = arith.addf %56, %58 : vector<16x128xf32>
    %60 = vector.extract_strided_slice %55 {offsets = [0, 128], sizes = [16, 128], strides = [1, 1]} : vector<16x256xf32> to vector<16x128xf32>
    %61 = vector.extract_strided_slice %53 {offsets = [1, 0], sizes = [1, 128], strides = [1, 1]} : vector<4x128xf32> to vector<1x128xf32>
    %62 = vector.broadcast %61 : vector<1x128xf32> to vector<16x128xf32>
    %63 = arith.addf %60, %62 : vector<16x128xf32>
    %64 = vector.extract_strided_slice %53 {offsets = [2, 0], sizes = [1, 128], strides = [1, 1]} : vector<4x128xf32> to vector<1x128xf32>
    %65 = vector.extract_strided_slice %53 {offsets = [3, 0], sizes = [1, 128], strides = [1, 1]} : vector<4x128xf32> to vector<1x128xf32>
    %66 = vector.shape_cast %59 : vector<16x128xf32> to vector<1x16x128xf32>
    %67 = vector.shape_cast %63 : vector<16x128xf32> to vector<16x1x128xf32>
    %68 = vector.broadcast %66 : vector<1x16x128xf32> to vector<16x16x128xf32>
    %69 = vector.broadcast %67 : vector<16x1x128xf32> to vector<16x16x128xf32>
    %70 = arith.addf %68, %69 : vector<16x16x128xf32>
    %cst_22 = arith.constant 0.000000e+00 : f32
    %71 = vector.broadcast %cst_22 : f32 to vector<16x16x128xf32>
    %72 = arith.cmpf ogt, %70, %71 : vector<16x16x128xf32>
    %cst_23 = arith.constant 2.000000e-01 : f32
    %73 = vector.broadcast %cst_23 : f32 to vector<16x16x128xf32>
    %74 = arith.mulf %73, %70 : vector<16x16x128xf32>
    %75 = arith.select %72, %70, %74 : vector<16x16x128xi1>, vector<16x16x128xf32>
    %76 = vector.shape_cast %64 : vector<1x128xf32> to vector<1x1x128xf32>
    %77 = vector.broadcast %76 : vector<1x1x128xf32> to vector<16x16x128xf32>
    %78 = arith.mulf %75, %77 : vector<16x16x128xf32>
    %cst_24 = arith.constant dense<0.000000e+00> : vector<16x16xf32>
    %79 = vector.multi_reduction <add>, %78, %cst_24 [2] : vector<16x16x128xf32> to vector<16x16xf32>
    %80 = arith.addf %79, %1 : vector<16x16xf32>
    %cst_25 = arith.constant dense<0xFF800000> : vector<16xf32>
    %81 = vector.multi_reduction <maximumf>, %80, %cst_25 [1] : vector<16x16xf32> to vector<16xf32>
    %82 = vector.shape_cast %81 : vector<16xf32> to vector<16x1xf32>
    %83 = vector.broadcast %82 : vector<16x1xf32> to vector<16x16xf32>
    %84 = arith.subf %80, %83 : vector<16x16xf32>
    %85 = math.exp %84 : vector<16x16xf32>
    %cst_26 = arith.constant dense<0.000000e+00> : vector<16xf32>
    %86 = vector.multi_reduction <add>, %85, %cst_26 [1] : vector<16x16xf32> to vector<16xf32>
    %87 = vector.shape_cast %86 : vector<16xf32> to vector<16x1xf32>
    %88 = tpu.reciprocal %87 {approx = true} : vector<16x1xf32> -> vector<16x1xf32>
    %89 = vector.broadcast %88 : vector<16x1xf32> to vector<16x16xf32>
    %90 = arith.mulf %85, %89 : vector<16x16xf32>
    %91 = arith.truncf %90 : vector<16x16xf32> to vector<16x16xbf16>
    %92 = arith.truncf %59 : vector<16x128xf32> to vector<16x128xbf16>
    %cst_27 = arith.constant dense<0.000000e+00> : vector<16x128xf32>
    %93 = tpu.matmul %91, %92, %cst_27 {dimension_numbers = #tpu.dot_dimension_numbers<[1], [0], [0], [1], [0, 0, 1, 1], [], []>} : vector<16x16xbf16>, vector<16x128xbf16>, vector<16x128xf32> -> vector<16x128xf32>
    %94 = vector.broadcast %65 : vector<1x128xf32> to vector<16x128xf32>
    %95 = arith.addf %93, %94 : vector<16x128xf32>
    %cst_28 = arith.constant 0.000000e+00 : f32
    %96 = vector.broadcast %cst_28 : f32 to vector<16x128xf32>
    %97 = arith.maximumf %95, %96 : vector<16x128xf32>
    %c0_29 = arith.constant 0 : index
    %c0_30 = arith.constant 0 : index
    %98 = vector.load %arg16[%c0_29, %c0_30] : memref<3x512xf32, #tpu.memory_space<vmem>>, vector<3x512xf32>
    %c0_31 = arith.constant 0 : index
    %c0_32 = arith.constant 0 : index
    %99 = vector.load %arg4[%c0_31, %c0_32] : memref<8x16xbf16, #tpu.memory_space<vmem>>, vector<8x16xbf16>
    %100 = arith.truncf %97 : vector<16x128xf32> to vector<16x128xbf16>
    %cst_33 = arith.constant dense<0.000000e+00> : vector<8x128xf32>
    %101 = tpu.matmul %99, %100, %cst_33 {dimension_numbers = #tpu.dot_dimension_numbers<[1], [0], [0], [1], [0, 0, 1, 1], [], []>} : vector<8x16xbf16>, vector<16x128xbf16>, vector<8x128xf32> -> vector<8x128xf32>
    %c0_34 = arith.constant 0 : index
    %c0_35 = arith.constant 0 : index
    %102 = vector.load %arg6[%c0_34, %c0_35] : memref<256x128xbf16, #tpu.memory_space<vmem>>, vector<256x128xbf16>
    %c0_36 = arith.constant 0 : index
    %c0_37 = arith.constant 0 : index
    %103 = vector.load %arg5[%c0_36, %c0_37] : memref<8x128xf32, #tpu.memory_space<vmem>>, vector<8x128xf32>
    %104 = arith.truncf %103 : vector<8x128xf32> to vector<8x128xbf16>
    %105 = vector.extract_strided_slice %102 {offsets = [0, 0], sizes = [128, 128], strides = [1, 1]} : vector<256x128xbf16> to vector<128x128xbf16>
    %cst_38 = arith.constant dense<0.000000e+00> : vector<8x128xf32>
    %106 = tpu.matmul %104, %105, %cst_38 {dimension_numbers = #tpu.dot_dimension_numbers<[1], [0], [0], [1], [0, 0, 1, 1], [], []>} : vector<8x128xbf16>, vector<128x128xbf16>, vector<8x128xf32> -> vector<8x128xf32>
    %107 = arith.truncf %101 : vector<8x128xf32> to vector<8x128xbf16>
    %108 = vector.extract_strided_slice %102 {offsets = [128, 0], sizes = [128, 128], strides = [1, 1]} : vector<256x128xbf16> to vector<128x128xbf16>
    %cst_39 = arith.constant dense<0.000000e+00> : vector<8x128xf32>
    %109 = tpu.matmul %107, %108, %cst_39 {dimension_numbers = #tpu.dot_dimension_numbers<[1], [0], [0], [1], [0, 0, 1, 1], [], []>} : vector<8x128xbf16>, vector<128x128xbf16>, vector<8x128xf32> -> vector<8x128xf32>
    %110 = arith.addf %106, %109 : vector<8x128xf32>
    %111 = vector.extract_strided_slice %98 {offsets = [0, 0], sizes = [1, 128], strides = [1, 1]} : vector<3x512xf32> to vector<1x128xf32>
    %112 = vector.broadcast %111 : vector<1x128xf32> to vector<8x128xf32>
    %113 = arith.addf %110, %112 : vector<8x128xf32>
    %c0_40 = arith.constant 0 : index
    %c0_41 = arith.constant 0 : index
    %114 = vector.load %arg7[%c0_40, %c0_41] : memref<8x8xf32, #tpu.memory_space<vmem>>, vector<8x8xf32>
    %c0_42 = arith.constant 0 : index
    %c0_43 = arith.constant 0 : index
    %c0_44 = arith.constant 0 : index
    %115 = vector.load %arg8[%c0_42, %c0_43, %c0_44] : memref<2x128x256xbf16, #tpu.memory_space<vmem>>, vector<1x128x256xbf16>
    %116 = vector.shape_cast %115 : vector<1x128x256xbf16> to vector<128x256xbf16>
    %c0_45 = arith.constant 0 : index
    %c0_46 = arith.constant 0 : index
    %c0_47 = arith.constant 0 : index
    %117 = vector.load %arg9[%c0_45, %c0_46, %c0_47] : memref<2x4x128xf32, #tpu.memory_space<vmem>>, vector<1x4x128xf32>
    %118 = vector.shape_cast %117 : vector<1x4x128xf32> to vector<4x128xf32>
    %119 = arith.truncf %113 : vector<8x128xf32> to vector<8x128xbf16>
    %cst_48 = arith.constant dense<0.000000e+00> : vector<8x256xf32>
    %120 = tpu.matmul %119, %116, %cst_48 {dimension_numbers = #tpu.dot_dimension_numbers<[1], [0], [0], [1], [0, 0, 1, 1], [], []>} : vector<8x128xbf16>, vector<128x256xbf16>, vector<8x256xf32> -> vector<8x256xf32>
    %121 = vector.extract_strided_slice %120 {offsets = [0, 0], sizes = [8, 128], strides = [1, 1]} : vector<8x256xf32> to vector<8x128xf32>
    %122 = vector.extract_strided_slice %118 {offsets = [0, 0], sizes = [1, 128], strides = [1, 1]} : vector<4x128xf32> to vector<1x128xf32>
    %123 = vector.broadcast %122 : vector<1x128xf32> to vector<8x128xf32>
    %124 = arith.addf %121, %123 : vector<8x128xf32>
    %125 = vector.extract_strided_slice %120 {offsets = [0, 128], sizes = [8, 128], strides = [1, 1]} : vector<8x256xf32> to vector<8x128xf32>
    %126 = vector.extract_strided_slice %118 {offsets = [1, 0], sizes = [1, 128], strides = [1, 1]} : vector<4x128xf32> to vector<1x128xf32>
    %127 = vector.broadcast %126 : vector<1x128xf32> to vector<8x128xf32>
    %128 = arith.addf %125, %127 : vector<8x128xf32>
    %129 = vector.extract_strided_slice %118 {offsets = [2, 0], sizes = [1, 128], strides = [1, 1]} : vector<4x128xf32> to vector<1x128xf32>
    %130 = vector.extract_strided_slice %118 {offsets = [3, 0], sizes = [1, 128], strides = [1, 1]} : vector<4x128xf32> to vector<1x128xf32>
    %131 = vector.shape_cast %124 : vector<8x128xf32> to vector<1x8x128xf32>
    %132 = vector.shape_cast %128 : vector<8x128xf32> to vector<8x1x128xf32>
    %133 = vector.broadcast %131 : vector<1x8x128xf32> to vector<8x8x128xf32>
    %134 = vector.broadcast %132 : vector<8x1x128xf32> to vector<8x8x128xf32>
    %135 = arith.addf %133, %134 : vector<8x8x128xf32>
    %cst_49 = arith.constant 0.000000e+00 : f32
    %136 = vector.broadcast %cst_49 : f32 to vector<8x8x128xf32>
    %137 = arith.cmpf ogt, %135, %136 : vector<8x8x128xf32>
    %cst_50 = arith.constant 2.000000e-01 : f32
    %138 = vector.broadcast %cst_50 : f32 to vector<8x8x128xf32>
    %139 = arith.mulf %138, %135 : vector<8x8x128xf32>
    %140 = arith.select %137, %135, %139 : vector<8x8x128xi1>, vector<8x8x128xf32>
    %141 = vector.shape_cast %129 : vector<1x128xf32> to vector<1x1x128xf32>
    %142 = vector.broadcast %141 : vector<1x1x128xf32> to vector<8x8x128xf32>
    %143 = arith.mulf %140, %142 : vector<8x8x128xf32>
    %cst_51 = arith.constant dense<0.000000e+00> : vector<8x8xf32>
    %144 = vector.multi_reduction <add>, %143, %cst_51 [2] : vector<8x8x128xf32> to vector<8x8xf32>
    %145 = arith.addf %144, %114 : vector<8x8xf32>
    %cst_52 = arith.constant dense<0xFF800000> : vector<8xf32>
    %146 = vector.multi_reduction <maximumf>, %145, %cst_52 [1] : vector<8x8xf32> to vector<8xf32>
    %147 = vector.shape_cast %146 : vector<8xf32> to vector<8x1xf32>
    %148 = vector.broadcast %147 : vector<8x1xf32> to vector<8x8xf32>
    %149 = arith.subf %145, %148 : vector<8x8xf32>
    %150 = math.exp %149 : vector<8x8xf32>
    %cst_53 = arith.constant dense<0.000000e+00> : vector<8xf32>
    %151 = vector.multi_reduction <add>, %150, %cst_53 [1] : vector<8x8xf32> to vector<8xf32>
    %152 = vector.shape_cast %151 : vector<8xf32> to vector<8x1xf32>
    %153 = tpu.reciprocal %152 {approx = true} : vector<8x1xf32> -> vector<8x1xf32>
    %154 = vector.broadcast %153 : vector<8x1xf32> to vector<8x8xf32>
    %155 = arith.mulf %150, %154 : vector<8x8xf32>
    %156 = arith.truncf %155 : vector<8x8xf32> to vector<8x8xbf16>
    %157 = arith.truncf %124 : vector<8x128xf32> to vector<8x128xbf16>
    %cst_54 = arith.constant dense<0.000000e+00> : vector<8x128xf32>
    %158 = tpu.matmul %156, %157, %cst_54 {dimension_numbers = #tpu.dot_dimension_numbers<[1], [0], [0], [1], [0, 0, 1, 1], [], []>} : vector<8x8xbf16>, vector<8x128xbf16>, vector<8x128xf32> -> vector<8x128xf32>
    %159 = vector.broadcast %130 : vector<1x128xf32> to vector<8x128xf32>
    %160 = arith.addf %158, %159 : vector<8x128xf32>
    %cst_55 = arith.constant 0.000000e+00 : f32
    %161 = vector.broadcast %cst_55 : f32 to vector<8x128xf32>
    %162 = arith.maximumf %160, %161 : vector<8x128xf32>
    %c1_56 = arith.constant 1 : index
    %c0_57 = arith.constant 0 : index
    %c0_58 = arith.constant 0 : index
    %163 = vector.load %arg8[%c1_56, %c0_57, %c0_58] : memref<2x128x256xbf16, #tpu.memory_space<vmem>>, vector<1x128x256xbf16>
    %164 = vector.shape_cast %163 : vector<1x128x256xbf16> to vector<128x256xbf16>
    %c1_59 = arith.constant 1 : index
    %c0_60 = arith.constant 0 : index
    %c0_61 = arith.constant 0 : index
    %165 = vector.load %arg9[%c1_59, %c0_60, %c0_61] : memref<2x4x128xf32, #tpu.memory_space<vmem>>, vector<1x4x128xf32>
    %166 = vector.shape_cast %165 : vector<1x4x128xf32> to vector<4x128xf32>
    %167 = arith.truncf %162 : vector<8x128xf32> to vector<8x128xbf16>
    %cst_62 = arith.constant dense<0.000000e+00> : vector<8x256xf32>
    %168 = tpu.matmul %167, %164, %cst_62 {dimension_numbers = #tpu.dot_dimension_numbers<[1], [0], [0], [1], [0, 0, 1, 1], [], []>} : vector<8x128xbf16>, vector<128x256xbf16>, vector<8x256xf32> -> vector<8x256xf32>
    %169 = vector.extract_strided_slice %168 {offsets = [0, 0], sizes = [8, 128], strides = [1, 1]} : vector<8x256xf32> to vector<8x128xf32>
    %170 = vector.extract_strided_slice %166 {offsets = [0, 0], sizes = [1, 128], strides = [1, 1]} : vector<4x128xf32> to vector<1x128xf32>
    %171 = vector.broadcast %170 : vector<1x128xf32> to vector<8x128xf32>
    %172 = arith.addf %169, %171 : vector<8x128xf32>
    %173 = vector.extract_strided_slice %168 {offsets = [0, 128], sizes = [8, 128], strides = [1, 1]} : vector<8x256xf32> to vector<8x128xf32>
    %174 = vector.extract_strided_slice %166 {offsets = [1, 0], sizes = [1, 128], strides = [1, 1]} : vector<4x128xf32> to vector<1x128xf32>
    %175 = vector.broadcast %174 : vector<1x128xf32> to vector<8x128xf32>
    %176 = arith.addf %173, %175 : vector<8x128xf32>
    %177 = vector.extract_strided_slice %166 {offsets = [2, 0], sizes = [1, 128], strides = [1, 1]} : vector<4x128xf32> to vector<1x128xf32>
    %178 = vector.extract_strided_slice %166 {offsets = [3, 0], sizes = [1, 128], strides = [1, 1]} : vector<4x128xf32> to vector<1x128xf32>
    %179 = vector.shape_cast %172 : vector<8x128xf32> to vector<1x8x128xf32>
    %180 = vector.shape_cast %176 : vector<8x128xf32> to vector<8x1x128xf32>
    %181 = vector.broadcast %179 : vector<1x8x128xf32> to vector<8x8x128xf32>
    %182 = vector.broadcast %180 : vector<8x1x128xf32> to vector<8x8x128xf32>
    %183 = arith.addf %181, %182 : vector<8x8x128xf32>
    %cst_63 = arith.constant 0.000000e+00 : f32
    %184 = vector.broadcast %cst_63 : f32 to vector<8x8x128xf32>
    %185 = arith.cmpf ogt, %183, %184 : vector<8x8x128xf32>
    %cst_64 = arith.constant 2.000000e-01 : f32
    %186 = vector.broadcast %cst_64 : f32 to vector<8x8x128xf32>
    %187 = arith.mulf %186, %183 : vector<8x8x128xf32>
    %188 = arith.select %185, %183, %187 : vector<8x8x128xi1>, vector<8x8x128xf32>
    %189 = vector.shape_cast %177 : vector<1x128xf32> to vector<1x1x128xf32>
    %190 = vector.broadcast %189 : vector<1x1x128xf32> to vector<8x8x128xf32>
    %191 = arith.mulf %188, %190 : vector<8x8x128xf32>
    %cst_65 = arith.constant dense<0.000000e+00> : vector<8x8xf32>
    %192 = vector.multi_reduction <add>, %191, %cst_65 [2] : vector<8x8x128xf32> to vector<8x8xf32>
    %193 = arith.addf %192, %114 : vector<8x8xf32>
    %cst_66 = arith.constant dense<0xFF800000> : vector<8xf32>
    %194 = vector.multi_reduction <maximumf>, %193, %cst_66 [1] : vector<8x8xf32> to vector<8xf32>
    %195 = vector.shape_cast %194 : vector<8xf32> to vector<8x1xf32>
    %196 = vector.broadcast %195 : vector<8x1xf32> to vector<8x8xf32>
    %197 = arith.subf %193, %196 : vector<8x8xf32>
    %198 = math.exp %197 : vector<8x8xf32>
    %cst_67 = arith.constant dense<0.000000e+00> : vector<8xf32>
    %199 = vector.multi_reduction <add>, %198, %cst_67 [1] : vector<8x8xf32> to vector<8xf32>
    %200 = vector.shape_cast %199 : vector<8xf32> to vector<8x1xf32>
    %201 = tpu.reciprocal %200 {approx = true} : vector<8x1xf32> -> vector<8x1xf32>
    %202 = vector.broadcast %201 : vector<8x1xf32> to vector<8x8xf32>
    %203 = arith.mulf %198, %202 : vector<8x8xf32>
    %204 = arith.truncf %203 : vector<8x8xf32> to vector<8x8xbf16>
    %205 = arith.truncf %172 : vector<8x128xf32> to vector<8x128xbf16>
    %cst_68 = arith.constant dense<0.000000e+00> : vector<8x128xf32>
    %206 = tpu.matmul %204, %205, %cst_68 {dimension_numbers = #tpu.dot_dimension_numbers<[1], [0], [0], [1], [0, 0, 1, 1], [], []>} : vector<8x8xbf16>, vector<8x128xbf16>, vector<8x128xf32> -> vector<8x128xf32>
    %207 = vector.broadcast %178 : vector<1x128xf32> to vector<8x128xf32>
    %208 = arith.addf %206, %207 : vector<8x128xf32>
    %cst_69 = arith.constant 0.000000e+00 : f32
    %209 = vector.broadcast %cst_69 : f32 to vector<8x128xf32>
    %210 = arith.maximumf %208, %209 : vector<8x128xf32>
    %c0_70 = arith.constant 0 : index
    %c0_71 = arith.constant 0 : index
    %211 = vector.load %arg10[%c0_70, %c0_71] : memref<256x512xbf16, #tpu.memory_space<vmem>>, vector<256x512xbf16>
    %212 = vector.extract_strided_slice %211 {offsets = [0, 0], sizes = [128, 512], strides = [1, 1]} : vector<256x512xbf16> to vector<128x512xbf16>
    %213 = vector.extract_strided_slice %211 {offsets = [128, 0], sizes = [128, 512], strides = [1, 1]} : vector<256x512xbf16> to vector<128x512xbf16>
    %214 = vector.extract_strided_slice %98 {offsets = [1, 0], sizes = [1, 512], strides = [1, 1]} : vector<3x512xf32> to vector<1x512xf32>
    %215 = tpu.concatenate %113, %162, %210 in 0 : vector<8x128xf32>, vector<8x128xf32>, vector<8x128xf32> -> vector<24x128xf32>
    %216 = arith.truncf %215 : vector<24x128xf32> to vector<24x128xbf16>
    %cst_72 = arith.constant dense<0.000000e+00> : vector<24x512xf32>
    %217 = tpu.matmul %216, %212, %cst_72 {dimension_numbers = #tpu.dot_dimension_numbers<[1], [0], [0], [1], [0, 0, 1, 1], [], []>} : vector<24x128xbf16>, vector<128x512xbf16>, vector<24x512xf32> -> vector<24x512xf32>
    %218 = vector.broadcast %214 : vector<1x512xf32> to vector<24x512xf32>
    %219 = arith.addf %217, %218 : vector<24x512xf32>
    %cst_73 = arith.constant 0.000000e+00 : f32
    %220 = vector.broadcast %cst_73 : f32 to vector<8x128xf32>
    %cst_74 = arith.constant 0.000000e+00 : f32
    %221 = vector.broadcast %cst_74 : f32 to vector<8x128xf32>
    %222 = vector.extract_strided_slice %219 {offsets = [0, 0], sizes = [8, 512], strides = [1, 1]} : vector<24x512xf32> to vector<8x512xf32>
    %223 = arith.truncf %220 : vector<8x128xf32> to vector<8x128xbf16>
    %cst_75 = arith.constant dense<0.000000e+00> : vector<8x512xf32>
    %224 = tpu.matmul %223, %213, %cst_75 {dimension_numbers = #tpu.dot_dimension_numbers<[1], [0], [0], [1], [0, 0, 1, 1], [], []>} : vector<8x128xbf16>, vector<128x512xbf16>, vector<8x512xf32> -> vector<8x512xf32>
    %225 = arith.addf %222, %224 : vector<8x512xf32>
    %226 = vector.extract_strided_slice %225 {offsets = [0, 0], sizes = [8, 128], strides = [1, 1]} : vector<8x512xf32> to vector<8x128xf32>
    %227 = arith.negf %226 : vector<8x128xf32>
    %228 = math.exp %227 : vector<8x128xf32>
    %cst_76 = arith.constant 1.000000e+00 : f32
    %229 = vector.broadcast %cst_76 : f32 to vector<8x128xf32>
    %230 = arith.addf %229, %228 : vector<8x128xf32>
    %231 = arith.divf %229, %230 : vector<8x128xf32>
    %232 = vector.extract_strided_slice %225 {offsets = [0, 128], sizes = [8, 128], strides = [1, 1]} : vector<8x512xf32> to vector<8x128xf32>
    %233 = arith.negf %232 : vector<8x128xf32>
    %234 = math.exp %233 : vector<8x128xf32>
    %cst_77 = arith.constant 1.000000e+00 : f32
    %235 = vector.broadcast %cst_77 : f32 to vector<8x128xf32>
    %236 = arith.addf %235, %234 : vector<8x128xf32>
    %237 = arith.divf %235, %236 : vector<8x128xf32>
    %238 = vector.extract_strided_slice %225 {offsets = [0, 256], sizes = [8, 128], strides = [1, 1]} : vector<8x512xf32> to vector<8x128xf32>
    %239 = math.tanh %238 : vector<8x128xf32>
    %240 = vector.extract_strided_slice %225 {offsets = [0, 384], sizes = [8, 128], strides = [1, 1]} : vector<8x512xf32> to vector<8x128xf32>
    %241 = arith.negf %240 : vector<8x128xf32>
    %242 = math.exp %241 : vector<8x128xf32>
    %cst_78 = arith.constant 1.000000e+00 : f32
    %243 = vector.broadcast %cst_78 : f32 to vector<8x128xf32>
    %244 = arith.addf %243, %242 : vector<8x128xf32>
    %245 = arith.divf %243, %244 : vector<8x128xf32>
    %246 = arith.mulf %237, %221 : vector<8x128xf32>
    %247 = arith.mulf %231, %239 : vector<8x128xf32>
    %248 = arith.addf %246, %247 : vector<8x128xf32>
    %249 = math.tanh %248 : vector<8x128xf32>
    %250 = arith.mulf %245, %249 : vector<8x128xf32>
    %251 = vector.extract_strided_slice %219 {offsets = [8, 0], sizes = [8, 512], strides = [1, 1]} : vector<24x512xf32> to vector<8x512xf32>
    %252 = arith.truncf %250 : vector<8x128xf32> to vector<8x128xbf16>
    %cst_79 = arith.constant dense<0.000000e+00> : vector<8x512xf32>
    %253 = tpu.matmul %252, %213, %cst_79 {dimension_numbers = #tpu.dot_dimension_numbers<[1], [0], [0], [1], [0, 0, 1, 1], [], []>} : vector<8x128xbf16>, vector<128x512xbf16>, vector<8x512xf32> -> vector<8x512xf32>
    %254 = arith.addf %251, %253 : vector<8x512xf32>
    %255 = vector.extract_strided_slice %254 {offsets = [0, 0], sizes = [8, 128], strides = [1, 1]} : vector<8x512xf32> to vector<8x128xf32>
    %256 = arith.negf %255 : vector<8x128xf32>
    %257 = math.exp %256 : vector<8x128xf32>
    %cst_80 = arith.constant 1.000000e+00 : f32
    %258 = vector.broadcast %cst_80 : f32 to vector<8x128xf32>
    %259 = arith.addf %258, %257 : vector<8x128xf32>
    %260 = arith.divf %258, %259 : vector<8x128xf32>
    %261 = vector.extract_strided_slice %254 {offsets = [0, 128], sizes = [8, 128], strides = [1, 1]} : vector<8x512xf32> to vector<8x128xf32>
    %262 = arith.negf %261 : vector<8x128xf32>
    %263 = math.exp %262 : vector<8x128xf32>
    %cst_81 = arith.constant 1.000000e+00 : f32
    %264 = vector.broadcast %cst_81 : f32 to vector<8x128xf32>
    %265 = arith.addf %264, %263 : vector<8x128xf32>
    %266 = arith.divf %264, %265 : vector<8x128xf32>
    %267 = vector.extract_strided_slice %254 {offsets = [0, 256], sizes = [8, 128], strides = [1, 1]} : vector<8x512xf32> to vector<8x128xf32>
    %268 = math.tanh %267 : vector<8x128xf32>
    %269 = vector.extract_strided_slice %254 {offsets = [0, 384], sizes = [8, 128], strides = [1, 1]} : vector<8x512xf32> to vector<8x128xf32>
    %270 = arith.negf %269 : vector<8x128xf32>
    %271 = math.exp %270 : vector<8x128xf32>
    %cst_82 = arith.constant 1.000000e+00 : f32
    %272 = vector.broadcast %cst_82 : f32 to vector<8x128xf32>
    %273 = arith.addf %272, %271 : vector<8x128xf32>
    %274 = arith.divf %272, %273 : vector<8x128xf32>
    %275 = arith.mulf %266, %248 : vector<8x128xf32>
    %276 = arith.mulf %260, %268 : vector<8x128xf32>
    %277 = arith.addf %275, %276 : vector<8x128xf32>
    %278 = math.tanh %277 : vector<8x128xf32>
    %279 = arith.mulf %274, %278 : vector<8x128xf32>
    %280 = vector.extract_strided_slice %219 {offsets = [16, 0], sizes = [8, 512], strides = [1, 1]} : vector<24x512xf32> to vector<8x512xf32>
    %281 = arith.truncf %279 : vector<8x128xf32> to vector<8x128xbf16>
    %cst_83 = arith.constant dense<0.000000e+00> : vector<8x512xf32>
    %282 = tpu.matmul %281, %213, %cst_83 {dimension_numbers = #tpu.dot_dimension_numbers<[1], [0], [0], [1], [0, 0, 1, 1], [], []>} : vector<8x128xbf16>, vector<128x512xbf16>, vector<8x512xf32> -> vector<8x512xf32>
    %283 = arith.addf %280, %282 : vector<8x512xf32>
    %284 = vector.extract_strided_slice %283 {offsets = [0, 0], sizes = [8, 128], strides = [1, 1]} : vector<8x512xf32> to vector<8x128xf32>
    %285 = arith.negf %284 : vector<8x128xf32>
    %286 = math.exp %285 : vector<8x128xf32>
    %cst_84 = arith.constant 1.000000e+00 : f32
    %287 = vector.broadcast %cst_84 : f32 to vector<8x128xf32>
    %288 = arith.addf %287, %286 : vector<8x128xf32>
    %289 = arith.divf %287, %288 : vector<8x128xf32>
    %290 = vector.extract_strided_slice %283 {offsets = [0, 128], sizes = [8, 128], strides = [1, 1]} : vector<8x512xf32> to vector<8x128xf32>
    %291 = arith.negf %290 : vector<8x128xf32>
    %292 = math.exp %291 : vector<8x128xf32>
    %cst_85 = arith.constant 1.000000e+00 : f32
    %293 = vector.broadcast %cst_85 : f32 to vector<8x128xf32>
    %294 = arith.addf %293, %292 : vector<8x128xf32>
    %295 = arith.divf %293, %294 : vector<8x128xf32>
    %296 = vector.extract_strided_slice %283 {offsets = [0, 256], sizes = [8, 128], strides = [1, 1]} : vector<8x512xf32> to vector<8x128xf32>
    %297 = math.tanh %296 : vector<8x128xf32>
    %298 = vector.extract_strided_slice %283 {offsets = [0, 384], sizes = [8, 128], strides = [1, 1]} : vector<8x512xf32> to vector<8x128xf32>
    %299 = arith.negf %298 : vector<8x128xf32>
    %300 = math.exp %299 : vector<8x128xf32>
    %cst_86 = arith.constant 1.000000e+00 : f32
    %301 = vector.broadcast %cst_86 : f32 to vector<8x128xf32>
    %302 = arith.addf %301, %300 : vector<8x128xf32>
    %303 = arith.divf %301, %302 : vector<8x128xf32>
    %304 = arith.mulf %295, %277 : vector<8x128xf32>
    %305 = arith.mulf %289, %297 : vector<8x128xf32>
    %306 = arith.addf %304, %305 : vector<8x128xf32>
    %307 = math.tanh %306 : vector<8x128xf32>
    %308 = arith.mulf %303, %307 : vector<8x128xf32>
    %c0_87 = arith.constant 0 : index
    %c0_88 = arith.constant 0 : index
    %309 = vector.load %arg15[%c0_87, %c0_88] : memref<8x512xf32, #tpu.memory_space<vmem>>, vector<8x512xf32>
    %310 = arith.truncf %210 : vector<8x128xf32> to vector<8x128xbf16>
    %c0_89 = arith.constant 0 : index
    %c0_90 = arith.constant 0 : index
    %311 = vector.load %arg11[%c0_89, %c0_90] : memref<128x512xbf16, #tpu.memory_space<vmem>>, vector<128x512xbf16>
    %cst_91 = arith.constant dense<0.000000e+00> : vector<8x512xf32>
    %312 = tpu.matmul %310, %311, %cst_91 {dimension_numbers = #tpu.dot_dimension_numbers<[1], [0], [0], [1], [0, 0, 1, 1], [], []>} : vector<8x128xbf16>, vector<128x512xbf16>, vector<8x512xf32> -> vector<8x512xf32>
    %313 = vector.extract_strided_slice %309 {offsets = [0, 0], sizes = [1, 512], strides = [1, 1]} : vector<8x512xf32> to vector<1x512xf32>
    %314 = vector.broadcast %313 : vector<1x512xf32> to vector<8x512xf32>
    %315 = arith.addf %312, %314 : vector<8x512xf32>
    %316 = vector.extract_strided_slice %309 {offsets = [1, 0], sizes = [1, 512], strides = [1, 1]} : vector<8x512xf32> to vector<1x512xf32>
    %317 = vector.extract_strided_slice %309 {offsets = [2, 0], sizes = [1, 512], strides = [1, 1]} : vector<8x512xf32> to vector<1x512xf32>
    %cst_92 = arith.constant dense<0.000000e+00> : vector<512xf32>
    %318 = vector.multi_reduction <add>, %315, %cst_92 [0] : vector<8x512xf32> to vector<512xf32>
    %319 = vector.shape_cast %318 : vector<512xf32> to vector<1x512xf32>
    %cst_93 = arith.constant 8.000000e+00 : f32
    %320 = vector.broadcast %cst_93 : f32 to vector<1x512xf32>
    %321 = arith.divf %319, %320 : vector<1x512xf32>
    %322 = vector.broadcast %321 : vector<1x512xf32> to vector<8x512xf32>
    %323 = arith.subf %315, %322 : vector<8x512xf32>
    %324 = arith.mulf %323, %323 : vector<8x512xf32>
    %cst_94 = arith.constant dense<0.000000e+00> : vector<512xf32>
    %325 = vector.multi_reduction <add>, %324, %cst_94 [0] : vector<8x512xf32> to vector<512xf32>
    %326 = vector.shape_cast %325 : vector<512xf32> to vector<1x512xf32>
    %cst_95 = arith.constant 8.000000e+00 : f32
    %327 = vector.broadcast %cst_95 : f32 to vector<1x512xf32>
    %328 = arith.divf %326, %327 : vector<1x512xf32>
    %329 = vector.broadcast %321 : vector<1x512xf32> to vector<8x512xf32>
    %330 = arith.subf %315, %329 : vector<8x512xf32>
    %cst_96 = arith.constant 9.99999974E-6 : f32
    %331 = vector.broadcast %cst_96 : f32 to vector<1x512xf32>
    %332 = arith.addf %328, %331 : vector<1x512xf32>
    %333 = math.rsqrt %332 : vector<1x512xf32>
    %334 = vector.broadcast %333 : vector<1x512xf32> to vector<8x512xf32>
    %335 = arith.mulf %330, %334 : vector<8x512xf32>
    %336 = vector.broadcast %316 : vector<1x512xf32> to vector<8x512xf32>
    %337 = arith.mulf %335, %336 : vector<8x512xf32>
    %338 = vector.broadcast %317 : vector<1x512xf32> to vector<8x512xf32>
    %339 = arith.addf %337, %338 : vector<8x512xf32>
    %cst_97 = arith.constant 0.000000e+00 : f32
    %340 = vector.broadcast %cst_97 : f32 to vector<8x512xf32>
    %341 = arith.maximumf %339, %340 : vector<8x512xf32>
    %342 = arith.truncf %341 : vector<8x512xf32> to vector<8x512xbf16>
    %c0_98 = arith.constant 0 : index
    %c0_99 = arith.constant 0 : index
    %343 = vector.load %arg12[%c0_98, %c0_99] : memref<512x512xbf16, #tpu.memory_space<vmem>>, vector<512x512xbf16>
    %cst_100 = arith.constant dense<0.000000e+00> : vector<8x512xf32>
    %344 = tpu.matmul %342, %343, %cst_100 {dimension_numbers = #tpu.dot_dimension_numbers<[1], [0], [0], [1], [0, 0, 1, 1], [], []>} : vector<8x512xbf16>, vector<512x512xbf16>, vector<8x512xf32> -> vector<8x512xf32>
    %345 = vector.extract_strided_slice %309 {offsets = [3, 0], sizes = [1, 512], strides = [1, 1]} : vector<8x512xf32> to vector<1x512xf32>
    %346 = vector.broadcast %345 : vector<1x512xf32> to vector<8x512xf32>
    %347 = arith.addf %344, %346 : vector<8x512xf32>
    %348 = vector.extract_strided_slice %309 {offsets = [4, 0], sizes = [1, 512], strides = [1, 1]} : vector<8x512xf32> to vector<1x512xf32>
    %349 = vector.extract_strided_slice %309 {offsets = [5, 0], sizes = [1, 512], strides = [1, 1]} : vector<8x512xf32> to vector<1x512xf32>
    %cst_101 = arith.constant dense<0.000000e+00> : vector<512xf32>
    %350 = vector.multi_reduction <add>, %347, %cst_101 [0] : vector<8x512xf32> to vector<512xf32>
    %351 = vector.shape_cast %350 : vector<512xf32> to vector<1x512xf32>
    %cst_102 = arith.constant 8.000000e+00 : f32
    %352 = vector.broadcast %cst_102 : f32 to vector<1x512xf32>
    %353 = arith.divf %351, %352 : vector<1x512xf32>
    %354 = vector.broadcast %353 : vector<1x512xf32> to vector<8x512xf32>
    %355 = arith.subf %347, %354 : vector<8x512xf32>
    %356 = arith.mulf %355, %355 : vector<8x512xf32>
    %cst_103 = arith.constant dense<0.000000e+00> : vector<512xf32>
    %357 = vector.multi_reduction <add>, %356, %cst_103 [0] : vector<8x512xf32> to vector<512xf32>
    %358 = vector.shape_cast %357 : vector<512xf32> to vector<1x512xf32>
    %cst_104 = arith.constant 8.000000e+00 : f32
    %359 = vector.broadcast %cst_104 : f32 to vector<1x512xf32>
    %360 = arith.divf %358, %359 : vector<1x512xf32>
    %361 = vector.broadcast %353 : vector<1x512xf32> to vector<8x512xf32>
    %362 = arith.subf %347, %361 : vector<8x512xf32>
    %cst_105 = arith.constant 9.99999974E-6 : f32
    %363 = vector.broadcast %cst_105 : f32 to vector<1x512xf32>
    %364 = arith.addf %360, %363 : vector<1x512xf32>
    %365 = math.rsqrt %364 : vector<1x512xf32>
    %366 = vector.broadcast %365 : vector<1x512xf32> to vector<8x512xf32>
    %367 = arith.mulf %362, %366 : vector<8x512xf32>
    %368 = vector.broadcast %348 : vector<1x512xf32> to vector<8x512xf32>
    %369 = arith.mulf %367, %368 : vector<8x512xf32>
    %370 = vector.broadcast %349 : vector<1x512xf32> to vector<8x512xf32>
    %371 = arith.addf %369, %370 : vector<8x512xf32>
    %cst_106 = arith.constant 0.000000e+00 : f32
    %372 = vector.broadcast %cst_106 : f32 to vector<8x512xf32>
    %373 = arith.maximumf %371, %372 : vector<8x512xf32>
    %374 = tpu.concatenate %210, %210, %210, %210 in 1 : vector<8x128xf32>, vector<8x128xf32>, vector<8x128xf32>, vector<8x128xf32> -> vector<8x512xf32>
    %375 = arith.addf %374, %373 : vector<8x512xf32>
    %376 = arith.truncf %375 : vector<8x512xf32> to vector<8x512xbf16>
    %c0_107 = arith.constant 0 : index
    %c0_108 = arith.constant 0 : index
    %377 = vector.load %arg13[%c0_107, %c0_108] : memref<512x512xbf16, #tpu.memory_space<vmem>>, vector<512x512xbf16>
    %cst_109 = arith.constant dense<0.000000e+00> : vector<8x512xf32>
    %378 = tpu.matmul %376, %377, %cst_109 {dimension_numbers = #tpu.dot_dimension_numbers<[1], [0], [0], [1], [0, 0, 1, 1], [], []>} : vector<8x512xbf16>, vector<512x512xbf16>, vector<8x512xf32> -> vector<8x512xf32>
    %379 = vector.extract_strided_slice %309 {offsets = [6, 0], sizes = [1, 512], strides = [1, 1]} : vector<8x512xf32> to vector<1x512xf32>
    %380 = vector.broadcast %379 : vector<1x512xf32> to vector<8x512xf32>
    %381 = arith.addf %378, %380 : vector<8x512xf32>
    %382 = arith.truncf %381 : vector<8x512xf32> to vector<8x512xbf16>
    %c0_110 = arith.constant 0 : index
    %c0_111 = arith.constant 0 : index
    %383 = vector.load %arg14[%c0_110, %c0_111] : memref<512x512xbf16, #tpu.memory_space<vmem>>, vector<512x512xbf16>
    %cst_112 = arith.constant dense<0.000000e+00> : vector<8x512xf32>
    %384 = tpu.matmul %382, %383, %cst_112 {dimension_numbers = #tpu.dot_dimension_numbers<[1], [0], [0], [1], [0, 0, 1, 1], [], []>} : vector<8x512xbf16>, vector<512x512xbf16>, vector<8x512xf32> -> vector<8x512xf32>
    %385 = vector.extract_strided_slice %309 {offsets = [7, 0], sizes = [1, 512], strides = [1, 1]} : vector<8x512xf32> to vector<1x512xf32>
    %386 = vector.broadcast %385 : vector<1x512xf32> to vector<8x512xf32>
    %387 = arith.addf %384, %386 : vector<8x512xf32>
    %388 = tpu.concatenate %308, %387 in 1 : vector<8x128xf32>, vector<8x512xf32> -> vector<8x640xf32>
    %c0_113 = arith.constant 0 : index
    %c0_114 = arith.constant 0 : index
    %c0_115 = arith.constant 0 : index
    %389 = vector.load %arg18[%c0_113, %c0_114, %c0_115] : memref<2x8x8xf32, #tpu.memory_space<vmem>>, vector<2x8x8xf32>
    %390 = vector.extract_strided_slice %389 {offsets = [0, 0, 0], sizes = [1, 8, 8], strides = [1, 1, 1]} : vector<2x8x8xf32> to vector<1x8x8xf32>
    %391 = vector.shape_cast %390 : vector<1x8x8xf32> to vector<8x8xf32>
    %cst_116 = arith.constant dense<0.000000e+00> : vector<8x640xf32>
    %392 = tpu.matmul %391, %388, %cst_116 {dimension_numbers = #tpu.dot_dimension_numbers<[1], [0], [0], [1], [0, 0, 1, 1], [], []>} : vector<8x8xf32>, vector<8x640xf32>, vector<8x640xf32> -> vector<8x640xf32>
    %393 = vector.extract_strided_slice %389 {offsets = [1, 0, 0], sizes = [1, 8, 8], strides = [1, 1, 1]} : vector<2x8x8xf32> to vector<1x8x8xf32>
    %394 = vector.shape_cast %393 : vector<1x8x8xf32> to vector<8x8xf32>
    %cst_117 = arith.constant dense<0.000000e+00> : vector<8x640xf32>
    %395 = tpu.matmul %394, %388, %cst_117 {dimension_numbers = #tpu.dot_dimension_numbers<[1], [0], [0], [1], [0, 0, 1, 1], [], []>} : vector<8x8xf32>, vector<8x640xf32>, vector<8x640xf32> -> vector<8x640xf32>
    %396 = arith.mulf %392, %395 : vector<8x640xf32>
    %c0_118 = arith.constant 0 : index
    %c0_119 = arith.constant 0 : index
    %397 = vector.load %arg17[%c0_118, %c0_119] : memref<640x128xf32, #tpu.memory_space<vmem>>, vector<640x128xf32>
    %cst_120 = arith.constant dense<0.000000e+00> : vector<8x128xf32>
    %398 = tpu.matmul %396, %397, %cst_120 {dimension_numbers = #tpu.dot_dimension_numbers<[1], [0], [0], [1], [0, 0, 1, 1], [], []>} : vector<8x640xf32>, vector<640x128xf32>, vector<8x128xf32> -> vector<8x128xf32>
    %399 = vector.extract_strided_slice %98 {offsets = [2, 0], sizes = [1, 128], strides = [1, 1]} : vector<3x512xf32> to vector<1x128xf32>
    %400 = vector.broadcast %399 : vector<1x128xf32> to vector<8x128xf32>
    %401 = arith.addf %398, %400 : vector<8x128xf32>
    %c0_121 = arith.constant 0 : index
    %c0_122 = arith.constant 0 : index
    %402 = vector.load %arg19[%c0_121, %c0_122] : memref<8x128xf32, #tpu.memory_space<vmem>>, vector<8x128xf32>
    tpu.vector_store %arg19[%c0_121, %c0_122], %401 {strides = array<i32>} : memref<8x128xf32, #tpu.memory_space<vmem>>, vector<8x128xf32>,
    return
  }
}

</mosaic_0001>

<bundles_post_ra>
// kernel: reignn_forward.1
= control target key start
LH: loop header
LB: loop body
LE: loop exit
PB: predicated region body
PF: predicated region fallthrough
CT: control target
= control target key end

     0   :  { %s15699_s0 = inlined_call_operand.vmem [shape: f32[16,128], index: 0, kind: input, shape index: {}]   ;;  %s15700_s1 = inlined_call_operand.hbm [shape: f32[16,16], index: 1, kind: input, shape index: {}]   ;;  %s15701_s2 = inlined_call_operand.hbm [shape: bf16[2,128,256], index: 2, kind: input, shape index: {}]   ;;  %s15702_s3 = inlined_call_operand.hbm [shape: f32[2,4,128], index: 3, kind: input, shape index: {}]   ;;  %s15703_s4 = inlined_call_operand.hbm [shape: bf16[8,16], index: 4, kind: input, shape index: {}]   ;;  %s15704_s5 = inlined_call_operand.hbm [shape: f32[8,128], index: 5, kind: input, shape index: {}]   ;;  %s15705_s6 = inlined_call_operand.hbm [shape: bf16[256,128], index: 6, kind: input, shape index: {}]   ;;  %s15706_s7 = inlined_call_operand.hbm [shape: f32[8,8], index: 7, kind: input, shape index: {}]   ;;  %s15707_s8 = inlined_call_operand.hbm [shape: bf16[2,128,256], index: 8, kind: input, shape index: {}]   ;;  %s15708_s9 = inlined_call_operand.hbm [shape: f32[2,4,128], index: 9, kind: input, shape index: {}]   ;;  %s15709_s10 = inlined_call_operand.hbm [shape: bf16[256,512], index: 10, kind: input, shape index: {}]   ;;  %s15710_s11 = inlined_call_operand.hbm [shape: bf16[128,512], index: 11, kind: input, shape index: {}]   ;;  %s15711_s12 = inlined_call_operand.hbm [shape: bf16[512,512], index: 12, kind: input, shape index: {}]   ;;  %s15712_s13 = inlined_call_operand.hbm [shape: bf16[512,512], index: 13, kind: input, shape index: {}]   ;;  %s15713_s14 = inlined_call_operand.hbm [shape: bf16[512,512], index: 14, kind: input, shape index: {}]   ;;  %s15714_s15 = inlined_call_operand.hbm [shape: f32[8,512], index: 15, kind: input, shape index: {}]   ;;  %s15715_s16 = inlined_call_operand.hbm [shape: f32[3,512], index: 16, kind: input, shape index: {}]   ;;  %s15716_s17 = inlined_call_operand.hbm [shape: f32[640,128], index: 17, kind: input, shape index: {}]   ;;  %s15717_s18 = inlined_call_operand.vmem [shape: f32[2,8,8], index: 18, kind: input, shape index: {}]   ;;  %s15718_s19 = inlined_call_operand.vmem [shape: f32[8,128], index: 19, kind: output, shape index: {}]  }
   0x1   :  { %15794 = sst [smem:[#allocation84_spill]] %s15699_s0 }
   0x2   :  { %15795 = sst [smem:[#allocation85_spill]] %s15700_s1 }
   0x3   :  { %15796 = sst [smem:[#allocation86_spill]] %s15701_s2 }
   0x4   :  { %15797 = sst [smem:[#allocation87_spill]] %s15702_s3 }
   0x5   :  { %24 = vsyncpa [#allocation3], 0 }
   0x6   :  { %25 = vsyncpa [#allocation5], 0 }
   0x7   :  { %26 = vsyncpa [#allocation8], 0 }
   0x8   :  { %27 = vsyncpa [#allocation11], 0 }
   0x9   :  { %28 = vsyncpa [#allocation14], 0 }
   0xa   :  { %29 = vsyncpa [#allocation17], 0 }
   0xb   :  { %30 = vsyncpa [#allocation20], 0 }
   0xc   :  { %31 = vsyncpa [#allocation23], 0 }
   0xd   :  { %32 = vsyncpa [#allocation26], 0  ;;  %s13233_s0 = smov [#allocation4]   ;;  %s13234_s20 = smov [#allocation7]  }
   0xe   :  { %s52_s30 = sshll.u32 %s13233_s0, 4  ;;  %s77_s21 = sshll.u32 %s13234_s20, 4  ;;  %s53_s30 = int_to_ptr.vmem [resolvable:$true] %s52_s30  ;;  %s78_s21 = int_to_ptr.vmem [resolvable:$true] %s77_s21 }
   0xf   :  { %s12883_s1 = scalar_lea.vmem %s53_s30, 4096  ;;  %p12888_p1 = scmp.lt.s32.totalorder %s53_s30, %s53_s30 }
  0x10   :  { %p12884_p0 = scmp.ne.s32.totalorder %s53_s30, %s12883_s1  ;;  %p12889_p2 = scmp.lt.s32.totalorder %s12883_s1, %s12883_s1 }
  0x12   :  { %p12890_p3 = por %p12889_p2, %p12888_p1 }
  0x14   :  { %p12891_p4 = pnand %p12890_p3, %p12884_p0 }
  0x16   :  { %12894 = shalt.err (!%p12891_p4)
}
  0x17   :  { %s13235_s22 = smov 128   ;;  %s13236_s2 = smov 8  }
  0x18   :  { %s15798_s25 = sld [smem:[#allocation86_spill]]  ;;  %s12903_s3 = scalar_lea.vmem %s78_s21, 64 }
  0x19   :  { %p12904_p5 = scmp.ne.s32.totalorder %s78_s21, %s12903_s3  ;;  %p12908_p6 = scmp.lt.s32.totalorder %s78_s21, %s78_s21 }
  0x1a   :  { %p12909_p7 = scmp.lt.s32.totalorder %s12903_s3, %s12903_s3 }
  0x1c   :  { %p12910_p8 = por %p12909_p7, %p12908_p6 }
  0x1e   :  { %58 = dma.hbm_to_vmem [thread:$0]  %s15798_s25, 4096, %s53_s30, [#allocation5], %s13235_s22, %s13235_s22, %s13236_s2  }
  0x1f   :  { %p12911_p9 = pnand %p12910_p8, %p12904_p5 }
  0x21   :  { %12914 = shalt.err (!%p12911_p9)
}
  0x22   :  { %80 = dma.hbm_to_vmem [thread:$0]  %s15703_s4, 64, %s78_s21, [#allocation8]  }
  0x23   :  { %s13237_s28 = smov [#allocation10]   ;;  %s13238_s0 = smov [#allocation13]  }
  0x24   :  { %s96_s29 = sshll.u32 %s13237_s28, 4  ;;  %s118_s20 = sshll.u32 %s13238_s0, 4  ;;  %s97_s29 = int_to_ptr.vmem [resolvable:$true] %s96_s29  ;;  %s119_s20 = int_to_ptr.vmem [resolvable:$true] %s118_s20 }
  0x25   :  { %s12923_s1 = scalar_lea.vmem %s97_s29, 2048  ;;  %p12928_p11 = scmp.lt.s32.totalorder %s97_s29, %s97_s29 }
  0x26   :  { %p12924_p10 = scmp.ne.s32.totalorder %s97_s29, %s12923_s1  ;;  %p12929_p12 = scmp.lt.s32.totalorder %s12923_s1, %s12923_s1 }
  0x28   :  { %p12930_p13 = por %p12929_p12, %p12928_p11 }
  0x2a   :  { %p12931_p0 = pnand %p12930_p13, %p12924_p10 }
  0x2c   :  { %12934 = shalt.err (!%p12931_p0)
}
  0x2d   :  { %s13239_s30 = smov 64   ;;  %s13240_s23 = smov 4  }
  0x2e   :  { %102 = dma.hbm_to_vmem [thread:$0]  %s15705_s6, 2048, %s97_s29, [#allocation11], %s13239_s30, %s13239_s30, %s13240_s23  }
  0x2f   :  { %s12943_s21 = scalar_lea.vmem %s119_s20, 4096  ;;  %p12948_p2 = scmp.lt.s32.totalorder %s119_s20, %s119_s20 }
  0x30   :  { %p12944_p1 = scmp.ne.s32.totalorder %s119_s20, %s12943_s21  ;;  %p12949_p3 = scmp.lt.s32.totalorder %s12943_s21, %s12943_s21 }
  0x32   :  { %p12950_p4 = por %p12949_p3, %p12948_p2 }
  0x34   :  { %p12951_p5 = pnand %p12950_p4, %p12944_p1 }
  0x36   :  { %12954 = shalt.err (!%p12951_p5)
}
  0x37   :  { %124 = dma.hbm_to_vmem [thread:$0]  %s15707_s8, 4096, %s119_s20, [#allocation14], %s13235_s22, %s13235_s22, %s13236_s2  }
  0x38   :  { %s13241_s26 = smov [#allocation16]  }
  0x39   :  { %s142_s27 = sshll.u32 %s13241_s26, 4  ;;  %s143_s27 = int_to_ptr.vmem [resolvable:$true] %s142_s27 }
  0x3a   :  { %s12963_s28 = scalar_lea.vmem %s143_s27, 8192  ;;  %p12968_p7 = scmp.lt.s32.totalorder %s143_s27, %s143_s27 }
  0x3b   :  { %p12964_p6 = scmp.ne.s32.totalorder %s143_s27, %s12963_s28  ;;  %p12969_p8 = scmp.lt.s32.totalorder %s12963_s28, %s12963_s28 }
  0x3d   :  { %p12970_p9 = por %p12969_p8, %p12968_p7 }
  0x3f   :  { %p12971_p10 = pnand %p12970_p9, %p12964_p6 }
  0x41   :  { %12974 = shalt.err (!%p12971_p10)
}
  0x42   :  { %s13242_s6 = smov 256   ;;  %s13243_s29 = smov 16  }
  0x43   :  { %148 = dma.hbm_to_vmem [thread:$0]  %s15709_s10, 8192, %s143_s27, [#allocation17], %s13242_s6, %s13242_s6, %s13243_s29  }
  0x44   :  { %s13244_s8 = smov [#allocation19]   ;;  %s13245_s24 = smov [#allocation22]  }
  0x45   :  { %s166_s20 = sshll.u32 %s13244_s8, 4  ;;  %s190_s4 = sshll.u32 %s13245_s24, 4  ;;  %s167_s20 = int_to_ptr.vmem [resolvable:$true] %s166_s20  ;;  %s191_s4 = int_to_ptr.vmem [resolvable:$true] %s190_s4 }
  0x46   :  { %s12983_s21 = scalar_lea.vmem %s167_s20, 16384  ;;  %p12988_p12 = scmp.lt.s32.totalorder %s167_s20, %s167_s20 }
  0x47   :  { %p12984_p11 = scmp.ne.s32.totalorder %s167_s20, %s12983_s21  ;;  %p12989_p13 = scmp.lt.s32.totalorder %s12983_s21, %s12983_s21 }
  0x49   :  { %p12990_p0 = por %p12989_p13, %p12988_p12 }
  0x4b   :  { %p12991_p1 = pnand %p12990_p0, %p12984_p11 }
  0x4d   :  { %12994 = shalt.err (!%p12991_p1)
}
  0x4e   :  { %172 = dma.hbm_to_vmem [thread:$0]  %s15711_s12, 16384, %s167_s20, [#allocation20], %s13242_s6, %s13242_s6, %s13243_s29  }
  0x4f   :  { %s13003_s10 = scalar_lea.vmem %s191_s4, 16384  ;;  %p13008_p3 = scmp.lt.s32.totalorder %s191_s4, %s191_s4 }
  0x50   :  { %p13004_p2 = scmp.ne.s32.totalorder %s191_s4, %s13003_s10  ;;  %p13009_p4 = scmp.lt.s32.totalorder %s13003_s10, %s13003_s10 }
  0x52   :  { %p13010_p5 = por %p13009_p4, %p13008_p3 }
  0x54   :  { %p13011_p6 = pnand %p13010_p5, %p13004_p2 }
  0x56   :  { %13014 = shalt.err (!%p13011_p6)
}
  0x57   :  { %196 = dma.hbm_to_vmem [thread:$0]  %s15713_s14, 16384, %s191_s4, [#allocation23], %s13242_s6, %s13242_s6, %s13243_s29  }
  0x58   :  { %s13246_s28 = smov [#allocation25]   ;;  %s13247_s1 = smov [#allocation2]  }
  0x59   :  { %s213_s0 = sshll.u32 %s13246_s28, 4  ;;  %s40_s12 = sshll.u32 %s13247_s1, 4  ;;  %s214_s0 = int_to_ptr.vmem [resolvable:$true] %s213_s0  ;;  %s41_s12 = int_to_ptr.vmem [resolvable:$true] %s40_s12 }
  0x5a   :  { %s13023_s8 = scalar_lea.vmem %s214_s0, 256  ;;  %p13028_p8 = scmp.lt.s32.totalorder %s214_s0, %s214_s0 }
  0x5b   :  { %p13024_p7 = scmp.ne.s32.totalorder %s214_s0, %s13023_s8  ;;  %p13029_p9 = scmp.lt.s32.totalorder %s13023_s8, %s13023_s8 }
  0x5d   :  { %p13030_p10 = por %p13029_p9, %p13028_p8 }
  0x5f   :  { %p13031_p11 = pnand %p13030_p10, %p13024_p7 }
  0x61   :  { %13034 = shalt.err (!%p13031_p11)
}
  0x62   :  { %216 = dma.hbm_to_vmem [thread:$0]  %s15715_s16, 256, %s214_s0, [#allocation26]  }
  0x63   :  { %s13043_s21 = scalar_lea.vmem %s41_s12, 256  ;;  %p13048_p13 = scmp.lt.s32.totalorder %s41_s12, %s41_s12 }
  0x64   :  { %p13044_p12 = scmp.ne.s32.totalorder %s41_s12, %s13043_s21  ;;  %p13049_p0 = scmp.lt.s32.totalorder %s13043_s21, %s13043_s21 }
  0x66   :  { %p13050_p1 = por %p13049_p0, %p13048_p13 }
  0x68   :  { %p13051_p2 = pnand %p13050_p1, %p13044_p12 }
  0x6a   :  { %13054 = shalt.err (!%p13051_p2)
}
  0x6b   :  { %s15799_s25 = sld [smem:[#allocation85_spill]]  ;;  %s13248_s3 = smov [#allocation6]  }
  0x6c   :  { %s64_s10 = sshll.u32 %s13248_s3, 4  ;;  %s13249_s26 = smov [#allocation9]   ;;  %s65_s10 = int_to_ptr.vmem [resolvable:$true] %s64_s10 }
  0x6d   :  { %s87_s16 = sshll.u32 %s13249_s26, 4  ;;  %s13063_s27 = scalar_lea.vmem %s65_s10, 128  ;;  %s88_s16 = int_to_ptr.vmem [resolvable:$true] %s87_s16 }
  0x6e   :  { %p13064_p3 = scmp.ne.s32.totalorder %s65_s10, %s13063_s27  ;;  %p13068_p4 = scmp.lt.s32.totalorder %s65_s10, %s65_s10 }
  0x6f   :  { %p13069_p5 = scmp.lt.s32.totalorder %s13063_s27, %s13063_s27 }
  0x71   :  { %46 = dma.hbm_to_vmem [thread:$0]  %s15799_s25, 256, %s41_s12, [#allocation3], %s13235_s22, %s13235_s22, %s13236_s2  }
  0x72   :  { %p13070_p6 = por %p13069_p5, %p13068_p4 }
  0x74   :  { %p13071_p7 = pnand %p13070_p6, %p13064_p3 }
  0x76   :  { %13074 = shalt.err (!%p13071_p7)
}
  0x77   :  { %s15800_s1 = sld [smem:[#allocation87_spill]]  ;;  %s13083_s12 = scalar_lea.vmem %s88_s16, 128 }
  0x78   :  { %p13084_p8 = scmp.ne.s32.totalorder %s88_s16, %s13083_s12  ;;  %p13088_p9 = scmp.lt.s32.totalorder %s88_s16, %s88_s16 }
  0x79   :  { %p13089_p10 = scmp.lt.s32.totalorder %s13083_s12, %s13083_s12 }
  0x7b   :  { %p13090_p11 = por %p13089_p10, %p13088_p9 }
  0x7d   :  { %70 = dma.hbm_to_vmem [thread:$0]  %s15800_s1, 128, %s65_s10, [#allocation5], %s13239_s30, %s13239_s30, %s13240_s23  }
  0x7e   :  { %p13091_p12 = pnand %p13090_p11, %p13084_p8 }
  0x80   :  { %13094 = shalt.err (!%p13091_p12)
}
  0x81   :  { %90 = dma.hbm_to_vmem [thread:$0]  %s15704_s5, 128, %s88_s16, [#allocation8]  }
  0x82   :  { %s13250_s24 = smov [#allocation12]   ;;  %s13251_s14 = smov [#allocation15]  }
  0x83   :  { %s109_s21 = sshll.u32 %s13250_s24, 4  ;;  %s130_s4 = sshll.u32 %s13251_s14, 4  ;;  %s110_s21 = int_to_ptr.vmem [resolvable:$true] %s109_s21  ;;  %s131_s4 = int_to_ptr.vmem [resolvable:$true] %s130_s4 }
  0x84   :  { %s13103_s25 = scalar_lea.vmem %s110_s21, 128  ;;  %p13108_p0 = scmp.lt.s32.totalorder %s110_s21, %s110_s21 }
  0x85   :  { %p13104_p13 = scmp.ne.s32.totalorder %s110_s21, %s13103_s25  ;;  %p13109_p1 = scmp.lt.s32.totalorder %s13103_s25, %s13103_s25 }
  0x87   :  { %p13110_p2 = por %p13109_p1, %p13108_p0 }
  0x89   :  { %p13111_p3 = pnand %p13110_p2, %p13104_p13 }
  0x8b   :  { %13114 = shalt.err (!%p13111_p3)
}
  0x8c   :  { %112 = dma.hbm_to_vmem [thread:$0]  %s15706_s7, 128, %s110_s21, [#allocation11]  }
  0x8d   :  { %s13123_s26 = scalar_lea.vmem %s131_s4, 128  ;;  %p13128_p5 = scmp.lt.s32.totalorder %s131_s4, %s131_s4 }
  0x8e   :  { %p13124_p4 = scmp.ne.s32.totalorder %s131_s4, %s13123_s26  ;;  %p13129_p6 = scmp.lt.s32.totalorder %s13123_s26, %s13123_s26 }
  0x90   :  { %p13130_p7 = por %p13129_p6, %p13128_p5 }
  0x92   :  { %p13131_p8 = pnand %p13130_p7, %p13124_p4 }
  0x94   :  { %13134 = shalt.err (!%p13131_p8)
}
  0x95   :  { %136 = dma.hbm_to_vmem [thread:$0]  %s15708_s9, 128, %s131_s4, [#allocation14], %s13239_s30, %s13239_s30, %s13240_s23  }
  0x96   :  { %s13252_s27 = smov [#allocation18]   ;;  %s13253_s0 = smov [#allocation21]  }
  0x97   :  { %s154_s28 = sshll.u32 %s13252_s27, 4  ;;  %s178_s7 = sshll.u32 %s13253_s0, 4  ;;  %s155_s28 = int_to_ptr.vmem [resolvable:$true] %s154_s28  ;;  %s179_s7 = int_to_ptr.vmem [resolvable:$true] %s178_s7 }
  0x98   :  { %s13143_s1 = scalar_lea.vmem %s155_s28, 4096  ;;  %p13148_p10 = scmp.lt.s32.totalorder %s155_s28, %s155_s28 }
  0x99   :  { %p13144_p9 = scmp.ne.s32.totalorder %s155_s28, %s13143_s1  ;;  %p13149_p11 = scmp.lt.s32.totalorder %s13143_s1, %s13143_s1 }
  0x9b   :  { %p13150_p12 = por %p13149_p11, %p13148_p10 }
  0x9d   :  { %p13151_p13 = pnand %p13150_p12, %p13144_p9 }
  0x9f   :  { %13154 = shalt.err (!%p13151_p13)
}
  0xa0   :  { %160 = dma.hbm_to_vmem [thread:$0]  %s15710_s11, 4096, %s155_s28, [#allocation17], %s13242_s6, %s13242_s6, %s13243_s29  }
  0xa1   :  { %s13163_s9 = scalar_lea.vmem %s179_s7, 16384  ;;  %p13168_p1 = scmp.lt.s32.totalorder %s179_s7, %s179_s7 }
  0xa2   :  { %p13164_p0 = scmp.ne.s32.totalorder %s179_s7, %s13163_s9  ;;  %p13169_p2 = scmp.lt.s32.totalorder %s13163_s9, %s13163_s9 }
  0xa4   :  { %p13170_p3 = por %p13169_p2, %p13168_p1 }
  0xa6   :  { %p13171_p4 = pnand %p13170_p3, %p13164_p0 }
  0xa8   :  { %13174 = shalt.err (!%p13171_p4)
}
  0xa9   :  { %184 = dma.hbm_to_vmem [thread:$0]  %s15712_s13, 16384, %s179_s7, [#allocation20], %s13242_s6, %s13242_s6, %s13243_s29  }
  0xaa   :  { %s13254_s20 = smov [#allocation24]   ;;  %s13255_s21 = smov [#allocation27]  }
  0xab   :  { %s203_s24 = sshll.u32 %s13254_s20, 4  ;;  %s222_s11 = sshll.u32 %s13255_s21, 4  ;;  %s204_s24 = int_to_ptr.vmem [resolvable:$true] %s203_s24  ;;  %s223_s11 = int_to_ptr.vmem [resolvable:$true] %s222_s11 }
  0xac   :  { %s13183_s14 = scalar_lea.vmem %s204_s24, 512  ;;  %p13188_p6 = scmp.lt.s32.totalorder %s204_s24, %s204_s24 }
  0xad   :  { %p13184_p5 = scmp.ne.s32.totalorder %s204_s24, %s13183_s14  ;;  %p13189_p7 = scmp.lt.s32.totalorder %s13183_s14, %s13183_s14 }
  0xaf   :  { %p13190_p8 = por %p13189_p7, %p13188_p6 }
  0xb1   :  { %p13191_p9 = pnand %p13190_p8, %p13184_p5 }
  0xb3   :  { %13194 = shalt.err (!%p13191_p9)
}
  0xb4   :  { %206 = dma.hbm_to_vmem [thread:$0]  %s15714_s15, 512, %s204_s24, [#allocation23]  }
  0xb5   :  { %s13203_s3 = scalar_lea.vmem %s223_s11, 10240  ;;  %p13208_p11 = scmp.lt.s32.totalorder %s223_s11, %s223_s11 }
  0xb6   :  { %p13204_p10 = scmp.ne.s32.totalorder %s223_s11, %s13203_s3  ;;  %p13209_p12 = scmp.lt.s32.totalorder %s13203_s3, %s13203_s3 }
  0xb8   :  { %p13210_p13 = por %p13209_p12, %p13208_p11 }
  0xba   :  { %p13211_p0 = pnand %p13210_p13, %p13204_p10 }
  0xbc   :  { %13214 = shalt.err (!%p13211_p0)
}
  0xbd   :  { %228 = dma.hbm_to_vmem [thread:$0]  %s15716_s17, 10240, %s223_s11, [#allocation26], %s13235_s22, %s13235_s22, %s13236_s2  }
  0xbe   :  { %13215 = dma.done.wait [#allocation3], 256  }
  0xbf   :  { %13216 = vsyncadd [#allocation3], 4294967040 }
  0xc0   :  { %13217 = dma.done.wait [#allocation5], 4224  }
  0xc1   :  { %13218 = vsyncadd [#allocation5], 4294963072 }
  0xc2   :  { %13219 = dma.done.wait [#allocation8], 192  }
  0xc3   :  { %13220 = vsyncadd [#allocation8], 4294967104 }
  0xc4   :  { %13221 = dma.done.wait [#allocation11], 2176  }
  0xc5   :  { %13222 = vsyncadd [#allocation11], 4294965120 }
  0xc6   :  { %13223 = dma.done.wait [#allocation14], 4224  }
  0xc7   :  { %13224 = vsyncadd [#allocation14], 4294963072 }
  0xc8   :  { %13225 = dma.done.wait [#allocation17], 12288  }
  0xc9   :  { %13226 = vsyncadd [#allocation17], 4294955008 }
  0xca   :  { %13227 = dma.done.wait [#allocation20], 32768  }
  0xcb   :  { %13228 = vsyncadd [#allocation20], 4294934528 }
  0xcc   :  { %13229 = dma.done.wait [#allocation23], 16896  }
  0xcd   :  { %13230 = vsyncadd [#allocation23], 4294950400 }
  0xce   :  { %13231 = dma.done.wait [#allocation26], 10496  }
  0xcf   :  { %13232 = vsyncadd [#allocation26], 4294956800  ;;  %v15720_v0 = vmov 0   ;;  %v11799_v1 = vld [vmem:[#allocation4 + $0x74] ss:$8 sps:$4 sm:$0xff]   ;;  %v15724_v2 = vlaneseq  ;;  %s15803_s22 = sld [smem:[#allocation84_spill]] }
  0xd0   :  { %417 = vmatprep.mubr.bf16.mxu0 %v15720_v0  ;;  %11797 = vset.pattern.permute.xlu0 %v15720_v0  ;;  %v11801_v3 = vld [vmem:[#allocation4 + $0x70] ss:$8 sps:$4 sm:$0xff]   ;;  %v11802_v4 = vld [vmem:[#allocation4 + $0x64] ss:$8 sps:$4 sm:$0xff]   ;;  %v11804_v5 = vld [vmem:[#allocation4 + $0x60] ss:$8 sps:$4 sm:$0xff]  }
  0xd1   :  { %11798 = vset.pattern.permute.xlu1 %v15720_v0  ;;  %2486 = vmatprep.mubr.bf16.mxu1 %v15720_v0  ;;  %v11805_v6 = vld [vmem:[#allocation4 + $0x54] ss:$8 sps:$4 sm:$0xff]   ;;  %v13452_v7 = vshrl.u32 %v15724_v2, 7  ;;  %v11807_v8 = vld [vmem:[#allocation4 + $0x50] ss:$8 sps:$4 sm:$0xff]   ;;  %v15722_v48 = vmov 0.0  }
  0xd2   :  { %385 = vmatprep.subr.bf16.mxu0 %v11799_v1  ;;  %v11808_v9 = vld [vmem:[#allocation4 + $0x44] ss:$8 sps:$4 sm:$0xff]   ;;  %v11810_v12 = vld [vmem:[#allocation4 + $0x40] ss:$8 sps:$4 sm:$0xff]   ;;  %v11811_v13 = vld [vmem:[#allocation4 + $0x34] ss:$8 sps:$4 sm:$0xff]  }
  0xd3   :  { %386 = vmatpush1.bf16.msra.mxu0 %v11801_v3  ;;  %v13455_v10 = vsub.s32 0, %v13452_v7  ;;  %v13458_v11 = vsub.s32 1, %v13452_v7  ;;  %v13460_v14 = vld [vmem:[#allocation2] sm:$0xff]  ;;  %v13464_v16 = vld [vmem:[#allocation2 + $0x8] sm:$0xff]  ;;  %v11814_v18 = vld [vmem:[#allocation4 + $0x24] ss:$8 sps:$4 sm:$0xff]  }
  0xd4   :  { %387 = vmatprep.subr.bf16.mxu0 %v11802_v4  ;;  %v11813_v17 = vld [vmem:[#allocation4 + $0x30] ss:$8 sps:$4 sm:$0xff]   ;;  %v11816_v21 = vld [vmem:[#allocation4 + $0x20] ss:$8 sps:$4 sm:$0xff]   ;;  %v13471_v22 = vsub.s32 2, %v13452_v7  ;;  %v13486_v32 = vsub.s32 3, %v13452_v7 }
  0xd5   :  { %15801 = vst [vmem:[#allocation37_spill] sm:$0xff] %v13455_v10  ;;  %v853_v15 = vrot.slane %v13460_v14, %v13455_v10  ;;  %v864_v19 = vrot.slane %v13460_v14, %v13458_v11  ;;  %v941_v20 = vrot.slane %v13464_v16, %v13455_v10  ;;  %v11817_v23 = vld [vmem:[#allocation4 + $0x14] ss:$8 sps:$4 sm:$0xff]   ;;  %v952_v24 = vrot.slane %v13464_v16, %v13458_v11  ;;  %v11819_v25 = vld [vmem:[#allocation4 + $0x10] ss:$8 sps:$4 sm:$0xff]  }
  0xd6   :  { %15802 = vst [vmem:[#allocation38_spill] sm:$0xff] %v13471_v22  ;;  %v11820_v26 = vld [vmem:[#allocation4 + $0x4] ss:$8 sps:$4 sm:$0xff]   ;;  %v875_v27 = vrot.slane %v13460_v14, %v13471_v22  ;;  %v11822_v28 = vld [vmem:[#allocation4] ss:$8 sps:$4 sm:$0xff]   ;;  %v283_v29 = vld [vmem:[%s15803_s22] sm:$0xff]  ;;  %v963_v31 = vrot.slane %v13464_v16, %v13471_v22  ;;  %v886_v34 = vrot.slane %v13460_v14, %v13486_v32  ;;  %v974_v35 = vrot.slane %v13464_v16, %v13486_v32 }
  0xd7   :  { %388 = vmatpush1.bf16.msra.mxu0 %v11804_v5  ;;  %859 = vbcast.lane.b32.xlu1 %v853_v15, 264  ;;  %v284_v30 = vld [vmem:[%s15803_s22 + $0x8] sm:$0xff]  ;;  %15804 = vst [vmem:[#allocation39_spill] sm:$0xff] %v13486_v32  ;;  %v13493_v36 = vsub.s32 4, %v13452_v7  ;;  %v13500_v39 = vsub.s32 5, %v13452_v7  ;;  %v13507_v42 = vsub.s32 6, %v13452_v7 }
  0xd8   :  { %389 = vmatprep.subr.bf16.mxu0 %v11805_v6  ;;  %855 = vbcast.lane.b32.xlu0 %v853_v15, 256  ;;  %v304_v33 = vpack.c.bf16 %v284_v30, %v283_v29  ;;  %v13514_v45 = vsub.s32 7, %v13452_v7  ;;  %v13258_v49 = vmov 1966171168   ;;  %v303_v52 = vld [vmem:[#allocation6] sm:$0xf] }
  0xd9   :  { %15805 = vst [vmem:[#allocation40_spill] sm:$0xff] %v13493_v36  ;;  %v897_v37 = vrot.slane %v13460_v14, %v13493_v36  ;;  %v985_v38 = vrot.slane %v13464_v16, %v13493_v36  ;;  %v908_v40 = vrot.slane %v13460_v14, %v13500_v39  ;;  %v996_v41 = vrot.slane %v13464_v16, %v13500_v39 }
  0xda   :  { %15806 = vst [vmem:[#allocation41_spill] sm:$0xff] %v13507_v42  ;;  %v919_v43 = vrot.slane %v13460_v14, %v13507_v42  ;;  %v1007_v44 = vrot.slane %v13464_v16, %v13507_v42  ;;  %15807 = vst [vmem:[#allocation42_spill] sm:$0xff] %v13514_v45  ;;  %v930_v46 = vrot.slane %v13460_v14, %v13514_v45  ;;  %v444_v50 = vunpack.c.l.s4 %v13258_v49 }
  0xdb   :  { %390 = vmatpush1.bf16.msra.mxu0 %v11807_v8  ;;  %866 = vbcast.lane.b32.xlu1 %v864_v19, 256  ;;  %v1018_v47 = vrot.slane %v13464_v16, %v13514_v45  ;;  %v437_v53 = vrot.slane %v303_v52, %v13458_v11  ;;  %v431_v56 = vrot.slane %v303_v52, %v13455_v10 }
  0xdc   :  { %391 = vmatprep.subr.bf16.mxu0 %v11808_v9  ;;  %943 = vbcast.lane.b32.xlu0 %v941_v20, 256  ;;  %v445_v51 = vunpack.c.0.s8 %v444_v50 }
  0xde   :  { %v13523_v55 = vsub.s32 %v445_v51, %v13452_v7 }
  0xdf   :  { %392 = vmatpush1.bf16.msra.mxu0 %v11810_v12  ;;  %870 = vbcast.lane.b32.xlu1 %v864_v19, 264 }
  0xe0   :  { %393 = vmatprep.subr.bf16.mxu0 %v11811_v13  ;;  %954 = vbcast.lane.b32.xlu0 %v952_v24, 256  ;;  %15808 = vst [vmem:[#allocation43_spill] sm:$0xff] %v13523_v55 }
  0xe3   :  { %394 = vmatpush1.bf16.msra.mxu0 %v11813_v17  ;;  %947 = vbcast.lane.b32.xlu1 %v941_v20, 264 }
  0xe4   :  { %395 = vmatprep.subr.bf16.mxu0 %v11814_v18  ;;  %877 = vbcast.lane.b32.xlu0 %v875_v27, 256 }
  0xe7   :  { %396 = vmatpush1.bf16.msra.mxu0 %v11816_v21  ;;  %958 = vbcast.lane.b32.xlu1 %v952_v24, 264  ;;  %v13558_v21 = vrot.slane %v303_v52, %v13471_v22 }
  0xe8   :  { %397 = vmatprep.subr.bf16.mxu0 %v11817_v23  ;;  %965 = vbcast.lane.b32.xlu0 %v963_v31, 256 }
  0xeb   :  { %398 = vmatpush1.bf16.msra.mxu0 %v11819_v25  ;;  %881 = vbcast.lane.b32.xlu1 %v875_v27, 264 }
  0xec   :  { %399 = vmatprep.subr.bf16.mxu0 %v11820_v26  ;;  %888 = vbcast.lane.b32.xlu0 %v886_v34, 256 }
  0xef   :  { %400 = vmatpush1.bf16.msra.mxu0 %v11822_v28  ;;  %969 = vbcast.lane.b32.xlu1 %v963_v31, 264 }
  0xf0   :  { %976 = vbcast.lane.b32.xlu0 %v974_v35, 256  ;;  %11655 = vmatprep.subr.bf16.mxu0 %v15722_v48 }
  0xf2   :  { %418 = vmatmul.mubr.bf16.vlgmr.msra.gmra.mxu0 %v304_v33 }
  0xf3   :  { %892 = vbcast.lane.b32.xlu1 %v886_v34, 264 }
  0xf4   :  { %899 = vbcast.lane.b32.xlu0 %v897_v37, 256 }
  0xf7   :  { %980 = vbcast.lane.b32.xlu1 %v974_v35, 264 }
  0xf8   :  { %987 = vbcast.lane.b32.xlu0 %v985_v38, 256 }
  0xfb   :  { %903 = vbcast.lane.b32.xlu1 %v897_v37, 264 }
  0xfc   :  { %910 = vbcast.lane.b32.xlu0 %v908_v40, 256 }
  0xff   :  { %991 = vbcast.lane.b32.xlu1 %v985_v38, 264 }
 0x100   :  { %998 = vbcast.lane.b32.xlu0 %v996_v41, 256 }
 0x103   :  { %914 = vbcast.lane.b32.xlu1 %v908_v40, 264 }
 0x104   :  { %921 = vbcast.lane.b32.xlu0 %v919_v43, 256 }
 0x107   :  { %1002 = vbcast.lane.b32.xlu1 %v996_v41, 264 }
 0x108   :  { %1009 = vbcast.lane.b32.xlu0 %v1007_v44, 256 }
 0x10b   :  { %925 = vbcast.lane.b32.xlu1 %v919_v43, 264 }
 0x10c   :  { %932 = vbcast.lane.b32.xlu0 %v930_v46, 256 }
 0x10f   :  { %1013 = vbcast.lane.b32.xlu1 %v1007_v44, 264 }
 0x110   :  { %1020 = vbcast.lane.b32.xlu0 %v1018_v47, 256 }
 0x113   :  { %936 = vbcast.lane.b32.xlu1 %v930_v46, 264 }
 0x117   :  { %1024 = vbcast.lane.b32.xlu1 %v1018_v47, 264 }
 0x1b2   :  { %v419_v54 = vpop.f32.mrf.mxu0 }
 0x1b3   :  { %v13529_v63 = vadd.f32 %v431_v56, %v419_v54 }
 0x1b4   :  { %v421_v57 = vpop.f32.mrf.mxu0 }
 0x1b5   :  { %v438_v58 = vadd.f32 %v437_v53, %v421_v57 }
 0x1b6   :  { %v423_v59 = vpop.f32.mrf.mxu0 }
 0x1b7   :  { %v442_v60 = vcombine.high %v438_v58, %v438_v58  ;;  %v449_v61 = vrot.slane %v438_v58, %v13523_v55  ;;  %v13527_v62 = vadd.f32 %v431_v56, %v423_v59 }
 0x1b8   :  { %v425_v1 = vpop.f32.mrf.mxu0 }
 0x1b9   :  { %v457_v3 = vcombine.high %v449_v61, %v449_v61  ;;  %v465_v4 = vrot.slane %v449_v61, %v13523_v55  ;;  %v13532_v5 = vadd.f32 %v437_v53, %v425_v1  ;;  %v456_v6 = vrot.slane %v442_v60, %v13523_v55 }
 0x1ba   :  { %v2000_v8 = vpack.c.bf16 %v13527_v62, %v13529_v63 }
 0x1bb   :  { %v13538_v9 = vrot.slane %v457_v3, %v13523_v55  ;;  %v543_v12 = vrot.slane %v465_v4, %v13455_v10  ;;  %v13543_v13 = vrot.slane %v13532_v5, %v13523_v55  ;;  %v487_v14 = vcombine.high %v465_v4, %v465_v4 }
 0x1bc   :  { %11656 = vmatpush3.bf16.msra.mxu0 %v2000_v8  ;;  %v13549_v16 = vrot.slane %v456_v6, %v13523_v55  ;;  %v458_v17 = vcombine.high %v456_v6, %v456_v6 }
 0x1bd   :  { %v547_v15 = vrot.slane %v13538_v9, %v13455_v10  ;;  %11661 = vmatprep.subr.bf16.mxu0 %v15722_v48  ;;  %v13553_v18 = vrot.slane %v13543_v13, %v13523_v55  ;;  %v620_v19 = vadd.f32 %v543_v12, %v13529_v63  ;;  %v621_v23 = vadd.f32 %v543_v12, %v13527_v62 }
 0x1be   :  { %v551_v24 = vrot.slane %v487_v14, %v13455_v10  ;;  %v559_v26 = vrot.slane %v13549_v16, %v13455_v10  ;;  %v13567_v28 = vrot.slane %v458_v17, %v13523_v55  ;;  %v489_v30 = vcombine.high %v13538_v9, %v13538_v9 }
 0x1bf   :  { %v622_v20 = vadd.f32 %v547_v15, %v13529_v63  ;;  %vm652_vm0 = vcmp.gt.f32.partialorder %v620_v19, 0.0  ;;  %v684_v25 = vmul.f32 0.2, %v620_v19  ;;  %v575_v27 = vrot.slane %v13553_v18, %v13455_v10 }
 0x1c0   :  { %vm653_vm2 = vcmp.gt.f32.partialorder %v621_v23, 0.0  ;;  %v685_v34 = vmul.f32 0.2, %v621_v23  ;;  %v623_v35 = vadd.f32 %v547_v15, %v13527_v62  ;;  %v624_v37 = vadd.f32 %v551_v24, %v13529_v63 }
 0x1c1   :  { %v716_v29 = vsel %vm652_vm0, %v620_v19, %v684_v25  ;;  %vm654_vm1 = vcmp.gt.f32.partialorder %v622_v20, 0.0  ;;  %v686_v33 = vmul.f32 0.2, %v622_v20  ;;  %v625_v38 = vadd.f32 %v551_v24, %v13527_v62 }
 0x1c2   :  { %v752_v31 = vmul.f32 %v13558_v21, %v716_v29  ;;  %v628_v41 = vadd.f32 %v559_v26, %v13529_v63  ;;  %v629_v43 = vadd.f32 %v559_v26, %v13527_v62  ;;  %v636_v44 = vadd.f32 %v575_v27, %v13529_v63 }
 0x1c3   :  { %v718_v40 = vsel %vm654_vm1, %v622_v20, %v686_v33  ;;  %v717_v47 = vsel %vm653_vm2, %v621_v23, %v685_v34  ;;  %vm655_vm3 = vcmp.gt.f32.partialorder %v623_v35, 0.0  ;;  %v687_v49 = vmul.f32 0.2, %v623_v35 }
 0x1c4   :  { %784 = vadd.xlane.f32.xlu0 %v752_v31  ;;  %v754_v46 = vmul.f32 %v13558_v21, %v718_v40  ;;  %v753_v50 = vmul.f32 %v13558_v21, %v717_v47  ;;  %vm656_vm4 = vcmp.gt.f32.partialorder %v624_v37, 0.0  ;;  %v688_v51 = vmul.f32 0.2, %v624_v37 }
 0x1c5   :  { %vm657_vm5 = vcmp.gt.f32.partialorder %v625_v38, 0.0  ;;  %v719_v52 = vsel %vm655_vm3, %v623_v35, %v687_v49  ;;  %v689_v53 = vmul.f32 0.2, %v625_v38  ;;  %vm660_vm6 = vcmp.gt.f32.partialorder %v628_v41, 0.0 }
 0x1c6   :  { %788 = vadd.xlane.f32.xlu1 %v754_v46  ;;  %v692_v54 = vmul.f32 0.2, %v628_v41  ;;  %v488_v56 = vcombine.high %v13549_v16, %v13549_v16  ;;  %v720_v57 = vsel %vm656_vm4, %v624_v37, %v688_v51  ;;  %v506_v58 = vcombine.high %v13543_v13, %v13543_v13 }
 0x1c7   :  { %v755_v59 = vmul.f32 %v13558_v21, %v719_v52  ;;  %vm661_vm7 = vcmp.gt.f32.partialorder %v629_v43, 0.0  ;;  %v693_v60 = vmul.f32 0.2, %v629_v43  ;;  %v756_v61 = vmul.f32 %v13558_v21, %v720_v57 }
 0x1c8   :  { %786 = vadd.xlane.f32.xlu0 %v753_v50  ;;  %v721_v1 = vsel %vm657_vm5, %v625_v38, %v689_v53  ;;  %v724_v3 = vsel %vm660_vm6, %v628_v41, %v692_v54  ;;  %v700_v4 = vmul.f32 0.2, %v636_v44  ;;  %vm668_vm8 = vcmp.gt.f32.partialorder %v636_v44, 0.0 }
 0x1c9   :  { %v637_v6 = vadd.f32 %v575_v27, %v13527_v62  ;;  %v555_v8 = vrot.slane %v489_v30, %v13455_v10  ;;  %v563_v9 = vrot.slane %v13567_v28, %v13455_v10  ;;  %v491_v12 = vcombine.high %v13532_v5, %v13532_v5 }
 0x1ca   :  { %790 = vadd.xlane.f32.xlu1 %v755_v59  ;;  %v13593_v13 = vrot.slane %v506_v58, %v13523_v55  ;;  %v757_v14 = vmul.f32 %v13558_v21, %v721_v1  ;;  %v760_v15 = vmul.f32 %v13558_v21, %v724_v3  ;;  %v725_v17 = vsel %vm661_vm7, %v629_v43, %v693_v60 }
 0x1cb   :  { %v626_v16 = vadd.f32 %v555_v8, %v13529_v63  ;;  %v732_v19 = vsel %vm668_vm8, %v636_v44, %v700_v4  ;;  %v701_v20 = vmul.f32 0.2, %v637_v6  ;;  %v627_v23 = vadd.f32 %v555_v8, %v13527_v62 }
 0x1cc   :  { %792 = vadd.xlane.f32.xlu0 %v756_v61  ;;  %vm669_vm9 = vcmp.gt.f32.partialorder %v637_v6, 0.0  ;;  %v630_v5 = vadd.f32 %v563_v9, %v13529_v63  ;;  %v567_v25 = vrot.slane %v488_v56, %v13455_v10  ;;  %v505_v26 = vrot.slane %v491_v12, %v13523_v55 }
 0x1cd   :  { %v690_v24 = vmul.f32 0.2, %v626_v16  ;;  %vm658_vm10 = vcmp.gt.f32.partialorder %v626_v16, 0.0  ;;  %v536_v27 = vcombine.high %v13553_v18, %v13553_v18  ;;  %v579_v29 = vrot.slane %v13593_v13, %v13455_v10 }
 0x1ce   :  { %794 = vadd.xlane.f32.xlu1 %v757_v14  ;;  %v761_v30 = vmul.f32 %v13558_v21, %v725_v17  ;;  %v768_v31 = vmul.f32 %v13558_v21, %v732_v19  ;;  %v733_v33 = vsel %vm669_vm9, %v637_v6, %v701_v20  ;;  %v691_v34 = vmul.f32 0.2, %v627_v23 }
 0x1cf   :  { %v631_v35 = vadd.f32 %v563_v9, %v13527_v62  ;;  %v722_v37 = vsel %vm658_vm10, %v626_v16, %v690_v24  ;;  %vm659_vm11 = vcmp.gt.f32.partialorder %v627_v23, 0.0  ;;  %v694_v38 = vmul.f32 0.2, %v630_v5 }
 0x1d0   :  { %800 = vadd.xlane.f32.xlu0 %v760_v15  ;;  %v632_v40 = vadd.f32 %v567_v25, %v13529_v63  ;;  %vm662_vm12 = vcmp.gt.f32.partialorder %v630_v5, 0.0  ;;  %v13612_v18 = vrot.slane %v505_v26, %v13523_v55  ;;  %v583_v41 = vrot.slane %v536_v27, %v13455_v10 }
 0x1d1   :  { %v769_v43 = vmul.f32 %v13558_v21, %v733_v33  ;;  %v758_v44 = vmul.f32 %v13558_v21, %v722_v37  ;;  %v723_v46 = vsel %vm659_vm11, %v627_v23, %v691_v34  ;;  %v695_v47 = vmul.f32 0.2, %v631_v35 }
 0x1d2   :  { %802 = vadd.xlane.f32.xlu1 %v761_v30  ;;  %v633_v49 = vadd.f32 %v567_v25, %v13527_v62  ;;  %v726_v50 = vsel %vm662_vm12, %v630_v5, %v694_v38  ;;  %vm663_vm13 = vcmp.gt.f32.partialorder %v631_v35, 0.0  ;;  %v696_v51 = vmul.f32 0.2, %v632_v40 }
 0x1d3   :  { %v638_v52 = vadd.f32 %v579_v29, %v13529_v63  ;;  %v507_v53 = vcombine.high %v505_v26, %v505_v26  ;;  %vm664_vm14 = vcmp.gt.f32.partialorder %v632_v40, 0.0  ;;  %v490_v54 = vcombine.high %v13567_v28, %v13567_v28 }
 0x1d4   :  { %816 = vadd.xlane.f32.xlu0 %v768_v31  ;;  %v591_v56 = vrot.slane %v13612_v18, %v13455_v10  ;;  %v759_v57 = vmul.f32 %v13558_v21, %v723_v46  ;;  %v762_v58 = vmul.f32 %v13558_v21, %v726_v50  ;;  %v727_v59 = vsel %vm663_vm13, %v631_v35, %v695_v47 }
 0x1d5   :  { %v697_v60 = vmul.f32 0.2, %v633_v49  ;;  %v639_v61 = vadd.f32 %v579_v29, %v13527_v62  ;;  %v728_v1 = vsel %vm664_vm14, %v632_v40, %v696_v51  ;;  %vm665_vm15 = vcmp.gt.f32.partialorder %v633_v49, 0.0 }
 0x1d6   :  { %818 = vadd.xlane.f32.xlu1 %v769_v43  ;;  %v702_v3 = vmul.f32 0.2, %v638_v52  ;;  %v640_v4 = vadd.f32 %v583_v41, %v13529_v63  ;;  %v535_v6 = vrot.slane %v507_v53, %v13523_v55  ;;  %vm670_vm0 = vcmp.gt.f32.partialorder %v638_v52, 0.0 }
 0x1d7   :  { %v538_v28 = vcombine.high %v13593_v13, %v13593_v13  ;;  %v763_v8 = vmul.f32 %v13558_v21, %v727_v59  ;;  %v641_v9 = vadd.f32 %v583_v41, %v13527_v62  ;;  %v764_v12 = vmul.f32 %v13558_v21, %v728_v1 }
 0x1d8   :  { %796 = vadd.xlane.f32.xlu0 %v758_v44  ;;  %v729_v14 = vsel %vm665_vm15, %v633_v49, %v697_v60  ;;  %v703_v15 = vmul.f32 0.2, %v639_v61  ;;  %v644_v16 = vadd.f32 %v591_v56, %v13529_v63  ;;  %v734_v17 = vsel %vm670_vm0, %v638_v52, %v702_v3 }
 0x1d9   :  { %vm671_vm1 = vcmp.gt.f32.partialorder %v639_v61, 0.0  ;;  %v704_v19 = vmul.f32 0.2, %v640_v4  ;;  %v571_v20 = vrot.slane %v490_v54, %v13455_v10  ;;  %v539_v23 = vcombine.high %v535_v6, %v535_v6 }
 0x1da   :  { %798 = vadd.xlane.f32.xlu1 %v759_v57  ;;  %vm672_vm2 = vcmp.gt.f32.partialorder %v640_v4, 0.0  ;;  %v765_v13 = vmul.f32 %v13558_v21, %v729_v14  ;;  %v705_v24 = vmul.f32 0.2, %v641_v9  ;;  %v645_v5 = vadd.f32 %v591_v56, %v13527_v62 }
 0x1db   :  { %v770_v25 = vmul.f32 %v13558_v21, %v734_v17  ;;  %v735_v26 = vsel %vm671_vm1, %v639_v61, %v703_v15  ;;  %vm673_vm3 = vcmp.gt.f32.partialorder %v641_v9, 0.0  ;;  %v708_v27 = vmul.f32 0.2, %v644_v16  ;;  %v13654_v61 = vpop.permute.xlu1 %859 }
 0x1dc   :  { %804 = vadd.xlane.f32.xlu0 %v762_v58  ;;  %v736_v29 = vsel %vm672_vm2, %v640_v4, %v704_v19  ;;  %vm676_vm4 = vcmp.gt.f32.partialorder %v644_v16, 0.0  ;;  %v634_v30 = vadd.f32 %v571_v20, %v13529_v63  ;;  %v587_v31 = vrot.slane %v538_v28, %v13455_v10  ;;  %15809 = vst [vmem:[#allocation44_spill] sm:$0xff] %v13654_v61 }
 0x1dd   :  { %v603_v33 = vrot.slane %v539_v23, %v13455_v10  ;;  %v771_v34 = vmul.f32 %v13558_v21, %v735_v26  ;;  %v737_v35 = vsel %vm673_vm3, %v641_v9, %v705_v24  ;;  %vm677_vm5 = vcmp.gt.f32.partialorder %v645_v5, 0.0 }
 0x1de   :  { %806 = vadd.xlane.f32.xlu1 %v763_v8  ;;  %v709_v37 = vmul.f32 0.2, %v645_v5  ;;  %v772_v38 = vmul.f32 %v13558_v21, %v736_v29  ;;  %v740_v40 = vsel %vm676_vm4, %v644_v16, %v708_v27  ;;  %v635_v41 = vadd.f32 %v571_v20, %v13527_v62 }
 0x1df   :  { %v595_v43 = vrot.slane %v535_v6, %v13455_v10  ;;  %v537_v44 = vcombine.high %v13612_v18, %v13612_v18  ;;  %v698_v46 = vmul.f32 0.2, %v634_v30  ;;  %v642_v47 = vadd.f32 %v587_v31, %v13529_v63  ;;  %v13662_v16 = vpop.permute.xlu1 %866 }
 0x1e0   :  { %808 = vadd.xlane.f32.xlu0 %v764_v12  ;;  %v651_v49 = vadd.f32 %v603_v33, %v13527_v62  ;;  %v773_v50 = vmul.f32 %v13558_v21, %v737_v35  ;;  %vm666_vm6 = vcmp.gt.f32.partialorder %v634_v30, 0.0  ;;  %v776_v51 = vmul.f32 %v13558_v21, %v740_v40  ;;  %15810 = vst [vmem:[#allocation45_spill] sm:$0xff] %v13662_v16 }
 0x1e1   :  { %v741_v52 = vsel %vm677_vm5, %v645_v5, %v709_v37  ;;  %vm667_vm8 = vcmp.gt.f32.partialorder %v635_v41, 0.0  ;;  %v699_v54 = vmul.f32 0.2, %v635_v41  ;;  %v643_v56 = vadd.f32 %v587_v31, %v13527_v62 }
 0x1e2   :  { %810 = vadd.xlane.f32.xlu1 %v765_v13  ;;  %vm683_vm7 = vcmp.gt.f32.partialorder %v651_v49, 0.0  ;;  %v715_v53 = vmul.f32 0.2, %v651_v49  ;;  %v646_v18 = vadd.f32 %v595_v43, %v13529_v63  ;;  %v730_v57 = vsel %vm666_vm6, %v634_v30, %v698_v46 }
 0x1e3   :  { %v706_v58 = vmul.f32 0.2, %v642_v47  ;;  %v599_v59 = vrot.slane %v537_v44, %v13455_v10  ;;  %vm674_vm9 = vcmp.gt.f32.partialorder %v642_v47, 0.0  ;;  %v777_v3 = vmul.f32 %v13558_v21, %v741_v52 }
 0x1e4   :  { %820 = vadd.xlane.f32.xlu0 %v770_v25  ;;  %v747_v60 = vsel %vm683_vm7, %v651_v49, %v715_v53  ;;  %v766_v4 = vmul.f32 %v13558_v21, %v730_v57  ;;  %v731_v6 = vsel %vm667_vm8, %v635_v41, %v699_v54  ;;  %v707_v28 = vmul.f32 0.2, %v643_v56  ;;  %v13667_v25 = vpop.permute.xlu0 %855 }
 0x1e5   :  { %v783_v1 = vmul.f32 %v13558_v21, %v747_v60  ;;  %v647_v8 = vadd.f32 %v595_v43, %v13527_v62  ;;  %v738_v9 = vsel %vm674_vm9, %v642_v47, %v706_v58  ;;  %vm675_vm10 = vcmp.gt.f32.partialorder %v643_v56, 0.0  ;;  %15811 = vst [vmem:[#allocation46_spill] sm:$0xff] %v13667_v25 }
 0x1e6   :  { %822 = vadd.xlane.f32.xlu1 %v771_v34  ;;  %v710_v12 = vmul.f32 0.2, %v646_v18  ;;  %v648_v14 = vadd.f32 %v599_v59, %v13529_v63  ;;  %vm678_vm11 = vcmp.gt.f32.partialorder %v646_v18, 0.0  ;;  %v767_v15 = vmul.f32 %v13558_v21, %v731_v6  ;;  %v13671_v34 = vpop.permute.xlu1 %870 }
 0x1e7   :  { %v774_v17 = vmul.f32 %v13558_v21, %v738_v9  ;;  %v739_v19 = vsel %vm675_vm10, %v643_v56, %v707_v28  ;;  %v711_v20 = vmul.f32 0.2, %v647_v8  ;;  %v649_v23 = vadd.f32 %v599_v59, %v13527_v62  ;;  %15812 = vst [vmem:[#allocation47_spill] sm:$0xff] %v13671_v34 }
 0x1e8   :  { %824 = vadd.xlane.f32.xlu0 %v772_v38  ;;  %v742_v13 = vsel %vm678_vm11, %v646_v18, %v710_v12  ;;  %vm679_vm12 = vcmp.gt.f32.partialorder %v647_v8, 0.0  ;;  %v712_v24 = vmul.f32 0.2, %v648_v14  ;;  %v650_v5 = vadd.f32 %v603_v33, %v13529_v63  ;;  %v13675_v37 = vpop.permute.xlu0 %943 }
 0x1e9   :  { %vm680_vm13 = vcmp.gt.f32.partialorder %v648_v14, 0.0  ;;  %v775_v26 = vmul.f32 %v13558_v21, %v739_v19  ;;  %v778_v27 = vmul.f32 %v13558_v21, %v742_v13  ;;  %v743_v29 = vsel %vm679_vm12, %v647_v8, %v711_v20  ;;  %15813 = vst [vmem:[#allocation48_spill] sm:$0xff] %v13675_v37 }
 0x1ea   :  { %826 = vadd.xlane.f32.xlu1 %v773_v50  ;;  %v713_v30 = vmul.f32 0.2, %v649_v23  ;;  %v744_v31 = vsel %vm680_vm13, %v648_v14, %v712_v24  ;;  %vm681_vm14 = vcmp.gt.f32.partialorder %v649_v23, 0.0  ;;  %v714_v62 = vmul.f32 0.2, %v650_v5  ;;  %v13678_v41 = vpop.permute.xlu1 %947 }
 0x1eb   :  { %vm682_vm15 = vcmp.gt.f32.partialorder %v650_v5, 0.0  ;;  %v779_v63 = vmul.f32 %v13558_v21, %v743_v29  ;;  %v780_v33 = vmul.f32 %v13558_v21, %v744_v31  ;;  %15814 = vst [vmem:[#allocation49_spill] sm:$0xff] %v13678_v41  ;;  %vm1229_vm0 = vcmask 130112  }
 0x1ec   :  { %832 = vadd.xlane.f32.xlu0 %v776_v51  ;;  %v745_v35 = vsel %vm681_vm14, %v649_v23, %v713_v30  ;;  %v746_v38 = vsel %vm682_vm15, %v650_v5, %v714_v62  ;;  %v13681_v44 = vpop.permute.xlu0 %954  ;;  %vm1366_vm1 = vcmask 1041409   ;;  %vm1368_vm2 = vcmask 1042434  }
 0x1ed   :  { %v781_v40 = vmul.f32 %v13558_v21, %v745_v35  ;;  %v782_v43 = vmul.f32 %v13558_v21, %v746_v38  ;;  %15815 = vst [vmem:[#allocation50_spill] sm:$0xff] %v13681_v44  ;;  %vm1370_vm3 = vcmask 1043459   ;;  %vm1372_vm4 = vcmask 1044484  }
 0x1ee   :  { %834 = vadd.xlane.f32.xlu1 %v777_v3  ;;  %v13683_v46 = vpop.permute.xlu1 %958  ;;  %vm1374_vm5 = vcmask 1045509   ;;  %vm1376_vm6 = vcmask 1046534   ;;  %vm1378_vm7 = vcmask 1047559   ;;  %vm1389_vm8 = vcmask 130048  }
 0x1ef   :  { %15816 = vst [vmem:[#allocation51_spill] sm:$0xff] %v13683_v46  ;;  %vm13259_vm9 = vmmov 0  }
 0x1f0   :  { %812 = vadd.xlane.f32.xlu0 %v766_v4  ;;  %v13685_v47 = vpop.permute.xlu0 %877 }
 0x1f1   :  { %15817 = vst [vmem:[#allocation52_spill] sm:$0xff] %v13685_v47 }
 0x1f2   :  { %814 = vadd.xlane.f32.xlu1 %v767_v15  ;;  %v13687_v49 = vpop.permute.xlu1 %881 }
 0x1f3   :  { %15818 = vst [vmem:[#allocation53_spill] sm:$0xff] %v13687_v49 }
 0x1f4   :  { %828 = vadd.xlane.f32.xlu0 %v774_v17  ;;  %v13689_v50 = vpop.permute.xlu0 %965 }
 0x1f5   :  { %15819 = vst [vmem:[#allocation54_spill] sm:$0xff] %v13689_v50 }
 0x1f6   :  { %830 = vadd.xlane.f32.xlu1 %v775_v26  ;;  %v13691_v51 = vpop.permute.xlu1 %969 }
 0x1f7   :  { %15820 = vst [vmem:[#allocation55_spill] sm:$0xff] %v13691_v51 }
 0x1f8   :  { %836 = vadd.xlane.f32.xlu0 %v778_v27  ;;  %v13693_v52 = vpop.permute.xlu0 %888 }
 0x1f9   :  { %15821 = vst [vmem:[#allocation56_spill] sm:$0xff] %v13693_v52 }
 0x1fa   :  { %838 = vadd.xlane.f32.xlu1 %v779_v63  ;;  %v13695_v53 = vpop.permute.xlu1 %892 }
 0x1fb   :  { %15822 = vst [vmem:[#allocation57_spill] sm:$0xff] %v13695_v53 }
 0x1fc   :  { %840 = vadd.xlane.f32.xlu0 %v780_v33  ;;  %v13697_v21 = vpop.permute.xlu0 %976 }
 0x1fd   :  { %15823 = vst [vmem:[#allocation58_spill] sm:$0xff] %v13697_v21 }
 0x1fe   :  { %842 = vadd.xlane.f32.xlu1 %v781_v40  ;;  %v13699_v54 = vpop.permute.xlu1 %980 }
 0x1ff   :  { %15824 = vst [vmem:[#allocation59_spill] sm:$0xff] %v13699_v54 }
 0x200   :  { %844 = vadd.xlane.f32.xlu0 %v782_v43  ;;  %v13701_v56 = vpop.permute.xlu0 %899 }
 0x201   :  { %15825 = vst [vmem:[#allocation60_spill] sm:$0xff] %v13701_v56 }
 0x202   :  { %846 = vadd.xlane.f32.xlu1 %v783_v1  ;;  %v13703_v18 = vpop.permute.xlu1 %903 }
 0x203   :  { %15826 = vst [vmem:[#allocation61_spill] sm:$0xff] %v13703_v18 }
 0x204   :  { %v13705_v57 = vpop.permute.xlu0 %987 }
 0x205   :  { %15827 = vst [vmem:[#allocation62_spill] sm:$0xff] %v13705_v57 }
 0x206   :  { %v13707_v58 = vpop.permute.xlu1 %991 }
 0x207   :  { %15828 = vst [vmem:[#allocation63_spill] sm:$0xff] %v13707_v58 }
 0x208   :  { %v13709_v59 = vpop.permute.xlu0 %910 }
 0x209   :  { %15829 = vst [vmem:[#allocation64_spill] sm:$0xff] %v13709_v59 }
 0x20a   :  { %v13711_v60 = vpop.permute.xlu1 %914 }
 0x20b   :  { %15830 = vst [vmem:[#allocation65_spill] sm:$0xff] %v13711_v60 }
 0x20c   :  { %v13713_v1 = vpop.permute.xlu0 %998 }
 0x20d   :  { %15831 = vst [vmem:[#allocation66_spill] sm:$0xff] %v13713_v1 }
 0x20e   :  { %v13715_v3 = vpop.permute.xlu1 %1002 }
 0x20f   :  { %15832 = vst [vmem:[#allocation67_spill] sm:$0xff] %v13715_v3 }
 0x210   :  { %v13717_v4 = vpop.permute.xlu0 %921 }
 0x211   :  { %15833 = vst [vmem:[#allocation68_spill] sm:$0xff] %v13717_v4 }
 0x212   :  { %v13719_v6 = vpop.permute.xlu1 %925 }
 0x213   :  { %15834 = vst [vmem:[#allocation69_spill] sm:$0xff] %v13719_v6 }
 0x214   :  { %v13721_v28 = vpop.permute.xlu0 %1009 }
 0x215   :  { %15835 = vst [vmem:[#allocation70_spill] sm:$0xff] %v13721_v28 }
 0x216   :  { %v13723_v8 = vpop.permute.xlu1 %1013 }
 0x217   :  { %15836 = vst [vmem:[#allocation71_spill] sm:$0xff] %v13723_v8 }
 0x218   :  { %v13725_v9 = vpop.permute.xlu0 %932 }
 0x219   :  { %15837 = vst [vmem:[#allocation72_spill] sm:$0xff] %v13725_v9 }
 0x21a   :  { %v13727_v12 = vpop.permute.xlu1 %936 }
 0x21b   :  { %15838 = vst [vmem:[#allocation73_spill] sm:$0xff] %v13727_v12 }
 0x21c   :  { %v13729_v14 = vpop.permute.xlu0 %1020 }
 0x21d   :  { %15839 = vst [vmem:[#allocation74_spill] sm:$0xff] %v13729_v14 }
 0x21e   :  { %v13731_v15 = vpop.permute.xlu1 %1024 }
 0x21f   :  { %15840 = vst [vmem:[#allocation75_spill] sm:$0xff] %v13731_v15 }
 0x24d   :  { %v785_v17 = vpop.xlane.xlu0 %784 }
 0x24e   :  { %v13734_v19 = vadd.f32 %v13667_v25, %v785_v17 }
 0x24f   :  { %v789_v20 = vpop.xlane.xlu1 %788 }
 0x250   :  { %1123 = vperm.xlu0 %11797, %v13734_v19   ;;  %v13745_v27 = vadd.f32 %v13662_v16, %v789_v20 }
 0x251   :  { %v787_v23 = vpop.xlane.xlu0 %786 }
 0x252   :  { %v13738_v13 = vadd.f32 %v13654_v61, %v787_v23 }
 0x253   :  { %v791_v24 = vpop.xlane.xlu1 %790 }
 0x254   :  { %1126 = vperm.xlu1 %11798, %v13738_v13   ;;  %v13742_v5 = vadd.f32 %v13671_v34, %v791_v24 }
 0x255   :  { %v793_v26 = vpop.xlane.xlu0 %792 }
 0x256   :  { %1132 = vperm.xlu0 %11797, %v13742_v5   ;;  %v13753_v62 = vadd.f32 %v13685_v47, %v793_v26 }
 0x257   :  { %v795_v29 = vpop.xlane.xlu1 %794 }
 0x258   :  { %1129 = vperm.xlu1 %11798, %v13745_v27   ;;  %v13750_v30 = vadd.f32 %v13687_v49, %v795_v29 }
 0x259   :  { %v801_v31 = vpop.xlane.xlu0 %800 }
 0x25a   :  { %1138 = vperm.xlu0 %11797, %v13750_v30   ;;  %v13761_v38 = vadd.f32 %v13701_v56, %v801_v31 }
 0x25b   :  { %v803_v63 = vpop.xlane.xlu1 %802 }
 0x25c   :  { %1135 = vperm.xlu1 %11798, %v13753_v62   ;;  %v13758_v33 = vadd.f32 %v13703_v18, %v803_v63  ;;  %v15849_v18 = vlaneseq }
 0x25d   :  { %v817_v35 = vpop.xlane.xlu0 %816 }
 0x25e   :  { %1150 = vperm.xlu0 %11797, %v13758_v33   ;;  %v13769_v20 = vadd.f32 %v13675_v37, %v817_v35  ;;  %v1219_v56 = vand.u32 127, %v15849_v18 }
 0x25f   :  { %v819_v40 = vpop.xlane.xlu1 %818 }
 0x260   :  { %1147 = vperm.xlu1 %11798, %v13761_v38   ;;  %v13766_v43 = vadd.f32 %v13678_v41, %v819_v40  ;;  %v1224_v49 = vadd.s32 4294967288, %v1219_v56  ;;  %v13867_v16 = vsub.s32 %v1219_v56, %v13452_v7 }
 0x261   :  { %v797_v17 = vpop.xlane.xlu0 %796 }
 0x262   :  { %1174 = vperm.xlu0 %11797, %v13766_v43   ;;  %v13777_v29 = vadd.f32 %v13693_v52, %v797_v17  ;;  %v13870_v61 = vsub.s32 %v1224_v49, %v13452_v7 }
 0x263   :  { %v799_v23 = vpop.xlane.xlu1 %798 }
 0x264   :  { %1171 = vperm.xlu1 %11798, %v13769_v20   ;;  %v13774_v24 = vadd.f32 %v13695_v53, %v799_v23 }
 0x265   :  { %v805_v26 = vpop.xlane.xlu0 %804 }
 0x266   :  { %1144 = vperm.xlu0 %11797, %v13774_v24   ;;  %v13785_v40 = vadd.f32 %v13709_v59, %v805_v26 }
 0x267   :  { %v807_v31 = vpop.xlane.xlu1 %806 }
 0x268   :  { %1141 = vperm.xlu1 %11798, %v13777_v29   ;;  %v13782_v63 = vadd.f32 %v13711_v60, %v807_v31 }
 0x269   :  { %v809_v35 = vpop.xlane.xlu0 %808 }
 0x26a   :  { %1156 = vperm.xlu0 %11797, %v13782_v63   ;;  %v13793_v48 = vadd.f32 %v13717_v4, %v809_v35 }
 0x26b   :  { %v811_v23 = vpop.xlane.xlu1 %810 }
 0x26c   :  { %1153 = vperm.xlu1 %11798, %v13785_v40   ;;  %v13790_v17 = vadd.f32 %v13719_v6, %v811_v23 }
 0x26d   :  { %v821_v0 = vpop.xlane.xlu0 %820 }
 0x26e   :  { %1162 = vperm.xlu0 %11797, %v13790_v17   ;;  %v13801_v60 = vadd.f32 %v13681_v44, %v821_v0 }
 0x26f   :  { %v823_v31 = vpop.xlane.xlu1 %822 }
 0x270   :  { %1159 = vperm.xlu1 %11798, %v13793_v48   ;;  %v13798_v26 = vadd.f32 %v13683_v46, %v823_v31 }
 0x271   :  { %v825_v2 = vpop.xlane.xlu0 %824 }
 0x272   :  { %1180 = vperm.xlu0 %11797, %v13798_v26   ;;  %v13809_v4 = vadd.f32 %v13689_v50, %v825_v2 }
 0x273   :  { %v827_v23 = vpop.xlane.xlu1 %826 }
 0x274   :  { %1177 = vperm.xlu1 %11798, %v13801_v60   ;;  %v13806_v35 = vadd.f32 %v13691_v51, %v827_v23 }
 0x275   :  { %v833_v6 = vpop.xlane.xlu0 %832 }
 0x276   :  { %1186 = vperm.xlu0 %11797, %v13806_v35   ;;  %v13817_v44 = vadd.f32 %v13705_v57, %v833_v6 }
 0x277   :  { %v835_v31 = vpop.xlane.xlu1 %834 }
 0x278   :  { %1183 = vperm.xlu1 %11798, %v13809_v4   ;;  %v13814_v0 = vadd.f32 %v13707_v58, %v835_v31  ;;  %15842 = vst [vmem:[#allocation77_spill] sm:$0xff] %v13817_v44 }
 0x279   :  { %v813_v46 = vpop.xlane.xlu0 %812 }
 0x27a   :  { %15841 = vst [vmem:[#allocation76_spill] sm:$0xff] %v13814_v0  ;;  %1198 = vperm.xlu0 %11797, %v13814_v0   ;;  %v13825_v50 = vadd.f32 %v13725_v9, %v813_v46 }
 0x27b   :  { %v815_v23 = vpop.xlane.xlu1 %814 }
 0x27c   :  { %1195 = vperm.xlu1 %11798, %v13817_v44   ;;  %v13822_v2 = vadd.f32 %v13727_v12, %v815_v23 }
 0x27d   :  { %v829_v51 = vpop.xlane.xlu0 %828 }
 0x27e   :  { %1168 = vperm.xlu0 %11797, %v13822_v2   ;;  %v13833_v57 = vadd.f32 %v13697_v21, %v829_v51 }
 0x27f   :  { %v831_v31 = vpop.xlane.xlu1 %830 }
 0x280   :  { %1165 = vperm.xlu1 %11798, %v13825_v50   ;;  %v13830_v6 = vadd.f32 %v13699_v54, %v831_v31 }
 0x281   :  { %v837_v58 = vpop.xlane.xlu0 %836 }
 0x282   :  { %1192 = vperm.xlu0 %11797, %v13830_v6   ;;  %v13841_v9 = vadd.f32 %v13713_v1, %v837_v58 }
 0x283   :  { %v839_v23 = vpop.xlane.xlu1 %838 }
 0x284   :  { %1189 = vperm.xlu1 %11798, %v13833_v57   ;;  %v13838_v46 = vadd.f32 %v13715_v3, %v839_v23  ;;  %15844 = vst [vmem:[#allocation79_spill] sm:$0xff] %v13841_v9 }
 0x285   :  { %v841_v12 = vpop.xlane.xlu0 %840 }
 0x286   :  { %15843 = vst [vmem:[#allocation78_spill] sm:$0xff] %v13838_v46  ;;  %1204 = vperm.xlu0 %11797, %v13838_v46   ;;  %v13849_v54 = vadd.f32 %v13721_v28, %v841_v12 }
 0x287   :  { %v843_v31 = vpop.xlane.xlu1 %842 }
 0x288   :  { %1201 = vperm.xlu1 %11798, %v13841_v9   ;;  %v13846_v51 = vadd.f32 %v13723_v8, %v843_v31  ;;  %15846 = vst [vmem:[#allocation81_spill] sm:$0xff] %v13849_v54 }
 0x289   :  { %v845_v21 = vpop.xlane.xlu0 %844 }
 0x28a   :  { %15845 = vst [vmem:[#allocation80_spill] sm:$0xff] %v13846_v51  ;;  %1210 = vperm.xlu0 %11797, %v13846_v51   ;;  %v13857_v3 = vadd.f32 %v13729_v14, %v845_v21 }
 0x28b   :  { %v847_v23 = vpop.xlane.xlu1 %846 }
 0x28c   :  { %1207 = vperm.xlu1 %11798, %v13849_v54   ;;  %v13854_v58 = vadd.f32 %v13731_v15, %v847_v23  ;;  %15848 = vst [vmem:[#allocation83_spill] sm:$0xff] %v13857_v3 }
 0x28e   :  { %15847 = vst [vmem:[#allocation82_spill] sm:$0xff] %v13854_v58  ;;  %1216 = vperm.xlu0 %11797, %v13854_v58  }
 0x290   :  { %1213 = vperm.xlu1 %11798, %v13857_v3  }
 0x2cb   :  { %v1124_v31 = vpop.permute.xlu0 %1123 }
 0x2cc   :  { %v1223_v7 = vrot.slane %v1124_v31, %v13867_v16 }
 0x2cf   :  { %v1127_v8 = vpop.permute.xlu1 %1126 }
 0x2d0   :  { %v1228_v54 = vrot.slane %v1127_v8, %v13870_v61 }
 0x2d1   :  { %v1133_v12 = vpop.permute.xlu0 %1132 }
 0x2d2   :  { %v1238_v18 = vrot.slane %v1133_v12, %v13870_v61  ;;  %v1230_v8 = vsel %vm1229_vm0, %v1228_v54, %v1223_v7 }
 0x2d3   :  { %v1130_v28 = vpop.permute.xlu1 %1129 }
 0x2d4   :  { %v1234_v3 = vrot.slane %v1130_v28, %v13867_v16 }
 0x2d5   :  { %v1139_v1 = vpop.permute.xlu0 %1138 }
 0x2d6   :  { %v1247_v56 = vrot.slane %v1139_v1, %v13870_v61  ;;  %v1239_v49 = vsel %vm1229_vm0, %v1238_v18, %v1234_v3 }
 0x2d7   :  { %v1136_v59 = vpop.permute.xlu1 %1135  ;;  %v1367_v1 = vsel %vm1366_vm1, %v1239_v49, %v1230_v8 }
 0x2d8   :  { %v1243_v58 = vrot.slane %v1136_v59, %v13867_v16 }
 0x2d9   :  { %v1151_v53 = vpop.permute.xlu0 %1150 }
 0x2da   :  { %v1248_v59 = vsel %vm1229_vm0, %v1247_v56, %v1243_v58  ;;  %v1265_v58 = vrot.slane %v1151_v53, %v13870_v61 }
 0x2db   :  { %v1148_v52 = vpop.permute.xlu1 %1147 }
 0x2dc   :  { %v1261_v31 = vrot.slane %v1148_v52, %v13867_v16 }
 0x2dd   :  { %v13861_v41 = vpop.permute.xlu0 %1174 }
 0x2de   :  { %v1266_v52 = vsel %vm1229_vm0, %v1265_v58, %v1261_v31 }
 0x2df   :  { %v13863_v37 = vpop.permute.xlu1 %1171 }
 0x2e1   :  { %v1145_v23 = vpop.permute.xlu0 %1144 }
 0x2e2   :  { %v1256_v28 = vrot.slane %v1145_v23, %v13870_v61  ;;  %v1369_v23 = vsel %vm1368_vm2, %v1248_v59, %v1367_v1 }
 0x2e3   :  { %v1142_v15 = vpop.permute.xlu1 %1141 }
 0x2e4   :  { %v1252_v51 = vrot.slane %v1142_v15, %v13867_v16 }
 0x2e5   :  { %v1157_v21 = vpop.permute.xlu0 %1156 }
 0x2e6   :  { %v1257_v15 = vsel %vm1229_vm0, %v1256_v28, %v1252_v51  ;;  %v1274_v18 = vrot.slane %v1157_v21, %v13870_v61 }
 0x2e7   :  { %v1154_v14 = vpop.permute.xlu1 %1153  ;;  %v1371_v54 = vsel %vm1370_vm3, %v1257_v15, %v1369_v23  ;;  %v1297_v23 = vrot.slane %v13863_v37, %v13867_v16 }
 0x2e8   :  { %v1270_v12 = vrot.slane %v1154_v14, %v13867_v16  ;;  %v1373_v53 = vsel %vm1372_vm4, %v1266_v52, %v1371_v54 }
 0x2e9   :  { %v1163_v47 = vpop.permute.xlu0 %1162 }
 0x2ea   :  { %v1283_v51 = vrot.slane %v1163_v47, %v13870_v61  ;;  %v1275_v14 = vsel %vm1229_vm0, %v1274_v18, %v1270_v12 }
 0x2eb   :  { %v1160_v34 = vpop.permute.xlu1 %1159  ;;  %v1375_v47 = vsel %vm1374_vm5, %v1275_v14, %v1373_v53 }
 0x2ec   :  { %v1279_v0 = vrot.slane %v1160_v34, %v13867_v16 }
 0x2ed   :  { %v13872_v25 = vpop.permute.xlu0 %1180 }
 0x2ee   :  { %v1284_v34 = vsel %vm1229_vm0, %v1283_v51, %v1279_v0  ;;  %v1310_v18 = vrot.slane %v13872_v25, %v13870_v61 }
 0x2ef   :  { %v1178_v55 = vpop.permute.xlu1 %1177  ;;  %v1377_v8 = vsel %vm1376_vm6, %v1284_v34, %v1375_v47 }
 0x2f0   :  { %v1306_v12 = vrot.slane %v1178_v55, %v13867_v16  ;;  %v1301_v55 = vrot.slane %v13861_v41, %v13870_v61 }
 0x2f1   :  { %v1187_v9 = vpop.permute.xlu0 %1186 }
 0x2f2   :  { %v1319_v51 = vrot.slane %v1187_v9, %v13870_v61  ;;  %v1302_v37 = vsel %vm1229_vm0, %v1301_v55, %v1297_v23 }
 0x2f3   :  { %v1184_v46 = vpop.permute.xlu1 %1183 }
 0x2f4   :  { %v1315_v31 = vrot.slane %v1184_v46, %v13867_v16 }
 0x2f5   :  { %v1199_v44 = vpop.permute.xlu0 %1198 }
 0x2f6   :  { %v1320_v52 = vsel %vm1229_vm0, %v1319_v51, %v1315_v31 }
 0x2f7   :  { %v1196_v3 = vpop.permute.xlu1 %1195 }
 0x2f8   :  { %v1333_v9 = vrot.slane %v1196_v3, %v13867_v16 }
 0x2f9   :  { %v1169_v56 = vpop.permute.xlu0 %1168 }
 0x2fa   :  { %v1292_v49 = vrot.slane %v1169_v56, %v13870_v61  ;;  %v1311_v56 = vsel %vm1229_vm0, %v1310_v18, %v1306_v12 }
 0x2fb   :  { %v1166_v7 = vpop.permute.xlu1 %1165 }
 0x2fc   :  { %v1288_v21 = vrot.slane %v1166_v7, %v13867_v16 }
 0x2fd   :  { %v1193_v28 = vpop.permute.xlu0 %1192 }
 0x2fe   :  { %v1293_v59 = vsel %vm1229_vm0, %v1292_v49, %v1288_v21  ;;  %v1328_v46 = vrot.slane %v1193_v28, %v13870_v61  ;;  %v1380_v49 = vsel %vm1366_vm1, %v1311_v56, %v1302_v37  ;;  %v1337_v28 = vrot.slane %v1199_v44, %v13870_v61 }
 0x2ff   :  { %v1190_v15 = vpop.permute.xlu1 %1189  ;;  %v1379_v0 = vsel %vm1378_vm7, %v1293_v59, %v1377_v8  ;;  %v1381_v41 = vsel %vm1368_vm2, %v1320_v52, %v1380_v49 }
 0x300   :  { %v1390_v1 = vsel %vm1389_vm8, %v1379_v0, -inf  ;;  %v1324_v58 = vrot.slane %v1190_v15, %v13867_v16  ;;  %v1338_v12 = vsel %vm1229_vm0, %v1337_v28, %v1333_v9 }
 0x301   :  { %1391 = vmax.xlane.f32.xlu1 %v1390_v1  ;;  %v1205_v54 = vpop.permute.xlu0 %1204 }
 0x302   :  { %v1329_v34 = vsel %vm1229_vm0, %v1328_v46, %v1324_v58  ;;  %v1346_v53 = vrot.slane %v1205_v54, %v13870_v61 }
 0x303   :  { %v1202_v14 = vpop.permute.xlu1 %1201  ;;  %v1382_v59 = vsel %vm1370_vm3, %v1329_v34, %v1381_v41 }
 0x304   :  { %v1342_v25 = vrot.slane %v1202_v14, %v13867_v16  ;;  %v1383_v18 = vsel %vm1372_vm4, %v1338_v12, %v1382_v59 }
 0x305   :  { %v1211_v7 = vpop.permute.xlu0 %1210 }
 0x306   :  { %v1355_v8 = vrot.slane %v1211_v7, %v13870_v61  ;;  %v1347_v15 = vsel %vm1229_vm0, %v1346_v53, %v1342_v25 }
 0x307   :  { %v1208_v21 = vpop.permute.xlu1 %1207  ;;  %v1384_v44 = vsel %vm1374_vm5, %v1347_v15, %v1383_v18 }
 0x308   :  { %v1351_v47 = vrot.slane %v1208_v21, %v13867_v16 }
 0x309   :  { %v1217_v0 = vpop.permute.xlu0 %1216 }
 0x30a   :  { %v1356_v3 = vsel %vm1229_vm0, %v1355_v8, %v1351_v47  ;;  %v1364_v31 = vrot.slane %v1217_v0, %v13870_v61 }
 0x30b   :  { %v1214_v1 = vpop.permute.xlu1 %1213  ;;  %v1385_v54 = vsel %vm1376_vm6, %v1356_v3, %v1384_v44 }
 0x30c   :  { %v1360_v23 = vrot.slane %v1214_v1, %v13867_v16 }
 0x30e   :  { %v1365_v58 = vsel %vm1229_vm0, %v1364_v31, %v1360_v23 }
 0x30f   :  { %v1386_v51 = vsel %vm1378_vm7, %v1365_v58, %v1385_v54 }
 0x310   :  { %v1393_v14 = vsel %vm1389_vm8, %v1386_v51, -inf }
 0x311   :  { %1394 = vmax.xlane.f32.xlu0 %v1393_v14 }
 0x38a   :  { %v1392_v55 = vpop.xlane.xlu1 %1391 }
 0x38b   :  { %v1401_v56 = vrot.slane %v1392_v55, %v13455_v10  ;;  %v1405_v46 = vrot.slane %v1392_v55, %v13458_v11  ;;  %v1409_v34 = vrot.slane %v1392_v55, %v13471_v22  ;;  %v1413_v21 = vrot.slane %v1392_v55, %v13486_v32 }
 0x38c   :  { %v1421_v8 = vrot.slane %v1392_v55, %v13500_v39  ;;  %v1425_v12 = vrot.slane %v1392_v55, %v13507_v42 }
 0x38d   :  { %v1478_v52 = vsub.f32 %v13734_v19, %v1401_v56  ;;  %v1479_v37 = vsub.f32 %v13738_v13, %v1401_v56  ;;  %v1481_v25 = vsub.f32 %v13742_v5, %v1405_v46  ;;  %v1480_v7 = vsub.f32 %v13745_v27, %v1405_v46 }
 0x38e   :  { %v1483_v41 = vsub.f32 %v13750_v30, %v1409_v34  ;;  %v1482_v47 = vsub.f32 %v13753_v62, %v1409_v34  ;;  %v1417_v13 = vrot.slane %v1392_v55, %v13493_v36  ;;  %v1485_v28 = vsub.f32 %v13774_v24, %v1413_v21 }
 0x38f   :  { %v1510_v49 = vmul.f32 1.442695, %v1478_v52  ;;  %v1512_v9 = vmul.f32 1.442695, %v1479_v37  ;;  %v1516_v53 = vmul.f32 1.442695, %v1481_v25  ;;  %v1484_v27 = vsub.f32 %v13777_v29, %v1413_v21 }
 0x390   :  { %v1514_v19 = vmul.f32 1.442695, %v1480_v7  ;;  %v1520_v5 = vmul.f32 1.442695, %v1483_v41  ;;  %v1518_v59 = vmul.f32 1.442695, %v1482_v47  ;;  %v1487_v30 = vsub.f32 %v13758_v33, %v1417_v13 }
 0x391   :  { %12631 = vpow2.f32 %v1510_v49  ;;  %v1524_v15 = vmul.f32 1.442695, %v1485_v28  ;;  %v1486_v62 = vsub.f32 %v13761_v38, %v1417_v13  ;;  %v1522_v0 = vmul.f32 1.442695, %v1484_v27 }
 0x392   :  { %12633 = vpow2.f32 %v1512_v9  ;;  %v1489_v24 = vsub.f32 %v13782_v63, %v1421_v8  ;;  %v1528_v1 = vmul.f32 1.442695, %v1487_v30  ;;  %v1488_v29 = vsub.f32 %v13785_v40, %v1421_v8 }
 0x393   :  { %12635 = vpow2.f32 %v1516_v53  ;;  %v1526_v31 = vmul.f32 1.442695, %v1486_v62  ;;  %v1429_v33 = vrot.slane %v1392_v55, %v13514_v45  ;;  %v1491_v38 = vsub.f32 %v13790_v17, %v1425_v12 }
 0x394   :  { %12637 = vpow2.f32 %v1514_v19  ;;  %v1532_v63 = vmul.f32 1.442695, %v1489_v24  ;;  %v1490_v44 = vsub.f32 %v13793_v48, %v1425_v12  ;;  %v1530_v40 = vmul.f32 1.442695, %v1488_v29 }
 0x395   :  { %12639 = vpow2.f32 %v1520_v5  ;;  %v1493_v51 = vsub.f32 %v13822_v2, %v1429_v33  ;;  %v1536_v17 = vmul.f32 1.442695, %v1491_v38  ;;  %v1492_v48 = vsub.f32 %v13825_v50, %v1429_v33  ;;  %v15852_v38 = vld [vmem:[#allocation78_spill] sm:$0xff] }
 0x396   :  { %12641 = vpow2.f32 %v1518_v59  ;;  %v1534_v56 = vmul.f32 1.442695, %v1490_v44 }
 0x397   :  { %12643 = vpow2.f32 %v1524_v15  ;;  %v1540_v52 = vmul.f32 1.442695, %v1493_v51  ;;  %v1538_v25 = vmul.f32 1.442695, %v1492_v48  ;;  %v15853_v51 = vld [vmem:[#allocation79_spill] sm:$0xff] }
 0x398   :  { %12645 = vpow2.f32 %v1522_v0  ;;  %v15850_v0 = vld [vmem:[#allocation76_spill] sm:$0xff] }
 0x399   :  { %12647 = vpow2.f32 %v1528_v1  ;;  %v15851_v1 = vld [vmem:[#allocation77_spill] sm:$0xff] }
 0x39a   :  { %12649 = vpow2.f32 %v1526_v31  ;;  %v13971_v58 = vpop.xlane.xlu0 %1394 }
 0x39b   :  { %12651 = vpow2.f32 %v1532_v63  ;;  %v1433_v14 = vrot.slane %v13971_v58, %v13455_v10  ;;  %v1437_v2 = vrot.slane %v13971_v58, %v13458_v11  ;;  %v1441_v49 = vrot.slane %v13971_v58, %v13471_v22 }
 0x39c   :  { %12653 = vpow2.f32 %v1530_v40  ;;  %v1445_v47 = vrot.slane %v13971_v58, %v13486_v32  ;;  %v1449_v27 = vrot.slane %v13971_v58, %v13493_v36  ;;  %v1453_v62 = vrot.slane %v13971_v58, %v13500_v39 }
 0x39d   :  { %12655 = vpow2.f32 %v1536_v17  ;;  %v1495_v37 = vsub.f32 %v13766_v43, %v1433_v14  ;;  %v1494_v50 = vsub.f32 %v13769_v20, %v1433_v14  ;;  %v1497_v9 = vsub.f32 %v13798_v26, %v1437_v2 }
 0x39e   :  { %v13959_v3 = vpop.eup %12631  ;;  %12657 = vpow2.f32 %v1534_v56  ;;  %v1496_v41 = vsub.f32 %v13801_v60, %v1437_v2  ;;  %v1499_v19 = vsub.f32 %v13806_v35, %v1441_v49  ;;  %v1498_v28 = vsub.f32 %v13809_v4, %v1441_v49 }
 0x39f   :  { %v13962_v23 = vpop.eup %12633  ;;  %1607 = vperm.xlu0 %11797, %v13959_v3   ;;  %12659 = vpow2.f32 %v1540_v52  ;;  %v1544_v21 = vmul.f32 1.442695, %v1495_v37  ;;  %v1542_v53 = vmul.f32 1.442695, %v1494_v50  ;;  %v1548_v26 = vmul.f32 1.442695, %v1497_v9 }
 0x3a0   :  { %1610 = vperm.xlu1 %11798, %v13962_v23   ;;  %v13968_v18 = vpop.eup %12635  ;;  %12661 = vpow2.f32 %v1538_v25  ;;  %v1546_v60 = vmul.f32 1.442695, %v1496_v41  ;;  %v1501_v59 = vsub.f32 %v13830_v6, %v1445_v47  ;;  %v1552_v35 = vmul.f32 1.442695, %v1499_v19  ;;  %v15854_v52 = vld [vmem:[#allocation80_spill] sm:$0xff]  ;;  %v15855_v50 = vld [vmem:[#allocation81_spill] sm:$0xff] }
 0x3a1   :  { %v13973_v54 = vpop.eup %12637  ;;  %12663 = vpow2.f32 %v1544_v21  ;;  %v1500_v30 = vsub.f32 %v13833_v57, %v1445_v47  ;;  %v1550_v4 = vmul.f32 1.442695, %v1498_v28  ;;  %v1503_v12 = vsub.f32 %v15850_v0, %v1449_v27  ;;  %v15856_v41 = vld [vmem:[#allocation82_spill] sm:$0xff]  ;;  %v15857_v19 = vld [vmem:[#allocation83_spill] sm:$0xff] }
 0x3a2   :  { %v13980_v55 = vpop.eup %12639  ;;  %12665 = vpow2.f32 %v1542_v53  ;;  %v1556_v6 = vmul.f32 1.442695, %v1501_v59  ;;  %v1502_v29 = vsub.f32 %v15851_v1, %v1449_v27  ;;  %v1457_v33 = vrot.slane %v13971_v58, %v13507_v42 }
 0x3a3   :  { %1616 = vperm.xlu0 %11797, %v13968_v18   ;;  %v13983_v46 = vpop.eup %12641  ;;  %12667 = vpow2.f32 %v1548_v26  ;;  %v1554_v57 = vmul.f32 1.442695, %v1500_v30  ;;  %v1505_v63 = vsub.f32 %v15852_v38, %v1453_v62  ;;  %v1560_v44 = vmul.f32 1.442695, %v1503_v12 }
 0x3a4   :  { %1613 = vperm.xlu1 %11798, %v13973_v54   ;;  %v13990_v34 = vpop.eup %12643  ;;  %12669 = vpow2.f32 %v1546_v60  ;;  %v1504_v17 = vsub.f32 %v15853_v51, %v1453_v62  ;;  %v1558_v14 = vmul.f32 1.442695, %v1502_v29  ;;  %v1461_v56 = vrot.slane %v13971_v58, %v13514_v45 }
 0x3a5   :  { %v13993_v7 = vpop.eup %12645  ;;  %12671 = vpow2.f32 %v1552_v35  ;;  %v1507_v2 = vsub.f32 %v15854_v52, %v1457_v33  ;;  %v1564_v37 = vmul.f32 1.442695, %v1505_v63  ;;  %v1506_v49 = vsub.f32 %v15855_v50, %v1457_v33 }
 0x3a6   :  { %v14000_v43 = vpop.eup %12647  ;;  %12673 = vpow2.f32 %v1550_v4  ;;  %v1562_v9 = vmul.f32 1.442695, %v1504_v17  ;;  %v1509_v53 = vsub.f32 %v15856_v41, %v1461_v56  ;;  %v1508_v26 = vsub.f32 %v15857_v19, %v1461_v56 }
 0x3a7   :  { %1622 = vperm.xlu0 %11797, %v13980_v55   ;;  %v14003_v20 = vpop.eup %12649  ;;  %12675 = vpow2.f32 %v1556_v6  ;;  %v1568_v58 = vmul.f32 1.442695, %v1507_v2  ;;  %v1566_v28 = vmul.f32 1.442695, %v1506_v49 }
 0x3a8   :  { %1619 = vperm.xlu1 %11798, %v13983_v46   ;;  %v14010_v13 = vpop.eup %12651  ;;  %12677 = vpow2.f32 %v1554_v57  ;;  %v1572_v27 = vmul.f32 1.442695, %v1509_v53  ;;  %v1570_v35 = vmul.f32 1.442695, %v1508_v26 }
 0x3a9   :  { %v14013_v5 = vpop.eup %12653  ;;  %12679 = vpow2.f32 %v1560_v44 }
 0x3aa   :  { %v14020_v8 = vpop.eup %12655  ;;  %12681 = vpow2.f32 %v1558_v14 }
 0x3ab   :  { %1628 = vperm.xlu0 %11797, %v13990_v34   ;;  %v14023_v15 = vpop.eup %12657  ;;  %12683 = vpow2.f32 %v1564_v37 }
 0x3ac   :  { %1625 = vperm.xlu1 %11798, %v13993_v7   ;;  %v14030_v24 = vpop.eup %12659  ;;  %12685 = vpow2.f32 %v1562_v9 }
 0x3ad   :  { %v14033_v31 = vpop.eup %12661  ;;  %12687 = vpow2.f32 %v1568_v58 }
 0x3ae   :  { %v14040_v40 = vpop.eup %12663  ;;  %12689 = vpow2.f32 %v1566_v28 }
 0x3af   :  { %1634 = vperm.xlu0 %11797, %v14000_v43   ;;  %v14043_v48 = vpop.eup %12665  ;;  %12691 = vpow2.f32 %v1572_v27 }
 0x3b0   :  { %1631 = vperm.xlu1 %11798, %v14003_v20   ;;  %v14050_v25 = vpop.eup %12667  ;;  %12693 = vpow2.f32 %v1570_v35 }
 0x3b1   :  { %v14053_v21 = vpop.eup %12669 }
 0x3b2   :  { %v14058_v47 = vpop.eup %12671 }
 0x3b3   :  { %1640 = vperm.xlu0 %11797, %v14010_v13   ;;  %v14061_v60 = vpop.eup %12673 }
 0x3b4   :  { %1637 = vperm.xlu1 %11798, %v14013_v5   ;;  %v14065_v59 = vpop.eup %12675 }
 0x3b5   :  { %v14067_v30 = vpop.eup %12677 }
 0x3b6   :  { %v14071_v4 = vpop.eup %12679 }
 0x3b7   :  { %1646 = vperm.xlu0 %11797, %v14020_v8   ;;  %v14073_v62 = vpop.eup %12681 }
 0x3b8   :  { %1643 = vperm.xlu1 %11798, %v14023_v15   ;;  %v14077_v0 = vpop.eup %12683 }
 0x3b9   :  { %v14079_v12 = vpop.eup %12685 }
 0x3ba   :  { %v14083_v6 = vpop.eup %12687 }
 0x3bb   :  { %1652 = vperm.xlu0 %11797, %v14030_v24   ;;  %v14085_v1 = vpop.eup %12689 }
 0x3bc   :  { %1649 = vperm.xlu1 %11798, %v14033_v31   ;;  %v14089_v29 = vpop.eup %12691 }
 0x3bd   :  { %15858 = vst [vmem:[#allocation76_spill] sm:$0xff] %v14089_v29  ;;  %v14091_v57 = vpop.eup %12693 }
 0x3bf   :  { %1658 = vperm.xlu0 %11797, %v14040_v40  }
 0x3c0   :  { %1655 = vperm.xlu1 %11798, %v14043_v48  }
 0x3c3   :  { %1664 = vperm.xlu0 %11797, %v14050_v25  }
 0x3c4   :  { %1661 = vperm.xlu1 %11798, %v14053_v21  }
 0x3c7   :  { %1670 = vperm.xlu0 %11797, %v14058_v47  }
 0x3c8   :  { %1667 = vperm.xlu1 %11798, %v14061_v60  }
 0x3cb   :  { %1676 = vperm.xlu0 %11797, %v14065_v59  }
 0x3cc   :  { %1673 = vperm.xlu1 %11798, %v14067_v30  }
 0x3cf   :  { %1682 = vperm.xlu0 %11797, %v14071_v4  }
 0x3d0   :  { %1679 = vperm.xlu1 %11798, %v14073_v62  }
 0x3d3   :  { %1688 = vperm.xlu0 %11797, %v14077_v0  }
 0x3d4   :  { %1685 = vperm.xlu1 %11798, %v14079_v12  }
 0x3d7   :  { %1694 = vperm.xlu0 %11797, %v14083_v6  }
 0x3d8   :  { %1691 = vperm.xlu1 %11798, %v14085_v1  }
 0x3db   :  { %1700 = vperm.xlu0 %11797, %v14089_v29  }
 0x3dc   :  { %1697 = vperm.xlu1 %11798, %v14091_v57  }
 0x41a   :  { %v1608_v33 = vpop.permute.xlu0 %1607 }
 0x41b   :  { %v1611_v38 = vpop.permute.xlu1 %1610  ;;  %v1705_v19 = vrot.slane %v1608_v33, %v13867_v16 }
 0x41c   :  { %v1709_v58 = vrot.slane %v1611_v38, %v13870_v61 }
 0x41e   :  { %v1617_v63 = vpop.permute.xlu0 %1616 }
 0x41f   :  { %v1614_v44 = vpop.permute.xlu1 %1613  ;;  %v1718_v50 = vrot.slane %v1617_v63, %v13870_v61 }
 0x420   :  { %v1714_v37 = vrot.slane %v1614_v44, %v13867_v16 }
 0x422   :  { %v1623_v51 = vpop.permute.xlu0 %1622  ;;  %v1719_v63 = vsel %vm1229_vm0, %v1718_v50, %v1714_v37 }
 0x423   :  { %v1620_v17 = vpop.permute.xlu1 %1619  ;;  %v1727_v41 = vrot.slane %v1623_v51, %v13870_v61 }
 0x424   :  { %v1723_v9 = vrot.slane %v1620_v17, %v13867_v16 }
 0x426   :  { %v1629_v14 = vpop.permute.xlu0 %1628  ;;  %v1728_v29 = vsel %vm1229_vm0, %v1727_v41, %v1723_v9 }
 0x427   :  { %v1626_v56 = vpop.permute.xlu1 %1625  ;;  %v1736_v28 = vrot.slane %v1629_v14, %v13870_v61 }
 0x428   :  { %v1732_v26 = vrot.slane %v1626_v56, %v13867_v16  ;;  %v1710_v56 = vsel %vm1229_vm0, %v1709_v58, %v1705_v19 }
 0x42a   :  { %v1635_v52 = vpop.permute.xlu0 %1634  ;;  %v1737_v14 = vsel %vm1229_vm0, %v1736_v28, %v1732_v26 }
 0x42b   :  { %v1632_v2 = vpop.permute.xlu1 %1631  ;;  %v1745_v35 = vrot.slane %v1635_v52, %v13870_v61  ;;  %v1846_v52 = vsel %vm1366_vm1, %v1719_v63, %v1710_v56 }
 0x42c   :  { %v1741_v27 = vrot.slane %v1632_v2, %v13867_v16  ;;  %v1847_v50 = vsel %vm1368_vm2, %v1728_v29, %v1846_v52 }
 0x42d   :  { %v1848_v9 = vsel %vm1370_vm3, %v1737_v14, %v1847_v50 }
 0x42e   :  { %v1641_v49 = vpop.permute.xlu0 %1640  ;;  %v1746_v37 = vsel %vm1229_vm0, %v1745_v35, %v1741_v27 }
 0x42f   :  { %v1638_v53 = vpop.permute.xlu1 %1637  ;;  %v1754_v17 = vrot.slane %v1641_v49, %v13870_v61  ;;  %v1849_v19 = vsel %vm1372_vm4, %v1746_v37, %v1848_v9 }
 0x430   :  { %v1750_v44 = vrot.slane %v1638_v53, %v13867_v16 }
 0x432   :  { %v1647_v51 = vpop.permute.xlu0 %1646  ;;  %v1755_v49 = vsel %vm1229_vm0, %v1754_v17, %v1750_v44 }
 0x433   :  { %v1644_v38 = vpop.permute.xlu1 %1643  ;;  %v1763_v33 = vrot.slane %v1647_v51, %v13870_v61  ;;  %v1850_v28 = vsel %vm1374_vm5, %v1755_v49, %v1849_v19 }
 0x434   :  { %v1759_v2 = vrot.slane %v1644_v38, %v13867_v16 }
 0x436   :  { %v1653_v53 = vpop.permute.xlu0 %1652  ;;  %v1764_v41 = vsel %vm1229_vm0, %v1763_v33, %v1759_v2 }
 0x437   :  { %v1650_v51 = vpop.permute.xlu1 %1649  ;;  %v1772_v58 = vrot.slane %v1653_v53, %v13870_v61  ;;  %v1851_v29 = vsel %vm1376_vm6, %v1764_v41, %v1850_v28 }
 0x438   :  { %v1768_v26 = vrot.slane %v1650_v51, %v13867_v16 }
 0x43a   :  { %v1659_v63 = vpop.permute.xlu0 %1658  ;;  %v1773_v27 = vsel %vm1229_vm0, %v1772_v58, %v1768_v26 }
 0x43b   :  { %v1656_v35 = vpop.permute.xlu1 %1655  ;;  %v1852_v44 = vsel %vm1378_vm7, %v1773_v27, %v1851_v29  ;;  %v1781_v26 = vrot.slane %v1659_v63, %v13870_v61 }
 0x43c   :  { %v1862_v17 = vsel %vm1389_vm8, %v1852_v44, 0.0  ;;  %v1777_v19 = vrot.slane %v1656_v35, %v13867_v16 }
 0x43d   :  { %1863 = vadd.xlane.f32.xlu1 %v1862_v17 }
 0x43e   :  { %v1665_v38 = vpop.permute.xlu0 %1664 }
 0x43f   :  { %v1662_v33 = vpop.permute.xlu1 %1661  ;;  %v1790_v53 = vrot.slane %v1665_v38, %v13870_v61 }
 0x440   :  { %v1786_v49 = vrot.slane %v1662_v33, %v13867_v16 }
 0x442   :  { %v1671_v56 = vpop.permute.xlu0 %1670  ;;  %v1791_v17 = vsel %vm1229_vm0, %v1790_v53, %v1786_v49 }
 0x443   :  { %v1668_v14 = vpop.permute.xlu1 %1667  ;;  %v1799_v51 = vrot.slane %v1671_v56, %v13870_v61 }
 0x444   :  { %v1795_v41 = vrot.slane %v1668_v14, %v13867_v16 }
 0x446   :  { %v1677_v2 = vpop.permute.xlu0 %1676  ;;  %v1800_v14 = vsel %vm1229_vm0, %v1799_v51, %v1795_v41 }
 0x447   :  { %v1674_v52 = vpop.permute.xlu1 %1673  ;;  %v1808_v27 = vrot.slane %v1677_v2, %v13870_v61 }
 0x448   :  { %v1804_v28 = vrot.slane %v1674_v52, %v13867_v16  ;;  %v1782_v52 = vsel %vm1229_vm0, %v1781_v26, %v1777_v19 }
 0x44a   :  { %v1683_v37 = vpop.permute.xlu0 %1682  ;;  %v1809_v2 = vsel %vm1229_vm0, %v1808_v27, %v1804_v28 }
 0x44b   :  { %v1680_v50 = vpop.permute.xlu1 %1679  ;;  %v1817_v44 = vrot.slane %v1683_v37, %v13870_v61  ;;  %v1853_v37 = vsel %vm1366_vm1, %v1791_v17, %v1782_v52 }
 0x44c   :  { %v1813_v29 = vrot.slane %v1680_v50, %v13867_v16  ;;  %v1854_v53 = vsel %vm1368_vm2, %v1800_v14, %v1853_v37 }
 0x44d   :  { %v1855_v41 = vsel %vm1370_vm3, %v1809_v2, %v1854_v53 }
 0x44e   :  { %v1689_v9 = vpop.permute.xlu0 %1688  ;;  %v1818_v49 = vsel %vm1229_vm0, %v1817_v44, %v1813_v29 }
 0x44f   :  { %v1686_v58 = vpop.permute.xlu1 %1685  ;;  %v1826_v33 = vrot.slane %v1689_v9, %v13870_v61  ;;  %v1856_v26 = vsel %vm1372_vm4, %v1818_v49, %v1855_v41 }
 0x450   :  { %v1822_v38 = vrot.slane %v1686_v58, %v13867_v16 }
 0x452   :  { %v1695_v56 = vpop.permute.xlu0 %1694  ;;  %v1827_v9 = vsel %vm1229_vm0, %v1826_v33, %v1822_v38 }
 0x453   :  { %v1692_v35 = vpop.permute.xlu1 %1691  ;;  %v1835_v63 = vrot.slane %v1695_v56, %v13870_v61  ;;  %v1857_v27 = vsel %vm1374_vm5, %v1827_v9, %v1856_v26 }
 0x454   :  { %v1831_v50 = vrot.slane %v1692_v35, %v13867_v16 }
 0x456   :  { %v1701_v58 = vpop.permute.xlu0 %1700  ;;  %v1836_v51 = vsel %vm1229_vm0, %v1835_v63, %v1831_v50 }
 0x457   :  { %v1698_v56 = vpop.permute.xlu1 %1697  ;;  %v1844_v19 = vrot.slane %v1701_v58, %v13870_v61  ;;  %v1858_v44 = vsel %vm1376_vm6, %v1836_v51, %v1857_v27 }
 0x458   :  { %v1840_v28 = vrot.slane %v1698_v56, %v13867_v16 }
 0x45a   :  { %v1845_v29 = vsel %vm1229_vm0, %v1844_v19, %v1840_v28 }
 0x45b   :  { %v1859_v17 = vsel %vm1378_vm7, %v1845_v29, %v1858_v44 }
 0x45c   :  { %v1865_v38 = vsel %vm1389_vm8, %v1859_v17, 0.0 }
 0x45d   :  { %1866 = vadd.xlane.f32.xlu0 %v1865_v38 }
 0x4c6   :  { %v1864_v33 = vpop.xlane.xlu1 %1863 }
 0x4c7   :  { %12695 = vrcp.f32 %v1864_v33 }
 0x4d4   :  { %v12696_v14 = vpop.eup %12695 }
 0x4d5   :  { %v1875_v35 = vrot.slane %v12696_v14, %v13455_v10  ;;  %v1879_v63 = vrot.slane %v12696_v14, %v13458_v11  ;;  %v1883_v52 = vrot.slane %v12696_v14, %v13471_v22  ;;  %v1887_v58 = vrot.slane %v12696_v14, %v13486_v32 }
 0x4d6   :  { %v1895_v27 = vrot.slane %v12696_v14, %v13500_v39 }
 0x4d7   :  { %v1952_v2 = vmul.f32 %v13959_v3, %v1875_v35  ;;  %v1953_v50 = vmul.f32 %v13962_v23, %v1875_v35  ;;  %v1954_v37 = vmul.f32 %v13973_v54, %v1879_v63  ;;  %v1955_v49 = vmul.f32 %v13968_v18, %v1879_v63 }
 0x4d8   :  { %v1956_v9 = vmul.f32 %v13983_v46, %v1883_v52  ;;  %v1957_v19 = vmul.f32 %v13980_v55, %v1883_v52  ;;  %v1958_v3 = vmul.f32 %v13993_v7, %v1887_v58  ;;  %v1891_v23 = vrot.slane %v12696_v14, %v13493_v36 }
 0x4d9   :  { %v1984_v53 = vpack.c.bf16 %v1953_v50, %v1952_v2  ;;  %v1985_v56 = vpack.c.bf16 %v1955_v49, %v1954_v37  ;;  %v1959_v18 = vmul.f32 %v13990_v34, %v1887_v58  ;;  %v1962_v38 = vmul.f32 %v14013_v5, %v1895_v27 }
 0x4da   :  { %v1986_v28 = vpack.c.bf16 %v1957_v19, %v1956_v9  ;;  %v1960_v46 = vmul.f32 %v14003_v20, %v1891_v23  ;;  %v1961_v17 = vmul.f32 %v14000_v43, %v1891_v23  ;;  %v1963_v33 = vmul.f32 %v14010_v13, %v1895_v27 }
 0x4db   :  { %v2022_v41 = vunpack.c.h.b16 %v1984_v53  ;;  %v2021_v51 = vunpack.c.l.b16 %v1984_v53  ;;  %v2023_v26 = vunpack.c.l.b16 %v1985_v56  ;;  %v2024_v54 = vunpack.c.h.b16 %v1985_v56 }
 0x4dc   :  { %v2025_v29 = vunpack.c.l.b16 %v1986_v28  ;;  %v2026_v44 = vunpack.c.h.b16 %v1986_v28  ;;  %v1987_v55 = vpack.c.bf16 %v1959_v18, %v1958_v3  ;;  %v1899_v34 = vrot.slane %v12696_v14, %v13507_v42 }
 0x4dd   :  { %2057 = vperm.xlu1 %11798, %v2022_v41   ;;  %2054 = vperm.xlu0 %11797, %v2021_v51   ;;  %v1988_v20 = vpack.c.bf16 %v1961_v17, %v1960_v46  ;;  %v1989_v52 = vpack.c.bf16 %v1963_v33, %v1962_v38  ;;  %v1903_v2 = vrot.slane %v12696_v14, %v13514_v45 }
 0x4de   :  { %v2027_v35 = vunpack.c.l.b16 %v1987_v55  ;;  %v2028_v63 = vunpack.c.h.b16 %v1987_v55  ;;  %v1964_v37 = vmul.f32 %v14023_v15, %v1899_v34  ;;  %v1965_v49 = vmul.f32 %v14020_v8, %v1899_v34 }
 0x4df   :  { %v2029_v50 = vunpack.c.l.b16 %v1988_v20  ;;  %v2030_v43 = vunpack.c.h.b16 %v1988_v20  ;;  %v1966_v13 = vmul.f32 %v14033_v31, %v1903_v2  ;;  %v1967_v5 = vmul.f32 %v14030_v24, %v1903_v2 }
 0x4e0   :  { %v2031_v53 = vunpack.c.l.b16 %v1989_v52  ;;  %v2032_v9 = vunpack.c.h.b16 %v1989_v52  ;;  %v1990_v58 = vpack.c.bf16 %v1965_v49, %v1964_v37 }
 0x4e1   :  { %2060 = vperm.xlu1 %11798, %v2023_v26   ;;  %2063 = vperm.xlu0 %11797, %v2024_v54   ;;  %v1991_v41 = vpack.c.bf16 %v1967_v5, %v1966_v13 }
 0x4e2   :  { %v2033_v51 = vunpack.c.l.b16 %v1990_v58  ;;  %v2034_v14 = vunpack.c.h.b16 %v1990_v58 }
 0x4e3   :  { %v2035_v19 = vunpack.c.l.b16 %v1991_v41  ;;  %v2036_v3 = vunpack.c.h.b16 %v1991_v41 }
 0x4e5   :  { %2066 = vperm.xlu1 %11798, %v2025_v29   ;;  %2069 = vperm.xlu0 %11797, %v2026_v44  }
 0x4e6   :  { %v1867_v7 = vpop.xlane.xlu0 %1866 }
 0x4e7   :  { %12697 = vrcp.f32 %v1867_v7 }
 0x4e9   :  { %2072 = vperm.xlu1 %11798, %v2027_v35   ;;  %2075 = vperm.xlu0 %11797, %v2028_v63  }
 0x4ed   :  { %2078 = vperm.xlu1 %11798, %v2029_v50   ;;  %2081 = vperm.xlu0 %11797, %v2030_v43  }
 0x4f1   :  { %2084 = vperm.xlu1 %11798, %v2031_v53   ;;  %2087 = vperm.xlu0 %11797, %v2032_v9   ;;  %v15859_v9 = vld [vmem:[#allocation76_spill] sm:$0xff] }
 0x4f4   :  { %v12698_v56 = vpop.eup %12697 }
 0x4f5   :  { %2090 = vperm.xlu1 %11798, %v2033_v51   ;;  %2093 = vperm.xlu0 %11797, %v2034_v14   ;;  %v1907_v15 = vrot.slane %v12698_v56, %v13455_v10  ;;  %v1911_v8 = vrot.slane %v12698_v56, %v13458_v11  ;;  %v1915_v31 = vrot.slane %v12698_v56, %v13471_v22  ;;  %v15860_v14 = vmov 0.0  }
 0x4f6   :  { %v1919_v46 = vrot.slane %v12698_v56, %v13486_v32  ;;  %v1927_v38 = vrot.slane %v12698_v56, %v13500_v39  ;;  %v1931_v63 = vrot.slane %v12698_v56, %v13507_v42  ;;  %v1935_v49 = vrot.slane %v12698_v56, %v13514_v45  ;;  %11657 = vmatprep.mubr.msk.bf16.mxu0 %vm13259_vm9, %v15860_v14 }
 0x4f7   :  { %v1968_v24 = vmul.f32 %v14043_v48, %v1907_v15  ;;  %v1969_v23 = vmul.f32 %v14040_v40, %v1907_v15  ;;  %v1970_v26 = vmul.f32 %v14053_v21, %v1911_v8  ;;  %v1971_v54 = vmul.f32 %v14050_v25, %v1911_v8  ;;  %v11825_v15 = vld [vmem:[#allocation4 + $0xf0] ss:$8 sps:$4 sm:$0xff]   ;;  %v11828_v8 = vld [vmem:[#allocation4 + $0xe0] ss:$8 sps:$4 sm:$0xff]  }
 0x4f8   :  { %v1972_v18 = vmul.f32 %v14061_v60, %v1915_v31  ;;  %v1973_v55 = vmul.f32 %v14058_v47, %v1915_v31  ;;  %v1974_v40 = vmul.f32 %v14067_v30, %v1919_v46  ;;  %v1923_v48 = vrot.slane %v12698_v56, %v13493_v36  ;;  %v11823_v56 = vld [vmem:[#allocation4 + $0xf4] ss:$8 sps:$4 sm:$0xff]   ;;  %v11832_v31 = vld [vmem:[#allocation4 + $0xc4] ss:$8 sps:$4 sm:$0xff]  }
 0x4f9   :  { %2096 = vperm.xlu1 %11798, %v2035_v19   ;;  %2099 = vperm.xlu0 %11797, %v2036_v3   ;;  %v1992_v28 = vpack.c.bf16 %v1969_v23, %v1968_v24  ;;  %v1993_v44 = vpack.c.bf16 %v1971_v54, %v1970_v26  ;;  %v1975_v7 = vmul.f32 %v14065_v59, %v1919_v46  ;;  %v11829_v19 = vld [vmem:[#allocation4 + $0xd4] ss:$8 sps:$4 sm:$0xff]   ;;  %v11831_v3 = vld [vmem:[#allocation4 + $0xd0] ss:$8 sps:$4 sm:$0xff]   ;;  %v11834_v24 = vld [vmem:[#allocation4 + $0xc0] ss:$8 sps:$4 sm:$0xff]  }
 0x4fa   :  { %v1994_v17 = vpack.c.bf16 %v1973_v55, %v1972_v18  ;;  %v1976_v60 = vmul.f32 %v14073_v62, %v1923_v48  ;;  %v1977_v35 = vmul.f32 %v14071_v4, %v1923_v48  ;;  %v1978_v30 = vmul.f32 %v14079_v12, %v1927_v38  ;;  %2454 = vmatprep.subr.bf16.mxu1 %v11823_v56  ;;  %v11835_v23 = vld [vmem:[#allocation4 + $0xb4] ss:$8 sps:$4 sm:$0xff]   ;;  %v11837_v26 = vld [vmem:[#allocation4 + $0xb0] ss:$8 sps:$4 sm:$0xff]   ;;  %v11838_v54 = vld [vmem:[#allocation4 + $0xa4] ss:$8 sps:$4 sm:$0xff]  }
 0x4fb   :  { %v2038_v27 = vunpack.c.h.b16 %v1992_v28  ;;  %v2037_v29 = vunpack.c.l.b16 %v1992_v28  ;;  %v2040_v21 = vunpack.c.h.b16 %v1993_v44  ;;  %v2039_v25 = vunpack.c.l.b16 %v1993_v44  ;;  %2455 = vmatpush1.bf16.msra.mxu1 %v11825_v15 }
 0x4fc   :  { %v2042_v33 = vunpack.c.h.b16 %v1994_v17  ;;  %v2041_v34 = vunpack.c.l.b16 %v1994_v17  ;;  %v1995_v47 = vpack.c.bf16 %v1975_v7, %v1974_v40  ;;  %v1996_v59 = vpack.c.bf16 %v1977_v35, %v1976_v60 }
 0x4fd   :  { %2105 = vperm.xlu0 %11797, %v2038_v27   ;;  %2102 = vperm.xlu1 %11798, %v2037_v29   ;;  %v1979_v2 = vmul.f32 %v14077_v0, %v1927_v38  ;;  %v1980_v62 = vmul.f32 %v14085_v1, %v1931_v63  ;;  %v1981_v50 = vmul.f32 %v14083_v6, %v1931_v63 }
 0x4fe   :  { %v2044_v20 = vunpack.c.h.b16 %v1995_v47  ;;  %v2043_v52 = vunpack.c.l.b16 %v1995_v47  ;;  %v2046_v43 = vunpack.c.h.b16 %v1996_v59  ;;  %v2045_v37 = vunpack.c.l.b16 %v1996_v59 }
 0x4ff   :  { %v1997_v4 = vpack.c.bf16 %v1979_v2, %v1978_v30  ;;  %v1998_v12 = vpack.c.bf16 %v1981_v50, %v1980_v62  ;;  %v1982_v53 = vmul.f32 %v14091_v57, %v1935_v49  ;;  %v1983_v0 = vmul.f32 %v15859_v9, %v1935_v49  ;;  %v11826_v57 = vld [vmem:[#allocation4 + $0xe4] ss:$8 sps:$4 sm:$0xff]  }
 0x500   :  { %2456 = vmatprep.subr.bf16.mxu1 %v11826_v57 }
 0x501   :  { %2111 = vperm.xlu0 %11797, %v2040_v21   ;;  %2108 = vperm.xlu1 %11798, %v2039_v25   ;;  %v2048_v13 = vunpack.c.h.b16 %v1997_v4  ;;  %v2047_v5 = vunpack.c.l.b16 %v1997_v4  ;;  %v2050_v58 = vunpack.c.h.b16 %v1998_v12  ;;  %v2049_v1 = vunpack.c.l.b16 %v1998_v12 }
 0x502   :  { %v1999_v41 = vpack.c.bf16 %v1983_v0, %v1982_v53  ;;  %2457 = vmatpush1.bf16.msra.mxu1 %v11828_v8 }
 0x503   :  { %2458 = vmatprep.subr.bf16.mxu1 %v11829_v19 }
 0x504   :  { %v2052_v6 = vunpack.c.h.b16 %v1999_v41  ;;  %v2051_v51 = vunpack.c.l.b16 %v1999_v41 }
 0x505   :  { %2117 = vperm.xlu0 %11797, %v2042_v33   ;;  %2114 = vperm.xlu1 %11798, %v2041_v34  }
 0x506   :  { %2459 = vmatpush1.bf16.msra.mxu1 %v11831_v3 }
 0x507   :  { %2460 = vmatprep.subr.bf16.mxu1 %v11832_v31 }
 0x509   :  { %2123 = vperm.xlu0 %11797, %v2044_v20   ;;  %2120 = vperm.xlu1 %11798, %v2043_v52  }
 0x50a   :  { %2461 = vmatpush1.bf16.msra.mxu1 %v11834_v24 }
 0x50b   :  { %2462 = vmatprep.subr.bf16.mxu1 %v11835_v23 }
 0x50d   :  { %2129 = vperm.xlu0 %11797, %v2046_v43   ;;  %2126 = vperm.xlu1 %11798, %v2045_v37  }
 0x50e   :  { %2463 = vmatpush1.bf16.msra.mxu1 %v11837_v26 }
 0x50f   :  { %2464 = vmatprep.subr.bf16.mxu1 %v11838_v54 }
 0x511   :  { %2135 = vperm.xlu0 %11797, %v2048_v13   ;;  %2132 = vperm.xlu1 %11798, %v2047_v5  }
 0x515   :  { %2141 = vperm.xlu0 %11797, %v2050_v58   ;;  %2138 = vperm.xlu1 %11798, %v2049_v1  }
 0x519   :  { %2147 = vperm.xlu0 %11797, %v2052_v6   ;;  %2144 = vperm.xlu1 %11798, %v2051_v51  }
 0x558   :  { %v2058_v28 = vpop.permute.xlu1 %2057  ;;  %v2055_v18 = vpop.permute.xlu0 %2054 }
 0x559   :  { %v2156_v50 = vrot.slane %v2058_v28, %v13870_v61  ;;  %v2152_v43 = vrot.slane %v2055_v18, %v13867_v16 }
 0x55b   :  { %v2157_v58 = vsel %vm1229_vm0, %v2156_v50, %v2152_v43 }
 0x55c   :  { %v2061_v46 = vpop.permute.xlu1 %2060  ;;  %v2064_v27 = vpop.permute.xlu0 %2063 }
 0x55d   :  { %v2161_v52 = vrot.slane %v2061_v46, %v13867_v16  ;;  %v2165_v59 = vrot.slane %v2064_v27, %v13870_v61 }
 0x55f   :  { %v2166_v37 = vsel %vm1229_vm0, %v2165_v59, %v2161_v52 }
 0x560   :  { %v2067_v29 = vpop.permute.xlu1 %2066  ;;  %v2070_v44 = vpop.permute.xlu0 %2069  ;;  %v2293_v1 = vsel %vm1366_vm1, %v2166_v37, %v2157_v58 }
 0x561   :  { %v2170_v4 = vrot.slane %v2067_v29, %v13867_v16  ;;  %v2174_v49 = vrot.slane %v2070_v44, %v13870_v61 }
 0x563   :  { %v2175_v41 = vsel %vm1229_vm0, %v2174_v49, %v2170_v4 }
 0x564   :  { %v2073_v55 = vpop.permute.xlu1 %2072  ;;  %v2076_v40 = vpop.permute.xlu0 %2075 }
 0x565   :  { %v2179_v12 = vrot.slane %v2073_v55, %v13867_v16  ;;  %v2183_v13 = vrot.slane %v2076_v40, %v13870_v61 }
 0x567   :  { %v2184_v56 = vsel %vm1229_vm0, %v2183_v13, %v2179_v12 }
 0x568   :  { %v2079_v48 = vpop.permute.xlu1 %2078  ;;  %v2082_v21 = vpop.permute.xlu0 %2081 }
 0x569   :  { %v2188_v5 = vrot.slane %v2079_v48, %v13867_v16  ;;  %v2192_v53 = vrot.slane %v2082_v21, %v13870_v61 }
 0x56b   :  { %v2193_v15 = vsel %vm1229_vm0, %v2192_v53, %v2188_v5 }
 0x56c   :  { %v14209_v25 = vpop.permute.xlu1 %2084  ;;  %v14211_v17 = vpop.permute.xlu0 %2087 }
 0x56d   :  { %v2197_v54 = vrot.slane %v14209_v25, %v13867_v16  ;;  %v2201_v28 = vrot.slane %v14211_v17, %v13870_v61 }
 0x570   :  { %v14213_v7 = vpop.permute.xlu1 %2090  ;;  %v14215_v60 = vpop.permute.xlu0 %2093 }
 0x571   :  { %v2206_v27 = vrot.slane %v14213_v7, %v13867_v16  ;;  %v2210_v40 = vrot.slane %v14215_v60, %v13870_v61  ;;  %v2294_v60 = vsel %vm1368_vm2, %v2175_v41, %v2293_v1 }
 0x574   :  { %v14217_v38 = vpop.permute.xlu1 %2096  ;;  %v14219_v33 = vpop.permute.xlu0 %2099 }
 0x575   :  { %v2215_v48 = vrot.slane %v14217_v38, %v13867_v16  ;;  %v2219_v21 = vrot.slane %v14219_v33, %v13870_v61  ;;  %v2295_v33 = vsel %vm1370_vm3, %v2184_v56, %v2294_v60  ;;  %v11840_v56 = vld [vmem:[#allocation4 + $0xa0] ss:$8 sps:$4 sm:$0xff]  }
 0x576   :  { %2465 = vmatpush1.bf16.msra.mxu1 %v11840_v56 }
 0x577   :  { %v2220_v49 = vsel %vm1229_vm0, %v2219_v21, %v2215_v48 }
 0x578   :  { %v2103_v34 = vpop.permute.xlu1 %2102  ;;  %v2106_v47 = vpop.permute.xlu0 %2105 }
 0x579   :  { %v2224_v31 = vrot.slane %v2103_v34, %v13867_v16  ;;  %v2228_v24 = vrot.slane %v2106_v47, %v13870_v61 }
 0x57b   :  { %v2229_v7 = vsel %vm1229_vm0, %v2228_v24, %v2224_v31 }
 0x57c   :  { %v2109_v35 = vpop.permute.xlu1 %2108  ;;  %v2112_v30 = vpop.permute.xlu0 %2111 }
 0x57d   :  { %v2233_v6 = vrot.slane %v2109_v35, %v13867_v16  ;;  %v2237_v51 = vrot.slane %v2112_v30, %v13870_v61 }
 0x57f   :  { %v2238_v29 = vsel %vm1229_vm0, %v2237_v51, %v2233_v6 }
 0x580   :  { %v2115_v63 = vpop.permute.xlu1 %2114  ;;  %v2118_v20 = vpop.permute.xlu0 %2117 }
 0x581   :  { %v2242_v57 = vrot.slane %v2115_v63, %v13867_v16  ;;  %v2246_v8 = vrot.slane %v2118_v20, %v13870_v61  ;;  %v2300_v63 = vsel %vm1366_vm1, %v2238_v29, %v2229_v7  ;;  %v2202_v20 = vsel %vm1229_vm0, %v2201_v28, %v2197_v54  ;;  %v15861_v7 = vld [vmem:[#allocation43_spill] sm:$0xff] }
 0x583   :  { %v2247_v25 = vsel %vm1229_vm0, %v2246_v8, %v2242_v57  ;;  %v11843_v57 = vld [vmem:[#allocation4 + $0x90] ss:$8 sps:$4 sm:$0xff]   ;;  %v11844_v8 = vld [vmem:[#allocation4 + $0x84] ss:$8 sps:$4 sm:$0xff]  }
 0x584   :  { %v2121_v2 = vpop.permute.xlu1 %2120  ;;  %v2124_v62 = vpop.permute.xlu0 %2123  ;;  %v2301_v52 = vsel %vm1368_vm2, %v2247_v25, %v2300_v63 }
 0x585   :  { %v2251_v23 = vrot.slane %v2121_v2, %v13867_v16  ;;  %v2255_v26 = vrot.slane %v2124_v62, %v13870_v61  ;;  %v2296_v2 = vsel %vm1372_vm4, %v2193_v15, %v2295_v33  ;;  %v2211_v62 = vsel %vm1229_vm0, %v2210_v40, %v2206_v27  ;;  %v11841_v15 = vld [vmem:[#allocation4 + $0x94] ss:$8 sps:$4 sm:$0xff]  }
 0x586   :  { %v2297_v53 = vsel %vm1374_vm5, %v2202_v20, %v2296_v2  ;;  %2466 = vmatprep.subr.bf16.mxu1 %v11841_v15 }
 0x587   :  { %v2256_v47 = vsel %vm1229_vm0, %v2255_v26, %v2251_v23  ;;  %2467 = vmatpush1.bf16.msra.mxu1 %v11843_v57 }
 0x588   :  { %v2127_v9 = vpop.permute.xlu1 %2126  ;;  %v2130_v0 = vpop.permute.xlu0 %2129  ;;  %v2302_v50 = vsel %vm1370_vm3, %v2256_v47, %v2301_v52  ;;  %2468 = vmatprep.subr.bf16.mxu1 %v11844_v8 }
 0x589   :  { %v2260_v18 = vrot.slane %v2127_v9, %v13867_v16  ;;  %v2264_v46 = vrot.slane %v2130_v0, %v13870_v61  ;;  %v2298_v0 = vsel %vm1376_vm6, %v2211_v62, %v2297_v53 }
 0x58a   :  { %v2299_v41 = vsel %vm1378_vm7, %v2220_v49, %v2298_v0 }
 0x58b   :  { %v2265_v38 = vsel %vm1229_vm0, %v2264_v46, %v2260_v18 }
 0x58c   :  { %v2133_v19 = vpop.permute.xlu1 %2132  ;;  %v2136_v3 = vpop.permute.xlu0 %2135  ;;  %v2303_v12 = vsel %vm1372_vm4, %v2265_v38, %v2302_v50 }
 0x58d   :  { %v2269_v44 = vrot.slane %v2133_v19, %v13867_v16  ;;  %v2273_v55 = vrot.slane %v2136_v3, %v13870_v61  ;;  %v11846_v19 = vld [vmem:[#allocation4 + $0x80] ss:$8 sps:$4 sm:$0xff]  }
 0x58e   :  { %2469 = vmatpush1.bf16.msra.mxu1 %v11846_v19  ;;  %v12867_v3 = vld [vmem:[#allocation6] sm:$0xf] }
 0x58f   :  { %v2274_v59 = vsel %vm1229_vm0, %v2273_v55, %v2269_v44  ;;  %11693 = vmatprep.subr.bf16.mxu1 %v15860_v14  ;;  %v2004_v31 = vrot.slane %v12867_v3, %v13486_v32  ;;  %v2372_v44 = vld [vmem:[#allocation6 + $0x4] sm:$0xf] }
 0x590   :  { %v2139_v17 = vpop.permute.xlu1 %2138  ;;  %v2142_v34 = vpop.permute.xlu0 %2141  ;;  %v2304_v9 = vsel %vm1374_vm5, %v2274_v59, %v2303_v12  ;;  %v2506_v55 = vrot.slane %v2372_v44, %v13458_v11  ;;  %v2500_v48 = vrot.slane %v2372_v44, %v13455_v10  ;;  %v14322_v53 = vrot.slane %v2372_v44, %v13471_v22 }
 0x591   :  { %v2278_v35 = vrot.slane %v2139_v17, %v13867_v16  ;;  %v2282_v30 = vrot.slane %v2142_v34, %v13870_v61 }
 0x593   :  { %v2283_v43 = vsel %vm1229_vm0, %v2282_v30, %v2278_v35 }
 0x594   :  { %v2145_v37 = vpop.permute.xlu1 %2144  ;;  %v2148_v4 = vpop.permute.xlu0 %2147  ;;  %v2305_v58 = vsel %vm1376_vm6, %v2283_v43, %v2304_v9 }
 0x595   :  { %v2287_v13 = vrot.slane %v2145_v37, %v13867_v16  ;;  %v2291_v5 = vrot.slane %v2148_v4, %v13870_v61 }
 0x597   :  { %v2292_v1 = vsel %vm1229_vm0, %v2291_v5, %v2287_v13 }
 0x598   :  { %v2306_v6 = vsel %vm1378_vm7, %v2292_v1, %v2305_v58 }
 0x599   :  { %v2307_v51 = vpack.c.b16 %v2306_v6, %v2299_v41 }
 0x59b   :  { %11658 = vmatmul.mubr.msk.bf16.vlgmr.msra.gmra.mxu0 %vm1389_vm8, %v2307_v51 }
 0x59c   :  { %11663 = vmatprep.mubr.msk.bf16.mxu0 %vm13259_vm9, %v15860_v14 }
 0x65b   :  { %v2345_v24 = vpop.f32.mrf.mxu0 }
 0x65c   :  { %v2346_v26 = vadd.f32 %v2345_v24, %v2004_v31 }
 0x65d   :  { %v11659_v23 = vpop.f32.mrf.mxu0 }
 0x65e   :  { %v2352_v46 = vmax.f32 %v2346_v26, 0.0 }
 0x65f   :  { %v2348_v54 = vpop.f32.mrf.mxu0 }
 0x660   :  { %v2349_v28 = vadd.f32 %v2348_v54, %v2004_v31 }
 0x661   :  { %v11660_v18 = vpop.f32.mrf.mxu0 }
 0x662   :  { %v2353_v27 = vmax.f32 %v2349_v28, 0.0 }
 0x664   :  { %v2373_v29 = vpack.c.bf16 %v2353_v27, %v2352_v46 }
 0x666   :  { %2487 = vmatmul.mubr.bf16.vlgmr.msra.gmra.mxu1 %v2373_v29 }
 0x667   :  { %11709 = vmatprep.mubr.msk.bf16.mxu1 %vm13259_vm9, %v15860_v14 }
 0x726   :  { %v2488_v40 = vpop.f32.mrf.mxu1 }
 0x727   :  { %v14301_v30 = vadd.f32 %v2500_v48, %v2488_v40 }
 0x728   :  { %v2490_v21 = vpop.f32.mrf.mxu1 }
 0x729   :  { %v2507_v25 = vadd.f32 %v2506_v55, %v2490_v21 }
 0x72a   :  { %v2492_v17 = vpop.f32.mrf.mxu1 }
 0x72b   :  { %v2511_v34 = vcombine.high %v2507_v25, %v2507_v25  ;;  %v2518_v47 = vrot.slane %v2507_v25, %v15861_v7  ;;  %v14299_v35 = vadd.f32 %v2500_v48, %v2492_v17 }
 0x72c   :  { %v2494_v60 = vpop.f32.mrf.mxu1 }
 0x72d   :  { %v2534_v63 = vrot.slane %v2518_v47, %v15861_v7  ;;  %v14304_v38 = vadd.f32 %v2506_v55, %v2494_v60  ;;  %v3847_v33 = vpack.c.bf16 %v14299_v35, %v14301_v30  ;;  %v2525_v20 = vrot.slane %v2511_v34, %v15861_v7 }
 0x72e   :  { %v2526_v52 = vcombine.high %v2518_v47, %v2518_v47 }
 0x72f   :  { %v2556_v59 = vcombine.high %v2534_v63, %v2534_v63  ;;  %v2612_v2 = vrot.slane %v2534_v63, %v13455_v10  ;;  %v2567_v62 = vrot.slane %v14304_v38, %v15861_v7  ;;  %11662 = vmatpush3.bf16.msra.mxu0 %v3847_v33  ;;  %v2541_v37 = vrot.slane %v2525_v20, %v15861_v7 }
 0x730   :  { %11667 = vmatprep.subr.bf16.mxu0 %v15860_v14  ;;  %v2548_v4 = vrot.slane %v2526_v52, %v15861_v7  ;;  %v2527_v49 = vcombine.high %v2525_v20, %v2525_v20  ;;  %v2560_v25 = vcombine.high %v14304_v38, %v14304_v38 }
 0x731   :  { %v2620_v50 = vrot.slane %v2556_v59, %v13455_v10  ;;  %v2689_v43 = vadd.f32 %v2612_v2, %v14301_v30  ;;  %v14318_v12 = vrot.slane %v2567_v62, %v15861_v7  ;;  %v2690_v5 = vadd.f32 %v2612_v2, %v14299_v35 }
 0x732   :  { %v2616_v0 = vrot.slane %v2548_v4, %v13455_v10  ;;  %v2628_v58 = vrot.slane %v2541_v37, %v13455_v10  ;;  %v14330_v6 = vrot.slane %v2527_v49, %v15861_v7  ;;  %v2558_v51 = vcombine.high %v2548_v4, %v2548_v4 }
 0x733   :  { %vm2721_vm10 = vcmp.gt.f32.partialorder %v2689_v43, 0.0  ;;  %v2753_v13 = vmul.f32 0.2, %v2689_v43  ;;  %v2693_v9 = vadd.f32 %v2620_v50, %v14301_v30  ;;  %v2644_v1 = vrot.slane %v14318_v12, %v13455_v10 }
 0x734   :  { %v2557_v56 = vcombine.high %v2541_v37, %v2541_v37  ;;  %vm2722_vm11 = vcmp.gt.f32.partialorder %v2690_v5, 0.0  ;;  %v2754_v8 = vmul.f32 0.2, %v2690_v5  ;;  %v2691_v3 = vadd.f32 %v2616_v0, %v14301_v30 }
 0x735   :  { %v2785_v41 = vsel %vm2721_vm10, %v2689_v43, %v2753_v13  ;;  %v2705_v15 = vadd.f32 %v2644_v1, %v14301_v30  ;;  %vm2725_vm12 = vcmp.gt.f32.partialorder %v2693_v9, 0.0  ;;  %v2757_v19 = vmul.f32 0.2, %v2693_v9 }
 0x736   :  { %v2821_v57 = vmul.f32 %v14322_v53, %v2785_v41  ;;  %v2697_v31 = vadd.f32 %v2628_v58, %v14301_v30  ;;  %v2692_v24 = vadd.f32 %v2616_v0, %v14299_v35  ;;  %v2624_v23 = vrot.slane %v2558_v51, %v13455_v10 }
 0x737   :  { %v14340_v26 = vrot.slane %v14330_v6, %v13455_v10  ;;  %v2575_v54 = vcombine.high %v2567_v62, %v2567_v62  ;;  %v2786_v28 = vsel %vm2722_vm11, %v2690_v5, %v2754_v8  ;;  %v2789_v46 = vsel %vm2725_vm12, %v2693_v9, %v2757_v19 }
 0x738   :  { %2853 = vadd.xlane.f32.xlu1 %v2821_v57  ;;  %v2822_v18 = vmul.f32 %v14322_v53, %v2786_v28  ;;  %vm2723_vm13 = vcmp.gt.f32.partialorder %v2691_v3, 0.0  ;;  %v2755_v27 = vmul.f32 0.2, %v2691_v3  ;;  %v2825_v29 = vmul.f32 %v14322_v53, %v2789_v46 }
 0x739   :  { %vm2729_vm14 = vcmp.gt.f32.partialorder %v2697_v31, 0.0  ;;  %v2761_v44 = vmul.f32 0.2, %v2697_v31  ;;  %v2694_v55 = vadd.f32 %v2620_v50, %v14299_v35  ;;  %vm2724_vm15 = vcmp.gt.f32.partialorder %v2692_v24, 0.0 }
 0x73a   :  { %2855 = vadd.xlane.f32.xlu0 %v2822_v18  ;;  %v2787_v40 = vsel %vm2723_vm13, %v2691_v3, %v2755_v27  ;;  %v2756_v48 = vmul.f32 0.2, %v2692_v24  ;;  %v2769_v21 = vmul.f32 0.2, %v2705_v15  ;;  %vm2737_vm10 = vcmp.gt.f32.partialorder %v2705_v15, 0.0 }
 0x73b   :  { %v2793_v17 = vsel %vm2729_vm14, %v2697_v31, %v2761_v44  ;;  %v14348_v34 = vrot.slane %v2557_v56, %v13455_v10  ;;  %v14351_v47 = vrot.slane %v2575_v54, %v15861_v7  ;;  %v2823_v60 = vmul.f32 %v14322_v53, %v2787_v40 }
 0x73c   :  { %2861 = vadd.xlane.f32.xlu1 %v2825_v29  ;;  %v2829_v63 = vmul.f32 %v14322_v53, %v2793_v17  ;;  %v2788_v33 = vsel %vm2724_vm15, %v2692_v24, %v2756_v48  ;;  %v2758_v20 = vmul.f32 0.2, %v2694_v55  ;;  %v2698_v52 = vadd.f32 %v2628_v58, %v14299_v35 }
 0x73d   :  { %vm2726_vm11 = vcmp.gt.f32.partialorder %v2694_v55, 0.0  ;;  %v2801_v38 = vsel %vm2737_vm10, %v2705_v15, %v2769_v21  ;;  %v2695_v59 = vadd.f32 %v2624_v23, %v14301_v30  ;;  %v2699_v2 = vadd.f32 %v14340_v26, %v14301_v30 }
 0x73e   :  { %2857 = vadd.xlane.f32.xlu0 %v2823_v60  ;;  %v2574_v62 = vrot.slane %v2560_v25, %v15861_v7  ;;  %v2605_v50 = vcombine.high %v14318_v12, %v14318_v12  ;;  %v2648_v43 = vrot.slane %v14351_v47, %v13455_v10  ;;  %v2824_v37 = vmul.f32 %v14322_v53, %v2788_v33 }
 0x73f   :  { %vm2727_vm12 = vcmp.gt.f32.partialorder %v2695_v59, 0.0  ;;  %v2759_v4 = vmul.f32 0.2, %v2695_v59  ;;  %v2706_v49 = vadd.f32 %v2644_v1, %v14299_v35  ;;  %v2790_v13 = vsel %vm2726_vm11, %v2694_v55, %v2758_v20 }
 0x740   :  { %2869 = vadd.xlane.f32.xlu1 %v2829_v63  ;;  %v2837_v5 = vmul.f32 %v14322_v53, %v2801_v38  ;;  %v2762_v9 = vmul.f32 0.2, %v2698_v52  ;;  %vm2730_vm13 = vcmp.gt.f32.partialorder %v2698_v52, 0.0  ;;  %v2763_v58 = vmul.f32 0.2, %v2699_v2 }
 0x741   :  { %v2791_v0 = vsel %vm2727_vm12, %v2695_v59, %v2759_v4  ;;  %v2701_v12 = vadd.f32 %v14348_v34, %v14301_v30  ;;  %vm2731_vm14 = vcmp.gt.f32.partialorder %v2699_v2, 0.0  ;;  %v2590_v41 = vrot.slane %v2574_v62, %v15861_v7 }
 0x742   :  { %2859 = vadd.xlane.f32.xlu0 %v2824_v37  ;;  %v14371_v51 = vrot.slane %v2605_v50, %v13455_v10  ;;  %v2826_v1 = vmul.f32 %v14322_v53, %v2790_v13  ;;  %v2794_v56 = vsel %vm2730_vm13, %v2698_v52, %v2762_v9  ;;  %v2827_v15 = vmul.f32 %v14322_v53, %v2791_v0 }
 0x743   :  { %v2770_v57 = vmul.f32 0.2, %v2706_v49  ;;  %v2696_v8 = vadd.f32 %v2624_v23, %v14299_v35  ;;  %vm2738_vm15 = vcmp.gt.f32.partialorder %v2706_v49, 0.0  ;;  %v2795_v19 = vsel %vm2731_vm14, %v2699_v2, %v2763_v58 }
 0x744   :  { %2885 = vadd.xlane.f32.xlu1 %v2837_v5  ;;  %v2765_v3 = vmul.f32 0.2, %v2701_v12  ;;  %v2707_v31 = vadd.f32 %v2648_v43, %v14301_v30  ;;  %v2576_v24 = vcombine.high %v2574_v62, %v2574_v62  ;;  %vm2733_vm10 = vcmp.gt.f32.partialorder %v2701_v12, 0.0 }
 0x745   :  { %v2559_v54 = vcombine.high %v14330_v6, %v14330_v6  ;;  %v14380_v28 = vrot.slane %v2590_v41, %v13455_v10  ;;  %v2830_v18 = vmul.f32 %v14322_v53, %v2794_v56  ;;  %v2802_v46 = vsel %vm2738_vm15, %v2706_v49, %v2770_v57 }
 0x746   :  { %2863 = vadd.xlane.f32.xlu0 %v2826_v1  ;;  %v2831_v23 = vmul.f32 %v14322_v53, %v2795_v19  ;;  %v2760_v27 = vmul.f32 0.2, %v2696_v8  ;;  %v2700_v29 = vadd.f32 %v14340_v26, %v14299_v35  ;;  %vm2728_vm11 = vcmp.gt.f32.partialorder %v2696_v8, 0.0 }
 0x747   :  { %v2797_v44 = vsel %vm2733_vm10, %v2701_v12, %v2765_v3  ;;  %v2771_v55 = vmul.f32 0.2, %v2707_v31  ;;  %v2709_v40 = vadd.f32 %v14371_v51, %v14301_v30  ;;  %v2604_v6 = vrot.slane %v2576_v24, %v15861_v7 }
 0x748   :  { %2865 = vadd.xlane.f32.xlu1 %v2827_v15  ;;  %vm2739_vm12 = vcmp.gt.f32.partialorder %v2707_v31, 0.0  ;;  %v2606_v48 = vcombine.high %v2590_v41, %v2590_v41  ;;  %v2607_v21 = vcombine.high %v14351_v47, %v14351_v47  ;;  %v2838_v25 = vmul.f32 %v14322_v53, %v2802_v46 }
 0x749   :  { %v2702_v26 = vadd.f32 %v14348_v34, %v14299_v35  ;;  %v2792_v17 = vsel %vm2728_vm11, %v2696_v8, %v2760_v27  ;;  %v2833_v60 = vmul.f32 %v14322_v53, %v2797_v44  ;;  %vm2732_vm13 = vcmp.gt.f32.partialorder %v2700_v29, 0.0 }
 0x74a   :  { %2871 = vadd.xlane.f32.xlu0 %v2830_v18  ;;  %v2764_v63 = vmul.f32 0.2, %v2700_v29  ;;  %v2803_v33 = vsel %vm2739_vm12, %v2707_v31, %v2771_v55  ;;  %v2773_v20 = vmul.f32 0.2, %v2709_v40  ;;  %v2713_v52 = vadd.f32 %v14380_v28, %v14301_v30 }
 0x74b   :  { %v2640_v38 = vrot.slane %v2559_v54, %v13455_v10  ;;  %vm2741_vm14 = vcmp.gt.f32.partialorder %v2709_v40, 0.0  ;;  %v2708_v47 = vadd.f32 %v2648_v43, %v14299_v35  ;;  %v2608_v59 = vcombine.high %v2604_v6, %v2604_v6 }
 0x74c   :  { %2873 = vadd.xlane.f32.xlu1 %v2831_v23  ;;  %v2668_v34 = vrot.slane %v2606_v48, %v13455_v10  ;;  %v2828_v2 = vmul.f32 %v14322_v53, %v2792_v17  ;;  %v2766_v62 = vmul.f32 0.2, %v2702_v26  ;;  %v2656_v50 = vrot.slane %v2607_v21, %v13455_v10 }
 0x74d   :  { %v2796_v37 = vsel %vm2732_vm13, %v2700_v29, %v2764_v63  ;;  %v2839_v4 = vmul.f32 %v14322_v53, %v2803_v33  ;;  %vm2734_vm15 = vcmp.gt.f32.partialorder %v2702_v26, 0.0  ;;  %v2805_v49 = vsel %vm2741_vm14, %v2709_v40, %v2773_v20 }
 0x74e   :  { %2887 = vadd.xlane.f32.xlu0 %v2838_v25  ;;  %v2777_v13 = vmul.f32 0.2, %v2713_v52  ;;  %v2703_v5 = vadd.f32 %v2640_v38, %v14301_v30  ;;  %v14405_v9 = vrot.slane %v2604_v6, %v13455_v10  ;;  %v2772_v43 = vmul.f32 0.2, %v2708_v47 }
 0x74f   :  { %vm2745_vm10 = vcmp.gt.f32.partialorder %v2713_v52, 0.0  ;;  %v2832_v0 = vmul.f32 %v14322_v53, %v2796_v37  ;;  %v2798_v58 = vsel %vm2734_vm15, %v2702_v26, %v2766_v62  ;;  %vm2740_vm11 = vcmp.gt.f32.partialorder %v2708_v47, 0.0 }
 0x750   :  { %2877 = vadd.xlane.f32.xlu1 %v2833_v60  ;;  %v2710_v12 = vadd.f32 %v14371_v51, %v14299_v35  ;;  %v2841_v41 = vmul.f32 %v14322_v53, %v2805_v49  ;;  %v2711_v1 = vadd.f32 %v2656_v50, %v14301_v30  ;;  %v2672_v56 = vrot.slane %v2608_v59, %v13455_v10 }
 0x751   :  { %v2718_v15 = vadd.f32 %v2668_v34, %v14299_v35  ;;  %v2809_v57 = vsel %vm2745_vm10, %v2713_v52, %v2777_v13  ;;  %v2767_v8 = vmul.f32 0.2, %v2703_v5  ;;  %v2834_v19 = vmul.f32 %v14322_v53, %v2798_v58 }
 0x752   :  { %2867 = vadd.xlane.f32.xlu0 %v2828_v2  ;;  %v2804_v3 = vsel %vm2740_vm11, %v2708_v47, %v2772_v43  ;;  %vm2735_vm12 = vcmp.gt.f32.partialorder %v2703_v5, 0.0  ;;  %vm2742_vm14 = vcmp.gt.f32.partialorder %v2710_v12, 0.0  ;;  %v2774_v31 = vmul.f32 0.2, %v2710_v12 }
 0x753   :  { %vm2750_vm13 = vcmp.gt.f32.partialorder %v2718_v15, 0.0  ;;  %v2782_v51 = vmul.f32 0.2, %v2718_v15  ;;  %v2720_v24 = vadd.f32 %v2672_v56, %v14299_v35  ;;  %v2845_v54 = vmul.f32 %v14322_v53, %v2809_v57 }
 0x754   :  { %2889 = vadd.xlane.f32.xlu1 %v2839_v4  ;;  %v2714_v18 = vadd.f32 %v14380_v28, %v14299_v35  ;;  %v2775_v46 = vmul.f32 0.2, %v2711_v1  ;;  %v2715_v23 = vadd.f32 %v14405_v9, %v14301_v30  ;;  %v2799_v27 = vsel %vm2735_vm12, %v2703_v5, %v2767_v8 }
 0x755   :  { %v2814_v29 = vsel %vm2750_vm13, %v2718_v15, %v2782_v51  ;;  %vm2752_vm15 = vcmp.gt.f32.partialorder %v2720_v24, 0.0  ;;  %v2784_v44 = vmul.f32 0.2, %v2720_v24  ;;  %vm2743_vm10 = vcmp.gt.f32.partialorder %v2711_v1, 0.0  ;;  %v15862_v15 = vld [vmem:[#allocation46_spill] sm:$0xff] }
 0x756   :  { %2875 = vadd.xlane.f32.xlu0 %v2832_v0  ;;  %v2850_v55 = vmul.f32 %v14322_v53, %v2814_v29  ;;  %v2840_v40 = vmul.f32 %v14322_v53, %v2804_v3  ;;  %v2806_v6 = vsel %vm2742_vm14, %v2710_v12, %v2774_v31  ;;  %v2835_v28 = vmul.f32 %v14322_v53, %v2799_v27 }
 0x757   :  { %v2816_v48 = vsel %vm2752_vm15, %v2720_v24, %v2784_v44  ;;  %v2778_v21 = vmul.f32 0.2, %v2714_v18  ;;  %v2704_v25 = vadd.f32 %v2640_v38, %v14299_v35  ;;  %vm2746_vm11 = vcmp.gt.f32.partialorder %v2714_v18, 0.0  ;;  %v15864_v24 = vld [vmem:[#allocation45_spill] sm:$0xff]  ;;  %v15866_v44 = vld [vmem:[#allocation52_spill] sm:$0xff] }
 0x758   :  { %2893 = vadd.xlane.f32.xlu1 %v2841_v41  ;;  %v2852_v26 = vmul.f32 %v14322_v53, %v2816_v48  ;;  %v2807_v17 = vsel %vm2743_vm10, %v2711_v1, %v2775_v46  ;;  %v2779_v60 = vmul.f32 0.2, %v2715_v23  ;;  %v2717_v63 = vadd.f32 %v2668_v34, %v14301_v30  ;;  %v15865_v46 = vld [vmem:[#allocation47_spill] sm:$0xff] }
 0x759   :  { %vm2747_vm12 = vcmp.gt.f32.partialorder %v2715_v23, 0.0  ;;  %v2842_v33 = vmul.f32 %v14322_v53, %v2806_v6  ;;  %v2810_v20 = vsel %vm2746_vm11, %v2714_v18, %v2778_v21  ;;  %v2843_v52 = vmul.f32 %v14322_v53, %v2807_v17  ;;  %v15868_v21 = vld [vmem:[#allocation60_spill] sm:$0xff] }
 0x75a   :  { %2879 = vadd.xlane.f32.xlu0 %v2834_v19  ;;  %v2768_v47 = vmul.f32 0.2, %v2704_v25  ;;  %v2712_v59 = vadd.f32 %v2656_v50, %v14299_v35  ;;  %vm2736_vm13 = vcmp.gt.f32.partialorder %v2704_v25, 0.0  ;;  %v2811_v38 = vsel %vm2747_vm12, %v2715_v23, %v2779_v60  ;;  %v15863_v19 = vld [vmem:[#allocation44_spill] sm:$0xff] }
 0x75b   :  { %v2781_v2 = vmul.f32 0.2, %v2717_v63  ;;  %v2719_v62 = vadd.f32 %v2672_v56, %v14301_v30  ;;  %vm2749_vm14 = vcmp.gt.f32.partialorder %v2717_v63, 0.0  ;;  %v2846_v34 = vmul.f32 %v14322_v53, %v2810_v20 }
 0x75c   :  { %2901 = vadd.xlane.f32.xlu1 %v2845_v54  ;;  %v2800_v37 = vsel %vm2736_vm13, %v2704_v25, %v2768_v47  ;;  %v2847_v4 = vmul.f32 %v14322_v53, %v2811_v38  ;;  %v2776_v49 = vmul.f32 0.2, %v2712_v59  ;;  %v2716_v13 = vadd.f32 %v14405_v9, %v14299_v35 }
 0x75d   :  { %vm2744_vm15 = vcmp.gt.f32.partialorder %v2712_v59, 0.0  ;;  %v2813_v50 = vsel %vm2749_vm14, %v2717_v63, %v2781_v2  ;;  %v2783_v5 = vmul.f32 0.2, %v2719_v62  ;;  %vm2751_vm10 = vcmp.gt.f32.partialorder %v2719_v62, 0.0  ;;  %v15872_v2 = vld [vmem:[#allocation56_spill] sm:$0xff] }
 0x75e   :  { %2891 = vadd.xlane.f32.xlu0 %v2840_v40  ;;  %v2836_v43 = vmul.f32 %v14322_v53, %v2800_v37  ;;  %v2808_v30 = vsel %vm2744_vm15, %v2712_v59, %v2776_v49  ;;  %v2849_v0 = vmul.f32 %v14322_v53, %v2813_v50  ;;  %v2780_v58 = vmul.f32 0.2, %v2716_v13  ;;  %v15867_v40 = vld [vmem:[#allocation53_spill] sm:$0xff] }
 0x75f   :  { %vm2748_vm11 = vcmp.gt.f32.partialorder %v2716_v13, 0.0  ;;  %v2815_v12 = vsel %vm2751_vm10, %v2719_v62, %v2783_v5  ;;  %v2844_v41 = vmul.f32 %v14322_v53, %v2808_v30  ;;  %v15875_v5 = vld [vmem:[#allocation65_spill] sm:$0xff] }
 0x760   :  { %2881 = vadd.xlane.f32.xlu1 %v2835_v28  ;;  %v2812_v1 = vsel %vm2748_vm11, %v2716_v13, %v2780_v58  ;;  %v2851_v35 = vmul.f32 %v14322_v53, %v2815_v12  ;;  %v15874_v13 = vld [vmem:[#allocation64_spill] sm:$0xff] }
 0x761   :  { %v2848_v9 = vmul.f32 %v14322_v53, %v2812_v1  ;;  %v15876_v58 = vld [vmem:[#allocation68_spill] sm:$0xff] }
 0x762   :  { %2895 = vadd.xlane.f32.xlu0 %v2842_v33  ;;  %v15870_v33 = vld [vmem:[#allocation48_spill] sm:$0xff] }
 0x764   :  { %2897 = vadd.xlane.f32.xlu1 %v2843_v52  ;;  %v15871_v52 = vld [vmem:[#allocation49_spill] sm:$0xff] }
 0x766   :  { %2903 = vadd.xlane.f32.xlu0 %v2846_v34  ;;  %v15873_v34 = vld [vmem:[#allocation57_spill] sm:$0xff] }
 0x768   :  { %2905 = vadd.xlane.f32.xlu1 %v2847_v4 }
 0x76a   :  { %2883 = vadd.xlane.f32.xlu0 %v2836_v43 }
 0x76c   :  { %2909 = vadd.xlane.f32.xlu1 %v2849_v0 }
 0x76e   :  { %2899 = vadd.xlane.f32.xlu0 %v2844_v41  ;;  %v15877_v41 = vld [vmem:[#allocation69_spill] sm:$0xff] }
 0x770   :  { %2913 = vadd.xlane.f32.xlu1 %v2851_v35 }
 0x772   :  { %2907 = vadd.xlane.f32.xlu0 %v2848_v9 }
 0x776   :  { %2911 = vadd.xlane.f32.xlu0 %v2850_v55 }
 0x77a   :  { %2915 = vadd.xlane.f32.xlu0 %v2852_v26  ;;  %v15869_v26 = vld [vmem:[#allocation61_spill] sm:$0xff] }
 0x7c1   :  { %v2854_v56 = vpop.xlane.xlu1 %2853 }
 0x7c2   :  { %v14442_v57 = vadd.f32 %v2854_v56, %v15862_v15  ;;  %v15878_v56 = vld [vmem:[#allocation50_spill] sm:$0xff] }
 0x7c3   :  { %v2856_v8 = vpop.xlane.xlu0 %2855 }
 0x7c4   :  { %2982 = vperm.xlu1 %11798, %v14442_v57   ;;  %v14446_v3 = vadd.f32 %v2856_v8, %v15863_v19  ;;  %v15879_v8 = vld [vmem:[#allocation51_spill] sm:$0xff] }
 0x7c5   :  { %v2862_v31 = vpop.xlane.xlu1 %2861 }
 0x7c6   :  { %2985 = vperm.xlu0 %11797, %v14446_v3   ;;  %v14458_v55 = vadd.f32 %v2862_v31, %v15866_v44  ;;  %v15882_v44 = vld [vmem:[#allocation62_spill] sm:$0xff] }
 0x7c7   :  { %v2858_v51 = vpop.xlane.xlu0 %2857 }
 0x7c8   :  { %v14450_v54 = vadd.f32 %v2858_v51, %v15864_v24  ;;  %v15880_v24 = vld [vmem:[#allocation54_spill] sm:$0xff] }
 0x7c9   :  { %v2870_v53 = vpop.xlane.xlu1 %2869 }
 0x7ca   :  { %2988 = vperm.xlu1 %11798, %v14450_v54   ;;  %v14466_v25 = vadd.f32 %v2870_v53, %v15868_v21 }
 0x7cb   :  { %v2860_v18 = vpop.xlane.xlu0 %2859 }
 0x7cc   :  { %v14454_v23 = vadd.f32 %v2860_v18, %v15865_v46  ;;  %v15881_v18 = vld [vmem:[#allocation55_spill] sm:$0xff] }
 0x7cd   :  { %v2886_v27 = vpop.xlane.xlu1 %2885 }
 0x7ce   :  { %2991 = vperm.xlu1 %11798, %v14454_v23   ;;  %v14474_v20 = vadd.f32 %v2886_v27, %v15870_v33 }
 0x7cf   :  { %v2864_v29 = vpop.xlane.xlu0 %2863 }
 0x7d0   :  { %v14461_v6 = vadd.f32 %v2864_v29, %v15867_v40 }
 0x7d1   :  { %v2866_v48 = vpop.xlane.xlu1 %2865 }
 0x7d2   :  { %2997 = vperm.xlu0 %11797, %v14461_v6   ;;  %2994 = vperm.xlu1 %11798, %v14458_v55   ;;  %v14482_v62 = vadd.f32 %v2866_v48, %v15872_v2  ;;  %v15884_v48 = vld [vmem:[#allocation63_spill] sm:$0xff] }
 0x7d3   :  { %v2872_v28 = vpop.xlane.xlu0 %2871 }
 0x7d4   :  { %v14469_v17 = vadd.f32 %v2872_v28, %v15869_v26  ;;  %v15886_v26 = vld [vmem:[#allocation72_spill] sm:$0xff] }
 0x7d5   :  { %v2874_v60 = vpop.xlane.xlu1 %2873 }
 0x7d6   :  { %3009 = vperm.xlu0 %11797, %v14469_v17   ;;  %3006 = vperm.xlu1 %11798, %v14466_v25   ;;  %v14490_v50 = vadd.f32 %v2874_v60, %v15874_v13 }
 0x7d7   :  { %v2888_v63 = vpop.xlane.xlu0 %2887 }
 0x7d8   :  { %v14477_v47 = vadd.f32 %v2888_v63, %v15871_v52  ;;  %v15887_v63 = vld [vmem:[#allocation73_spill] sm:$0xff] }
 0x7d9   :  { %v2878_v59 = vpop.xlane.xlu1 %2877 }
 0x7da   :  { %3033 = vperm.xlu0 %11797, %v14477_v47   ;;  %3030 = vperm.xlu1 %11798, %v14474_v20   ;;  %v14498_v12 = vadd.f32 %v2878_v59, %v15876_v58 }
 0x7db   :  { %v2868_v38 = vpop.xlane.xlu0 %2867 }
 0x7dc   :  { %v14485_v37 = vadd.f32 %v2868_v38, %v15873_v34  ;;  %v15888_v38 = vld [vmem:[#allocation58_spill] sm:$0xff]  ;;  %v15889_v34 = vld [vmem:[#allocation59_spill] sm:$0xff] }
 0x7dd   :  { %v2890_v4 = vpop.xlane.xlu1 %2889 }
 0x7de   :  { %3003 = vperm.xlu0 %11797, %v14485_v37   ;;  %3000 = vperm.xlu1 %11798, %v14482_v62   ;;  %v14506_v15 = vadd.f32 %v2890_v4, %v15878_v56  ;;  %v15896_v56 = vld [vmem:[#allocation71_spill] sm:$0xff] }
 0x7df   :  { %v2876_v49 = vpop.xlane.xlu0 %2875 }
 0x7e0   :  { %v14493_v43 = vadd.f32 %v2876_v49, %v15875_v5  ;;  %v15890_v5 = vld [vmem:[#allocation66_spill] sm:$0xff] }
 0x7e1   :  { %v2894_v30 = vpop.xlane.xlu1 %2893 }
 0x7e2   :  { %3015 = vperm.xlu0 %11797, %v14493_v43   ;;  %3012 = vperm.xlu1 %11798, %v14490_v50   ;;  %v14514_v53 = vadd.f32 %v2894_v30, %v15880_v24  ;;  %v15898_v24 = vld [vmem:[#allocation74_spill] sm:$0xff] }
 0x7e3   :  { %v2880_v0 = vpop.xlane.xlu0 %2879 }
 0x7e4   :  { %v14501_v1 = vadd.f32 %v2880_v0, %v15877_v41  ;;  %v15892_v0 = vld [vmem:[#allocation67_spill] sm:$0xff] }
 0x7e5   :  { %v2902_v35 = vpop.xlane.xlu1 %2901 }
 0x7e6   :  { %3021 = vperm.xlu0 %11797, %v14501_v1   ;;  %3018 = vperm.xlu1 %11798, %v14498_v12   ;;  %v14522_v40 = vadd.f32 %v2902_v35, %v15882_v44  ;;  %v15894_v35 = vld [vmem:[#allocation70_spill] sm:$0xff] }
 0x7e7   :  { %v2892_v9 = vpop.xlane.xlu0 %2891 }
 0x7e8   :  { %v14509_v19 = vadd.f32 %v2892_v9, %v15879_v8  ;;  %15883 = vst [vmem:[#allocation77_spill] sm:$0xff] %v14522_v40 }
 0x7e9   :  { %v2882_v31 = vpop.xlane.xlu1 %2881 }
 0x7ea   :  { %3039 = vperm.xlu0 %11797, %v14509_v19   ;;  %3036 = vperm.xlu1 %11798, %v14506_v15   ;;  %v14530_v60 = vadd.f32 %v2882_v31, %v15886_v26 }
 0x7eb   :  { %v2896_v51 = vpop.xlane.xlu0 %2895 }
 0x7ec   :  { %v14517_v46 = vadd.f32 %v2896_v51, %v15881_v18 }
 0x7ed   :  { %v2898_v29 = vpop.xlane.xlu1 %2897 }
 0x7ee   :  { %3045 = vperm.xlu0 %11797, %v14517_v46   ;;  %3042 = vperm.xlu1 %11798, %v14514_v53   ;;  %v14538_v2 = vadd.f32 %v2898_v29, %v15888_v38 }
 0x7ef   :  { %v2904_v27 = vpop.xlane.xlu0 %2903 }
 0x7f0   :  { %v14525_v28 = vadd.f32 %v2904_v27, %v15884_v48  ;;  %v15900_v27 = vld [vmem:[#allocation75_spill] sm:$0xff] }
 0x7f1   :  { %v2906_v52 = vpop.xlane.xlu1 %2905 }
 0x7f2   :  { %15885 = vst [vmem:[#allocation78_spill] sm:$0xff] %v14525_v28  ;;  %3057 = vperm.xlu0 %11797, %v14525_v28   ;;  %3054 = vperm.xlu1 %11798, %v14522_v40   ;;  %v14546_v30 = vadd.f32 %v2906_v52, %v15890_v5 }
 0x7f3   :  { %v2884_v21 = vpop.xlane.xlu0 %2883 }
 0x7f4   :  { %v14533_v33 = vadd.f32 %v2884_v21, %v15887_v63  ;;  %15891 = vst [vmem:[#allocation79_spill] sm:$0xff] %v14546_v30 }
 0x7f5   :  { %v2910_v49 = vpop.xlane.xlu1 %2909 }
 0x7f6   :  { %3027 = vperm.xlu0 %11797, %v14533_v33   ;;  %3024 = vperm.xlu1 %11798, %v14530_v60   ;;  %v14554_v9 = vadd.f32 %v2910_v49, %v15894_v35 }
 0x7f7   :  { %v2900_v59 = vpop.xlane.xlu0 %2899 }
 0x7f8   :  { %v14541_v4 = vadd.f32 %v2900_v59, %v15889_v34  ;;  %15895 = vst [vmem:[#allocation81_spill] sm:$0xff] %v14554_v9 }
 0x7f9   :  { %v2914_v31 = vpop.xlane.xlu1 %2913 }
 0x7fa   :  { %3051 = vperm.xlu0 %11797, %v14541_v4   ;;  %3048 = vperm.xlu1 %11798, %v14538_v2   ;;  %v14562_v18 = vadd.f32 %v2914_v31, %v15898_v24 }
 0x7fb   :  { %v2908_v13 = vpop.xlane.xlu0 %2907 }
 0x7fc   :  { %v14549_v58 = vadd.f32 %v2908_v13, %v15892_v0  ;;  %15899 = vst [vmem:[#allocation83_spill] sm:$0xff] %v14562_v18 }
 0x7fe   :  { %15893 = vst [vmem:[#allocation80_spill] sm:$0xff] %v14549_v58  ;;  %3063 = vperm.xlu0 %11797, %v14549_v58   ;;  %3060 = vperm.xlu1 %11798, %v14546_v30  }
 0x7ff   :  { %v2912_v41 = vpop.xlane.xlu0 %2911 }
 0x800   :  { %v14557_v8 = vadd.f32 %v2912_v41, %v15896_v56 }
 0x802   :  { %15897 = vst [vmem:[#allocation82_spill] sm:$0xff] %v14557_v8  ;;  %3069 = vperm.xlu0 %11797, %v14557_v8   ;;  %3066 = vperm.xlu1 %11798, %v14554_v9  }
 0x803   :  { %v2916_v51 = vpop.xlane.xlu0 %2915 }
 0x804   :  { %v14565_v29 = vadd.f32 %v2916_v51, %v15900_v27 }
 0x806   :  { %15901 = vst [vmem:[#allocation76_spill] sm:$0xff] %v14565_v29  ;;  %3075 = vperm.xlu0 %11797, %v14565_v29   ;;  %3072 = vperm.xlu1 %11798, %v14562_v18  }
 0x83f   :  { %v2983_v44 = vpop.permute.xlu1 %2982 }
 0x840   :  { %v3080_v27 = vrot.slane %v2983_v44, %v13867_v16 }
 0x841   :  { %v2986_v21 = vpop.permute.xlu0 %2985 }
 0x842   :  { %v3084_v7 = vrot.slane %v2986_v21, %v13870_v61 }
 0x844   :  { %v3085_v40 = vsel %vm1229_vm0, %v3084_v7, %v3080_v27 }
 0x845   :  { %v2989_v48 = vpop.permute.xlu1 %2988 }
 0x846   :  { %v3089_v14 = vrot.slane %v2989_v48, %v13867_v16 }
 0x849   :  { %v2992_v26 = vpop.permute.xlu1 %2991 }
 0x84a   :  { %v3093_v31 = vrot.slane %v2992_v26, %v13870_v61 }
 0x84c   :  { %v3094_v30 = vsel %vm1229_vm0, %v3093_v31, %v3089_v14 }
 0x84d   :  { %v2998_v63 = vpop.permute.xlu0 %2997  ;;  %v2995_v52 = vpop.permute.xlu1 %2994  ;;  %v3221_v21 = vsel %vm1366_vm1, %v3094_v30, %v3085_v40 }
 0x84e   :  { %v3102_v18 = vrot.slane %v2998_v63, %v13870_v61  ;;  %v3098_v29 = vrot.slane %v2995_v52, %v13867_v16 }
 0x850   :  { %v3103_v44 = vsel %vm1229_vm0, %v3102_v18, %v3098_v29 }
 0x851   :  { %v3010_v59 = vpop.permute.xlu0 %3009  ;;  %v3007_v38 = vpop.permute.xlu1 %3006  ;;  %v3222_v18 = vsel %vm1368_vm2, %v3103_v44, %v3221_v21 }
 0x855   :  { %v14569_v34 = vpop.permute.xlu0 %3033  ;;  %v14571_v49 = vpop.permute.xlu1 %3030 }
 0x859   :  { %v3004_v13 = vpop.permute.xlu0 %3003  ;;  %v3001_v5 = vpop.permute.xlu1 %3000 }
 0x85a   :  { %v3111_v9 = vrot.slane %v3004_v13, %v13870_v61  ;;  %v3107_v8 = vrot.slane %v3001_v5, %v13867_v16  ;;  %v3120_v13 = vrot.slane %v3010_v59, %v13870_v61  ;;  %v3116_v5 = vrot.slane %v3007_v38, %v13867_v16 }
 0x85c   :  { %v3112_v48 = vsel %vm1229_vm0, %v3111_v9, %v3107_v8  ;;  %v3121_v9 = vsel %vm1229_vm0, %v3120_v13, %v3116_v5 }
 0x85d   :  { %v3016_v0 = vpop.permute.xlu0 %3015  ;;  %v3013_v41 = vpop.permute.xlu1 %3012  ;;  %v3223_v40 = vsel %vm1370_vm3, %v3112_v48, %v3222_v18  ;;  %v3152_v18 = vrot.slane %v14571_v49, %v13867_v16 }
 0x85e   :  { %v3129_v63 = vrot.slane %v3016_v0, %v13870_v61  ;;  %v3125_v52 = vrot.slane %v3013_v41, %v13867_v16  ;;  %v3224_v41 = vsel %vm1372_vm4, %v3121_v9, %v3223_v40 }
 0x860   :  { %v3130_v30 = vsel %vm1229_vm0, %v3129_v63, %v3125_v52 }
 0x861   :  { %v3022_v35 = vpop.permute.xlu0 %3021  ;;  %v3019_v56 = vpop.permute.xlu1 %3018 }
 0x862   :  { %v3138_v14 = vrot.slane %v3022_v35, %v13870_v61  ;;  %v3134_v31 = vrot.slane %v3019_v56, %v13867_v16  ;;  %v3225_v35 = vsel %vm1374_vm5, %v3130_v30, %v3224_v41 }
 0x864   :  { %v3139_v8 = vsel %vm1229_vm0, %v3138_v14, %v3134_v31  ;;  %v3156_v31 = vrot.slane %v14569_v34, %v13870_v61 }
 0x865   :  { %v3040_v51 = vpop.permute.xlu0 %3039  ;;  %v3037_v24 = vpop.permute.xlu1 %3036  ;;  %v3226_v27 = vsel %vm1376_vm6, %v3139_v8, %v3225_v35 }
 0x866   :  { %v3165_v63 = vrot.slane %v3040_v51, %v13870_v61  ;;  %v3161_v52 = vrot.slane %v3037_v24, %v13867_v16 }
 0x868   :  { %v3166_v24 = vsel %vm1229_vm0, %v3165_v63, %v3161_v52 }
 0x869   :  { %v3046_v58 = vpop.permute.xlu0 %3045  ;;  %v3043_v26 = vpop.permute.xlu1 %3042 }
 0x86a   :  { %v3174_v5 = vrot.slane %v3046_v58, %v13870_v61  ;;  %v3170_v14 = vrot.slane %v3043_v26, %v13867_v16  ;;  %v3157_v58 = vsel %vm1229_vm0, %v3156_v31, %v3152_v18 }
 0x86b   :  { %v3228_v49 = vsel %vm1366_vm1, %v3166_v24, %v3157_v58 }
 0x86c   :  { %v3175_v8 = vsel %vm1229_vm0, %v3174_v5, %v3170_v14 }
 0x86d   :  { %v3058_v28 = vpop.permute.xlu0 %3057  ;;  %v3055_v7 = vpop.permute.xlu1 %3054  ;;  %v3229_v35 = vsel %vm1368_vm2, %v3175_v8, %v3228_v49 }
 0x871   :  { %v3028_v29 = vpop.permute.xlu0 %3027  ;;  %v3025_v59 = vpop.permute.xlu1 %3024 }
 0x872   :  { %v3147_v38 = vrot.slane %v3028_v29, %v13870_v61  ;;  %v3143_v0 = vrot.slane %v3025_v59, %v13867_v16  ;;  %v3192_v59 = vrot.slane %v3058_v28, %v13870_v61 }
 0x874   :  { %v3148_v56 = vsel %vm1229_vm0, %v3147_v38, %v3143_v0  ;;  %v3188_v38 = vrot.slane %v3055_v7, %v13867_v16 }
 0x875   :  { %v3052_v44 = vpop.permute.xlu0 %3051  ;;  %v3049_v21 = vpop.permute.xlu1 %3048  ;;  %v3227_v48 = vsel %vm1378_vm7, %v3148_v56, %v3226_v27 }
 0x876   :  { %v3237_v13 = vsel %vm1389_vm8, %v3227_v48, -inf  ;;  %v3183_v40 = vrot.slane %v3052_v44, %v13870_v61  ;;  %v3179_v30 = vrot.slane %v3049_v21, %v13867_v16  ;;  %v3193_v48 = vsel %vm1229_vm0, %v3192_v59, %v3188_v38 }
 0x877   :  { %3238 = vmax.xlane.f32.xlu1 %v3237_v13 }
 0x878   :  { %v3184_v26 = vsel %vm1229_vm0, %v3183_v40, %v3179_v30 }
 0x879   :  { %v3064_v51 = vpop.permute.xlu0 %3063  ;;  %v3061_v9 = vpop.permute.xlu1 %3060  ;;  %v3230_v44 = vsel %vm1370_vm3, %v3184_v26, %v3229_v35 }
 0x87a   :  { %v3201_v29 = vrot.slane %v3064_v51, %v13870_v61  ;;  %v3197_v34 = vrot.slane %v3061_v9, %v13867_v16  ;;  %v3231_v5 = vsel %vm1372_vm4, %v3193_v48, %v3230_v44 }
 0x87c   :  { %v3202_v21 = vsel %vm1229_vm0, %v3201_v29, %v3197_v34 }
 0x87d   :  { %v3070_v0 = vpop.permute.xlu0 %3069  ;;  %v3067_v41 = vpop.permute.xlu1 %3066  ;;  %v3232_v14 = vsel %vm1374_vm5, %v3202_v21, %v3231_v5 }
 0x87e   :  { %v3210_v56 = vrot.slane %v3070_v0, %v13870_v61  ;;  %v3206_v27 = vrot.slane %v3067_v41, %v13867_v16 }
 0x880   :  { %v3211_v63 = vsel %vm1229_vm0, %v3210_v56, %v3206_v27 }
 0x881   :  { %v3076_v52 = vpop.permute.xlu0 %3075  ;;  %v3073_v28 = vpop.permute.xlu1 %3072  ;;  %v3233_v18 = vsel %vm1376_vm6, %v3211_v63, %v3232_v14 }
 0x882   :  { %v3219_v7 = vrot.slane %v3076_v52, %v13870_v61  ;;  %v3215_v13 = vrot.slane %v3073_v28, %v13867_v16 }
 0x884   :  { %v3220_v31 = vsel %vm1229_vm0, %v3219_v7, %v3215_v13 }
 0x885   :  { %v3234_v40 = vsel %vm1378_vm7, %v3220_v31, %v3233_v18 }
 0x886   :  { %v3240_v30 = vsel %vm1389_vm8, %v3234_v40, -inf }
 0x887   :  { %3241 = vmax.xlane.f32.xlu0 %v3240_v30 }
 0x900   :  { %v3239_v51 = vpop.xlane.xlu1 %3238 }
 0x901   :  { %v3248_v9 = vrot.slane %v3239_v51, %v13455_v10  ;;  %v3252_v24 = vrot.slane %v3239_v51, %v13458_v11  ;;  %v3256_v26 = vrot.slane %v3239_v51, %v13471_v22  ;;  %v3260_v38 = vrot.slane %v3239_v51, %v13486_v32 }
 0x902   :  { %v3268_v44 = vrot.slane %v3239_v51, %v13500_v39  ;;  %v3272_v63 = vrot.slane %v3239_v51, %v13507_v42 }
 0x903   :  { %v3325_v8 = vsub.f32 %v14442_v57, %v3248_v9  ;;  %v3326_v58 = vsub.f32 %v14446_v3, %v3248_v9  ;;  %v3328_v29 = vsub.f32 %v14454_v23, %v3252_v24  ;;  %v3327_v34 = vsub.f32 %v14450_v54, %v3252_v24 }
 0x904   :  { %v3330_v0 = vsub.f32 %v14461_v6, %v3256_v26  ;;  %v3329_v35 = vsub.f32 %v14458_v55, %v3256_v26  ;;  %v3264_v3 = vrot.slane %v3239_v51, %v13493_v36  ;;  %v3332_v56 = vsub.f32 %v14485_v37, %v3260_v38 }
 0x905   :  { %v3357_v49 = vmul.f32 1.442695, %v3325_v8  ;;  %v3359_v59 = vmul.f32 1.442695, %v3326_v58  ;;  %v3363_v41 = vmul.f32 1.442695, %v3328_v29  ;;  %v3331_v54 = vsub.f32 %v14482_v62, %v3260_v38 }
 0x906   :  { %v3361_v57 = vmul.f32 1.442695, %v3327_v34  ;;  %v3367_v23 = vmul.f32 1.442695, %v3330_v0  ;;  %v3365_v27 = vmul.f32 1.442695, %v3329_v35  ;;  %v3334_v6 = vsub.f32 %v14469_v17, %v3264_v3 }
 0x907   :  { %12699 = vpow2.f32 %v3357_v49  ;;  %v3371_v21 = vmul.f32 1.442695, %v3332_v56  ;;  %v3333_v55 = vsub.f32 %v14466_v25, %v3264_v3  ;;  %v3369_v48 = vmul.f32 1.442695, %v3331_v54 }
 0x908   :  { %12701 = vpow2.f32 %v3359_v59  ;;  %v3336_v37 = vsub.f32 %v14493_v43, %v3268_v44  ;;  %v3375_v52 = vmul.f32 1.442695, %v3334_v6  ;;  %v3335_v62 = vsub.f32 %v14490_v50, %v3268_v44 }
 0x909   :  { %12703 = vpow2.f32 %v3363_v41  ;;  %v3373_v7 = vmul.f32 1.442695, %v3333_v55  ;;  %v3276_v25 = vrot.slane %v3239_v51, %v13514_v45  ;;  %v3338_v17 = vsub.f32 %v14501_v1, %v3272_v63 }
 0x90a   :  { %12705 = vpow2.f32 %v3361_v57  ;;  %v3379_v43 = vmul.f32 1.442695, %v3336_v37  ;;  %v3337_v14 = vsub.f32 %v14498_v12, %v3272_v63  ;;  %v3377_v50 = vmul.f32 1.442695, %v3335_v62 }
 0x90b   :  { %12707 = vpow2.f32 %v3367_v23  ;;  %v3340_v40 = vsub.f32 %v14533_v33, %v3276_v25  ;;  %v3383_v1 = vmul.f32 1.442695, %v3338_v17  ;;  %v3339_v12 = vsub.f32 %v14530_v60, %v3276_v25  ;;  %v15904_v17 = vld [vmem:[#allocation80_spill] sm:$0xff] }
 0x90c   :  { %12709 = vpow2.f32 %v3365_v27  ;;  %v3381_v9 = vmul.f32 1.442695, %v3337_v14 }
 0x90d   :  { %12711 = vpow2.f32 %v3371_v21  ;;  %v3387_v8 = vmul.f32 1.442695, %v3340_v40  ;;  %v3385_v29 = vmul.f32 1.442695, %v3339_v12  ;;  %v15905_v40 = vld [vmem:[#allocation79_spill] sm:$0xff] }
 0x90e   :  { %12713 = vpow2.f32 %v3369_v48  ;;  %v15902_v48 = vld [vmem:[#allocation78_spill] sm:$0xff] }
 0x90f   :  { %12715 = vpow2.f32 %v3375_v52  ;;  %v15903_v52 = vld [vmem:[#allocation77_spill] sm:$0xff] }
 0x910   :  { %12717 = vpow2.f32 %v3373_v7  ;;  %v14669_v31 = vpop.xlane.xlu0 %3241 }
 0x911   :  { %12719 = vpow2.f32 %v3379_v43  ;;  %v3280_v30 = vrot.slane %v14669_v31, %v13455_v10  ;;  %v3284_v33 = vrot.slane %v14669_v31, %v13458_v11  ;;  %v3288_v49 = vrot.slane %v14669_v31, %v13471_v22 }
 0x912   :  { %12721 = vpow2.f32 %v3377_v50  ;;  %v3292_v35 = vrot.slane %v14669_v31, %v13486_v32  ;;  %v3296_v54 = vrot.slane %v14669_v31, %v13493_v36  ;;  %v3300_v55 = vrot.slane %v14669_v31, %v13500_v39 }
 0x913   :  { %12723 = vpow2.f32 %v3383_v1  ;;  %v3342_v58 = vsub.f32 %v14477_v47, %v3280_v30  ;;  %v3341_v60 = vsub.f32 %v14474_v20, %v3280_v30  ;;  %v3344_v59 = vsub.f32 %v14509_v19, %v3284_v33 }
 0x914   :  { %v14657_v28 = vpop.eup %12699  ;;  %12725 = vpow2.f32 %v3381_v9  ;;  %v3343_v0 = vsub.f32 %v14506_v15, %v3284_v33  ;;  %v3346_v57 = vsub.f32 %v14517_v46, %v3288_v49  ;;  %v3345_v56 = vsub.f32 %v14514_v53, %v3288_v49 }
 0x915   :  { %v14660_v13 = vpop.eup %12701  ;;  %3454 = vperm.xlu0 %11797, %v14657_v28   ;;  %12727 = vpow2.f32 %v3387_v8  ;;  %v3391_v38 = vmul.f32 1.442695, %v3342_v58  ;;  %v3389_v41 = vmul.f32 1.442695, %v3341_v60  ;;  %v3395_v19 = vmul.f32 1.442695, %v3344_v59 }
 0x916   :  { %3457 = vperm.xlu1 %11798, %v14660_v13   ;;  %v14666_v5 = vpop.eup %12703  ;;  %12729 = vpow2.f32 %v3385_v29  ;;  %v3393_v15 = vmul.f32 1.442695, %v3343_v0  ;;  %v3348_v27 = vsub.f32 %v14541_v4, %v3292_v35  ;;  %v3399_v46 = vmul.f32 1.442695, %v3346_v57  ;;  %v15906_v8 = vld [vmem:[#allocation82_spill] sm:$0xff]  ;;  %v15907_v60 = vld [vmem:[#allocation81_spill] sm:$0xff] }
 0x917   :  { %v14671_v18 = vpop.eup %12705  ;;  %12731 = vpow2.f32 %v3391_v38  ;;  %v3347_v6 = vsub.f32 %v14538_v2, %v3292_v35  ;;  %v3397_v53 = vmul.f32 1.442695, %v3345_v56  ;;  %v3350_v63 = vsub.f32 %v15902_v48, %v3296_v54  ;;  %v15908_v0 = vld [vmem:[#allocation76_spill] sm:$0xff]  ;;  %v15909_v57 = vld [vmem:[#allocation83_spill] sm:$0xff] }
 0x918   :  { %v14678_v51 = vpop.eup %12707  ;;  %12733 = vpow2.f32 %v3389_v41  ;;  %v3403_v4 = vmul.f32 1.442695, %v3348_v27  ;;  %v3349_v62 = vsub.f32 %v15903_v52, %v3296_v54  ;;  %v3304_v25 = vrot.slane %v14669_v31, %v13507_v42 }
 0x919   :  { %3463 = vperm.xlu0 %11797, %v14666_v5   ;;  %v14681_v24 = vpop.eup %12709  ;;  %12735 = vpow2.f32 %v3395_v19  ;;  %v3401_v2 = vmul.f32 1.442695, %v3347_v6  ;;  %v3352_v43 = vsub.f32 %v15904_v17, %v3300_v55  ;;  %v3407_v14 = vmul.f32 1.442695, %v3350_v63 }
 0x91a   :  { %3460 = vperm.xlu1 %11798, %v14671_v18   ;;  %v14688_v26 = vpop.eup %12711  ;;  %12737 = vpow2.f32 %v3393_v15  ;;  %v3351_v1 = vsub.f32 %v15905_v40, %v3300_v55  ;;  %v3405_v30 = vmul.f32 1.442695, %v3349_v62  ;;  %v3308_v9 = vrot.slane %v14669_v31, %v13514_v45 }
 0x91b   :  { %v14691_v34 = vpop.eup %12713  ;;  %12739 = vpow2.f32 %v3399_v46  ;;  %v3354_v33 = vsub.f32 %v15906_v8, %v3304_v25  ;;  %v3411_v58 = vmul.f32 1.442695, %v3352_v43  ;;  %v3353_v49 = vsub.f32 %v15907_v60, %v3304_v25 }
 0x91c   :  { %v14698_v47 = vpop.eup %12715  ;;  %12741 = vpow2.f32 %v3397_v53  ;;  %v3409_v59 = vmul.f32 1.442695, %v3351_v1  ;;  %v3356_v41 = vsub.f32 %v15908_v0, %v3308_v9  ;;  %v3355_v19 = vsub.f32 %v15909_v57, %v3308_v9 }
 0x91d   :  { %3469 = vperm.xlu0 %11797, %v14678_v51   ;;  %v14701_v20 = vpop.eup %12717  ;;  %12743 = vpow2.f32 %v3403_v4  ;;  %v3415_v31 = vmul.f32 1.442695, %v3354_v33  ;;  %v3413_v56 = vmul.f32 1.442695, %v3353_v49 }
 0x91e   :  { %3466 = vperm.xlu1 %11798, %v14681_v24   ;;  %v14708_v3 = vpop.eup %12719  ;;  %12745 = vpow2.f32 %v3401_v2  ;;  %v3419_v54 = vmul.f32 1.442695, %v3356_v41  ;;  %v3417_v46 = vmul.f32 1.442695, %v3355_v19 }
 0x91f   :  { %v14711_v23 = vpop.eup %12721  ;;  %12747 = vpow2.f32 %v3407_v14 }
 0x920   :  { %v14718_v44 = vpop.eup %12723  ;;  %12749 = vpow2.f32 %v3405_v30 }
 0x921   :  { %3475 = vperm.xlu0 %11797, %v14688_v26   ;;  %v14721_v21 = vpop.eup %12725  ;;  %12751 = vpow2.f32 %v3411_v58 }
 0x922   :  { %3472 = vperm.xlu1 %11798, %v14691_v34   ;;  %v14728_v37 = vpop.eup %12727  ;;  %12753 = vpow2.f32 %v3409_v59 }
 0x923   :  { %v14731_v7 = vpop.eup %12729  ;;  %12755 = vpow2.f32 %v3415_v31 }
 0x924   :  { %v14738_v50 = vpop.eup %12731  ;;  %12757 = vpow2.f32 %v3413_v56 }
 0x925   :  { %3481 = vperm.xlu0 %11797, %v14698_v47   ;;  %v14741_v12 = vpop.eup %12733  ;;  %12759 = vpow2.f32 %v3419_v54 }
 0x926   :  { %3478 = vperm.xlu1 %11798, %v14701_v20   ;;  %v14748_v29 = vpop.eup %12735  ;;  %12761 = vpow2.f32 %v3417_v46 }
 0x927   :  { %v14751_v38 = vpop.eup %12737 }
 0x928   :  { %v14756_v35 = vpop.eup %12739 }
 0x929   :  { %3487 = vperm.xlu0 %11797, %v14708_v3   ;;  %v14759_v15 = vpop.eup %12741 }
 0x92a   :  { %3484 = vperm.xlu1 %11798, %v14711_v23   ;;  %v14763_v27 = vpop.eup %12743 }
 0x92b   :  { %v14765_v6 = vpop.eup %12745 }
 0x92c   :  { %v14769_v53 = vpop.eup %12747 }
 0x92d   :  { %3493 = vperm.xlu0 %11797, %v14718_v44   ;;  %v14771_v55 = vpop.eup %12749 }
 0x92e   :  { %3490 = vperm.xlu1 %11798, %v14721_v21   ;;  %v14775_v48 = vpop.eup %12751 }
 0x92f   :  { %v14777_v63 = vpop.eup %12753 }
 0x930   :  { %v14781_v4 = vpop.eup %12755 }
 0x931   :  { %3499 = vperm.xlu0 %11797, %v14728_v37   ;;  %v14783_v52 = vpop.eup %12757 }
 0x932   :  { %3496 = vperm.xlu1 %11798, %v14731_v7   ;;  %v14787_v62 = vpop.eup %12759 }
 0x933   :  { %15910 = vst [vmem:[#allocation46_spill] sm:$0xff] %v14787_v62  ;;  %v14789_v2 = vpop.eup %12761 }
 0x935   :  { %3505 = vperm.xlu0 %11797, %v14738_v50  }
 0x936   :  { %3502 = vperm.xlu1 %11798, %v14741_v12  }
 0x939   :  { %3511 = vperm.xlu0 %11797, %v14748_v29  }
 0x93a   :  { %3508 = vperm.xlu1 %11798, %v14751_v38  }
 0x93d   :  { %3517 = vperm.xlu0 %11797, %v14756_v35  }
 0x93e   :  { %3514 = vperm.xlu1 %11798, %v14759_v15  }
 0x941   :  { %3523 = vperm.xlu0 %11797, %v14763_v27  }
 0x942   :  { %3520 = vperm.xlu1 %11798, %v14765_v6  }
 0x945   :  { %3529 = vperm.xlu0 %11797, %v14769_v53  }
 0x946   :  { %3526 = vperm.xlu1 %11798, %v14771_v55  }
 0x949   :  { %3535 = vperm.xlu0 %11797, %v14775_v48  }
 0x94a   :  { %3532 = vperm.xlu1 %11798, %v14777_v63  }
 0x94d   :  { %3541 = vperm.xlu0 %11797, %v14781_v4  }
 0x94e   :  { %3538 = vperm.xlu1 %11798, %v14783_v52  }
 0x951   :  { %3547 = vperm.xlu0 %11797, %v14787_v62  }
 0x952   :  { %3544 = vperm.xlu1 %11798, %v14789_v2  }
 0x990   :  { %v3455_v25 = vpop.permute.xlu0 %3454 }
 0x991   :  { %v3458_v17 = vpop.permute.xlu1 %3457  ;;  %v3552_v57 = vrot.slane %v3455_v25, %v13867_v16 }
 0x992   :  { %v3556_v31 = vrot.slane %v3458_v17, %v13870_v61 }
 0x994   :  { %v3464_v43 = vpop.permute.xlu0 %3463 }
 0x995   :  { %v3461_v14 = vpop.permute.xlu1 %3460  ;;  %v3565_v60 = vrot.slane %v3464_v43, %v13870_v61 }
 0x996   :  { %v3561_v58 = vrot.slane %v3461_v14, %v13867_v16 }
 0x998   :  { %v3470_v40 = vpop.permute.xlu0 %3469  ;;  %v3566_v43 = vsel %vm1229_vm0, %v3565_v60, %v3561_v58 }
 0x999   :  { %v3467_v1 = vpop.permute.xlu1 %3466  ;;  %v3574_v0 = vrot.slane %v3470_v40, %v13870_v61 }
 0x99a   :  { %v3570_v59 = vrot.slane %v3467_v1, %v13867_v16 }
 0x99c   :  { %v3476_v30 = vpop.permute.xlu0 %3475  ;;  %v3575_v62 = vsel %vm1229_vm0, %v3574_v0, %v3570_v59 }
 0x99d   :  { %v3473_v9 = vpop.permute.xlu1 %3472  ;;  %v3583_v56 = vrot.slane %v3476_v30, %v13870_v61 }
 0x99e   :  { %v3579_v19 = vrot.slane %v3473_v9, %v13867_v16  ;;  %v3557_v9 = vsel %vm1229_vm0, %v3556_v31, %v3552_v57 }
 0x9a0   :  { %v3482_v8 = vpop.permute.xlu0 %3481  ;;  %v3584_v30 = vsel %vm1229_vm0, %v3583_v56, %v3579_v19 }
 0x9a1   :  { %v3479_v33 = vpop.permute.xlu1 %3478  ;;  %v3592_v46 = vrot.slane %v3482_v8, %v13870_v61  ;;  %v3693_v8 = vsel %vm1366_vm1, %v3566_v43, %v3557_v9 }
 0x9a2   :  { %v3588_v54 = vrot.slane %v3479_v33, %v13867_v16  ;;  %v3694_v60 = vsel %vm1368_vm2, %v3575_v62, %v3693_v8 }
 0x9a3   :  { %v3695_v59 = vsel %vm1370_vm3, %v3584_v30, %v3694_v60 }
 0x9a4   :  { %v3488_v49 = vpop.permute.xlu0 %3487  ;;  %v3593_v58 = vsel %vm1229_vm0, %v3592_v46, %v3588_v54 }
 0x9a5   :  { %v3485_v41 = vpop.permute.xlu1 %3484  ;;  %v3601_v1 = vrot.slane %v3488_v49, %v13870_v61  ;;  %v3696_v57 = vsel %vm1372_vm4, %v3593_v58, %v3695_v59 }
 0x9a6   :  { %v3597_v14 = vrot.slane %v3485_v41, %v13867_v16 }
 0x9a8   :  { %v3494_v40 = vpop.permute.xlu0 %3493  ;;  %v3602_v49 = vsel %vm1229_vm0, %v3601_v1, %v3597_v14 }
 0x9a9   :  { %v3491_v17 = vpop.permute.xlu1 %3490  ;;  %v3610_v25 = vrot.slane %v3494_v40, %v13870_v61  ;;  %v3697_v56 = vsel %vm1374_vm5, %v3602_v49, %v3696_v57 }
 0x9aa   :  { %v3606_v33 = vrot.slane %v3491_v17, %v13867_v16 }
 0x9ac   :  { %v3500_v41 = vpop.permute.xlu0 %3499  ;;  %v3611_v0 = vsel %vm1229_vm0, %v3610_v25, %v3606_v33 }
 0x9ad   :  { %v3497_v40 = vpop.permute.xlu1 %3496  ;;  %v3619_v31 = vrot.slane %v3500_v41, %v13870_v61  ;;  %v3698_v62 = vsel %vm1376_vm6, %v3611_v0, %v3697_v56 }
 0x9ae   :  { %v3615_v19 = vrot.slane %v3497_v40, %v13867_v16 }
 0x9b0   :  { %v3506_v43 = vpop.permute.xlu0 %3505  ;;  %v3620_v54 = vsel %vm1229_vm0, %v3619_v31, %v3615_v19 }
 0x9b1   :  { %v3503_v46 = vpop.permute.xlu1 %3502  ;;  %v3699_v14 = vsel %vm1378_vm7, %v3620_v54, %v3698_v62  ;;  %v3628_v19 = vrot.slane %v3506_v43, %v13870_v61 }
 0x9b2   :  { %v3709_v1 = vsel %vm1389_vm8, %v3699_v14, 0.0  ;;  %v3624_v57 = vrot.slane %v3503_v46, %v13867_v16 }
 0x9b3   :  { %3710 = vadd.xlane.f32.xlu1 %v3709_v1 }
 0x9b4   :  { %v3512_v17 = vpop.permute.xlu0 %3511 }
 0x9b5   :  { %v3509_v25 = vpop.permute.xlu1 %3508  ;;  %v3637_v41 = vrot.slane %v3512_v17, %v13870_v61 }
 0x9b6   :  { %v3633_v49 = vrot.slane %v3509_v25, %v13867_v16 }
 0x9b8   :  { %v3518_v9 = vpop.permute.xlu0 %3517  ;;  %v3638_v1 = vsel %vm1229_vm0, %v3637_v41, %v3633_v49 }
 0x9b9   :  { %v3515_v30 = vpop.permute.xlu1 %3514  ;;  %v3646_v40 = vrot.slane %v3518_v9, %v13870_v61 }
 0x9ba   :  { %v3642_v0 = vrot.slane %v3515_v30, %v13867_v16 }
 0x9bc   :  { %v3524_v33 = vpop.permute.xlu0 %3523  ;;  %v3647_v30 = vsel %vm1229_vm0, %v3646_v40, %v3642_v0 }
 0x9bd   :  { %v3521_v8 = vpop.permute.xlu1 %3520  ;;  %v3655_v54 = vrot.slane %v3524_v33, %v13870_v61 }
 0x9be   :  { %v3651_v56 = vrot.slane %v3521_v8, %v13867_v16  ;;  %v3629_v8 = vsel %vm1229_vm0, %v3628_v19, %v3624_v57 }
 0x9c0   :  { %v3530_v58 = vpop.permute.xlu0 %3529  ;;  %v3656_v33 = vsel %vm1229_vm0, %v3655_v54, %v3651_v56 }
 0x9c1   :  { %v3527_v60 = vpop.permute.xlu1 %3526  ;;  %v3664_v14 = vrot.slane %v3530_v58, %v13870_v61  ;;  %v3700_v58 = vsel %vm1366_vm1, %v3638_v1, %v3629_v8 }
 0x9c2   :  { %v3660_v62 = vrot.slane %v3527_v60, %v13867_v16  ;;  %v3701_v41 = vsel %vm1368_vm2, %v3647_v30, %v3700_v58 }
 0x9c3   :  { %v3702_v0 = vsel %vm1370_vm3, %v3656_v33, %v3701_v41 }
 0x9c4   :  { %v3536_v59 = vpop.permute.xlu0 %3535  ;;  %v3665_v49 = vsel %vm1229_vm0, %v3664_v14, %v3660_v62 }
 0x9c5   :  { %v3533_v31 = vpop.permute.xlu1 %3532  ;;  %v3673_v25 = vrot.slane %v3536_v59, %v13870_v61  ;;  %v3703_v19 = vsel %vm1372_vm4, %v3665_v49, %v3702_v0 }
 0x9c6   :  { %v3669_v17 = vrot.slane %v3533_v31, %v13867_v16 }
 0x9c8   :  { %v3542_v9 = vpop.permute.xlu0 %3541  ;;  %v3674_v59 = vsel %vm1229_vm0, %v3673_v25, %v3669_v17 }
 0x9c9   :  { %v3539_v46 = vpop.permute.xlu1 %3538  ;;  %v3682_v43 = vrot.slane %v3542_v9, %v13870_v61  ;;  %v3704_v54 = vsel %vm1374_vm5, %v3674_v59, %v3703_v19 }
 0x9ca   :  { %v3678_v60 = vrot.slane %v3539_v46, %v13867_v16 }
 0x9cc   :  { %v3548_v31 = vpop.permute.xlu0 %3547  ;;  %v3683_v40 = vsel %vm1229_vm0, %v3682_v43, %v3678_v60 }
 0x9cd   :  { %v3545_v9 = vpop.permute.xlu1 %3544  ;;  %v3691_v57 = vrot.slane %v3548_v31, %v13870_v61  ;;  %v3705_v14 = vsel %vm1376_vm6, %v3683_v40, %v3704_v54 }
 0x9ce   :  { %v3687_v56 = vrot.slane %v3545_v9, %v13867_v16 }
 0x9d0   :  { %v3692_v62 = vsel %vm1229_vm0, %v3691_v57, %v3687_v56 }
 0x9d1   :  { %v3706_v1 = vsel %vm1378_vm7, %v3692_v62, %v3705_v14 }
 0x9d2   :  { %v3712_v17 = vsel %vm1389_vm8, %v3706_v1, 0.0 }
 0x9d3   :  { %3713 = vadd.xlane.f32.xlu0 %v3712_v17 }
 0xa3c   :  { %v3711_v25 = vpop.xlane.xlu1 %3710 }
 0xa3d   :  { %12763 = vrcp.f32 %v3711_v25 }
 0xa4a   :  { %v12764_v30 = vpop.eup %12763 }
 0xa4b   :  { %v3722_v46 = vrot.slane %v12764_v30, %v13455_v10  ;;  %v3726_v43 = vrot.slane %v12764_v30, %v13458_v11  ;;  %v3730_v8 = vrot.slane %v12764_v30, %v13471_v22  ;;  %v3734_v31 = vrot.slane %v12764_v30, %v13486_v32 }
 0xa4c   :  { %v3742_v54 = vrot.slane %v12764_v30, %v13500_v39 }
 0xa4d   :  { %v3799_v33 = vmul.f32 %v14657_v28, %v3722_v46  ;;  %v3800_v60 = vmul.f32 %v14660_v13, %v3722_v46  ;;  %v3801_v58 = vmul.f32 %v14671_v18, %v3726_v43  ;;  %v3802_v49 = vmul.f32 %v14666_v5, %v3726_v43 }
 0xa4e   :  { %v3803_v59 = vmul.f32 %v14681_v24, %v3730_v8  ;;  %v3804_v57 = vmul.f32 %v14678_v51, %v3730_v8  ;;  %v3805_v28 = vmul.f32 %v14691_v34, %v3734_v31  ;;  %v3738_v13 = vrot.slane %v12764_v30, %v13493_v36 }
 0xa4f   :  { %v3831_v41 = vpack.c.bf16 %v3800_v60, %v3799_v33  ;;  %v3832_v9 = vpack.c.bf16 %v3802_v49, %v3801_v58  ;;  %v3806_v5 = vmul.f32 %v14688_v26, %v3734_v31  ;;  %v3809_v17 = vmul.f32 %v14711_v23, %v3742_v54 }
 0xa50   :  { %v3833_v56 = vpack.c.bf16 %v3804_v57, %v3803_v59  ;;  %v3807_v24 = vmul.f32 %v14701_v20, %v3738_v13  ;;  %v3808_v1 = vmul.f32 %v14698_v47, %v3738_v13  ;;  %v3810_v25 = vmul.f32 %v14708_v3, %v3742_v54 }
 0xa51   :  { %v3869_v0 = vunpack.c.h.b16 %v3831_v41  ;;  %v3868_v40 = vunpack.c.l.b16 %v3831_v41  ;;  %v3870_v19 = vunpack.c.l.b16 %v3832_v9  ;;  %v3871_v18 = vunpack.c.h.b16 %v3832_v9 }
 0xa52   :  { %v3872_v62 = vunpack.c.l.b16 %v3833_v56  ;;  %v3873_v14 = vunpack.c.h.b16 %v3833_v56  ;;  %v3834_v51 = vpack.c.bf16 %v3806_v5, %v3805_v28  ;;  %v3746_v26 = vrot.slane %v12764_v30, %v13507_v42 }
 0xa53   :  { %3904 = vperm.xlu1 %11798, %v3869_v0   ;;  %3901 = vperm.xlu0 %11797, %v3868_v40   ;;  %v3835_v20 = vpack.c.bf16 %v3808_v1, %v3807_v24  ;;  %v3836_v8 = vpack.c.bf16 %v3810_v25, %v3809_v17  ;;  %v3750_v33 = vrot.slane %v12764_v30, %v13514_v45 }
 0xa54   :  { %v3874_v46 = vunpack.c.l.b16 %v3834_v51  ;;  %v3875_v43 = vunpack.c.h.b16 %v3834_v51  ;;  %v3811_v58 = vmul.f32 %v14721_v21, %v3746_v26  ;;  %v3812_v49 = vmul.f32 %v14718_v44, %v3746_v26 }
 0xa55   :  { %v3876_v60 = vunpack.c.l.b16 %v3835_v20  ;;  %v3877_v47 = vunpack.c.h.b16 %v3835_v20  ;;  %v3813_v3 = vmul.f32 %v14731_v7, %v3750_v33  ;;  %v3814_v23 = vmul.f32 %v14728_v37, %v3750_v33 }
 0xa56   :  { %v3878_v41 = vunpack.c.l.b16 %v3836_v8  ;;  %v3879_v59 = vunpack.c.h.b16 %v3836_v8  ;;  %v3837_v31 = vpack.c.bf16 %v3812_v49, %v3811_v58 }
 0xa57   :  { %3907 = vperm.xlu1 %11798, %v3870_v19   ;;  %3910 = vperm.xlu0 %11797, %v3871_v18   ;;  %v3838_v0 = vpack.c.bf16 %v3814_v23, %v3813_v3 }
 0xa58   :  { %v3880_v40 = vunpack.c.l.b16 %v3837_v31  ;;  %v3881_v30 = vunpack.c.h.b16 %v3837_v31 }
 0xa59   :  { %v3882_v57 = vunpack.c.l.b16 %v3838_v0  ;;  %v3883_v28 = vunpack.c.h.b16 %v3838_v0 }
 0xa5b   :  { %3913 = vperm.xlu1 %11798, %v3872_v62   ;;  %3916 = vperm.xlu0 %11797, %v3873_v14  }
 0xa5c   :  { %v3714_v34 = vpop.xlane.xlu0 %3713 }
 0xa5d   :  { %12765 = vrcp.f32 %v3714_v34 }
 0xa5f   :  { %3919 = vperm.xlu1 %11798, %v3874_v46   ;;  %3922 = vperm.xlu0 %11797, %v3875_v43  }
 0xa63   :  { %3925 = vperm.xlu1 %11798, %v3876_v60   ;;  %3928 = vperm.xlu0 %11797, %v3877_v47  }
 0xa67   :  { %3931 = vperm.xlu1 %11798, %v3878_v41   ;;  %3934 = vperm.xlu0 %11797, %v3879_v59   ;;  %v15911_v59 = vld [vmem:[#allocation46_spill] sm:$0xff] }
 0xa6a   :  { %v12766_v9 = vpop.eup %12765 }
 0xa6b   :  { %3937 = vperm.xlu1 %11798, %v3880_v40   ;;  %3940 = vperm.xlu0 %11797, %v3881_v30   ;;  %v3754_v21 = vrot.slane %v12766_v9, %v13455_v10  ;;  %v3758_v44 = vrot.slane %v12766_v9, %v13458_v11  ;;  %v3762_v7 = vrot.slane %v12766_v9, %v13471_v22 }
 0xa6c   :  { %v3766_v24 = vrot.slane %v12766_v9, %v13486_v32  ;;  %v3774_v17 = vrot.slane %v12766_v9, %v13500_v39  ;;  %v3778_v43 = vrot.slane %v12766_v9, %v13507_v42  ;;  %v3782_v49 = vrot.slane %v12766_v9, %v13514_v45 }
 0xa6d   :  { %v3815_v37 = vmul.f32 %v14741_v12, %v3754_v21  ;;  %v3816_v13 = vmul.f32 %v14738_v50, %v3754_v21  ;;  %v3817_v19 = vmul.f32 %v14751_v38, %v3758_v44  ;;  %v3818_v18 = vmul.f32 %v14748_v29, %v3758_v44 }
 0xa6e   :  { %v3819_v5 = vmul.f32 %v14759_v15, %v3762_v7  ;;  %v3820_v51 = vmul.f32 %v14756_v35, %v3762_v7  ;;  %v3821_v50 = vmul.f32 %v14765_v6, %v3766_v24  ;;  %v3770_v12 = vrot.slane %v12766_v9, %v13493_v36 }
 0xa6f   :  { %3943 = vperm.xlu1 %11798, %v3882_v57   ;;  %3946 = vperm.xlu0 %11797, %v3883_v28   ;;  %v3839_v56 = vpack.c.bf16 %v3816_v13, %v3815_v37  ;;  %v3840_v14 = vpack.c.bf16 %v3818_v18, %v3817_v19  ;;  %v3822_v34 = vmul.f32 %v14763_v27, %v3766_v24 }
 0xa70   :  { %v3841_v1 = vpack.c.bf16 %v3820_v51, %v3819_v5  ;;  %v3823_v15 = vmul.f32 %v14771_v55, %v3770_v12  ;;  %v3824_v46 = vmul.f32 %v14769_v53, %v3770_v12  ;;  %v3825_v6 = vmul.f32 %v14777_v63, %v3774_v17 }
 0xa71   :  { %v3885_v54 = vunpack.c.h.b16 %v3839_v56  ;;  %v3884_v62 = vunpack.c.l.b16 %v3839_v56  ;;  %v3887_v38 = vunpack.c.h.b16 %v3840_v14  ;;  %v3886_v29 = vunpack.c.l.b16 %v3840_v14 }
 0xa72   :  { %v3889_v25 = vunpack.c.h.b16 %v3841_v1  ;;  %v3888_v26 = vunpack.c.l.b16 %v3841_v1  ;;  %v3842_v35 = vpack.c.bf16 %v3822_v34, %v3821_v50  ;;  %v3843_v27 = vpack.c.bf16 %v3824_v46, %v3823_v15 }
 0xa73   :  { %3952 = vperm.xlu0 %11797, %v3885_v54   ;;  %3949 = vperm.xlu1 %11798, %v3884_v62   ;;  %v3826_v33 = vmul.f32 %v14775_v48, %v3774_v17  ;;  %v3827_v55 = vmul.f32 %v14783_v52, %v3778_v43  ;;  %v3828_v60 = vmul.f32 %v14781_v4, %v3778_v43 }
 0xa74   :  { %v3891_v20 = vunpack.c.h.b16 %v3842_v35  ;;  %v3890_v8 = vunpack.c.l.b16 %v3842_v35  ;;  %v3893_v47 = vunpack.c.h.b16 %v3843_v27  ;;  %v3892_v58 = vunpack.c.l.b16 %v3843_v27 }
 0xa75   :  { %v3844_v53 = vpack.c.bf16 %v3826_v33, %v3825_v6  ;;  %v3845_v63 = vpack.c.bf16 %v3828_v60, %v3827_v55  ;;  %v3829_v41 = vmul.f32 %v14789_v2, %v3782_v49  ;;  %v3830_v48 = vmul.f32 %v15911_v59, %v3782_v49 }
 0xa77   :  { %3958 = vperm.xlu0 %11797, %v3887_v38   ;;  %3955 = vperm.xlu1 %11798, %v3886_v29   ;;  %v3895_v3 = vunpack.c.h.b16 %v3844_v53  ;;  %v3894_v23 = vunpack.c.l.b16 %v3844_v53  ;;  %v3897_v31 = vunpack.c.h.b16 %v3845_v63  ;;  %v3896_v52 = vunpack.c.l.b16 %v3845_v63 }
 0xa78   :  { %v3846_v0 = vpack.c.bf16 %v3830_v48, %v3829_v41 }
 0xa7a   :  { %v3899_v4 = vunpack.c.h.b16 %v3846_v0  ;;  %v3898_v40 = vunpack.c.l.b16 %v3846_v0 }
 0xa7b   :  { %3964 = vperm.xlu0 %11797, %v3889_v25   ;;  %3961 = vperm.xlu1 %11798, %v3888_v26  }
 0xa7f   :  { %3970 = vperm.xlu0 %11797, %v3891_v20   ;;  %3967 = vperm.xlu1 %11798, %v3890_v8  }
 0xa83   :  { %3976 = vperm.xlu0 %11797, %v3893_v47   ;;  %3973 = vperm.xlu1 %11798, %v3892_v58  }
 0xa87   :  { %3982 = vperm.xlu0 %11797, %v3895_v3   ;;  %3979 = vperm.xlu1 %11798, %v3894_v23  }
 0xa8b   :  { %3988 = vperm.xlu0 %11797, %v3897_v31   ;;  %3985 = vperm.xlu1 %11798, %v3896_v52  }
 0xa8f   :  { %3994 = vperm.xlu0 %11797, %v3899_v4   ;;  %3991 = vperm.xlu1 %11798, %v3898_v40  }
 0xace   :  { %v3905_v30 = vpop.permute.xlu1 %3904  ;;  %v3902_v9 = vpop.permute.xlu0 %3901 }
 0xacf   :  { %v4003_v17 = vrot.slane %v3905_v30, %v13870_v61  ;;  %v3999_v25 = vrot.slane %v3902_v9, %v13867_v16 }
 0xad1   :  { %v4004_v55 = vsel %vm1229_vm0, %v4003_v17, %v3999_v25 }
 0xad2   :  { %v3908_v21 = vpop.permute.xlu1 %3907  ;;  %v3911_v44 = vpop.permute.xlu0 %3910 }
 0xad3   :  { %v4008_v29 = vrot.slane %v3908_v21, %v13867_v16  ;;  %v4012_v1 = vrot.slane %v3911_v44, %v13870_v61 }
 0xad5   :  { %v4013_v26 = vsel %vm1229_vm0, %v4012_v1, %v4008_v29 }
 0xad6   :  { %v3914_v57 = vpop.permute.xlu1 %3913  ;;  %v3917_v28 = vpop.permute.xlu0 %3916  ;;  %v4140_v60 = vsel %vm1366_vm1, %v4013_v26, %v4004_v55 }
 0xad7   :  { %v4017_v35 = vrot.slane %v3914_v57, %v13867_v16  ;;  %v4021_v46 = vrot.slane %v3917_v28, %v13870_v61 }
 0xad9   :  { %v4022_v47 = vsel %vm1229_vm0, %v4021_v46, %v4017_v35 }
 0xada   :  { %v3920_v2 = vpop.permute.xlu1 %3919  ;;  %v3923_v7 = vpop.permute.xlu0 %3922 }
 0xadb   :  { %v4026_v6 = vrot.slane %v3920_v2, %v13867_v16  ;;  %v4030_v43 = vrot.slane %v3923_v7, %v13870_v61 }
 0xadd   :  { %v4031_v49 = vsel %vm1229_vm0, %v4030_v43, %v4026_v6 }
 0xade   :  { %v3926_v37 = vpop.permute.xlu1 %3925  ;;  %v3929_v13 = vpop.permute.xlu0 %3928 }
 0xadf   :  { %v4035_v20 = vrot.slane %v3926_v37, %v13867_v16  ;;  %v4039_v8 = vrot.slane %v3929_v13, %v13870_v61 }
 0xae1   :  { %v4040_v63 = vsel %vm1229_vm0, %v4039_v8, %v4035_v20 }
 0xae2   :  { %v14905_v19 = vpop.permute.xlu1 %3931  ;;  %v14907_v18 = vpop.permute.xlu0 %3934 }
 0xae3   :  { %v4044_v4 = vrot.slane %v14905_v19, %v13867_v16  ;;  %v4048_v40 = vrot.slane %v14907_v18, %v13870_v61 }
 0xae6   :  { %v14909_v56 = vpop.permute.xlu1 %3937  ;;  %v14911_v5 = vpop.permute.xlu0 %3940 }
 0xae7   :  { %v4053_v21 = vrot.slane %v14909_v56, %v13867_v16  ;;  %v4057_v2 = vrot.slane %v14911_v5, %v13870_v61  ;;  %v4141_v5 = vsel %vm1368_vm2, %v4022_v47, %v4140_v60 }
 0xaea   :  { %v14913_v24 = vpop.permute.xlu1 %3943  ;;  %v14915_v54 = vpop.permute.xlu0 %3946 }
 0xaeb   :  { %v4062_v7 = vrot.slane %v14913_v24, %v13867_v16  ;;  %v4066_v37 = vrot.slane %v14915_v54, %v13870_v61  ;;  %v4142_v54 = vsel %vm1370_vm3, %v4031_v49, %v4141_v5  ;;  %v11849_v49 = vld [vmem:[#allocation10 + $0x30] sm:$0xff]   ;;  %v11862_v5 = vld [vmem:[#allocation10 + $0x40] sm:$0xff]  }
 0xaec   :  { %v4143_v1 = vsel %vm1372_vm4, %v4040_v63, %v4142_v54  ;;  %v11851_v63 = vld [vmem:[#allocation10 + $0x28] sm:$0xff]  }
 0xaed   :  { %v4067_v35 = vsel %vm1229_vm0, %v4066_v37, %v4062_v7  ;;  %v4203_v37 = vld [vmem:[#allocation7] sm:$0xf] }
 0xaee   :  { %v3950_v62 = vpop.permute.xlu1 %3949  ;;  %v3953_v14 = vpop.permute.xlu0 %3952 }
 0xaef   :  { %v4071_v48 = vrot.slane %v3950_v62, %v13867_v16  ;;  %v4075_v31 = vrot.slane %v3953_v14, %v13870_v61 }
 0xaf1   :  { %v4076_v56 = vsel %vm1229_vm0, %v4075_v31, %v4071_v48  ;;  %v11861_v48 = vld [vmem:[#allocation10] sm:$0xff]   ;;  %v4280_v31 = vld [vmem:[#allocation9] sm:$0xff] }
 0xaf2   :  { %v3956_v51 = vpop.permute.xlu1 %3955  ;;  %v3959_v50 = vpop.permute.xlu0 %3958 }
 0xaf3   :  { %v4080_v58 = vrot.slane %v3956_v51, %v13867_v16  ;;  %v4084_v53 = vrot.slane %v3959_v50, %v13870_v61 }
 0xaf5   :  { %v4085_v44 = vsel %vm1229_vm0, %v4084_v53, %v4080_v58  ;;  %v15912_v53 = vmov 0.0  }
 0xaf6   :  { %v3962_v12 = vpop.permute.xlu1 %3961  ;;  %v3965_v38 = vpop.permute.xlu0 %3964  ;;  %v4147_v50 = vsel %vm1366_vm1, %v4085_v44, %v4076_v56  ;;  %v11854_v56 = vld [vmem:[#allocation10 + $0x60] sm:$0xff]  }
 0xaf7   :  { %v4089_v3 = vrot.slane %v3962_v12, %v13867_v16  ;;  %v4093_v23 = vrot.slane %v3965_v38, %v13870_v61  ;;  %v4049_v12 = vsel %vm1229_vm0, %v4048_v40, %v4044_v4 }
 0xaf8   :  { %v4144_v20 = vsel %vm1374_vm5, %v4049_v12, %v4143_v1  ;;  %v11863_v1 = vld [vmem:[#allocation13 + $0x70] ss:$8 sps:$4 sm:$0xff]  }
 0xaf9   :  { %v4094_v13 = vsel %vm1229_vm0, %v4093_v23, %v4089_v3  ;;  %v11853_v3 = vld [vmem:[#allocation10 + $0x20] sm:$0xff]   ;;  %v11855_v23 = vld [vmem:[#allocation10 + $0x18] sm:$0xff]  }
 0xafa   :  { %v3968_v34 = vpop.permute.xlu1 %3967  ;;  %v3971_v15 = vpop.permute.xlu0 %3970  ;;  %v4148_v38 = vsel %vm1368_vm2, %v4094_v13, %v4147_v50  ;;  %v11848_v13 = vld [vmem:[#allocation10 + $0x78] sm:$0xff]  }
 0xafb   :  { %v4098_v52 = vrot.slane %v3968_v34, %v13867_v16  ;;  %v4102_v0 = vrot.slane %v3971_v15, %v13870_v61  ;;  %v4058_v34 = vsel %vm1229_vm0, %v4057_v2, %v4053_v21  ;;  %v11865_v50 = vld [vmem:[#allocation13 + $0x74] ss:$8 sps:$4 sm:$0xff]  }
 0xafd   :  { %v4103_v62 = vsel %vm1229_vm0, %v4102_v0, %v4098_v52  ;;  %v4281_v52 = vpack.c.bf16 %v4280_v31, %v4280_v31  ;;  %v12868_v0 = vld [vmem:[#allocation6 + $0x4] sm:$0xf] }
 0xafe   :  { %v3974_v27 = vpop.permute.xlu1 %3973  ;;  %v3977_v33 = vpop.permute.xlu0 %3976  ;;  %v4149_v15 = vsel %vm1370_vm3, %v4103_v62, %v4148_v38  ;;  %v3851_v4 = vrot.slane %v12868_v0, %v13486_v32  ;;  %v11856_v62 = vld [vmem:[#allocation10 + $0x58] sm:$0xff]  }
 0xaff   :  { %v4107_v30 = vrot.slane %v3974_v27, %v13867_v16  ;;  %v4111_v9 = vrot.slane %v3977_v33, %v13870_v61  ;;  %v4145_v27 = vsel %vm1376_vm6, %v4058_v34, %v4144_v20  ;;  %v11874_v20 = vld [vmem:[#allocation13 + $0x44] ss:$8 sps:$4 sm:$0xff]  }
 0xb00   :  { %v4146_v60 = vsel %vm1378_vm7, %v4067_v35, %v4145_v27  ;;  %v15913_v35 = vmov 0   ;;  %v11877_v27 = vld [vmem:[#allocation13 + $0x34] ss:$8 sps:$4 sm:$0xff]  }
 0xb01   :  { %v4112_v24 = vsel %vm1229_vm0, %v4111_v9, %v4107_v30 }
 0xb02   :  { %v3980_v41 = vpop.permute.xlu1 %3979  ;;  %v3983_v59 = vpop.permute.xlu0 %3982  ;;  %v4150_v46 = vsel %vm1372_vm4, %v4112_v24, %v4149_v15  ;;  %v11868_v15 = vld [vmem:[#allocation13 + $0x64] ss:$8 sps:$4 sm:$0xff]  }
 0xb03   :  { %v4116_v57 = vrot.slane %v3980_v41, %v13867_v16  ;;  %v4120_v28 = vrot.slane %v3983_v59, %v13870_v61  ;;  %v11857_v41 = vld [vmem:[#allocation10 + $0x10] sm:$0xff]   ;;  %v11859_v59 = vld [vmem:[#allocation10 + $0x8] sm:$0xff]  }
 0xb05   :  { %v4121_v29 = vsel %vm1229_vm0, %v4120_v28, %v4116_v57 }
 0xb06   :  { %v3986_v19 = vpop.permute.xlu1 %3985  ;;  %v3989_v18 = vpop.permute.xlu0 %3988  ;;  %v4151_v8 = vsel %vm1374_vm5, %v4121_v29, %v4150_v46  ;;  %v11871_v46 = vld [vmem:[#allocation13 + $0x54] ss:$8 sps:$4 sm:$0xff]  }
 0xb07   :  { %v4125_v14 = vrot.slane %v3986_v19, %v13867_v16  ;;  %v4129_v51 = vrot.slane %v3989_v18, %v13870_v61  ;;  %v11850_v19 = vld [vmem:[#allocation10 + $0x70] sm:$0xff]   ;;  %v11852_v18 = vld [vmem:[#allocation10 + $0x68] sm:$0xff]  }
 0xb09   :  { %v4130_v17 = vsel %vm1229_vm0, %v4129_v51, %v4125_v14  ;;  %v11858_v14 = vld [vmem:[#allocation10 + $0x50] sm:$0xff]   ;;  %v11860_v51 = vld [vmem:[#allocation10 + $0x48] sm:$0xff]  }
 0xb0a   :  { %v3992_v25 = vpop.permute.xlu1 %3991  ;;  %v3995_v26 = vpop.permute.xlu0 %3994  ;;  %v4152_v33 = vsel %vm1376_vm6, %v4130_v17, %v4151_v8  ;;  %v11872_v8 = vld [vmem:[#allocation13 + $0x40] ss:$8 sps:$4 sm:$0xff]  }
 0xb0b   :  { %v4134_v6 = vrot.slane %v3992_v25, %v13867_v16  ;;  %v4138_v43 = vrot.slane %v3995_v26, %v13870_v61  ;;  %v11847_v61 = vld [vmem:[#allocation10 + $0x38] sm:$0xff]   ;;  %v11866_v26 = vld [vmem:[#allocation13 + $0x60] ss:$8 sps:$4 sm:$0xff]  }
 0xb0c   :  { %11694 = vmatpush3.bf16.msra.mxu1 %v11847_v61  ;;  %v11884_v61 = vld [vmem:[#allocation13] ss:$8 sps:$4 sm:$0xff]  }
 0xb0d   :  { %v4139_v55 = vsel %vm1229_vm0, %v4138_v43, %v4134_v6  ;;  %11695 = vmatprep.subr.bf16.mxu1 %v15912_v53  ;;  %v11869_v43 = vld [vmem:[#allocation13 + $0x50] ss:$8 sps:$4 sm:$0xff]   ;;  %vm5199_vm0 = vcmask 1043456  }
 0xb0e   :  { %v4153_v47 = vsel %vm1378_vm7, %v4139_v55, %v4152_v33  ;;  %v11875_v33 = vld [vmem:[#allocation13 + $0x30] ss:$8 sps:$4 sm:$0xff]   ;;  %v11880_v55 = vld [vmem:[#allocation13 + $0x24] ss:$8 sps:$4 sm:$0xff]  }
 0xb0f   :  { %v4154_v58 = vpack.c.b16 %v4153_v47, %v4146_v60  ;;  %v11878_v60 = vld [vmem:[#allocation13 + $0x20] ss:$8 sps:$4 sm:$0xff]   ;;  %v11883_v47 = vld [vmem:[#allocation13 + $0x14] ss:$8 sps:$4 sm:$0xff]  }
 0xb10   :  { %11696 = vmatpush3.bf16.msra.mxu1 %v11849_v49  ;;  %v11886_v49 = vld [vmem:[#allocation13 + $0x4] ss:$8 sps:$4 sm:$0xff]  }
 0xb11   :  { %11664 = vmatmul.mubr.msk.bf16.vlgmr.msra.gmra.mxu0 %vm1389_vm8, %v4154_v58  ;;  %11697 = vmatprep.subr.bf16.mxu1 %v15912_v53  ;;  %v11881_v58 = vld [vmem:[#allocation13 + $0x10] ss:$8 sps:$4 sm:$0xff]  }
 0xb12   :  { %11669 = vmatprep.mubr.msk.bf16.mxu0 %vm13259_vm9, %v15912_v53 }
 0xb14   :  { %11698 = vmatpush3.bf16.msra.mxu1 %v11851_v63  ;;  %v15011_v63 = vld [vmem:[#allocation12] sm:$0xff] }
 0xb15   :  { %11699 = vmatprep.subr.bf16.mxu1 %v15912_v53  ;;  %v4796_v31 = vrot.slane %v15011_v63, %v13493_v36 }
 0xb18   :  { %11700 = vmatpush3.bf16.msra.mxu1 %v11853_v3  ;;  %v4768_v3 = vrot.slane %v15011_v63, %v13455_v10 }
 0xb19   :  { %11701 = vmatprep.subr.bf16.mxu1 %v15912_v53 }
 0xb1a   :  { %4770 = vbcast.lane.b32.xlu1 %v4768_v3, 256 }
 0xb1c   :  { %11702 = vmatpush3.bf16.msra.mxu1 %v11855_v23  ;;  %v4775_v23 = vrot.slane %v15011_v63, %v13458_v11 }
 0xb1d   :  { %11703 = vmatprep.subr.bf16.mxu1 %v15912_v53 }
 0xb1e   :  { %4777 = vbcast.lane.b32.xlu0 %v4775_v23, 256 }
 0xb20   :  { %11704 = vmatpush3.bf16.msra.mxu1 %v11857_v41  ;;  %v4782_v41 = vrot.slane %v15011_v63, %v13471_v22 }
 0xb21   :  { %11705 = vmatprep.subr.bf16.mxu1 %v15912_v53 }
 0xb22   :  { %4784 = vbcast.lane.b32.xlu1 %v4782_v41, 256 }
 0xb24   :  { %11706 = vmatpush3.bf16.msra.mxu1 %v11859_v59  ;;  %v4803_v59 = vrot.slane %v15011_v63, %v13500_v39 }
 0xb25   :  { %11707 = vmatprep.subr.bf16.mxu1 %v15912_v53 }
 0xb26   :  { %4805 = vbcast.lane.b32.xlu0 %v4803_v59, 256 }
 0xb28   :  { %11708 = vmatpush3.bf16.msra.mxu1 %v11861_v48  ;;  %v4789_v48 = vrot.slane %v15011_v63, %v13486_v32 }
 0xb29   :  { %11713 = vmatprep.subr.bf16.mxu1 %v15912_v53 }
 0xb2a   :  { %4791 = vbcast.lane.b32.xlu1 %v4789_v48, 256 }
 0xb2b   :  { %11710 = vmatmul.mubr.bf16.vlgmr.msra.gmra.mxu1 %v4281_v52  ;;  %v4201_v52 = vld [vmem:[#allocation25] sm:$0x77] }
 0xb2c   :  { %11715 = vmatprep.mubr.msk.bf16.mxu1 %vm13259_vm9, %v15912_v53  ;;  %v4462_v0 = vrot.slane %v4201_v52, %v13455_v10 }
 0xb2e   :  { %4798 = vbcast.lane.b32.xlu1 %v4796_v31, 256 }
 0xbd1   :  { %v4192_v40 = vpop.f32.mrf.mxu0 }
 0xbd2   :  { %v4193_v9 = vadd.f32 %v4192_v40, %v3851_v4 }
 0xbd3   :  { %v11665_v30 = vpop.f32.mrf.mxu0 }
 0xbd4   :  { %v4199_v28 = vmax.f32 %v4193_v9, 0.0 }
 0xbd5   :  { %v4195_v21 = vpop.f32.mrf.mxu0 }
 0xbd6   :  { %v4196_v44 = vadd.f32 %v4195_v21, %v3851_v4 }
 0xbd7   :  { %v11666_v57 = vpop.f32.mrf.mxu0 }
 0xbd8   :  { %v4200_v2 = vmax.f32 %v4196_v44, 0.0 }
 0xbda   :  { %v4204_v7 = vpack.c.bf16 %v4200_v2, %v4199_v28  ;;  %v15033_v28 = vld [vmem:[#allocation15] sm:$0xf] }
 0xbdb   :  { %v4607_v2 = vrot.slane %v15033_v28, %v13455_v10 }
 0xbdc   :  { %11668 = vmatpush3.bf16.msra.mxu0 %v4204_v7  ;;  %v4612_v7 = vrot.slane %v15033_v28, %v13458_v11 }
 0xbdd   :  { %11673 = vmatprep.subr.bf16.mxu0 %v15912_v53 }
 0xbdf   :  { %11670 = vmatmul.mubr.msk.bf16.vlgmr.msra.gmra.mxu0 %vm1389_vm8, %v4203_v37 }
 0xbe0   :  { %11674 = vmatpush3.bf16.msra.mxu0 %v11848_v13  ;;  %11689 = vmatprep.mubr.msk.bf16.mxu0 %vm13259_vm9, %v15912_v53 }
 0xbe1   :  { %11675 = vmatprep.subr.bf16.mxu0 %v15912_v53 }
 0xbe4   :  { %11676 = vmatpush3.bf16.msra.mxu0 %v11850_v19 }
 0xbe5   :  { %11677 = vmatprep.subr.bf16.mxu0 %v15912_v53 }
 0xbe8   :  { %11678 = vmatpush3.bf16.msra.mxu0 %v11852_v18 }
 0xbe9   :  { %11679 = vmatprep.subr.bf16.mxu0 %v15912_v53 }
 0xbeb   :  { %v4453_v24 = vpop.f32.mrf.mxu1 }
 0xbec   :  { %11680 = vmatpush3.bf16.msra.mxu0 %v11854_v56 }
 0xbed   :  { %11681 = vmatprep.subr.bf16.mxu0 %v15912_v53  ;;  %v11711_v54 = vpop.f32.mrf.mxu1 }
 0xbef   :  { %v4456_v12 = vpop.f32.mrf.mxu1 }
 0xbf0   :  { %11682 = vmatpush3.bf16.msra.mxu0 %v11856_v62 }
 0xbf1   :  { %11683 = vmatprep.subr.bf16.mxu0 %v15912_v53  ;;  %v11712_v38 = vpop.f32.mrf.mxu1 }
 0xbf4   :  { %11684 = vmatpush3.bf16.msra.mxu0 %v11858_v14 }
 0xbf5   :  { %11685 = vmatprep.subr.bf16.mxu0 %v15912_v53 }
 0xbf8   :  { %11686 = vmatpush3.bf16.msra.mxu0 %v11860_v51  ;;  %v15914_v51 = vld [vmem:[#allocation43_spill] sm:$0xff] }
 0xbf9   :  { %11687 = vmatprep.subr.bf16.mxu0 %v15912_v53 }
 0xbfc   :  { %11688 = vmatpush3.bf16.msra.mxu0 %v11862_v5 }
 0xbfd   :  { %4563 = vmatprep.subr.bf16.mxu0 %v11865_v50 }
 0xc9f   :  { %v4242_v29 = vpop.f32.mrf.mxu0 }
 0xca0   :  { %v4282_v34 = vpack.c.bf16 %v4242_v29, %v4242_v29 }
 0xca1   :  { %v11671_v17 = vpop.f32.mrf.mxu0 }
 0xca2   :  { %11690 = vmatmul.mubr.bf16.vlgmr.msra.gmra.mxu0 %v4282_v34 }
 0xca3   :  { %v4245_v25 = vpop.f32.mrf.mxu0  ;;  %4564 = vmatpush1.bf16.msra.mxu0 %v11863_v1  ;;  %4595 = vmatprep.mubr.bf16.mxu0 %v15913_v35 }
 0xca4   :  { %4565 = vmatprep.subr.bf16.mxu0 %v11868_v15 }
 0xca5   :  { %v11672_v6 = vpop.f32.mrf.mxu0 }
 0xca7   :  { %4566 = vmatpush1.bf16.msra.mxu0 %v11866_v26 }
 0xca8   :  { %4567 = vmatprep.subr.bf16.mxu0 %v11871_v46 }
 0xcab   :  { %4568 = vmatpush1.bf16.msra.mxu0 %v11869_v43 }
 0xcac   :  { %4569 = vmatprep.subr.bf16.mxu0 %v11874_v20 }
 0xcaf   :  { %4570 = vmatpush1.bf16.msra.mxu0 %v11872_v8 }
 0xcb0   :  { %4571 = vmatprep.subr.bf16.mxu0 %v11877_v27  ;;  %v4739_v27 = vrot.slane %v15033_v28, %v13471_v22 }
 0xcb3   :  { %4572 = vmatpush1.bf16.msra.mxu0 %v11875_v33 }
 0xcb4   :  { %4573 = vmatprep.subr.bf16.mxu0 %v11880_v55 }
 0xcb7   :  { %4574 = vmatpush1.bf16.msra.mxu0 %v11878_v60 }
 0xcb8   :  { %4575 = vmatprep.subr.bf16.mxu0 %v11883_v47 }
 0xcbb   :  { %4576 = vmatpush1.bf16.msra.mxu0 %v11881_v58 }
 0xcbc   :  { %4577 = vmatprep.subr.bf16.mxu0 %v11886_v49 }
 0xcbf   :  { %4578 = vmatpush1.bf16.msra.mxu0 %v11884_v61 }
 0xcc0   :  { %11719 = vmatprep.subr.bf16.mxu0 %v15912_v53 }
 0xd62   :  { %v4365_v4 = vpop.f32.mrf.mxu0 }
 0xd63   :  { %v4454_v40 = vadd.f32 %v4453_v24, %v4365_v4 }
 0xd64   :  { %v11691_v30 = vpop.f32.mrf.mxu0 }
 0xd65   :  { %v15027_v9 = vadd.f32 %v4462_v0, %v4454_v40 }
 0xd66   :  { %v4368_v21 = vpop.f32.mrf.mxu0 }
 0xd67   :  { %v4482_v44 = vpack.c.bf16 %v15027_v9, %v15027_v9 }
 0xd68   :  { %v11692_v57 = vpop.f32.mrf.mxu0 }
 0xd69   :  { %4596 = vmatmul.mubr.bf16.vlgmr.msra.gmra.mxu0 %v4482_v44 }
 0xd6a   :  { %11721 = vmatprep.mubr.msk.bf16.mxu0 %vm13259_vm9, %v15912_v53 }
 0xe29   :  { %v4597_v37 = vpop.f32.mrf.mxu0 }
 0xe2a   :  { %v15039_v13 = vadd.f32 %v4607_v2, %v4597_v37 }
 0xe2b   :  { %v4599_v19 = vpop.f32.mrf.mxu0 }
 0xe2c   :  { %v4613_v18 = vadd.f32 %v4612_v7, %v4599_v19  ;;  %v5111_v56 = vpack.c.bf16 %v15039_v13, %v15039_v13 }
 0xe2d   :  { %v4601_v62 = vpop.f32.mrf.mxu0 }
 0xe2e   :  { %v4615_v14 = vcombine.high %v4613_v18, %v4613_v18  ;;  %v4622_v5 = vrot.slane %v4613_v18, %v15914_v51  ;;  %v5201_v50 = vsel %vm5199_vm0, %v5111_v56, 0 }
 0xe2f   :  { %v4602_v24 = vpop.f32.mrf.mxu0  ;;  %11714 = vmatpush3.bf16.msra.mxu1 %v5201_v50 }
 0xe30   :  { %v4629_v54 = vrot.slane %v4615_v14, %v15914_v51  ;;  %v4630_v12 = vcombine.high %v4622_v5, %v4622_v5  ;;  %v4638_v38 = vrot.slane %v4622_v5, %v15914_v51 }
 0xe32   :  { %v4631_v29 = vcombine.high %v4629_v54, %v4629_v54  ;;  %v4645_v1 = vrot.slane %v4629_v54, %v15914_v51  ;;  %v4652_v34 = vrot.slane %v4630_v12, %v15914_v51  ;;  %v4660_v15 = vcombine.high %v4638_v38, %v4638_v38 }
 0xe33   :  { %v4667_v17 = vrot.slane %v4638_v38, %v13455_v10 }
 0xe34   :  { %v4659_v25 = vrot.slane %v4631_v29, %v15914_v51  ;;  %v4661_v26 = vcombine.high %v4645_v1, %v4645_v1  ;;  %v4662_v46 = vcombine.high %v4652_v34, %v4652_v34  ;;  %v4671_v6 = vrot.slane %v4652_v34, %v13455_v10  ;;  %v15072_v34 = vpop.permute.xlu1 %4770 }
 0xe35   :  { %v4675_v43 = vrot.slane %v4660_v15, %v13455_v10  ;;  %v4683_v20 = vrot.slane %v4645_v1, %v13455_v10  ;;  %v4704_v8 = vadd.f32 %v4667_v17, %v15039_v13  ;;  %v4810_v1 = vrot.slane %v15011_v63, %v13507_v42 }
 0xe36   :  { %v4663_v33 = vcombine.high %v4659_v25, %v4659_v25  ;;  %v4679_v55 = vrot.slane %v4662_v46, %v13455_v10  ;;  %v4691_v60 = vrot.slane %v4661_v26, %v13455_v10  ;;  %v4705_v58 = vadd.f32 %v4671_v6, %v15039_v13 }
 0xe37   :  { %vm4712_vm8 = vcmp.gt.f32.partialorder %v4704_v8, 0.0  ;;  %v4720_v47 = vmul.f32 0.2, %v4704_v8  ;;  %v4708_v61 = vadd.f32 %v4683_v20, %v15039_v13  ;;  %v4687_v49 = vrot.slane %v4659_v25, %v13455_v10  ;;  %v15078_v25 = vpop.permute.xlu0 %4777 }
 0xe38   :  { %v4706_v3 = vadd.f32 %v4675_v43, %v15039_v13  ;;  %v4710_v23 = vadd.f32 %v4691_v60, %v15039_v13  ;;  %v4707_v41 = vadd.f32 %v4679_v55, %v15039_v13  ;;  %vm4713_vm12 = vcmp.gt.f32.partialorder %v4705_v58, 0.0  ;;  %v15074_v15 = vpop.permute.xlu1 %4784 }
 0xe39   :  { %v4728_v59 = vsel %vm4712_vm8, %v4704_v8, %v4720_v47  ;;  %v4721_v48 = vmul.f32 0.2, %v4705_v58  ;;  %vm4716_vm13 = vcmp.gt.f32.partialorder %v4708_v61, 0.0  ;;  %v4724_v52 = vmul.f32 0.2, %v4708_v61 }
 0xe3a   :  { %v4740_v31 = vmul.f32 %v4739_v27, %v4728_v59  ;;  %vm4714_vm14 = vcmp.gt.f32.partialorder %v4706_v3, 0.0  ;;  %v4722_v0 = vmul.f32 0.2, %v4706_v3  ;;  %v4726_v40 = vmul.f32 0.2, %v4710_v23 }
 0xe3b   :  { %v4729_v4 = vsel %vm4713_vm12, %v4705_v58, %v4721_v48  ;;  %v4732_v21 = vsel %vm4716_vm13, %v4708_v61, %v4724_v52  ;;  %vm4718_vm15 = vcmp.gt.f32.partialorder %v4710_v23, 0.0  ;;  %v4723_v57 = vmul.f32 0.2, %v4707_v41  ;;  %v15082_v46 = vpop.permute.xlu0 %4805 }
 0xe3c   :  { %4748 = vadd.xlane.f32.xlu1 %v4740_v31  ;;  %v4741_v30 = vmul.f32 %v4739_v27, %v4729_v4  ;;  %v4730_v44 = vsel %vm4714_vm14, %v4706_v3, %v4722_v0  ;;  %v4709_v2 = vadd.f32 %v4687_v49, %v15039_v13  ;;  %v4744_v7 = vmul.f32 %v4739_v27, %v4732_v21  ;;  %v15076_v17 = vpop.permute.xlu1 %4791 }
 0xe3d   :  { %vm4715_vm10 = vcmp.gt.f32.partialorder %v4707_v41, 0.0  ;;  %v4695_v37 = vrot.slane %v4663_v33, %v13455_v10  ;;  %v4734_v19 = vsel %vm4718_vm15, %v4710_v23, %v4726_v40  ;;  %v4742_v18 = vmul.f32 %v4739_v27, %v4730_v44 }
 0xe3e   :  { %4750 = vadd.xlane.f32.xlu0 %v4741_v30  ;;  %v4731_v56 = vsel %vm4715_vm10, %v4707_v41, %v4723_v57  ;;  %v4725_v62 = vmul.f32 0.2, %v4709_v2  ;;  %v4746_v5 = vmul.f32 %v4739_v27, %v4734_v19  ;;  %vm4717_vm11 = vcmp.gt.f32.partialorder %v4709_v2, 0.0 }
 0xe3f   :  { %v4711_v14 = vadd.f32 %v4695_v37, %v15039_v13  ;;  %v4743_v50 = vmul.f32 %v4739_v27, %v4731_v56  ;;  %v4817_v13 = vrot.slane %v15011_v63, %v13514_v45  ;;  %vm4909_vm12 = vcmask 64512  }
 0xe40   :  { %4756 = vadd.xlane.f32.xlu1 %v4744_v7  ;;  %v4733_v24 = vsel %vm4717_vm11, %v4709_v2, %v4725_v62  ;;  %v15080_v26 = vpop.permute.xlu1 %4798 }
 0xe41   :  { %v4727_v54 = vmul.f32 0.2, %v4711_v14  ;;  %vm4719_vm8 = vcmp.gt.f32.partialorder %v4711_v14, 0.0  ;;  %v4745_v12 = vmul.f32 %v4739_v27, %v4733_v24 }
 0xe42   :  { %4752 = vadd.xlane.f32.xlu0 %v4742_v18 }
 0xe43   :  { %v4735_v38 = vsel %vm4719_vm8, %v4711_v14, %v4727_v54 }
 0xe44   :  { %4760 = vadd.xlane.f32.xlu1 %v4746_v5  ;;  %v4747_v29 = vmul.f32 %v4739_v27, %v4735_v38 }
 0xe46   :  { %4754 = vadd.xlane.f32.xlu0 %v4743_v50 }
 0xe4a   :  { %4758 = vadd.xlane.f32.xlu0 %v4745_v12 }
 0xe4e   :  { %4762 = vadd.xlane.f32.xlu0 %v4747_v29 }
 0xe55   :  { %4812 = vbcast.lane.b32.xlu1 %v4810_v1, 256 }
 0xe64   :  { %4819 = vbcast.lane.b32.xlu0 %v4817_v13, 256 }
 0xec5   :  { %v4749_v6 = vpop.xlane.xlu1 %4748 }
 0xec6   :  { %v4829_v43 = vadd.f32 %v15072_v34, %v4749_v6 }
 0xec7   :  { %v4751_v20 = vpop.xlane.xlu0 %4750 }
 0xec8   :  { %v4830_v8 = vadd.f32 %v15078_v25, %v4751_v20  ;;  %4846 = vperm.xlu1 %11798, %v4829_v43  }
 0xec9   :  { %v4757_v63 = vpop.xlane.xlu1 %4756 }
 0xeca   :  { %4849 = vperm.xlu0 %11797, %v4830_v8   ;;  %v4833_v47 = vadd.f32 %v15080_v26, %v4757_v63 }
 0xecb   :  { %v4753_v27 = vpop.xlane.xlu0 %4752 }
 0xecc   :  { %v4831_v33 = vadd.f32 %v15074_v15, %v4753_v27 }
 0xecd   :  { %v4761_v55 = vpop.xlane.xlu1 %4760 }
 0xece   :  { %4852 = vperm.xlu1 %11798, %v4831_v33  }
 0xecf   :  { %v4755_v60 = vpop.xlane.xlu0 %4754 }
 0xed0   :  { %v4832_v58 = vadd.f32 %v15076_v17, %v4755_v60 }
 0xed1   :  { %v15089_v61 = vpop.permute.xlu1 %4812 }
 0xed2   :  { %4858 = vperm.xlu1 %11798, %v4833_v47   ;;  %4855 = vperm.xlu0 %11797, %v4832_v58   ;;  %v4835_v3 = vadd.f32 %v15089_v61, %v4761_v55 }
 0xed3   :  { %v4759_v49 = vpop.xlane.xlu0 %4758 }
 0xed4   :  { %v4834_v23 = vadd.f32 %v15082_v46, %v4759_v49 }
 0xed6   :  { %4864 = vperm.xlu1 %11798, %v4835_v3   ;;  %4861 = vperm.xlu0 %11797, %v4834_v23  }
 0xed7   :  { %v4763_v41 = vpop.xlane.xlu0 %4762 }
 0xedb   :  { %v15093_v59 = vpop.permute.xlu0 %4819 }
 0xedc   :  { %v4836_v48 = vadd.f32 %v15093_v59, %v4763_v41 }
 0xede   :  { %4867 = vperm.xlu0 %11797, %v4836_v48  }
 0xf43   :  { %v4847_v31 = vpop.permute.xlu1 %4846 }
 0xf44   :  { %v4872_v44 = vrot.slane %v4847_v31, %v13867_v16 }
 0xf45   :  { %v4850_v52 = vpop.permute.xlu0 %4849 }
 0xf46   :  { %v4876_v40 = vrot.slane %v4850_v52, %v13867_v16 }
 0xf48   :  { %v4901_v7 = vsel %vm1366_vm1, %v4876_v40, %v4872_v44 }
 0xf49   :  { %v4853_v0 = vpop.permute.xlu1 %4852 }
 0xf4a   :  { %v4880_v21 = vrot.slane %v4853_v0, %v13867_v16 }
 0xf4c   :  { %v4902_v37 = vsel %vm1368_vm2, %v4880_v21, %v4901_v7 }
 0xf4d   :  { %v4856_v4 = vpop.permute.xlu0 %4855  ;;  %v4859_v30 = vpop.permute.xlu1 %4858 }
 0xf4e   :  { %v4884_v57 = vrot.slane %v4856_v4, %v13867_v16  ;;  %v4888_v19 = vrot.slane %v4859_v30, %v13867_v16 }
 0xf50   :  { %v4903_v18 = vsel %vm1370_vm3, %v4884_v57, %v4902_v37 }
 0xf51   :  { %v4862_v2 = vpop.permute.xlu0 %4861  ;;  %v4865_v56 = vpop.permute.xlu1 %4864  ;;  %v4904_v5 = vsel %vm1372_vm4, %v4888_v19, %v4903_v18 }
 0xf52   :  { %v4892_v62 = vrot.slane %v4862_v2, %v13867_v16  ;;  %v4896_v14 = vrot.slane %v4865_v56, %v13867_v16 }
 0xf54   :  { %v4905_v50 = vsel %vm1374_vm5, %v4892_v62, %v4904_v5 }
 0xf55   :  { %v4906_v12 = vsel %vm1376_vm6, %v4896_v14, %v4905_v50 }
 0xf59   :  { %v4868_v24 = vpop.permute.xlu0 %4867 }
 0xf5a   :  { %v4900_v54 = vrot.slane %v4868_v24, %v13867_v16 }
 0xf5c   :  { %v4907_v38 = vsel %vm1378_vm7, %v4900_v54, %v4906_v12 }
 0xf5d   :  { %v4910_v29 = vsel %vm4909_vm12, %v4907_v38, -inf }
 0xf5e   :  { %4911 = vmax.xlane.f32.xlu1 %v4910_v29 }
 0xfe7   :  { %v4912_v1 = vpop.xlane.xlu1 %4911 }
 0xfe8   :  { %v4917_v13 = vrot.slane %v4912_v1, %v13455_v10  ;;  %v4921_v6 = vrot.slane %v4912_v1, %v13458_v11  ;;  %v4925_v20 = vrot.slane %v4912_v1, %v13471_v22  ;;  %v4929_v60 = vrot.slane %v4912_v1, %v13486_v32 }
 0xfe9   :  { %v4933_v31 = vrot.slane %v4912_v1, %v13493_v36  ;;  %v4937_v4 = vrot.slane %v4912_v1, %v13500_v39  ;;  %v4941_v21 = vrot.slane %v4912_v1, %v13507_v42 }
 0xfea   :  { %v4954_v63 = vsub.f32 %v4829_v43, %v4917_v13  ;;  %v4955_v27 = vsub.f32 %v4830_v8, %v4921_v6  ;;  %v4956_v49 = vsub.f32 %v4831_v33, %v4925_v20  ;;  %v4957_v52 = vsub.f32 %v4832_v58, %v4929_v60 }
 0xfeb   :  { %v4958_v40 = vsub.f32 %v4833_v47, %v4933_v31  ;;  %v4959_v43 = vsub.f32 %v4834_v23, %v4937_v4  ;;  %v4945_v33 = vrot.slane %v4912_v1, %v13514_v45  ;;  %v4960_v57 = vsub.f32 %v4835_v3, %v4941_v21 }
 0xfec   :  { %v4962_v55 = vmul.f32 1.442695, %v4954_v63  ;;  %v4964_v41 = vmul.f32 1.442695, %v4955_v27  ;;  %v4966_v0 = vmul.f32 1.442695, %v4956_v49 }
 0xfed   :  { %v4968_v30 = vmul.f32 1.442695, %v4957_v52  ;;  %v4970_v8 = vmul.f32 1.442695, %v4958_v40  ;;  %v4972_v2 = vmul.f32 1.442695, %v4959_v43  ;;  %v4961_v7 = vsub.f32 %v4836_v48, %v4945_v33 }
 0xfee   :  { %12767 = vpow2.f32 %v4962_v55  ;;  %v4974_v37 = vmul.f32 1.442695, %v4960_v57 }
 0xfef   :  { %12769 = vpow2.f32 %v4964_v41  ;;  %v4976_v19 = vmul.f32 1.442695, %v4961_v7 }
 0xff0   :  { %12771 = vpow2.f32 %v4966_v0 }
 0xff1   :  { %12773 = vpow2.f32 %v4968_v30 }
 0xff2   :  { %12775 = vpow2.f32 %v4970_v8 }
 0xff3   :  { %12777 = vpow2.f32 %v4972_v2 }
 0xff4   :  { %12779 = vpow2.f32 %v4974_v37 }
 0xff5   :  { %12781 = vpow2.f32 %v4976_v19 }
 0xffb   :  { %v12768_v44 = vpop.eup %12767 }
 0xffc   :  { %4987 = vperm.xlu0 %11797, %v12768_v44   ;;  %v12770_v58 = vpop.eup %12769 }
 0xffd   :  { %v12772_v47 = vpop.eup %12771 }
 0xffe   :  { %v12774_v18 = vpop.eup %12773 }
 0xfff   :  { %v12776_v23 = vpop.eup %12775 }
0x1000   :  { %4990 = vperm.xlu0 %11797, %v12770_v58   ;;  %v12778_v56 = vpop.eup %12777 }
0x1001   :  { %v12780_v62 = vpop.eup %12779 }
0x1002   :  { %v15120_v3 = vpop.eup %12781 }
0x1004   :  { %4993 = vperm.xlu0 %11797, %v12772_v47  }
0x1008   :  { %4996 = vperm.xlu0 %11797, %v12774_v18  }
0x100c   :  { %4999 = vperm.xlu0 %11797, %v12776_v23  }
0x1010   :  { %5002 = vperm.xlu0 %11797, %v12778_v56  }
0x1014   :  { %5005 = vperm.xlu0 %11797, %v12780_v62  }
0x1018   :  { %5008 = vperm.xlu0 %11797, %v15120_v3  }
0x1077   :  { %v4988_v48 = vpop.permute.xlu0 %4987 }
0x1078   :  { %v5013_v29 = vrot.slane %v4988_v48, %v13867_v16 }
0x107b   :  { %v4991_v14 = vpop.permute.xlu0 %4990 }
0x107c   :  { %v5017_v12 = vrot.slane %v4991_v14, %v13867_v16 }
0x107e   :  { %v5042_v20 = vsel %vm1366_vm1, %v5017_v12, %v5013_v29 }
0x107f   :  { %v4994_v5 = vpop.permute.xlu0 %4993 }
0x1080   :  { %v5021_v38 = vrot.slane %v4994_v5, %v13867_v16 }
0x1082   :  { %v5043_v27 = vsel %vm1368_vm2, %v5021_v38, %v5042_v20 }
0x1083   :  { %v4997_v50 = vpop.permute.xlu0 %4996 }
0x1084   :  { %v5025_v1 = vrot.slane %v4997_v50, %v13867_v16 }
0x1086   :  { %v5044_v60 = vsel %vm1370_vm3, %v5025_v1, %v5043_v27 }
0x1087   :  { %v5000_v24 = vpop.permute.xlu0 %4999 }
0x1088   :  { %v5029_v13 = vrot.slane %v5000_v24, %v13867_v16 }
0x108a   :  { %v5045_v49 = vsel %vm1372_vm4, %v5029_v13, %v5044_v60 }
0x108b   :  { %v5003_v54 = vpop.permute.xlu0 %5002 }
0x108c   :  { %v5033_v63 = vrot.slane %v5003_v54, %v13867_v16 }
0x108e   :  { %v5046_v31 = vsel %vm1374_vm5, %v5033_v63, %v5045_v49 }
0x108f   :  { %v5006_v6 = vpop.permute.xlu0 %5005 }
0x1090   :  { %v5037_v55 = vrot.slane %v5006_v6, %v13867_v16 }
0x1092   :  { %v5047_v0 = vsel %vm1376_vm6, %v5037_v55, %v5046_v31 }
0x1093   :  { %v5009_v41 = vpop.permute.xlu0 %5008 }
0x1094   :  { %v5041_v52 = vrot.slane %v5009_v41, %v13867_v16 }
0x1096   :  { %v5048_v4 = vsel %vm1378_vm7, %v5041_v52, %v5047_v0 }
0x1097   :  { %v5050_v40 = vsel %vm4909_vm12, %v5048_v4, 0.0 }
0x1098   :  { %5051 = vadd.xlane.f32.xlu0 %v5050_v40 }
0x1121   :  { %v5052_v30 = vpop.xlane.xlu0 %5051 }
0x1122   :  { %12783 = vrcp.f32 %v5052_v30 }
0x112f   :  { %v12784_v21 = vpop.eup %12783 }
0x1130   :  { %v5074_v43 = vrot.slane %v12784_v21, %v13493_v36  ;;  %v5058_v8 = vrot.slane %v12784_v21, %v13455_v10  ;;  %v5062_v33 = vrot.slane %v12784_v21, %v13458_v11  ;;  %v5066_v37 = vrot.slane %v12784_v21, %v13471_v22 }
0x1131   :  { %v5070_v14 = vrot.slane %v12784_v21, %v13486_v32  ;;  %v5078_v1 = vrot.slane %v12784_v21, %v13500_v39  ;;  %v5082_v13 = vrot.slane %v12784_v21, %v13507_v42  ;;  %v5086_v27 = vrot.slane %v12784_v21, %v13514_v45 }
0x1132   :  { %v5099_v57 = vmul.f32 %v12776_v23, %v5074_v43  ;;  %v5095_v2 = vmul.f32 %v12768_v44, %v5058_v8  ;;  %v5096_v7 = vmul.f32 %v12770_v58, %v5062_v33  ;;  %v5097_v54 = vmul.f32 %v12772_v47, %v5066_v37 }
0x1133   :  { %v5098_v29 = vmul.f32 %v12774_v18, %v5070_v14  ;;  %v5100_v23 = vmul.f32 %v12778_v56, %v5078_v1  ;;  %v5101_v63 = vmul.f32 %v12780_v62, %v5082_v13  ;;  %v5102_v60 = vmul.f32 %v15120_v3, %v5086_v27  ;;  %v11889_v56 = vld [vmem:[#allocation13 + $0xf4] ss:$8 sps:$4 sm:$0xff]   ;;  %v11890_v1 = vld [vmem:[#allocation13 + $0xe0] ss:$8 sps:$4 sm:$0xff]  }
0x1134   :  { %v5107_v19 = vpack.c.bf16 %v5099_v57, %v5099_v57  ;;  %v5103_v48 = vpack.c.bf16 %v5095_v2, %v5095_v2  ;;  %v5104_v24 = vpack.c.bf16 %v5096_v7, %v5096_v7  ;;  %v5105_v38 = vpack.c.bf16 %v5097_v54, %v5097_v54  ;;  %5344 = vmatprep.subr.bf16.mxu1 %v11889_v56  ;;  %v11896_v13 = vld [vmem:[#allocation13 + $0xc0] ss:$8 sps:$4 sm:$0xff]  }
0x1135   :  { %v5106_v58 = vpack.c.bf16 %v5098_v29, %v5098_v29  ;;  %v5108_v20 = vpack.c.bf16 %v5100_v23, %v5100_v23  ;;  %v5109_v55 = vpack.c.bf16 %v5101_v63, %v5101_v63  ;;  %v5110_v49 = vpack.c.bf16 %v5102_v60, %v5102_v60  ;;  %v11892_v29 = vld [vmem:[#allocation13 + $0xe4] ss:$8 sps:$4 sm:$0xff]   ;;  %v11902_v27 = vld [vmem:[#allocation13 + $0xa0] ss:$8 sps:$4 sm:$0xff]  }
0x1136   :  { %v5128_v5 = vunpack.c.l.b16 %v5107_v19  ;;  %v5124_v50 = vunpack.c.l.b16 %v5103_v48  ;;  %v5125_v12 = vunpack.c.l.b16 %v5104_v24  ;;  %v5126_v44 = vunpack.c.l.b16 %v5105_v38  ;;  %v11898_v23 = vld [vmem:[#allocation13 + $0xc4] ss:$8 sps:$4 sm:$0xff]   ;;  %v11908_v60 = vld [vmem:[#allocation13 + $0x80] ss:$8 sps:$4 sm:$0xff]  }
0x1137   :  { %v5127_v6 = vunpack.c.l.b16 %v5106_v58  ;;  %v5129_v47 = vunpack.c.l.b16 %v5108_v20  ;;  %v5130_v18 = vunpack.c.l.b16 %v5109_v55  ;;  %v5131_v41 = vunpack.c.l.b16 %v5110_v49  ;;  %v11893_v58 = vld [vmem:[#allocation13 + $0xd0] ss:$8 sps:$4 sm:$0xff]   ;;  %v11904_v63 = vld [vmem:[#allocation13 + $0xa4] ss:$8 sps:$4 sm:$0xff]  }
0x1138   :  { %5145 = vperm.xlu0 %11797, %v5128_v5   ;;  %5133 = vperm.xlu1 %11798, %v5124_v50   ;;  %v11899_v20 = vld [vmem:[#allocation13 + $0xb0] ss:$8 sps:$4 sm:$0xff]   ;;  %v11913_v49 = vld [vmem:[#allocation16 + $0xec] ss:$16 sps:$4 sm:$0xff]  }
0x1139   :  { %v11905_v55 = vld [vmem:[#allocation13 + $0x90] ss:$8 sps:$4 sm:$0xff]  }
0x113c   :  { %5136 = vperm.xlu1 %11798, %v5125_v12   ;;  %v11887_v12 = vld [vmem:[#allocation13 + $0xf0] ss:$8 sps:$4 sm:$0xff]  }
0x1140   :  { %5139 = vperm.xlu1 %11798, %v5126_v44   ;;  %v11895_v44 = vld [vmem:[#allocation13 + $0xd4] ss:$8 sps:$4 sm:$0xff]  }
0x1144   :  { %5142 = vperm.xlu1 %11798, %v5127_v6   ;;  %v11901_v6 = vld [vmem:[#allocation13 + $0xb4] ss:$8 sps:$4 sm:$0xff]  }
0x1148   :  { %5148 = vperm.xlu1 %11798, %v5129_v47   ;;  %v11907_v47 = vld [vmem:[#allocation13 + $0x94] ss:$8 sps:$4 sm:$0xff]  }
0x114c   :  { %5151 = vperm.xlu1 %11798, %v5130_v18   ;;  %v11910_v18 = vld [vmem:[#allocation13 + $0x84] ss:$8 sps:$4 sm:$0xff]  }
0x1150   :  { %5154 = vperm.xlu1 %11798, %v5131_v41   ;;  %v5115_v41 = vrot.slane %v15033_v28, %v13486_v32  ;;  %v11922_v28 = vld [vmem:[#allocation16 + $0x8c] ss:$16 sps:$4 sm:$0xff]  }
0x11b3   :  { %v5134_v31 = vpop.permute.xlu1 %5133  ;;  %v5146_v43 = vpop.permute.xlu0 %5145 }
0x11b4   :  { %v5159_v21 = vrot.slane %v5134_v31, %v13867_v16  ;;  %v5175_v37 = vrot.slane %v5146_v43, %v13867_v16  ;;  %v11919_v43 = vld [vmem:[#allocation16 + $0xac] ss:$16 sps:$4 sm:$0xff]  }
0x11b7   :  { %v5137_v52 = vpop.permute.xlu1 %5136 }
0x11b8   :  { %v5163_v62 = vrot.slane %v5137_v52, %v13867_v16 }
0x11ba   :  { %v5188_v8 = vsel %vm1366_vm1, %v5163_v62, %v5159_v21  ;;  %v11911_v62 = vld [vmem:[#allocation16 + $0xe8] ss:$16 sps:$4 sm:$0xff]  }
0x11bb   :  { %v5140_v0 = vpop.permute.xlu1 %5139 }
0x11bc   :  { %v5167_v40 = vrot.slane %v5140_v0, %v13867_v16 }
0x11be   :  { %v5189_v33 = vsel %vm1368_vm2, %v5167_v40, %v5188_v8  ;;  %v11917_v8 = vld [vmem:[#allocation16 + $0xa8] ss:$16 sps:$4 sm:$0xff]  }
0x11bf   :  { %v5143_v4 = vpop.permute.xlu1 %5142 }
0x11c0   :  { %v5171_v3 = vrot.slane %v5143_v4, %v13867_v16 }
0x11c2   :  { %v5190_v2 = vsel %vm1370_vm3, %v5171_v3, %v5189_v33  ;;  %v11914_v3 = vld [vmem:[#allocation16 + $0xc8] ss:$16 sps:$4 sm:$0xff]  }
0x11c3   :  { %v5149_v30 = vpop.permute.xlu1 %5148  ;;  %v5191_v48 = vsel %vm1372_vm4, %v5175_v37, %v5190_v2  ;;  %v11920_v33 = vld [vmem:[#allocation16 + $0x88] ss:$16 sps:$4 sm:$0xff]  }
0x11c4   :  { %v5179_v7 = vrot.slane %v5149_v30, %v13867_v16  ;;  %v11916_v30 = vld [vmem:[#allocation16 + $0xcc] ss:$16 sps:$4 sm:$0xff]   ;;  %v11923_v2 = vld [vmem:[#allocation16 + $0x68] ss:$16 sps:$4 sm:$0xff]  }
0x11c5   :  { %v11926_v37 = vld [vmem:[#allocation16 + $0x48] ss:$16 sps:$4 sm:$0xff]  }
0x11c6   :  { %v5192_v5 = vsel %vm1374_vm5, %v5179_v7, %v5191_v48  ;;  %v11928_v7 = vld [vmem:[#allocation16 + $0x4c] ss:$16 sps:$4 sm:$0xff]   ;;  %v11929_v48 = vld [vmem:[#allocation16 + $0x28] ss:$16 sps:$4 sm:$0xff]  }
0x11c7   :  { %v5152_v57 = vpop.permute.xlu1 %5151 }
0x11c8   :  { %v5183_v19 = vrot.slane %v5152_v57, %v13867_v16  ;;  %v11925_v57 = vld [vmem:[#allocation16 + $0x6c] ss:$16 sps:$4 sm:$0xff]  }
0x11ca   :  { %v5193_v24 = vsel %vm1376_vm6, %v5183_v19, %v5192_v5  ;;  %v11931_v19 = vld [vmem:[#allocation16 + $0x2c] ss:$16 sps:$4 sm:$0xff]   ;;  %v11932_v5 = vld [vmem:[#allocation16 + $0x8] ss:$16 sps:$4 sm:$0xff]  }
0x11cb   :  { %v5155_v14 = vpop.permute.xlu1 %5154 }
0x11cc   :  { %v5187_v50 = vrot.slane %v5155_v14, %v13867_v16  ;;  %v11934_v14 = vld [vmem:[#allocation16 + $0xc] ss:$16 sps:$4 sm:$0xff]  }
0x11ce   :  { %v5194_v54 = vsel %vm1378_vm7, %v5187_v50, %v5193_v24  ;;  %v15173_v24 = vld [vmem:[#allocation15 + $0x4] sm:$0xf] }
0x11cf   :  { %v5195_v38 = vpack.c.b16 %v5194_v54, %v5194_v54  ;;  %v5388_v54 = vrot.slane %v15173_v24, %v13455_v10 }
0x11d1   :  { %11716 = vmatmul.mubr.msk.bf16.vlgmr.msra.gmra.mxu1 %vm4909_vm12, %v5195_v38 }
0x11d2   :  { %5345 = vmatpush1.bf16.msra.mxu1 %v11887_v12  ;;  %5376 = vmatprep.mubr.bf16.mxu1 %v15913_v35  ;;  %v5393_v12 = vrot.slane %v15173_v24, %v13458_v11 }
0x11d3   :  { %5346 = vmatprep.subr.bf16.mxu1 %v11892_v29 }
0x11d6   :  { %5347 = vmatpush1.bf16.msra.mxu1 %v11890_v1 }
0x11d7   :  { %5348 = vmatprep.subr.bf16.mxu1 %v11895_v44 }
0x11da   :  { %5349 = vmatpush1.bf16.msra.mxu1 %v11893_v58 }
0x11db   :  { %5350 = vmatprep.subr.bf16.mxu1 %v11898_v23 }
0x11de   :  { %5351 = vmatpush1.bf16.msra.mxu1 %v11896_v13 }
0x11df   :  { %5352 = vmatprep.subr.bf16.mxu1 %v11901_v6 }
0x11e2   :  { %5353 = vmatpush1.bf16.msra.mxu1 %v11899_v20 }
0x11e3   :  { %5354 = vmatprep.subr.bf16.mxu1 %v11904_v63 }
0x11e6   :  { %5355 = vmatpush1.bf16.msra.mxu1 %v11902_v27 }
0x11e7   :  { %5356 = vmatprep.subr.bf16.mxu1 %v11907_v47 }
0x11ea   :  { %5357 = vmatpush1.bf16.msra.mxu1 %v11905_v55 }
0x11eb   :  { %5358 = vmatprep.subr.bf16.mxu1 %v11910_v18 }
0x11ee   :  { %5359 = vmatpush1.bf16.msra.mxu1 %v11908_v60 }
0x11ef   :  { %6273 = vmatprep.subr.bf16.mxu1 %v11913_v49 }
0x1291   :  { %v5237_v56 = vpop.f32.mrf.mxu1 }
0x1292   :  { %v5238_v31 = vadd.f32 %v5237_v56, %v5115_v41 }
0x1293   :  { %v11717_v52 = vpop.f32.mrf.mxu1 }
0x1294   :  { %v5243_v0 = vmax.f32 %v5238_v31, 0.0 }
0x1295   :  { %v5240_v4 = vpop.f32.mrf.mxu1 }
0x1296   :  { %v5263_v40 = vpack.c.bf16 %v5243_v0, %v5243_v0  ;;  %v15169_v50 = vpack.c.bf16 %v5243_v0, %v15027_v9 }
0x1297   :  { %v11718_v21 = vpop.f32.mrf.mxu1 }
0x1298   :  { %5377 = vmatmul.mubr.bf16.vlgmr.msra.gmra.mxu1 %v5263_v40 }
0x1299   :  { %6274 = vmatpush1.bf16.msra.mxu1 %v11911_v62  ;;  %6305 = vmatprep.mubr.bf16.mxu1 %v15913_v35 }
0x129a   :  { %6275 = vmatprep.subr.bf16.mxu1 %v11916_v30  ;;  %v5520_v30 = vrot.slane %v15173_v24, %v13471_v22 }
0x129d   :  { %6276 = vmatpush1.bf16.msra.mxu1 %v11914_v3 }
0x129e   :  { %6277 = vmatprep.subr.bf16.mxu1 %v11919_v43 }
0x12a1   :  { %6278 = vmatpush1.bf16.msra.mxu1 %v11917_v8 }
0x12a2   :  { %6279 = vmatprep.subr.bf16.mxu1 %v11922_v28 }
0x12a5   :  { %6280 = vmatpush1.bf16.msra.mxu1 %v11920_v33 }
0x12a6   :  { %6281 = vmatprep.subr.bf16.mxu1 %v11925_v57 }
0x12a9   :  { %6282 = vmatpush1.bf16.msra.mxu1 %v11923_v2 }
0x12aa   :  { %6283 = vmatprep.subr.bf16.mxu1 %v11928_v7 }
0x12ad   :  { %6284 = vmatpush1.bf16.msra.mxu1 %v11926_v37 }
0x12ae   :  { %6285 = vmatprep.subr.bf16.mxu1 %v11931_v19 }
0x12b1   :  { %6286 = vmatpush1.bf16.msra.mxu1 %v11929_v48 }
0x12b2   :  { %6287 = vmatprep.subr.bf16.mxu1 %v11934_v14 }
0x12b5   :  { %6288 = vmatpush1.bf16.msra.mxu1 %v11932_v5 }
0x12b8   :  { %6306 = vmatmul.mubr.bf16.vlgmr.msra.gmra.mxu1 %v15169_v50 }
0x12b9   :  { %6315 = vmatprep.mubr.bf16.mxu1 %v15913_v35 }
0x1358   :  { %v5378_v38 = vpop.f32.mrf.mxu1 }
0x1359   :  { %v15179_v29 = vadd.f32 %v5388_v54, %v5378_v38 }
0x135a   :  { %v5380_v1 = vpop.f32.mrf.mxu1 }
0x135b   :  { %v5394_v44 = vadd.f32 %v5393_v12, %v5380_v1  ;;  %v5826_v9 = vpack.c.bf16 %v15179_v29, %v15179_v29 }
0x135c   :  { %v5382_v58 = vpop.f32.mrf.mxu1 }
0x135d   :  { %v5396_v23 = vcombine.high %v5394_v44, %v5394_v44  ;;  %v5403_v13 = vrot.slane %v5394_v44, %v15914_v51  ;;  %v5915_v6 = vsel %vm5199_vm0, %v5826_v9, 0 }
0x135e   :  { %v5383_v20 = vpop.f32.mrf.mxu1  ;;  %11720 = vmatpush3.bf16.msra.mxu0 %v5915_v6 }
0x135f   :  { %v5410_v63 = vrot.slane %v5396_v23, %v15914_v51  ;;  %v5411_v27 = vcombine.high %v5403_v13, %v5403_v13  ;;  %v5419_v47 = vrot.slane %v5403_v13, %v15914_v51 }
0x1361   :  { %v5412_v55 = vcombine.high %v5410_v63, %v5410_v63  ;;  %v5426_v60 = vrot.slane %v5410_v63, %v15914_v51  ;;  %v5433_v18 = vrot.slane %v5411_v27, %v15914_v51  ;;  %v5441_v49 = vcombine.high %v5419_v47, %v5419_v47 }
0x1362   :  { %v5448_v41 = vrot.slane %v5419_v47, %v13455_v10 }
0x1363   :  { %v5440_v56 = vrot.slane %v5412_v55, %v15914_v51  ;;  %v5442_v31 = vcombine.high %v5426_v60, %v5426_v60  ;;  %v5443_v52 = vcombine.high %v5433_v18, %v5433_v18  ;;  %v5452_v0 = vrot.slane %v5433_v18, %v13455_v10 }
0x1364   :  { %v5456_v4 = vrot.slane %v5441_v49, %v13455_v10  ;;  %v5464_v62 = vrot.slane %v5426_v60, %v13455_v10  ;;  %v5485_v40 = vadd.f32 %v5448_v41, %v15179_v29 }
0x1365   :  { %v5460_v21 = vrot.slane %v5443_v52, %v13455_v10  ;;  %v5468_v3 = vrot.slane %v5440_v56, %v13455_v10  ;;  %v5472_v43 = vrot.slane %v5442_v31, %v13455_v10  ;;  %v5486_v8 = vadd.f32 %v5452_v0, %v15179_v29 }
0x1366   :  { %vm5493_vm0 = vcmp.gt.f32.partialorder %v5485_v40, 0.0  ;;  %v5501_v51 = vmul.f32 0.2, %v5485_v40  ;;  %v5487_v28 = vadd.f32 %v5456_v4, %v15179_v29  ;;  %v5444_v33 = vcombine.high %v5440_v56, %v5440_v56 }
0x1367   :  { %v5488_v57 = vadd.f32 %v5460_v21, %v15179_v29  ;;  %v5489_v2 = vadd.f32 %v5464_v62, %v15179_v29  ;;  %v5490_v7 = vadd.f32 %v5468_v3, %v15179_v29  ;;  %vm5494_vm13 = vcmp.gt.f32.partialorder %v5486_v8, 0.0 }
0x1368   :  { %v5509_v37 = vsel %vm5493_vm0, %v5485_v40, %v5501_v51  ;;  %v5502_v19 = vmul.f32 0.2, %v5486_v8  ;;  %vm5495_vm14 = vcmp.gt.f32.partialorder %v5487_v28, 0.0  ;;  %v5503_v14 = vmul.f32 0.2, %v5487_v28 }
0x1369   :  { %v5521_v48 = vmul.f32 %v5520_v30, %v5509_v37  ;;  %vm5496_vm15 = vcmp.gt.f32.partialorder %v5488_v57, 0.0  ;;  %v5504_v5 = vmul.f32 0.2, %v5488_v57  ;;  %v5505_v12 = vmul.f32 0.2, %v5489_v2 }
0x136a   :  { %v5510_v54 = vsel %vm5494_vm13, %v5486_v8, %v5502_v19  ;;  %v5491_v38 = vadd.f32 %v5472_v43, %v15179_v29  ;;  %v5511_v44 = vsel %vm5495_vm14, %v5487_v28, %v5503_v14  ;;  %vm5497_vm10 = vcmp.gt.f32.partialorder %v5489_v2, 0.0 }
0x136b   :  { %5529 = vadd.xlane.f32.xlu1 %v5521_v48  ;;  %v5522_v1 = vmul.f32 %v5520_v30, %v5510_v54  ;;  %v5512_v9 = vsel %vm5496_vm15, %v5488_v57, %v5504_v5  ;;  %v5506_v58 = vmul.f32 0.2, %v5490_v7  ;;  %v5523_v23 = vmul.f32 %v5520_v30, %v5511_v44 }
0x136c   :  { %vm5498_vm11 = vcmp.gt.f32.partialorder %v5490_v7, 0.0  ;;  %v5476_v13 = vrot.slane %v5444_v33, %v13455_v10  ;;  %v5513_v6 = vsel %vm5497_vm10, %v5489_v2, %v5505_v12  ;;  %v5507_v20 = vmul.f32 0.2, %v5491_v38 }
0x136d   :  { %5531 = vadd.xlane.f32.xlu0 %v5522_v1  ;;  %v5524_v63 = vmul.f32 %v5520_v30, %v5512_v9  ;;  %vm5499_vm8 = vcmp.gt.f32.partialorder %v5491_v38, 0.0  ;;  %v5514_v47 = vsel %vm5498_vm11, %v5490_v7, %v5506_v58  ;;  %v5525_v55 = vmul.f32 %v5520_v30, %v5513_v6 }
0x136e   :  { %v5492_v27 = vadd.f32 %v5476_v13, %v15179_v29  ;;  %v5515_v18 = vsel %vm5499_vm8, %v5491_v38, %v5507_v20  ;;  %v5526_v49 = vmul.f32 %v5520_v30, %v5514_v47 }
0x136f   :  { %5533 = vadd.xlane.f32.xlu1 %v5523_v23  ;;  %v5527_v56 = vmul.f32 %v5520_v30, %v5515_v18 }
0x1370   :  { %vm5500_vm0 = vcmp.gt.f32.partialorder %v5492_v27, 0.0  ;;  %v5508_v60 = vmul.f32 0.2, %v5492_v27 }
0x1371   :  { %5535 = vadd.xlane.f32.xlu0 %v5524_v63 }
0x1372   :  { %v5516_v41 = vsel %vm5500_vm0, %v5492_v27, %v5508_v60 }
0x1373   :  { %5537 = vadd.xlane.f32.xlu1 %v5525_v55  ;;  %v5528_v31 = vmul.f32 %v5520_v30, %v5516_v41 }
0x1375   :  { %5539 = vadd.xlane.f32.xlu0 %v5526_v49 }
0x1377   :  { %5541 = vadd.xlane.f32.xlu1 %v5527_v56 }
0x1379   :  { %5543 = vadd.xlane.f32.xlu0 %v5528_v31 }
0x13f4   :  { %v5530_v52 = vpop.xlane.xlu1 %5529 }
0x13f5   :  { %v5545_v0 = vadd.f32 %v5530_v52, %v15072_v34 }
0x13f6   :  { %v5532_v4 = vpop.xlane.xlu0 %5531 }
0x13f7   :  { %v5546_v29 = vadd.f32 %v5532_v4, %v15078_v25  ;;  %5562 = vperm.xlu1 %11798, %v5545_v0  }
0x13f8   :  { %v5534_v62 = vpop.xlane.xlu1 %5533 }
0x13f9   :  { %v5547_v40 = vadd.f32 %v5534_v62, %v15074_v15  ;;  %5565 = vperm.xlu0 %11797, %v5546_v29  }
0x13fa   :  { %v5536_v21 = vpop.xlane.xlu0 %5535 }
0x13fb   :  { %5568 = vperm.xlu1 %11798, %v5547_v40   ;;  %v5548_v8 = vadd.f32 %v5536_v21, %v15076_v17 }
0x13fc   :  { %v5538_v3 = vpop.xlane.xlu1 %5537 }
0x13fd   :  { %v5549_v43 = vadd.f32 %v5538_v3, %v15080_v26 }
0x13fe   :  { %v5540_v51 = vpop.xlane.xlu0 %5539 }
0x13ff   :  { %v5550_v30 = vadd.f32 %v5540_v51, %v15082_v46  ;;  %5574 = vperm.xlu1 %11798, %v5549_v43  }
0x1400   :  { %v5542_v34 = vpop.xlane.xlu1 %5541 }
0x1401   :  { %5577 = vperm.xlu0 %11797, %v5550_v30   ;;  %v5551_v15 = vadd.f32 %v5542_v34, %v15089_v61 }
0x1402   :  { %v5544_v28 = vpop.xlane.xlu0 %5543 }
0x1403   :  { %v5552_v25 = vadd.f32 %v5544_v28, %v15093_v59  ;;  %5571 = vperm.xlu1 %11798, %v5548_v8  }
0x1405   :  { %5583 = vperm.xlu0 %11797, %v5552_v25  }
0x1407   :  { %5580 = vperm.xlu1 %11798, %v5551_v15  }
0x1472   :  { %v5563_v33 = vpop.permute.xlu1 %5562 }
0x1473   :  { %v5588_v46 = vrot.slane %v5563_v33, %v13867_v16 }
0x1474   :  { %v5566_v57 = vpop.permute.xlu0 %5565 }
0x1475   :  { %v5592_v26 = vrot.slane %v5566_v57, %v13867_v16 }
0x1476   :  { %v5569_v2 = vpop.permute.xlu1 %5568 }
0x1477   :  { %v5596_v17 = vrot.slane %v5569_v2, %v13867_v16  ;;  %v5617_v19 = vsel %vm1366_vm1, %v5592_v26, %v5588_v46 }
0x1479   :  { %v5618_v61 = vsel %vm1368_vm2, %v5596_v17, %v5617_v19 }
0x147a   :  { %v5575_v7 = vpop.permute.xlu1 %5574 }
0x147b   :  { %v5604_v14 = vrot.slane %v5575_v7, %v13867_v16 }
0x147c   :  { %v5578_v37 = vpop.permute.xlu0 %5577 }
0x147d   :  { %v5608_v5 = vrot.slane %v5578_v37, %v13867_v16 }
0x147e   :  { %v5572_v48 = vpop.permute.xlu1 %5571 }
0x147f   :  { %v5600_v59 = vrot.slane %v5572_v48, %v13867_v16 }
0x1480   :  { %v5584_v12 = vpop.permute.xlu0 %5583 }
0x1481   :  { %v5619_v54 = vsel %vm1370_vm3, %v5600_v59, %v5618_v61  ;;  %v5616_v58 = vrot.slane %v5584_v12, %v13867_v16 }
0x1482   :  { %v5620_v38 = vsel %vm1372_vm4, %v5604_v14, %v5619_v54  ;;  %v5581_v1 = vpop.permute.xlu1 %5580 }
0x1483   :  { %v5612_v44 = vrot.slane %v5581_v1, %v13867_v16  ;;  %v5621_v9 = vsel %vm1374_vm5, %v5608_v5, %v5620_v38 }
0x1485   :  { %v5622_v23 = vsel %vm1376_vm6, %v5612_v44, %v5621_v9 }
0x1486   :  { %v5623_v13 = vsel %vm1378_vm7, %v5616_v58, %v5622_v23 }
0x1487   :  { %v5625_v6 = vsel %vm4909_vm12, %v5623_v13, -inf }
0x1488   :  { %5626 = vmax.xlane.f32.xlu1 %v5625_v6 }
0x1511   :  { %v5627_v20 = vpop.xlane.xlu1 %5626 }
0x1512   :  { %v5632_v63 = vrot.slane %v5627_v20, %v13455_v10  ;;  %v5636_v27 = vrot.slane %v5627_v20, %v13458_v11  ;;  %v5640_v47 = vrot.slane %v5627_v20, %v13471_v22  ;;  %v5644_v49 = vrot.slane %v5627_v20, %v13486_v32 }
0x1513   :  { %v5648_v31 = vrot.slane %v5627_v20, %v13493_v36  ;;  %v5652_v62 = vrot.slane %v5627_v20, %v13500_v39  ;;  %v5656_v51 = vrot.slane %v5627_v20, %v13507_v42 }
0x1514   :  { %v5669_v55 = vsub.f32 %v5545_v0, %v5632_v63  ;;  %v5670_v60 = vsub.f32 %v5546_v29, %v5636_v27  ;;  %v5671_v41 = vsub.f32 %v5547_v40, %v5640_v47  ;;  %v5672_v52 = vsub.f32 %v5548_v8, %v5644_v49 }
0x1515   :  { %v5673_v21 = vsub.f32 %v5549_v43, %v5648_v31  ;;  %v5674_v0 = vsub.f32 %v5550_v30, %v5652_v62  ;;  %v5660_v40 = vrot.slane %v5627_v20, %v13514_v45  ;;  %v5675_v28 = vsub.f32 %v5551_v15, %v5656_v51 }
0x1516   :  { %v5677_v18 = vmul.f32 1.442695, %v5669_v55  ;;  %v5679_v56 = vmul.f32 1.442695, %v5670_v60  ;;  %v5681_v4 = vmul.f32 1.442695, %v5671_v41 }
0x1517   :  { %v5683_v3 = vmul.f32 1.442695, %v5672_v52  ;;  %v5685_v29 = vmul.f32 1.442695, %v5673_v21  ;;  %v5687_v33 = vmul.f32 1.442695, %v5674_v0  ;;  %v5676_v57 = vsub.f32 %v5552_v25, %v5660_v40 }
0x1518   :  { %12785 = vpow2.f32 %v5677_v18  ;;  %v5689_v2 = vmul.f32 1.442695, %v5675_v28 }
0x1519   :  { %12787 = vpow2.f32 %v5679_v56  ;;  %v5691_v26 = vmul.f32 1.442695, %v5676_v57 }
0x151a   :  { %12789 = vpow2.f32 %v5681_v4 }
0x151b   :  { %12791 = vpow2.f32 %v5683_v3 }
0x151c   :  { %12793 = vpow2.f32 %v5685_v29 }
0x151d   :  { %12795 = vpow2.f32 %v5687_v33 }
0x151e   :  { %12797 = vpow2.f32 %v5689_v2 }
0x151f   :  { %12799 = vpow2.f32 %v5691_v26 }
0x1525   :  { %v12786_v34 = vpop.eup %12785 }
0x1526   :  { %5702 = vperm.xlu0 %11797, %v12786_v34   ;;  %v12788_v8 = vpop.eup %12787 }
0x1527   :  { %v12790_v43 = vpop.eup %12789 }
0x1528   :  { %v12792_v7 = vpop.eup %12791 }
0x1529   :  { %v12794_v30 = vpop.eup %12793 }
0x152a   :  { %5705 = vperm.xlu0 %11797, %v12788_v8   ;;  %v12796_v46 = vpop.eup %12795 }
0x152b   :  { %v12798_v17 = vpop.eup %12797 }
0x152c   :  { %v15240_v15 = vpop.eup %12799 }
0x152e   :  { %5708 = vperm.xlu0 %11797, %v12790_v43  }
0x1532   :  { %5711 = vperm.xlu0 %11797, %v12792_v7  }
0x1536   :  { %5714 = vperm.xlu0 %11797, %v12794_v30  }
0x153a   :  { %5717 = vperm.xlu0 %11797, %v12796_v46  }
0x153e   :  { %5720 = vperm.xlu0 %11797, %v12798_v17  }
0x1542   :  { %5723 = vperm.xlu0 %11797, %v15240_v15  }
0x15a1   :  { %v5703_v25 = vpop.permute.xlu0 %5702 }
0x15a2   :  { %v5728_v54 = vrot.slane %v5703_v25, %v13867_v16 }
0x15a5   :  { %v5706_v37 = vpop.permute.xlu0 %5705 }
0x15a6   :  { %v5732_v14 = vrot.slane %v5706_v37, %v13867_v16 }
0x15a8   :  { %v5757_v44 = vsel %vm1366_vm1, %v5732_v14, %v5728_v54 }
0x15a9   :  { %v5709_v19 = vpop.permute.xlu0 %5708 }
0x15aa   :  { %v5736_v5 = vrot.slane %v5709_v19, %v13867_v16 }
0x15ac   :  { %v5758_v58 = vsel %vm1368_vm2, %v5736_v5, %v5757_v44  ;;  %v15276_v44 = vld [vmem:[#allocation16 + $0x1c8] ss:$16 sps:$4 sm:$0xff]  }
0x15ad   :  { %v5712_v48 = vpop.permute.xlu0 %5711 }
0x15ae   :  { %v5740_v12 = vrot.slane %v5712_v48, %v13867_v16 }
0x15b0   :  { %v5759_v13 = vsel %vm1370_vm3, %v5740_v12, %v5758_v58  ;;  %v15285_v58 = vld [vmem:[#allocation16 + $0x18c] ss:$16 sps:$4 sm:$0xff]  }
0x15b1   :  { %v5715_v59 = vpop.permute.xlu0 %5714 }
0x15b2   :  { %v5744_v38 = vrot.slane %v5715_v59, %v13867_v16 }
0x15b4   :  { %v5760_v6 = vsel %vm1372_vm4, %v5744_v38, %v5759_v13  ;;  %v11937_v38 = vld [vmem:[#allocation16 + $0xe4] ss:$16 sps:$4 sm:$0xff]   ;;  %v15291_v13 = vld [vmem:[#allocation16 + $0x16c] ss:$16 sps:$4 sm:$0xff]  }
0x15b5   :  { %v5718_v61 = vpop.permute.xlu0 %5717  ;;  %6222 = vmatprep.subr.bf16.mxu0 %v11937_v38  ;;  %v15320_v38 = vld [vmem:[#allocation16 + $0x1c4] ss:$16 sps:$4 sm:$0xff]  }
0x15b6   :  { %v5748_v9 = vrot.slane %v5718_v61, %v13867_v16 }
0x15b8   :  { %v5761_v63 = vsel %vm1374_vm5, %v5748_v9, %v5760_v6  ;;  %v15282_v9 = vld [vmem:[#allocation16 + $0x1a8] ss:$16 sps:$4 sm:$0xff]  }
0x15b9   :  { %v5721_v1 = vpop.permute.xlu0 %5720  ;;  %v15294_v6 = vld [vmem:[#allocation16 + $0x168] ss:$16 sps:$4 sm:$0xff]  }
0x15ba   :  { %v5752_v23 = vrot.slane %v5721_v1, %v13867_v16  ;;  %v15270_v1 = vld [vmem:[#allocation16 + $0x1ec] ss:$16 sps:$4 sm:$0xff]  }
0x15bb   :  { %6525 = vmatprep.subr.bf16.mxu1 %v15270_v1 }
0x15bc   :  { %v5762_v47 = vsel %vm1376_vm6, %v5752_v23, %v5761_v63  ;;  %v15288_v23 = vld [vmem:[#allocation16 + $0x188] ss:$16 sps:$4 sm:$0xff]  }
0x15bd   :  { %v5724_v20 = vpop.permute.xlu0 %5723 }
0x15be   :  { %v5756_v27 = vrot.slane %v5724_v20, %v13867_v16 }
0x15c0   :  { %v5763_v55 = vsel %vm1378_vm7, %v5756_v27, %v5762_v47 }
0x15c1   :  { %v5765_v60 = vsel %vm4909_vm12, %v5763_v55, 0.0 }
0x15c2   :  { %5766 = vadd.xlane.f32.xlu0 %v5765_v60 }
0x164b   :  { %v5767_v18 = vpop.xlane.xlu0 %5766 }
0x164c   :  { %12801 = vrcp.f32 %v5767_v18 }
0x1659   :  { %v12802_v49 = vpop.eup %12801 }
0x165a   :  { %v5789_v41 = vrot.slane %v12802_v49, %v13493_v36  ;;  %v5773_v56 = vrot.slane %v12802_v49, %v13455_v10  ;;  %v5777_v31 = vrot.slane %v12802_v49, %v13458_v11  ;;  %v5781_v21 = vrot.slane %v12802_v49, %v13471_v22 }
0x165b   :  { %v5785_v0 = vrot.slane %v12802_v49, %v13486_v32  ;;  %v5793_v25 = vrot.slane %v12802_v49, %v13500_v39  ;;  %v5797_v37 = vrot.slane %v12802_v49, %v13507_v42  ;;  %v5801_v61 = vrot.slane %v12802_v49, %v13514_v45  ;;  %v4202_v42 = vld [vmem:[#allocation25 + $0x8] sm:$0x77] }
0x165c   :  { %v5814_v52 = vmul.f32 %v12794_v30, %v5789_v41  ;;  %v5810_v4 = vmul.f32 %v12786_v34, %v5773_v56  ;;  %v5811_v62 = vmul.f32 %v12788_v8, %v5777_v31  ;;  %v5812_v33 = vmul.f32 %v12790_v43, %v5781_v21 }
0x165d   :  { %v5813_v26 = vmul.f32 %v12792_v7, %v5785_v0  ;;  %v5815_v30 = vmul.f32 %v12796_v46, %v5793_v25  ;;  %v5816_v59 = vmul.f32 %v12798_v17, %v5797_v37  ;;  %v5817_v5 = vmul.f32 %v15240_v15, %v5801_v61  ;;  %v15268_v46 = vld [vmem:[#allocation16 + $0x1e8] ss:$16 sps:$4 sm:$0xff]   ;;  %v15272_v17 = vld [vmem:[#allocation16 + $0x1cc] ss:$16 sps:$4 sm:$0xff]   ;;  %v11940_v25 = vld [vmem:[#allocation16 + $0xc4] ss:$16 sps:$4 sm:$0xff]  }
0x165e   :  { %v5822_v3 = vpack.c.bf16 %v5814_v52, %v5814_v52  ;;  %v5818_v51 = vpack.c.bf16 %v5810_v4, %v5810_v4  ;;  %v5819_v28 = vpack.c.bf16 %v5811_v62, %v5811_v62  ;;  %v5820_v2 = vpack.c.bf16 %v5812_v33, %v5812_v33  ;;  %6526 = vmatpush1.bf16.msra.mxu1 %v15268_v46  ;;  %v15279_v15 = vld [vmem:[#allocation16 + $0x1ac] ss:$16 sps:$4 sm:$0xff]   ;;  %v11946_v37 = vld [vmem:[#allocation16 + $0x84] ss:$16 sps:$4 sm:$0xff]   ;;  %v11950_v61 = vld [vmem:[#allocation16 + $0x40] ss:$16 sps:$4 sm:$0xff]  }
0x165f   :  { %v5821_v8 = vpack.c.bf16 %v5813_v26, %v5813_v26  ;;  %v5823_v48 = vpack.c.bf16 %v5815_v30, %v5815_v30  ;;  %v5824_v14 = vpack.c.bf16 %v5816_v59, %v5816_v59  ;;  %v5825_v54 = vpack.c.bf16 %v5817_v5, %v5817_v5  ;;  %6527 = vmatprep.subr.bf16.mxu1 %v15272_v17  ;;  %v11941_v30 = vld [vmem:[#allocation16 + $0xa0] ss:$16 sps:$4 sm:$0xff]   ;;  %v11952_v59 = vld [vmem:[#allocation16 + $0x44] ss:$16 sps:$4 sm:$0xff]  }
0x1660   :  { %v5843_v29 = vunpack.c.l.b16 %v5822_v3  ;;  %v5839_v40 = vunpack.c.l.b16 %v5818_v51  ;;  %v5840_v57 = vunpack.c.l.b16 %v5819_v28  ;;  %v5841_v34 = vunpack.c.l.b16 %v5820_v2  ;;  %v11935_v2 = vld [vmem:[#allocation16 + $0xe0] ss:$16 sps:$4 sm:$0xff]   ;;  %v11958_v5 = vld [vmem:[#allocation16 + $0x4] ss:$16 sps:$4 sm:$0xff]  }
0x1661   :  { %v5842_v19 = vunpack.c.l.b16 %v5821_v8  ;;  %v5844_v43 = vunpack.c.l.b16 %v5823_v48  ;;  %v5845_v7 = vunpack.c.l.b16 %v5824_v14  ;;  %v5846_v12 = vunpack.c.l.b16 %v5825_v54  ;;  %v11943_v8 = vld [vmem:[#allocation16 + $0xa4] ss:$16 sps:$4 sm:$0xff]   ;;  %v11947_v48 = vld [vmem:[#allocation16 + $0x60] ss:$16 sps:$4 sm:$0xff]  }
0x1662   :  { %5860 = vperm.xlu0 %11797, %v5843_v29   ;;  %5848 = vperm.xlu1 %11798, %v5839_v40   ;;  %v11953_v14 = vld [vmem:[#allocation16 + $0x20] ss:$16 sps:$4 sm:$0xff]   ;;  %v15315_v54 = vld [vmem:[#allocation16 + $0x1e4] ss:$16 sps:$4 sm:$0xff]   ;;  %v6041_v36 = vrot.slane %v4202_v42, %v13500_v39 }
0x1663   :  { %6528 = vmatpush1.bf16.msra.mxu1 %v15276_v44 }
0x1664   :  { %6529 = vmatprep.subr.bf16.mxu1 %v15279_v15 }
0x1666   :  { %5851 = vperm.xlu1 %11798, %v5840_v57  }
0x1667   :  { %6530 = vmatpush1.bf16.msra.mxu1 %v15282_v9 }
0x1668   :  { %6531 = vmatprep.subr.bf16.mxu1 %v15285_v58 }
0x166a   :  { %5854 = vperm.xlu1 %11798, %v5841_v34   ;;  %v11938_v34 = vld [vmem:[#allocation16 + $0xc0] ss:$16 sps:$4 sm:$0xff]  }
0x166b   :  { %6532 = vmatpush1.bf16.msra.mxu1 %v15288_v23 }
0x166c   :  { %6533 = vmatprep.subr.bf16.mxu1 %v15291_v13 }
0x166e   :  { %5857 = vperm.xlu1 %11798, %v5842_v19   ;;  %v11949_v19 = vld [vmem:[#allocation16 + $0x64] ss:$16 sps:$4 sm:$0xff]  }
0x166f   :  { %6534 = vmatpush1.bf16.msra.mxu1 %v15294_v6 }
0x1672   :  { %5863 = vperm.xlu1 %11798, %v5844_v43   ;;  %v11955_v43 = vld [vmem:[#allocation16 + $0x24] ss:$16 sps:$4 sm:$0xff]  }
0x1676   :  { %5866 = vperm.xlu1 %11798, %v5845_v7   ;;  %v11956_v7 = vld [vmem:[#allocation16] ss:$16 sps:$4 sm:$0xff]  }
0x167a   :  { %5869 = vperm.xlu1 %11798, %v5846_v12   ;;  %v15317_v12 = vld [vmem:[#allocation16 + $0x1e0] ss:$16 sps:$4 sm:$0xff]  }
0x16dd   :  { %v5849_v20 = vpop.permute.xlu1 %5848  ;;  %v5861_v56 = vpop.permute.xlu0 %5860 }
0x16de   :  { %v5874_v49 = vrot.slane %v5849_v20, %v13867_v16  ;;  %v5890_v3 = vrot.slane %v5861_v56, %v13867_v16  ;;  %v15324_v20 = vld [vmem:[#allocation16 + $0x1c0] ss:$16 sps:$4 sm:$0xff]   ;;  %v15353_v56 = vld [vmem:[#allocation16 + $0x14c] ss:$16 sps:$4 sm:$0xff]  }
0x16df   :  { %6535 = vmatprep.subr.bf16.mxu1 %v15353_v56 }
0x16e1   :  { %v5852_v63 = vpop.permute.xlu1 %5851 }
0x16e2   :  { %v5878_v55 = vrot.slane %v5852_v63, %v13867_v16  ;;  %v15328_v63 = vld [vmem:[#allocation16 + $0x1a4] ss:$16 sps:$4 sm:$0xff]  }
0x16e4   :  { %v5903_v31 = vsel %vm1366_vm1, %v5878_v55, %v5874_v49  ;;  %v15340_v55 = vld [vmem:[#allocation16 + $0x164] ss:$16 sps:$4 sm:$0xff]  }
0x16e5   :  { %v5855_v27 = vpop.permute.xlu1 %5854  ;;  %v15349_v49 = vld [vmem:[#allocation16 + $0x144] ss:$16 sps:$4 sm:$0xff]  }
0x16e6   :  { %v5882_v60 = vrot.slane %v5855_v27, %v13867_v16  ;;  %v15331_v27 = vld [vmem:[#allocation16 + $0x1a0] ss:$16 sps:$4 sm:$0xff]  }
0x16e8   :  { %v5904_v52 = vsel %vm1368_vm2, %v5882_v60, %v5903_v31  ;;  %v15343_v60 = vld [vmem:[#allocation16 + $0x160] ss:$16 sps:$4 sm:$0xff]  }
0x16e9   :  { %v5858_v47 = vpop.permute.xlu1 %5857  ;;  %v15359_v31 = vld [vmem:[#allocation16 + $0x120] ss:$16 sps:$4 sm:$0xff]  }
0x16ea   :  { %v5886_v41 = vrot.slane %v5858_v47, %v13867_v16  ;;  %v15334_v47 = vld [vmem:[#allocation16 + $0x184] ss:$16 sps:$4 sm:$0xff]  }
0x16ec   :  { %v5905_v62 = vsel %vm1370_vm3, %v5886_v41, %v5904_v52  ;;  %v15351_v41 = vld [vmem:[#allocation16 + $0x148] ss:$16 sps:$4 sm:$0xff]   ;;  %v15361_v52 = vld [vmem:[#allocation16 + $0x124] ss:$16 sps:$4 sm:$0xff]  }
0x16ed   :  { %v5864_v18 = vpop.permute.xlu1 %5863  ;;  %v5906_v0 = vsel %vm1372_vm4, %v5890_v3, %v5905_v62  ;;  %6536 = vmatpush1.bf16.msra.mxu1 %v15351_v41  ;;  %v15365_v62 = vld [vmem:[#allocation16 + $0x12c] ss:$16 sps:$4 sm:$0xff]  }
0x16ee   :  { %v5894_v21 = vrot.slane %v5864_v18, %v13867_v16  ;;  %v15347_v18 = vld [vmem:[#allocation16 + $0x140] ss:$16 sps:$4 sm:$0xff]   ;;  %v15370_v3 = vld [vmem:[#allocation16 + $0x10c] ss:$16 sps:$4 sm:$0xff]   ;;  %6537 = vmatprep.subr.bf16.mxu1 %v15365_v62 }
0x16f0   :  { %v5907_v40 = vsel %vm1374_vm5, %v5894_v21, %v5906_v0  ;;  %v15367_v21 = vld [vmem:[#allocation16 + $0x104] ss:$16 sps:$4 sm:$0xff]   ;;  %v15378_v0 = vld [vmem:[#allocation16 + $0x108] ss:$16 sps:$4 sm:$0xff]  }
0x16f1   :  { %v5867_v4 = vpop.permute.xlu1 %5866 }
0x16f2   :  { %v5898_v51 = vrot.slane %v5867_v4, %v13867_v16  ;;  %v15363_v4 = vld [vmem:[#allocation16 + $0x128] ss:$16 sps:$4 sm:$0xff]  }
0x16f3   :  { %6538 = vmatpush1.bf16.msra.mxu1 %v15363_v4 }
0x16f4   :  { %v5908_v33 = vsel %vm1376_vm6, %v5898_v51, %v5907_v40  ;;  %v15374_v51 = vld [vmem:[#allocation16 + $0x100] ss:$16 sps:$4 sm:$0xff]   ;;  %6539 = vmatprep.subr.bf16.mxu1 %v15370_v3 }
0x16f5   :  { %v5870_v29 = vpop.permute.xlu1 %5869 }
0x16f6   :  { %v5902_v28 = vrot.slane %v5870_v29, %v13867_v16  ;;  %v11944_v16 = vld [vmem:[#allocation16 + $0x80] ss:$16 sps:$4 sm:$0xff]   ;;  %v5830_v29 = vrot.slane %v15173_v24, %v13486_v32  ;;  %v6307_v24 = vpop.f32.mrf.mxu1 }
0x16f7   :  { %6540 = vmatpush1.bf16.msra.mxu1 %v15378_v0 }
0x16f8   :  { %v5909_v57 = vsel %vm1378_vm7, %v5902_v28, %v5908_v33  ;;  %6636 = vmatprep.subr.bf16.mxu1 %v15270_v1 }
0x16f9   :  { %v5910_v26 = vpack.c.b16 %v5909_v57, %v5909_v57 }
0x16fb   :  { %11722 = vmatmul.mubr.msk.bf16.vlgmr.msra.gmra.mxu0 %vm4909_vm12, %v5910_v26 }
0x16fc   :  { %6223 = vmatpush1.bf16.msra.mxu0 %v11935_v2  ;;  %6254 = vmatprep.mubr.bf16.mxu0 %v15913_v35 }
0x16fd   :  { %6224 = vmatprep.subr.bf16.mxu0 %v11940_v25 }
0x1700   :  { %6225 = vmatpush1.bf16.msra.mxu0 %v11938_v34 }
0x1701   :  { %6226 = vmatprep.subr.bf16.mxu0 %v11943_v8  ;;  %v6309_v8 = vpop.f32.mrf.mxu1 }
0x1704   :  { %6227 = vmatpush1.bf16.msra.mxu0 %v11941_v30 }
0x1705   :  { %6228 = vmatprep.subr.bf16.mxu0 %v11946_v37  ;;  %v15433_v37 = vpop.f32.mrf.mxu1 }
0x1708   :  { %6229 = vmatpush1.bf16.msra.mxu0 %v11944_v16 }
0x1709   :  { %6230 = vmatprep.subr.bf16.mxu0 %v11949_v19  ;;  %v15437_v19 = vpop.f32.mrf.mxu1 }
0x170c   :  { %6231 = vmatpush1.bf16.msra.mxu0 %v11947_v48 }
0x170d   :  { %6232 = vmatprep.subr.bf16.mxu0 %v11952_v59  ;;  %v12869_v59 = vld [vmem:[#allocation25] sm:$0x77] }
0x1710   :  { %6233 = vmatpush1.bf16.msra.mxu0 %v11950_v61  ;;  %v6029_v61 = vrot.slane %v12869_v59, %v13458_v11 }
0x1711   :  { %6234 = vmatprep.subr.bf16.mxu0 %v11955_v43 }
0x1714   :  { %6235 = vmatpush1.bf16.msra.mxu0 %v11953_v14 }
0x1715   :  { %6236 = vmatprep.subr.bf16.mxu0 %v11958_v5 }
0x1718   :  { %6237 = vmatpush1.bf16.msra.mxu0 %v11956_v7 }
0x1719   :  { %6484 = vmatprep.subr.bf16.mxu0 %v15315_v54 }
0x171b   :  { %6255 = vmatmul.mubr.bf16.vlgmr.msra.gmra.mxu0 %v15169_v50  ;;  %v15337_v50 = vld [vmem:[#allocation16 + $0x180] ss:$16 sps:$4 sm:$0xff]  }
0x171c   :  { %6485 = vmatpush1.bf16.msra.mxu0 %v15317_v12  ;;  %6264 = vmatprep.mubr.bf16.mxu0 %v15913_v35 }
0x171d   :  { %6486 = vmatprep.subr.bf16.mxu0 %v15320_v38 }
0x1720   :  { %6487 = vmatpush1.bf16.msra.mxu0 %v15324_v20 }
0x1721   :  { %6488 = vmatprep.subr.bf16.mxu0 %v15328_v63 }
0x1724   :  { %6489 = vmatpush1.bf16.msra.mxu0 %v15331_v27 }
0x1725   :  { %6490 = vmatprep.subr.bf16.mxu0 %v15334_v47 }
0x1728   :  { %6491 = vmatpush1.bf16.msra.mxu0 %v15337_v50 }
0x1729   :  { %6492 = vmatprep.subr.bf16.mxu0 %v15340_v55 }
0x172c   :  { %6493 = vmatpush1.bf16.msra.mxu0 %v15343_v60 }
0x172d   :  { %6494 = vmatprep.subr.bf16.mxu0 %v15349_v49 }
0x1730   :  { %6495 = vmatpush1.bf16.msra.mxu0 %v15347_v18 }
0x1731   :  { %6496 = vmatprep.subr.bf16.mxu0 %v15361_v52 }
0x1734   :  { %6497 = vmatpush1.bf16.msra.mxu0 %v15359_v31 }
0x1735   :  { %6498 = vmatprep.subr.bf16.mxu0 %v15367_v21 }
0x1738   :  { %6499 = vmatpush1.bf16.msra.mxu0 %v15374_v51 }
0x1739   :  { %6595 = vmatprep.subr.bf16.mxu0 %v15315_v54 }
0x17bb   :  { %v5951_v40 = vpop.f32.mrf.mxu0 }
0x17bc   :  { %v5952_v28 = vadd.f32 %v5951_v40, %v5830_v29 }
0x17bd   :  { %v11723_v33 = vpop.f32.mrf.mxu0 }
0x17be   :  { %v15387_v57 = vmax.f32 %v5952_v28, 0.0 }
0x17bf   :  { %v5954_v2 = vpop.f32.mrf.mxu0 }
0x17c0   :  { %15915 = vst [vmem:[#allocation44_spill] sm:$0xff] %v15387_v57  ;;  %v15391_v26 = vpack.c.bf16 %v15387_v57, %v15387_v57 }
0x17c1   :  { %v11724_v25 = vpop.f32.mrf.mxu0 }
0x17c2   :  { %6265 = vmatmul.mubr.bf16.gmra.mxu0 %v15391_v26  ;;  %6316 = vmatmul.mubr.bf16.gmra.mxu1 %v15391_v26 }
0x17c3   :  { %6516 = vmatprep.mubr.bf16.mxu0 %v15913_v35  ;;  %6557 = vmatprep.mubr.bf16.mxu1 %v15913_v35 }
0x17ca   :  { %6517 = vmatmul.mubr.bf16.vlgmr.msra.gmra.mxu0 %v15913_v35  ;;  %6558 = vmatmul.mubr.bf16.vlgmr.msra.gmra.mxu1 %v15913_v35 }
0x17cb   :  { %6596 = vmatpush1.bf16.msra.mxu0 %v15317_v12  ;;  %6637 = vmatpush1.bf16.msra.mxu1 %v15268_v46 }
0x17cc   :  { %6597 = vmatprep.subr.bf16.mxu0 %v15320_v38  ;;  %6638 = vmatprep.subr.bf16.mxu1 %v15272_v17 }
0x17cd   :  { %6627 = vmatprep.mubr.bf16.mxu0 %v15913_v35  ;;  %6668 = vmatprep.mubr.bf16.mxu1 %v15913_v35 }
0x17cf   :  { %6598 = vmatpush1.bf16.msra.mxu0 %v15324_v20  ;;  %6639 = vmatpush1.bf16.msra.mxu1 %v15276_v44 }
0x17d0   :  { %6599 = vmatprep.subr.bf16.mxu0 %v15328_v63  ;;  %6640 = vmatprep.subr.bf16.mxu1 %v15279_v15 }
0x17d3   :  { %6600 = vmatpush1.bf16.msra.mxu0 %v15331_v27  ;;  %6641 = vmatpush1.bf16.msra.mxu1 %v15282_v9 }
0x17d4   :  { %6601 = vmatprep.subr.bf16.mxu0 %v15334_v47  ;;  %6642 = vmatprep.subr.bf16.mxu1 %v15285_v58 }
0x17d7   :  { %6602 = vmatpush1.bf16.msra.mxu0 %v15337_v50  ;;  %6643 = vmatpush1.bf16.msra.mxu1 %v15288_v23 }
0x17d8   :  { %6603 = vmatprep.subr.bf16.mxu0 %v15340_v55  ;;  %6644 = vmatprep.subr.bf16.mxu1 %v15291_v13 }
0x17db   :  { %6604 = vmatpush1.bf16.msra.mxu0 %v15343_v60  ;;  %6645 = vmatpush1.bf16.msra.mxu1 %v15294_v6  ;;  %v6256_v34 = vpop.f32.mrf.mxu0 }
0x17dc   :  { %6605 = vmatprep.subr.bf16.mxu0 %v15349_v49  ;;  %6646 = vmatprep.subr.bf16.mxu1 %v15353_v56 }
0x17dd   :  { %v6258_v30 = vpop.f32.mrf.mxu0 }
0x17df   :  { %6606 = vmatpush1.bf16.msra.mxu0 %v15347_v18  ;;  %6647 = vmatpush1.bf16.msra.mxu1 %v15351_v41  ;;  %v15435_v16 = vpop.f32.mrf.mxu0 }
0x17e0   :  { %6607 = vmatprep.subr.bf16.mxu0 %v15361_v52  ;;  %6648 = vmatprep.subr.bf16.mxu1 %v15365_v62 }
0x17e1   :  { %v15439_v48 = vpop.f32.mrf.mxu0 }
0x17e3   :  { %6608 = vmatpush1.bf16.msra.mxu0 %v15359_v31  ;;  %6649 = vmatpush1.bf16.msra.mxu1 %v15363_v4 }
0x17e4   :  { %6609 = vmatprep.subr.bf16.mxu0 %v15367_v21  ;;  %6650 = vmatprep.subr.bf16.mxu1 %v15370_v3 }
0x17e7   :  { %6610 = vmatpush1.bf16.msra.mxu0 %v15374_v51  ;;  %6651 = vmatpush1.bf16.msra.mxu1 %v15378_v0 }
0x17e8   :  { %6706 = vmatprep.subr.bf16.mxu0 %v15315_v54  ;;  %6747 = vmatprep.subr.bf16.mxu1 %v15270_v1  ;;  %v6033_v1 = vrot.slane %v12869_v59, %v13500_v39  ;;  %v15452_v54 = vrot.slane %v6029_v61, %v13458_v11 }
0x17ea   :  { %v15455_v28 = vrot.slane %v6033_v1, %v13458_v11  ;;  %v6257_v25 = vadd.f32 %v6256_v34, %v15452_v54 }
0x17ec   :  { %v6259_v59 = vadd.f32 %v6258_v30, %v15455_v28 }
0x1882   :  { %v15442_v43 = vpop.f32.mrf.mxu0  ;;  %v15444_v14 = vpop.f32.mrf.mxu1 }
0x1884   :  { %v15447_v5 = vpop.f32.mrf.mxu0  ;;  %v15449_v7 = vpop.f32.mrf.mxu1 }
0x1885   :  { %15916 = vst [vmem:[#allocation45_spill] sm:$0xff] %v15449_v7  ;;  %v6037_v7 = vrot.slane %v4202_v42, %v13458_v11 }
0x1886   :  { %v6270_v29 = vpop.f32.mrf.mxu0  ;;  %v6321_v40 = vpop.f32.mrf.mxu1 }
0x1887   :  { %v15466_v30 = vrot.slane %v6037_v7, %v13458_v11 }
0x1888   :  { %v6271_v33 = vpop.f32.mrf.mxu0  ;;  %v6322_v2 = vpop.f32.mrf.mxu1 }
0x1889   :  { %v15461_v33 = vrot.slane %v6041_v36, %v13458_v11 }
0x188a   :  { %v6518_v45 = vpop.f32.mrf.mxu0  ;;  %v6559_v53 = vpop.f32.mrf.mxu1 }
0x188b   :  { %v6566_v57 = vadd.f32 %v6518_v45, %v6257_v25  ;;  %v6310_v45 = vadd.f32 %v6309_v8, %v15461_v33 }
0x188c   :  { %v6520_v32 = vpop.f32.mrf.mxu0  ;;  %v6561_v61 = vpop.f32.mrf.mxu1 }
0x188d   :  { %v11105_v22 = vmul.f32 -1.442695, %v6566_v57  ;;  %v6567_v29 = vadd.f32 %v6520_v32, %v6259_v59  ;;  %v6569_v25 = vadd.f32 %v6561_v61, %v6310_v45  ;;  %v6308_v32 = vadd.f32 %v6307_v24, %v15466_v30 }
0x188e   :  { %v6522_v40 = vpop.f32.mrf.mxu0  ;;  %v6563_v10 = vpop.f32.mrf.mxu1 }
0x188f   :  { %12803 = vpow2.f32 %v11105_v22  ;;  %v11106_v1 = vmul.f32 -1.442695, %v6567_v29  ;;  %v11107_v57 = vmul.f32 -1.442695, %v6569_v25  ;;  %v6568_v22 = vadd.f32 %v6559_v53, %v6308_v32 }
0x1890   :  { %v6523_v34 = vpop.f32.mrf.mxu0  ;;  %v6564_v2 = vpop.f32.mrf.mxu1 }
0x1891   :  { %12805 = vpow2.f32 %v11106_v1 }
0x1892   :  { %12807 = vpow2.f32 %v11107_v57 }
0x189c   :  { %v12804_v10 = vpop.eup %12803 }
0x189d   :  { %v6573_v59 = vadd.f32 1.0, %v12804_v10  ;;  %v12007_v10 = vld [vmem:[#allocation18 + $0xe0] ss:$16 sps:$4 sm:$0xff]  }
0x189e   :  { %v12806_v29 = vpop.eup %12805 }
0x189f   :  { %12809 = vrcp.f32 %v6573_v59  ;;  %v6579_v36 = vadd.f32 1.0, %v12806_v29  ;;  %v12808_v40 = vpop.eup %12807  ;;  %v12015_v29 = vld [vmem:[#allocation18 + $0xc4] ss:$16 sps:$4 sm:$0xff]  }
0x18a0   :  { %12811 = vtanh.f32 %v6568_v22  ;;  %v6586_v34 = vadd.f32 1.0, %v12808_v40  ;;  %v12010_v22 = vld [vmem:[#allocation18 + $0xe8] ss:$16 sps:$4 sm:$0xff]   ;;  %v12013_v40 = vld [vmem:[#allocation18 + $0xc0] ss:$16 sps:$4 sm:$0xff]  }
0x18a1   :  { %12813 = vrcp.f32 %v6579_v36  ;;  %v12018_v36 = vld [vmem:[#allocation18 + $0xcc] ss:$16 sps:$4 sm:$0xff]  }
0x18a2   :  { %12815 = vrcp.f32 %v6586_v34  ;;  %v12019_v34 = vld [vmem:[#allocation18 + $0xa0] ss:$16 sps:$4 sm:$0xff]  }
0x18ac   :  { %v12810_v42 = vpop.eup %12809 }
0x18ad   :  { %v12812_v1 = vpop.eup %12811 }
0x18ae   :  { %v12814_v8 = vpop.eup %12813  ;;  %v6590_v2 = vmul.f32 %v12812_v1, %v12810_v42  ;;  %v12016_v42 = vld [vmem:[#allocation18 + $0xc8] ss:$16 sps:$4 sm:$0xff]   ;;  %v12021_v1 = vld [vmem:[#allocation18 + $0xa4] ss:$16 sps:$4 sm:$0xff]  }
0x18af   :  { %v6589_v7 = vmul.f32 0.0, %v12814_v8  ;;  %v12816_v53 = vpop.eup %12815  ;;  %v12024_v8 = vld [vmem:[#allocation18 + $0xac] ss:$16 sps:$4 sm:$0xff]  }
0x18b1   :  { %v15469_v61 = vadd.f32 %v6590_v2, %v6589_v7  ;;  %v12022_v7 = vld [vmem:[#allocation18 + $0xa8] ss:$16 sps:$4 sm:$0xff]   ;;  %v12027_v2 = vld [vmem:[#allocation18 + $0x84] ss:$16 sps:$4 sm:$0xff]  }
0x18b3   :  { %12817 = vtanh.f32 %v15469_v61 }
0x18c0   :  { %v12818_v24 = vpop.eup %12817 }
0x18c1   :  { %v6593_v45 = vmul.f32 %v12818_v24, %v12816_v53  ;;  %v12025_v53 = vld [vmem:[#allocation18 + $0x80] ss:$16 sps:$4 sm:$0xff]   ;;  %v12028_v24 = vld [vmem:[#allocation18 + $0x88] ss:$16 sps:$4 sm:$0xff]  }
0x18c3   :  { %v6594_v25 = vpack.c.bf16 %v6593_v45, %v6593_v45  ;;  %v12033_v45 = vld [vmem:[#allocation18 + $0x64] ss:$16 sps:$4 sm:$0xff]  }
0x18c5   :  { %6628 = vmatmul.mubr.bf16.vlgmr.msra.gmra.mxu0 %v6594_v25  ;;  %6669 = vmatmul.mubr.bf16.vlgmr.msra.gmra.mxu1 %v6594_v25  ;;  %v12036_v25 = vld [vmem:[#allocation18 + $0x6c] ss:$16 sps:$4 sm:$0xff]  }
0x18c6   :  { %6707 = vmatpush1.bf16.msra.mxu0 %v15317_v12  ;;  %6748 = vmatpush1.bf16.msra.mxu1 %v15268_v46  ;;  %v12009_v46 = vld [vmem:[#allocation18 + $0xe4] ss:$16 sps:$4 sm:$0xff]  }
0x18c7   :  { %6708 = vmatprep.subr.bf16.mxu0 %v15320_v38  ;;  %6749 = vmatprep.subr.bf16.mxu1 %v15272_v17  ;;  %v12012_v17 = vld [vmem:[#allocation18 + $0xec] ss:$16 sps:$4 sm:$0xff]  }
0x18c8   :  { %6738 = vmatprep.mubr.bf16.mxu0 %v15913_v35  ;;  %6779 = vmatprep.mubr.bf16.mxu1 %v15913_v35 }
0x18ca   :  { %6709 = vmatpush1.bf16.msra.mxu0 %v15324_v20  ;;  %6750 = vmatpush1.bf16.msra.mxu1 %v15276_v44  ;;  %v6261_v44 = vadd.f32 %v15435_v16, %v15452_v54 }
0x18cb   :  { %6710 = vmatprep.subr.bf16.mxu0 %v15328_v63  ;;  %6751 = vmatprep.subr.bf16.mxu1 %v15279_v15 }
0x18ce   :  { %6711 = vmatpush1.bf16.msra.mxu0 %v15331_v27  ;;  %6752 = vmatpush1.bf16.msra.mxu1 %v15282_v9 }
0x18cf   :  { %6712 = vmatprep.subr.bf16.mxu0 %v15334_v47  ;;  %6753 = vmatprep.subr.bf16.mxu1 %v15285_v58  ;;  %v6263_v58 = vadd.f32 %v15439_v48, %v15455_v28 }
0x18d2   :  { %6713 = vmatpush1.bf16.msra.mxu0 %v15337_v50  ;;  %6754 = vmatpush1.bf16.msra.mxu1 %v15288_v23 }
0x18d3   :  { %6714 = vmatprep.subr.bf16.mxu0 %v15340_v55  ;;  %6755 = vmatprep.subr.bf16.mxu1 %v15291_v13  ;;  %v6314_v55 = vadd.f32 %v15437_v19, %v15461_v33 }
0x18d6   :  { %6715 = vmatpush1.bf16.msra.mxu0 %v15343_v60  ;;  %6756 = vmatpush1.bf16.msra.mxu1 %v15294_v6 }
0x18d7   :  { %6716 = vmatprep.subr.bf16.mxu0 %v15349_v49  ;;  %6757 = vmatprep.subr.bf16.mxu1 %v15353_v56 }
0x18da   :  { %6717 = vmatpush1.bf16.msra.mxu0 %v15347_v18  ;;  %6758 = vmatpush1.bf16.msra.mxu1 %v15351_v41  ;;  %v6312_v18 = vadd.f32 %v15433_v37, %v15466_v30 }
0x18db   :  { %6718 = vmatprep.subr.bf16.mxu0 %v15361_v52  ;;  %6759 = vmatprep.subr.bf16.mxu1 %v15365_v62 }
0x18de   :  { %6719 = vmatpush1.bf16.msra.mxu0 %v15359_v31  ;;  %6760 = vmatpush1.bf16.msra.mxu1 %v15363_v4 }
0x18df   :  { %6720 = vmatprep.subr.bf16.mxu0 %v15367_v21  ;;  %6761 = vmatprep.subr.bf16.mxu1 %v15370_v3 }
0x18e2   :  { %6721 = vmatpush1.bf16.msra.mxu0 %v15374_v51  ;;  %6762 = vmatpush1.bf16.msra.mxu1 %v15378_v0 }
0x18e3   :  { %7028 = vmatprep.subr.bf16.mxu0 %v12009_v46  ;;  %7069 = vmatprep.subr.bf16.mxu1 %v12012_v17  ;;  %v12031_v46 = vld [vmem:[#allocation18 + $0x60] ss:$16 sps:$4 sm:$0xff]   ;;  %v12039_v17 = vld [vmem:[#allocation18 + $0x44] ss:$16 sps:$4 sm:$0xff]  }
0x1985   :  { %v6629_v15 = vpop.f32.mrf.mxu0  ;;  %v6670_v9 = vpop.f32.mrf.mxu1 }
0x1986   :  { %v6677_v23 = vadd.f32 %v6629_v15, %v6261_v44  ;;  %v6679_v49 = vadd.f32 %v6670_v9, %v6312_v18  ;;  %v12042_v44 = vld [vmem:[#allocation18 + $0x4c] ss:$16 sps:$4 sm:$0xff]   ;;  %v12037_v15 = vld [vmem:[#allocation18 + $0x40] ss:$16 sps:$4 sm:$0xff]   ;;  %v12040_v9 = vld [vmem:[#allocation18 + $0x48] ss:$16 sps:$4 sm:$0xff]  }
0x1987   :  { %v6631_v13 = vpop.f32.mrf.mxu0  ;;  %v6672_v6 = vpop.f32.mrf.mxu1  ;;  %v12066_v18 = vld [vmem:[#allocation19 + $0x2c4] ss:$16 sps:$4 sm:$0xff]  }
0x1988   :  { %v11108_v12 = vmul.f32 -1.442695, %v6677_v23  ;;  %v6678_v38 = vadd.f32 %v6631_v13, %v6263_v58  ;;  %v6680_v60 = vadd.f32 %v6672_v6, %v6314_v55  ;;  %v12045_v58 = vld [vmem:[#allocation18 + $0x24] ss:$16 sps:$4 sm:$0xff]   ;;  %v12048_v23 = vld [vmem:[#allocation18 + $0x2c] ss:$16 sps:$4 sm:$0xff]  }
0x1989   :  { %v6633_v20 = vpop.f32.mrf.mxu0  ;;  %v6674_v63 = vpop.f32.mrf.mxu1  ;;  %v12043_v13 = vld [vmem:[#allocation18 + $0x20] ss:$16 sps:$4 sm:$0xff]   ;;  %v12046_v6 = vld [vmem:[#allocation18 + $0x28] ss:$16 sps:$4 sm:$0xff]   ;;  %v12060_v55 = vld [vmem:[#allocation19 + $0x2e4] ss:$16 sps:$4 sm:$0xff]  }
0x198a   :  { %12819 = vpow2.f32 %v11108_v12  ;;  %v11109_v27 = vmul.f32 -1.442695, %v6678_v38  ;;  %v11110_v41 = vmul.f32 -1.442695, %v6680_v60  ;;  %v12051_v12 = vld [vmem:[#allocation18 + $0x4] ss:$16 sps:$4 sm:$0xff]  }
0x198b   :  { %v6634_v47 = vpop.f32.mrf.mxu0  ;;  %v6675_v50 = vpop.f32.mrf.mxu1  ;;  %v12054_v38 = vld [vmem:[#allocation18 + $0xc] ss:$16 sps:$4 sm:$0xff]   ;;  %v12049_v20 = vld [vmem:[#allocation18] ss:$16 sps:$4 sm:$0xff]   ;;  %v12052_v63 = vld [vmem:[#allocation18 + $0x8] ss:$16 sps:$4 sm:$0xff]  }
0x198c   :  { %12821 = vpow2.f32 %v11109_v27  ;;  %v12055_v27 = vld [vmem:[#allocation19 + $0xe0] ss:$16 sps:$4 sm:$0xff]   ;;  %v12057_v47 = vld [vmem:[#allocation19 + $0xe4] ss:$16 sps:$4 sm:$0xff]  }
0x198d   :  { %12823 = vtanh.f32 %v6679_v49  ;;  %v12058_v50 = vld [vmem:[#allocation19 + $0x2e0] ss:$16 sps:$4 sm:$0xff]   ;;  %v12063_v60 = vld [vmem:[#allocation19 + $0xc4] ss:$16 sps:$4 sm:$0xff]  }
0x198e   :  { %12825 = vpow2.f32 %v11110_v41  ;;  %v12061_v49 = vld [vmem:[#allocation19 + $0xc0] ss:$16 sps:$4 sm:$0xff]  }
0x198f   :  { %v12064_v41 = vld [vmem:[#allocation19 + $0x2c0] ss:$16 sps:$4 sm:$0xff]  }
0x1997   :  { %v12820_v56 = vpop.eup %12819 }
0x1998   :  { %v6684_v31 = vadd.f32 1.0, %v12820_v56  ;;  %v12069_v56 = vld [vmem:[#allocation19 + $0xa4] ss:$16 sps:$4 sm:$0xff]  }
0x1999   :  { %v12822_v52 = vpop.eup %12821 }
0x199a   :  { %12827 = vrcp.f32 %v6684_v31  ;;  %v6690_v4 = vadd.f32 1.0, %v12822_v52  ;;  %v12824_v62 = vpop.eup %12823  ;;  %v12072_v31 = vld [vmem:[#allocation19 + $0x2a4] ss:$16 sps:$4 sm:$0xff]   ;;  %v12067_v52 = vld [vmem:[#allocation19 + $0xa0] ss:$16 sps:$4 sm:$0xff]  }
0x199b   :  { %v12826_v21 = vpop.eup %12825 }
0x199c   :  { %12829 = vrcp.f32 %v6690_v4  ;;  %v6697_v16 = vadd.f32 1.0, %v12826_v21  ;;  %v12075_v4 = vld [vmem:[#allocation19 + $0x84] ss:$16 sps:$4 sm:$0xff]   ;;  %v12073_v21 = vld [vmem:[#allocation19 + $0x80] ss:$16 sps:$4 sm:$0xff]  }
0x199e   :  { %12831 = vrcp.f32 %v6697_v16  ;;  %v12079_v16 = vld [vmem:[#allocation19 + $0x60] ss:$16 sps:$4 sm:$0xff]  }
0x19a7   :  { %v12828_v3 = vpop.eup %12827 }
0x19a8   :  { %v6701_v51 = vmul.f32 %v12828_v3, %v12824_v62  ;;  %v12078_v62 = vld [vmem:[#allocation19 + $0x284] ss:$16 sps:$4 sm:$0xff]   ;;  %v12076_v3 = vld [vmem:[#allocation19 + $0x280] ss:$16 sps:$4 sm:$0xff]  }
0x19a9   :  { %v12830_v0 = vpop.eup %12829 }
0x19aa   :  { %v6700_v19 = vmul.f32 %v12830_v0, %v15469_v61  ;;  %v12030_v61 = vld [vmem:[#allocation18 + $0x8c] ss:$16 sps:$4 sm:$0xff]   ;;  %v12084_v0 = vld [vmem:[#allocation19 + $0x264] ss:$16 sps:$4 sm:$0xff]  }
0x19ab   :  { %v12832_v37 = vpop.eup %12831 }
0x19ac   :  { %v15513_v48 = vadd.f32 %v6701_v51, %v6700_v19  ;;  %v12081_v51 = vld [vmem:[#allocation19 + $0x64] ss:$16 sps:$4 sm:$0xff]   ;;  %v12082_v19 = vld [vmem:[#allocation19 + $0x260] ss:$16 sps:$4 sm:$0xff]  }
0x19ae   :  { %12833 = vtanh.f32 %v15513_v48 }
0x19bb   :  { %v12834_v32 = vpop.eup %12833 }
0x19bc   :  { %v6704_v57 = vmul.f32 %v12834_v32, %v12832_v37  ;;  %v12087_v37 = vld [vmem:[#allocation19 + $0x44] ss:$16 sps:$4 sm:$0xff]  }
0x19bd   :  { %v12090_v32 = vld [vmem:[#allocation19 + $0x244] ss:$16 sps:$4 sm:$0xff]  }
0x19be   :  { %v6705_v59 = vpack.c.bf16 %v6704_v57, %v6704_v57  ;;  %v12085_v57 = vld [vmem:[#allocation19 + $0x40] ss:$16 sps:$4 sm:$0xff]  }
0x19c0   :  { %6739 = vmatmul.mubr.bf16.vlgmr.msra.gmra.mxu0 %v6705_v59  ;;  %6780 = vmatmul.mubr.bf16.vlgmr.msra.gmra.mxu1 %v6705_v59  ;;  %v12096_v59 = vld [vmem:[#allocation19 + $0x224] ss:$16 sps:$4 sm:$0xff]  }
0x19c1   :  { %7029 = vmatpush1.bf16.msra.mxu0 %v12007_v10  ;;  %7070 = vmatpush1.bf16.msra.mxu1 %v12010_v22  ;;  %v12088_v10 = vld [vmem:[#allocation19 + $0x240] ss:$16 sps:$4 sm:$0xff]   ;;  %v12093_v22 = vld [vmem:[#allocation19 + $0x24] ss:$16 sps:$4 sm:$0xff]  }
0x19c2   :  { %7030 = vmatprep.subr.bf16.mxu0 %v12015_v29  ;;  %7071 = vmatprep.subr.bf16.mxu1 %v12018_v36  ;;  %v12091_v29 = vld [vmem:[#allocation19 + $0x20] ss:$16 sps:$4 sm:$0xff]  }
0x19c3   :  { %7060 = vmatprep.mubr.bf16.mxu0 %v15913_v35  ;;  %7101 = vmatprep.mubr.bf16.mxu1 %v15913_v35  ;;  %v12034_v35 = vld [vmem:[#allocation18 + $0x68] ss:$16 sps:$4 sm:$0xff]   ;;  %v12094_v36 = vld [vmem:[#allocation19 + $0x220] ss:$16 sps:$4 sm:$0xff]  }
0x19c5   :  { %7031 = vmatpush1.bf16.msra.mxu0 %v12013_v40  ;;  %7072 = vmatpush1.bf16.msra.mxu1 %v12016_v42  ;;  %v12099_v40 = vld [vmem:[#allocation19 + $0x4] ss:$16 sps:$4 sm:$0xff]  }
0x19c6   :  { %7032 = vmatprep.subr.bf16.mxu0 %v12021_v1  ;;  %7073 = vmatprep.subr.bf16.mxu1 %v12024_v8  ;;  %v12102_v42 = vld [vmem:[#allocation19 + $0x204] ss:$16 sps:$4 sm:$0xff]   ;;  %v12097_v1 = vld [vmem:[#allocation19] ss:$16 sps:$4 sm:$0xff]  }
0x19c7   :  { %v12100_v8 = vld [vmem:[#allocation19 + $0x200] ss:$16 sps:$4 sm:$0xff]  }
0x19c9   :  { %7033 = vmatpush1.bf16.msra.mxu0 %v12019_v34  ;;  %7074 = vmatpush1.bf16.msra.mxu1 %v12022_v7  ;;  %v12105_v34 = vld [vmem:[#allocation19 + $0x1e4] ss:$16 sps:$4 sm:$0xff]  }
0x19ca   :  { %7034 = vmatprep.subr.bf16.mxu0 %v12027_v2  ;;  %7075 = vmatprep.subr.bf16.mxu1 %v12030_v61  ;;  %v12108_v7 = vld [vmem:[#allocation19 + $0x3e4] ss:$16 sps:$4 sm:$0xff]   ;;  %v12103_v2 = vld [vmem:[#allocation19 + $0x1e0] ss:$16 sps:$4 sm:$0xff]  }
0x19cb   :  { %v12106_v61 = vld [vmem:[#allocation19 + $0x3e0] ss:$16 sps:$4 sm:$0xff]  }
0x19cd   :  { %7035 = vmatpush1.bf16.msra.mxu0 %v12025_v53  ;;  %7076 = vmatpush1.bf16.msra.mxu1 %v12028_v24  ;;  %v12109_v53 = vld [vmem:[#allocation19 + $0x1c0] ss:$16 sps:$4 sm:$0xff]   ;;  %v12111_v24 = vld [vmem:[#allocation19 + $0x1c4] ss:$16 sps:$4 sm:$0xff]  }
0x19ce   :  { %7036 = vmatprep.subr.bf16.mxu0 %v12033_v45  ;;  %7077 = vmatprep.subr.bf16.mxu1 %v12036_v25  ;;  %v12112_v45 = vld [vmem:[#allocation19 + $0x3c0] ss:$16 sps:$4 sm:$0xff]   ;;  %v12114_v25 = vld [vmem:[#allocation19 + $0x3c4] ss:$16 sps:$4 sm:$0xff]  }
0x19d1   :  { %7037 = vmatpush1.bf16.msra.mxu0 %v12031_v46  ;;  %7078 = vmatpush1.bf16.msra.mxu1 %v12034_v35  ;;  %v12117_v46 = vld [vmem:[#allocation19 + $0x1a4] ss:$16 sps:$4 sm:$0xff]  }
0x19d2   :  { %7038 = vmatprep.subr.bf16.mxu0 %v12039_v17  ;;  %7079 = vmatprep.subr.bf16.mxu1 %v12042_v44  ;;  %v12120_v35 = vld [vmem:[#allocation19 + $0x3a4] ss:$16 sps:$4 sm:$0xff]   ;;  %v12115_v17 = vld [vmem:[#allocation19 + $0x1a0] ss:$16 sps:$4 sm:$0xff]  }
0x19d3   :  { %v12118_v44 = vld [vmem:[#allocation19 + $0x3a0] ss:$16 sps:$4 sm:$0xff]  }
0x19d5   :  { %7039 = vmatpush1.bf16.msra.mxu0 %v12037_v15  ;;  %7080 = vmatpush1.bf16.msra.mxu1 %v12040_v9  ;;  %v12123_v15 = vld [vmem:[#allocation19 + $0x184] ss:$16 sps:$4 sm:$0xff]  }
0x19d6   :  { %7040 = vmatprep.subr.bf16.mxu0 %v12045_v58  ;;  %7081 = vmatprep.subr.bf16.mxu1 %v12048_v23  ;;  %v12126_v9 = vld [vmem:[#allocation19 + $0x384] ss:$16 sps:$4 sm:$0xff]   ;;  %v12121_v58 = vld [vmem:[#allocation19 + $0x180] ss:$16 sps:$4 sm:$0xff]  }
0x19d7   :  { %v12124_v23 = vld [vmem:[#allocation19 + $0x380] ss:$16 sps:$4 sm:$0xff]  }
0x19d9   :  { %7041 = vmatpush1.bf16.msra.mxu0 %v12043_v13  ;;  %7082 = vmatpush1.bf16.msra.mxu1 %v12046_v6  ;;  %v12129_v13 = vld [vmem:[#allocation19 + $0x164] ss:$16 sps:$4 sm:$0xff]  }
0x19da   :  { %7042 = vmatprep.subr.bf16.mxu0 %v12051_v12  ;;  %7083 = vmatprep.subr.bf16.mxu1 %v12054_v38  ;;  %v12132_v6 = vld [vmem:[#allocation19 + $0x364] ss:$16 sps:$4 sm:$0xff]   ;;  %v12127_v12 = vld [vmem:[#allocation19 + $0x160] ss:$16 sps:$4 sm:$0xff]  }
0x19db   :  { %v12130_v38 = vld [vmem:[#allocation19 + $0x360] ss:$16 sps:$4 sm:$0xff]  }
0x19dd   :  { %7043 = vmatpush1.bf16.msra.mxu0 %v12049_v20  ;;  %7084 = vmatpush1.bf16.msra.mxu1 %v12052_v63  ;;  %v12135_v20 = vld [vmem:[#allocation19 + $0x144] ss:$16 sps:$4 sm:$0xff]  }
0x19de   :  { %8019 = vmatprep.subr.bf16.mxu0 %v12057_v47  ;;  %8060 = vmatprep.subr.bf16.mxu1 %v12060_v55  ;;  %v12138_v63 = vld [vmem:[#allocation19 + $0x344] ss:$16 sps:$4 sm:$0xff]   ;;  %v12136_v47 = vld [vmem:[#allocation19 + $0x340] ss:$16 sps:$4 sm:$0xff]  }
0x19df   :  { %v12144_v55 = vld [vmem:[#allocation19 + $0x324] ss:$16 sps:$4 sm:$0xff]  }
0x19e0   :  { %7061 = vmatmul.mubr.bf16.vlgmr.msra.gmra.mxu0 %v15391_v26  ;;  %7102 = vmatmul.mubr.bf16.vlgmr.msra.gmra.mxu1 %v15391_v26  ;;  %v12070_v26 = vld [vmem:[#allocation19 + $0x2a0] ss:$16 sps:$4 sm:$0xff]  }
0x19e1   :  { %8020 = vmatpush1.bf16.msra.mxu0 %v12055_v27  ;;  %8061 = vmatpush1.bf16.msra.mxu1 %v12058_v50  ;;  %v12133_v27 = vld [vmem:[#allocation19 + $0x140] ss:$16 sps:$4 sm:$0xff]   ;;  %v12141_v50 = vld [vmem:[#allocation19 + $0x124] ss:$16 sps:$4 sm:$0xff]  }
0x19e2   :  { %8021 = vmatprep.subr.bf16.mxu0 %v12063_v60  ;;  %8062 = vmatprep.subr.bf16.mxu1 %v12066_v18  ;;  %v12139_v60 = vld [vmem:[#allocation19 + $0x120] ss:$16 sps:$4 sm:$0xff]  }
0x19e3   :  { %v12142_v18 = vld [vmem:[#allocation19 + $0x320] ss:$16 sps:$4 sm:$0xff]  }
0x19e5   :  { %8022 = vmatpush1.bf16.msra.mxu0 %v12061_v49  ;;  %8063 = vmatpush1.bf16.msra.mxu1 %v12064_v41  ;;  %v12147_v49 = vld [vmem:[#allocation19 + $0x104] ss:$16 sps:$4 sm:$0xff]  }
0x19e6   :  { %8023 = vmatprep.subr.bf16.mxu0 %v12069_v56  ;;  %8064 = vmatprep.subr.bf16.mxu1 %v12072_v31  ;;  %v12150_v41 = vld [vmem:[#allocation19 + $0x304] ss:$16 sps:$4 sm:$0xff]   ;;  %v12145_v56 = vld [vmem:[#allocation19 + $0x100] ss:$16 sps:$4 sm:$0xff]  }
0x19e7   :  { %v12148_v31 = vld [vmem:[#allocation19 + $0x300] ss:$16 sps:$4 sm:$0xff]  }
0x19e9   :  { %8024 = vmatpush1.bf16.msra.mxu0 %v12067_v52  ;;  %8065 = vmatpush1.bf16.msra.mxu1 %v12070_v26  ;;  %v12153_v52 = vld [vmem:[#allocation19 + $0xec] ss:$16 sps:$4 sm:$0xff]  }
0x19ea   :  { %8025 = vmatprep.subr.bf16.mxu0 %v12075_v4  ;;  %8066 = vmatprep.subr.bf16.mxu1 %v12078_v62  ;;  %v12156_v26 = vld [vmem:[#allocation19 + $0x2ec] ss:$16 sps:$4 sm:$0xff]   ;;  %v6267_v4 = vadd.f32 %v15442_v43, %v15452_v54  ;;  %v6318_v62 = vadd.f32 %v15444_v14, %v15466_v30 }
0x19ed   :  { %8026 = vmatpush1.bf16.msra.mxu0 %v12073_v21  ;;  %8067 = vmatpush1.bf16.msra.mxu1 %v12076_v3 }
0x19ee   :  { %8027 = vmatprep.subr.bf16.mxu0 %v12081_v51  ;;  %8068 = vmatprep.subr.bf16.mxu1 %v12084_v0  ;;  %v6269_v51 = vadd.f32 %v15447_v5, %v15455_v28  ;;  %v15917_v0 = vld [vmem:[#allocation45_spill] sm:$0xff] }
0x19f1   :  { %8028 = vmatpush1.bf16.msra.mxu0 %v12079_v16  ;;  %8069 = vmatpush1.bf16.msra.mxu1 %v12082_v19  ;;  %v6320_v16 = vadd.f32 %v15917_v0, %v15461_v33 }
0x19f2   :  { %8029 = vmatprep.subr.bf16.mxu0 %v12087_v37  ;;  %8070 = vmatprep.subr.bf16.mxu1 %v12090_v32 }
0x19f5   :  { %8030 = vmatpush1.bf16.msra.mxu0 %v12085_v57  ;;  %8071 = vmatpush1.bf16.msra.mxu1 %v12088_v10 }
0x19f6   :  { %8031 = vmatprep.subr.bf16.mxu0 %v12093_v22  ;;  %8072 = vmatprep.subr.bf16.mxu1 %v12096_v59 }
0x19f9   :  { %8032 = vmatpush1.bf16.msra.mxu0 %v12091_v29  ;;  %8073 = vmatpush1.bf16.msra.mxu1 %v12094_v36 }
0x19fa   :  { %8033 = vmatprep.subr.bf16.mxu0 %v12099_v40  ;;  %8074 = vmatprep.subr.bf16.mxu1 %v12102_v42  ;;  %v15528_v42 = vld [vmem:[#allocation24] sm:$0xff] }
0x19fd   :  { %8034 = vmatpush1.bf16.msra.mxu0 %v12097_v1  ;;  %8075 = vmatpush1.bf16.msra.mxu1 %v12100_v8  ;;  %v15530_v1 = vld [vmem:[#allocation24 + $0x10] sm:$0xff]  ;;  %v15532_v8 = vld [vmem:[#allocation24 + $0x8] sm:$0xff] }
0x19fe   :  { %8035 = vmatprep.subr.bf16.mxu0 %v12105_v34  ;;  %8076 = vmatprep.subr.bf16.mxu1 %v12108_v7  ;;  %v15918_v34 = vld [vmem:[#allocation37_spill] sm:$0xff] }
0x19ff   :  { %v6855_v7 = vrot.slane %v15528_v42, %v15918_v34 }
0x1a01   :  { %8036 = vmatpush2.bf16.msra.mxu0 %v12103_v2  ;;  %8077 = vmatpush2.bf16.msra.mxu1 %v12106_v61  ;;  %v6863_v2 = vrot.slane %v15530_v1, %v15918_v34  ;;  %v15538_v61 = vld [vmem:[#allocation24 + $0x18] sm:$0xff] }
0x1a02   :  { %8037 = vmatprep.subr.bf16.mxu0 %v12111_v24  ;;  %8078 = vmatprep.subr.bf16.mxu1 %v12114_v25 }
0x1a05   :  { %8038 = vmatpush2.bf16.msra.mxu0 %v12109_v53  ;;  %8079 = vmatpush2.bf16.msra.mxu1 %v12112_v45  ;;  %v6859_v53 = vrot.slane %v15532_v8, %v15918_v34 }
0x1a06   :  { %8039 = vmatprep.subr.bf16.mxu0 %v12117_v46  ;;  %8080 = vmatprep.subr.bf16.mxu1 %v12120_v35  ;;  %v6867_v46 = vrot.slane %v15538_v61, %v15918_v34 }
0x1a09   :  { %8040 = vmatpush2.bf16.msra.mxu0 %v12115_v17  ;;  %8081 = vmatpush2.bf16.msra.mxu1 %v12118_v44 }
0x1a0a   :  { %8041 = vmatprep.subr.bf16.mxu0 %v12123_v15  ;;  %8082 = vmatprep.subr.bf16.mxu1 %v12126_v9 }
0x1a0d   :  { %8042 = vmatpush2.bf16.msra.mxu0 %v12121_v58  ;;  %8083 = vmatpush2.bf16.msra.mxu1 %v12124_v23 }
0x1a0e   :  { %8043 = vmatprep.subr.bf16.mxu0 %v12129_v13  ;;  %8084 = vmatprep.subr.bf16.mxu1 %v12132_v6 }
0x1a11   :  { %8044 = vmatpush2.bf16.msra.mxu0 %v12127_v12  ;;  %8085 = vmatpush2.bf16.msra.mxu1 %v12130_v38 }
0x1a12   :  { %8045 = vmatprep.subr.bf16.mxu0 %v12135_v20  ;;  %8086 = vmatprep.subr.bf16.mxu1 %v12138_v63 }
0x1a15   :  { %8046 = vmatpush2.bf16.msra.mxu0 %v12133_v27  ;;  %8087 = vmatpush2.bf16.msra.mxu1 %v12136_v47 }
0x1a16   :  { %8047 = vmatprep.subr.bf16.mxu0 %v12141_v50  ;;  %8088 = vmatprep.subr.bf16.mxu1 %v12144_v55 }
0x1a19   :  { %8048 = vmatpush2.bf16.msra.mxu0 %v12139_v60  ;;  %8089 = vmatpush2.bf16.msra.mxu1 %v12142_v18 }
0x1a1a   :  { %8049 = vmatprep.subr.bf16.mxu0 %v12147_v49  ;;  %8090 = vmatprep.subr.bf16.mxu1 %v12150_v41 }
0x1a1d   :  { %8050 = vmatpush2.bf16.msra.mxu0 %v12145_v56  ;;  %8091 = vmatpush2.bf16.msra.mxu1 %v12148_v31 }
0x1a1e   :  { %8101 = vmatprep.subr.bf16.mxu0 %v12153_v52  ;;  %8142 = vmatprep.subr.bf16.mxu1 %v12156_v26 }
0x1a80   :  { %v6740_v21 = vpop.f32.mrf.mxu0  ;;  %v6781_v3 = vpop.f32.mrf.mxu1 }
0x1a81   :  { %v6788_v19 = vadd.f32 %v6740_v21, %v6267_v4  ;;  %v6790_v37 = vadd.f32 %v6781_v3, %v6318_v62 }
0x1a82   :  { %v6742_v32 = vpop.f32.mrf.mxu0  ;;  %v6783_v57 = vpop.f32.mrf.mxu1 }
0x1a83   :  { %v11111_v10 = vmul.f32 -1.442695, %v6788_v19  ;;  %v6789_v22 = vadd.f32 %v6742_v32, %v6269_v51  ;;  %v6791_v59 = vadd.f32 %v6783_v57, %v6320_v16 }
0x1a84   :  { %v6744_v29 = vpop.f32.mrf.mxu0  ;;  %v6785_v43 = vpop.f32.mrf.mxu1 }
0x1a85   :  { %12835 = vpow2.f32 %v11111_v10  ;;  %v11112_v54 = vmul.f32 -1.442695, %v6789_v22  ;;  %v11113_v36 = vmul.f32 -1.442695, %v6791_v59 }
0x1a86   :  { %v6745_v14 = vpop.f32.mrf.mxu0  ;;  %v6786_v30 = vpop.f32.mrf.mxu1 }
0x1a87   :  { %12837 = vpow2.f32 %v11112_v54 }
0x1a88   :  { %12839 = vtanh.f32 %v6790_v37 }
0x1a89   :  { %12841 = vpow2.f32 %v11113_v36 }
0x1a92   :  { %v12836_v40 = vpop.eup %12835 }
0x1a93   :  { %v6795_v5 = vadd.f32 1.0, %v12836_v40 }
0x1a94   :  { %v12838_v28 = vpop.eup %12837 }
0x1a95   :  { %12843 = vrcp.f32 %v6795_v5  ;;  %v6801_v33 = vadd.f32 1.0, %v12838_v28  ;;  %v12840_v24 = vpop.eup %12839 }
0x1a96   :  { %v12842_v35 = vpop.eup %12841 }
0x1a97   :  { %12845 = vrcp.f32 %v6801_v33  ;;  %v6808_v20 = vadd.f32 1.0, %v12842_v35 }
0x1a99   :  { %12847 = vrcp.f32 %v6808_v20 }
0x1aa0   :  { %v7062_v45 = vpop.f32.mrf.mxu0  ;;  %v7103_v25 = vpop.f32.mrf.mxu1 }
0x1aa1   :  { %v7063_v17 = vadd.f32 %v7062_v45, %v6855_v7  ;;  %v7104_v44 = vadd.f32 %v7103_v25, %v6863_v2 }
0x1aa2   :  { %v12844_v15 = vpop.eup %12843  ;;  %v7064_v9 = vpop.f32.mrf.mxu0 }
0x1aa3   :  { %v7105_v58 = vpop.f32.mrf.mxu1  ;;  %v6812_v23 = vmul.f32 %v12844_v15, %v12840_v24  ;;  %v7110_v13 = vrot.slane %v7063_v17, 4  ;;  %v7122_v6 = vrot.slane %v7104_v44, 4  ;;  %v7065_v12 = vadd.f32 %v7064_v9, %v6859_v53 }
0x1aa4   :  { %v12846_v38 = vpop.eup %12845  ;;  %v7106_v63 = vadd.f32 %v7105_v58, %v6867_v46  ;;  %v7066_v27 = vpop.f32.mrf.mxu0 }
0x1aa5   :  { %v7107_v47 = vpop.f32.mrf.mxu1  ;;  %v6811_v50 = vmul.f32 %v12846_v38, %v15513_v48  ;;  %v7111_v55 = vadd.f32 %v7110_v13, %v7063_v17  ;;  %v7123_v60 = vadd.f32 %v7122_v6, %v7104_v44  ;;  %v7116_v18 = vrot.slane %v7065_v12, 4 }
0x1aa6   :  { %v7128_v49 = vrot.slane %v7106_v63, 4  ;;  %v7067_v41 = vpop.f32.mrf.mxu0  ;;  %v12848_v7 = vpop.eup %12847 }
0x1aa7   :  { %v7108_v56 = vpop.f32.mrf.mxu1  ;;  %v6813_v31 = vadd.f32 %v6812_v23, %v6811_v50  ;;  %v7112_v52 = vrot.slane %v7111_v55, 2  ;;  %v7124_v26 = vrot.slane %v7123_v60, 2  ;;  %v7117_v4 = vadd.f32 %v7116_v18, %v7065_v12 }
0x1aa8   :  { %v7129_v62 = vadd.f32 %v7128_v49, %v7106_v63 }
0x1aa9   :  { %v7113_v21 = vadd.f32 %v7112_v52, %v7111_v55  ;;  %v7125_v3 = vadd.f32 %v7124_v26, %v7123_v60  ;;  %v7118_v51 = vrot.slane %v7117_v4, 2  ;;  %12849 = vtanh.f32 %v6813_v31 }
0x1aaa   :  { %v7130_v0 = vrot.slane %v7129_v62, 2 }
0x1aab   :  { %v7114_v16 = vrot.slane %v7113_v21, 1  ;;  %v7126_v19 = vrot.slane %v7125_v3, 1  ;;  %v7119_v48 = vadd.f32 %v7118_v51, %v7117_v4 }
0x1aac   :  { %v7131_v37 = vadd.f32 %v7130_v0, %v7129_v62  ;;  %v7190_v0 = vrot.slane %v15528_v42, %v13458_v11 }
0x1aad   :  { %v7115_v32 = vadd.f32 %v7114_v16, %v7113_v21  ;;  %v7127_v57 = vadd.f32 %v7126_v19, %v7125_v3  ;;  %v7120_v10 = vrot.slane %v7119_v48, 1  ;;  %v7198_v19 = vrot.slane %v15530_v1, %v13458_v11 }
0x1aae   :  { %v7132_v22 = vrot.slane %v7131_v37, 1 }
0x1aaf   :  { %v7135_v59 = vmul.f32 0.125, %v7115_v32  ;;  %v7137_v29 = vmul.f32 0.125, %v7127_v57  ;;  %v7121_v43 = vadd.f32 %v7120_v10, %v7119_v48  ;;  %v7194_v32 = vrot.slane %v15532_v8, %v13458_v11  ;;  %v15919_v57 = vld [vmem:[#allocation38_spill] sm:$0xff] }
0x1ab0   :  { %v7133_v54 = vadd.f32 %v7132_v22, %v7131_v37  ;;  %v7210_v10 = vrot.slane %v15528_v42, %v15919_v57 }
0x1ab1   :  { %v7139_v14 = vsub.f32 %v7063_v17, %v7135_v59  ;;  %v7141_v30 = vsub.f32 %v7104_v44, %v7137_v29  ;;  %v7136_v36 = vmul.f32 0.125, %v7121_v43  ;;  %v7202_v29 = vrot.slane %v15538_v61, %v13458_v11 }
0x1ab2   :  { %v7138_v40 = vmul.f32 0.125, %v7133_v54  ;;  %v7218_v43 = vrot.slane %v15530_v1, %v15919_v57 }
0x1ab3   :  { %v7143_v5 = vmul.f32 %v7139_v14, %v7139_v14  ;;  %v7145_v28 = vmul.f32 %v7141_v30, %v7141_v30  ;;  %v7140_v33 = vsub.f32 %v7065_v12, %v7136_v36 }
0x1ab4   :  { %v7142_v34 = vsub.f32 %v7106_v63, %v7138_v40 }
0x1ab5   :  { %v7147_v2 = vrot.slane %v7143_v5, 4  ;;  %v7159_v53 = vrot.slane %v7145_v28, 4  ;;  %v7144_v24 = vmul.f32 %v7140_v33, %v7140_v33 }
0x1ab6   :  { %v12850_v45 = vpop.eup %12849  ;;  %v7146_v25 = vmul.f32 %v7142_v34, %v7142_v34 }
0x1ab7   :  { %v7148_v46 = vadd.f32 %v7147_v2, %v7143_v5  ;;  %v7160_v35 = vadd.f32 %v7159_v53, %v7145_v28  ;;  %v7153_v15 = vrot.slane %v7144_v24, 4  ;;  %v15545_v9 = vmul.f32 %v12850_v45, %v12848_v7 }
0x1ab8   :  { %v7165_v58 = vrot.slane %v7146_v25, 4  ;;  %v7222_v7 = vrot.slane %v15538_v61, %v15919_v57 }
0x1ab9   :  { %v7149_v17 = vrot.slane %v7148_v46, 2  ;;  %v7161_v44 = vrot.slane %v7160_v35, 2  ;;  %v7154_v23 = vadd.f32 %v7153_v15, %v7144_v24 }
0x1aba   :  { %v7166_v13 = vadd.f32 %v7165_v58, %v7146_v25 }
0x1abb   :  { %v7150_v6 = vadd.f32 %v7149_v17, %v7148_v46  ;;  %v7162_v38 = vadd.f32 %v7161_v44, %v7160_v35  ;;  %v7155_v12 = vrot.slane %v7154_v23, 2  ;;  %v12154_v44 = vld [vmem:[#allocation19 + $0x2e8] ss:$16 sps:$4 sm:$0xff]  }
0x1abc   :  { %v7167_v20 = vrot.slane %v7166_v13, 2 }
0x1abd   :  { %v7151_v63 = vrot.slane %v7150_v6, 1  ;;  %v7163_v27 = vrot.slane %v7162_v38, 1  ;;  %v7156_v47 = vadd.f32 %v7155_v12, %v7154_v23  ;;  %v12160_v12 = vld [vmem:[#allocation19 + $0x2c8] ss:$16 sps:$4 sm:$0xff]  }
0x1abe   :  { %v7168_v50 = vadd.f32 %v7167_v20, %v7166_v13  ;;  %v12159_v13 = vld [vmem:[#allocation19 + $0xcc] ss:$16 sps:$4 sm:$0xff]  }
0x1abf   :  { %v7152_v55 = vadd.f32 %v7151_v63, %v7150_v6  ;;  %v7164_v60 = vadd.f32 %v7163_v27, %v7162_v38  ;;  %v7157_v18 = vrot.slane %v7156_v47, 1  ;;  %v12162_v6 = vld [vmem:[#allocation19 + $0x2cc] ss:$16 sps:$4 sm:$0xff]   ;;  %v12157_v38 = vld [vmem:[#allocation19 + $0xc8] ss:$16 sps:$4 sm:$0xff]  }
0x1ac0   :  { %v7169_v49 = vrot.slane %v7168_v50, 1  ;;  %v12165_v20 = vld [vmem:[#allocation19 + $0xac] ss:$16 sps:$4 sm:$0xff]   ;;  %v12163_v27 = vld [vmem:[#allocation19 + $0xa8] ss:$16 sps:$4 sm:$0xff]  }
0x1ac1   :  { %v7171_v41 = vmul.f32 0.125, %v7152_v55  ;;  %v7173_v56 = vmul.f32 0.125, %v7164_v60  ;;  %v7158_v31 = vadd.f32 %v7157_v18, %v7156_v47  ;;  %v12168_v63 = vld [vmem:[#allocation19 + $0x2ac] ss:$16 sps:$4 sm:$0xff]   ;;  %v12166_v47 = vld [vmem:[#allocation19 + $0x2a8] ss:$16 sps:$4 sm:$0xff]  }
0x1ac2   :  { %v7170_v52 = vadd.f32 %v7169_v49, %v7168_v50  ;;  %v12171_v50 = vld [vmem:[#allocation19 + $0x8c] ss:$16 sps:$4 sm:$0xff]   ;;  %v12169_v60 = vld [vmem:[#allocation19 + $0x88] ss:$16 sps:$4 sm:$0xff]  }
0x1ac3   :  { %v7175_v26 = vadd.f32 1e-05, %v7171_v41  ;;  %v7177_v4 = vadd.f32 1e-05, %v7173_v56  ;;  %v7172_v62 = vmul.f32 0.125, %v7158_v31 }
0x1ac4   :  { %v7174_v21 = vmul.f32 0.125, %v7170_v52  ;;  %v12174_v55 = vld [vmem:[#allocation19 + $0x28c] ss:$16 sps:$4 sm:$0xff]   ;;  %v12172_v18 = vld [vmem:[#allocation19 + $0x288] ss:$16 sps:$4 sm:$0xff]  }
0x1ac5   :  { %12851 = vrsqrt.f32 %v7175_v26  ;;  %v7176_v3 = vadd.f32 1e-05, %v7172_v62  ;;  %v12177_v49 = vld [vmem:[#allocation19 + $0x6c] ss:$16 sps:$4 sm:$0xff]   ;;  %v12175_v56 = vld [vmem:[#allocation19 + $0x68] ss:$16 sps:$4 sm:$0xff]  }
0x1ac6   :  { %12853 = vrsqrt.f32 %v7177_v4  ;;  %v7178_v51 = vadd.f32 1e-05, %v7174_v21  ;;  %v12180_v41 = vld [vmem:[#allocation19 + $0x26c] ss:$16 sps:$4 sm:$0xff]   ;;  %v12178_v31 = vld [vmem:[#allocation19 + $0x268] ss:$16 sps:$4 sm:$0xff]  }
0x1ac7   :  { %12855 = vrsqrt.f32 %v7176_v3  ;;  %v12183_v52 = vld [vmem:[#allocation19 + $0x4c] ss:$16 sps:$4 sm:$0xff]   ;;  %v12181_v4 = vld [vmem:[#allocation19 + $0x48] ss:$16 sps:$4 sm:$0xff]  }
0x1ac8   :  { %12857 = vrsqrt.f32 %v7178_v51  ;;  %v12186_v26 = vld [vmem:[#allocation19 + $0x24c] ss:$16 sps:$4 sm:$0xff]   ;;  %v12184_v62 = vld [vmem:[#allocation19 + $0x248] ss:$16 sps:$4 sm:$0xff]  }
0x1ac9   :  { %v12189_v21 = vld [vmem:[#allocation19 + $0x2c] ss:$16 sps:$4 sm:$0xff]   ;;  %v12187_v51 = vld [vmem:[#allocation19 + $0x28] ss:$16 sps:$4 sm:$0xff]  }
0x1aca   :  { %v12192_v3 = vld [vmem:[#allocation19 + $0x22c] ss:$16 sps:$4 sm:$0xff]  }
0x1ad2   :  { %v12852_v16 = vpop.eup %12851 }
0x1ad3   :  { %v12854_v48 = vpop.eup %12853  ;;  %v7183_v37 = vmul.f32 %v12852_v16, %v7139_v14  ;;  %v7214_v14 = vrot.slane %v15532_v8, %v15919_v57  ;;  %v12195_v16 = vld [vmem:[#allocation19 + $0xc] ss:$16 sps:$4 sm:$0xff]  }
0x1ad4   :  { %v12856_v22 = vpop.eup %12855  ;;  %v7185_v59 = vmul.f32 %v12854_v48, %v7141_v30  ;;  %v12193_v48 = vld [vmem:[#allocation19 + $0x8] ss:$16 sps:$4 sm:$0xff]  }
0x1ad5   :  { %v12858_v54 = vpop.eup %12857  ;;  %v7203_v36 = vmul.f32 %v7190_v0, %v7183_v37  ;;  %v7184_v40 = vmul.f32 %v12856_v22, %v7140_v33  ;;  %v12151_v33 = vld [vmem:[#allocation19 + $0xe8] ss:$16 sps:$4 sm:$0xff]  }
0x1ad6   :  { %v7205_v5 = vmul.f32 %v7198_v19, %v7185_v59  ;;  %v7186_v28 = vmul.f32 %v12858_v54, %v7142_v34  ;;  %v12190_v0 = vld [vmem:[#allocation19 + $0x228] ss:$16 sps:$4 sm:$0xff]   ;;  %v12198_v19 = vld [vmem:[#allocation19 + $0x20c] ss:$16 sps:$4 sm:$0xff]  }
0x1ad7   :  { %v7204_v2 = vmul.f32 %v7194_v32, %v7184_v40  ;;  %v7223_v53 = vadd.f32 %v7210_v10, %v7203_v36  ;;  %v12196_v37 = vld [vmem:[#allocation19 + $0x208] ss:$16 sps:$4 sm:$0xff]   ;;  %v12201_v32 = vld [vmem:[#allocation19 + $0x1ec] ss:$16 sps:$4 sm:$0xff]  }
0x1ad8   :  { %v7206_v30 = vmul.f32 %v7202_v29, %v7186_v28  ;;  %v7225_v24 = vadd.f32 %v7218_v43, %v7205_v5  ;;  %v12204_v10 = vld [vmem:[#allocation19 + $0x3ec] ss:$16 sps:$4 sm:$0xff]   ;;  %v12199_v22 = vld [vmem:[#allocation19 + $0x1e8] ss:$16 sps:$4 sm:$0xff]  }
0x1ad9   :  { %v7224_v45 = vadd.f32 %v7214_v14, %v7204_v2  ;;  %v7227_v25 = vmax.f32 %v7223_v53, 0.0  ;;  %v12202_v59 = vld [vmem:[#allocation19 + $0x3e8] ss:$16 sps:$4 sm:$0xff]   ;;  %v12207_v29 = vld [vmem:[#allocation19 + $0x1cc] ss:$16 sps:$4 sm:$0xff]  }
0x1ada   :  { %v7226_v11 = vadd.f32 %v7222_v7, %v7206_v30  ;;  %v7229_v35 = vmax.f32 %v7225_v24, 0.0  ;;  %v12210_v43 = vld [vmem:[#allocation19 + $0x3cc] ss:$16 sps:$4 sm:$0xff]   ;;  %v12205_v54 = vld [vmem:[#allocation19 + $0x1c8] ss:$16 sps:$4 sm:$0xff]  }
0x1adb   :  { %v7228_v46 = vmax.f32 %v7224_v45, 0.0  ;;  %v15563_v23 = vpack.c.bf16 %v7227_v25, %v7227_v25  ;;  %v12208_v36 = vld [vmem:[#allocation19 + $0x3c8] ss:$16 sps:$4 sm:$0xff]   ;;  %v12213_v40 = vld [vmem:[#allocation19 + $0x1ac] ss:$16 sps:$4 sm:$0xff]  }
0x1adc   :  { %v7230_v15 = vmax.f32 %v7226_v11, 0.0  ;;  %v15565_v34 = vpack.c.bf16 %v7229_v35, %v7229_v35  ;;  %v12216_v14 = vld [vmem:[#allocation19 + $0x3ac] ss:$16 sps:$4 sm:$0xff]   ;;  %v12211_v5 = vld [vmem:[#allocation19 + $0x1a8] ss:$16 sps:$4 sm:$0xff]  }
0x1add   :  { %v7232_v58 = vpack.c.bf16 %v7228_v46, %v7228_v46  ;;  %v12214_v28 = vld [vmem:[#allocation19 + $0x3a8] ss:$16 sps:$4 sm:$0xff]   ;;  %v12219_v7 = vld [vmem:[#allocation19 + $0x18c] ss:$16 sps:$4 sm:$0xff]  }
0x1ade   :  { %v7234_v17 = vpack.c.bf16 %v7230_v15, %v7230_v15  ;;  %v12222_v2 = vld [vmem:[#allocation19 + $0x38c] ss:$16 sps:$4 sm:$0xff]   ;;  %v12217_v53 = vld [vmem:[#allocation19 + $0x188] ss:$16 sps:$4 sm:$0xff]  }
0x1adf   :  { %8051 = vmatprep.mubr.bf16.mxu0 %v7232_v58  ;;  %v12220_v30 = vld [vmem:[#allocation19 + $0x388] ss:$16 sps:$4 sm:$0xff]   ;;  %v12225_v24 = vld [vmem:[#allocation19 + $0x16c] ss:$16 sps:$4 sm:$0xff]  }
0x1ae0   :  { %8092 = vmatprep.mubr.bf16.mxu1 %v7234_v17  ;;  %8052 = vmatmul.mubr.bf16.vlgmr.msra.gmra.mxu0 %v15563_v23  ;;  %v12228_v45 = vld [vmem:[#allocation19 + $0x36c] ss:$16 sps:$4 sm:$0xff]   ;;  %v12223_v11 = vld [vmem:[#allocation19 + $0x168] ss:$16 sps:$4 sm:$0xff]  }
0x1ae1   :  { %8093 = vmatmul.mubr.bf16.vlgmr.msra.gmra.mxu1 %v15565_v34  ;;  %8102 = vmatpush1.bf16.msra.mxu0 %v12151_v33  ;;  %v12226_v25 = vld [vmem:[#allocation19 + $0x368] ss:$16 sps:$4 sm:$0xff]   ;;  %v12231_v46 = vld [vmem:[#allocation19 + $0x14c] ss:$16 sps:$4 sm:$0xff]  }
0x1ae2   :  { %8143 = vmatpush1.bf16.msra.mxu1 %v12154_v44  ;;  %8133 = vmatprep.mubr.bf16.mxu0 %v7232_v58  ;;  %v12234_v35 = vld [vmem:[#allocation19 + $0x34c] ss:$16 sps:$4 sm:$0xff]   ;;  %v12229_v15 = vld [vmem:[#allocation19 + $0x148] ss:$16 sps:$4 sm:$0xff]  }
0x1ae3   :  { %8174 = vmatprep.mubr.bf16.mxu1 %v7234_v17  ;;  %8103 = vmatprep.subr.bf16.mxu0 %v12159_v13  ;;  %v12232_v58 = vld [vmem:[#allocation19 + $0x348] ss:$16 sps:$4 sm:$0xff]   ;;  %v12237_v33 = vld [vmem:[#allocation19 + $0x12c] ss:$16 sps:$4 sm:$0xff]  }
0x1ae4   :  { %8144 = vmatprep.subr.bf16.mxu1 %v12162_v6  ;;  %v12240_v17 = vld [vmem:[#allocation19 + $0x32c] ss:$16 sps:$4 sm:$0xff]   ;;  %v12235_v44 = vld [vmem:[#allocation19 + $0x128] ss:$16 sps:$4 sm:$0xff]  }
0x1ae5   :  { %8104 = vmatpush1.bf16.msra.mxu0 %v12157_v38  ;;  %v12238_v13 = vld [vmem:[#allocation19 + $0x328] ss:$16 sps:$4 sm:$0xff]   ;;  %v12243_v6 = vld [vmem:[#allocation19 + $0x10c] ss:$16 sps:$4 sm:$0xff]  }
0x1ae6   :  { %8145 = vmatpush1.bf16.msra.mxu1 %v12160_v12  ;;  %8105 = vmatprep.subr.bf16.mxu0 %v12165_v20  ;;  %v12246_v38 = vld [vmem:[#allocation19 + $0x30c] ss:$16 sps:$4 sm:$0xff]   ;;  %v12241_v12 = vld [vmem:[#allocation19 + $0x108] ss:$16 sps:$4 sm:$0xff]  }
0x1ae7   :  { %8146 = vmatprep.subr.bf16.mxu1 %v12168_v63  ;;  %v12244_v20 = vld [vmem:[#allocation19 + $0x308] ss:$16 sps:$4 sm:$0xff]   ;;  %v12249_v63 = vld [vmem:[#allocation21 + $0xe4] ss:$16 sps:$4 sm:$0xff]  }
0x1ae9   :  { %8106 = vmatpush1.bf16.msra.mxu0 %v12163_v27  ;;  %v12247_v27 = vld [vmem:[#allocation21 + $0xe0] ss:$16 sps:$4 sm:$0xff]  }
0x1aea   :  { %8147 = vmatpush1.bf16.msra.mxu1 %v12166_v47  ;;  %8107 = vmatprep.subr.bf16.mxu0 %v12171_v50  ;;  %v12252_v47 = vld [vmem:[#allocation21 + $0xc4] ss:$16 sps:$4 sm:$0xff]   ;;  %v12250_v50 = vld [vmem:[#allocation21 + $0xc0] ss:$16 sps:$4 sm:$0xff]  }
0x1aeb   :  { %8148 = vmatprep.subr.bf16.mxu1 %v12174_v55  ;;  %v12255_v55 = vld [vmem:[#allocation21 + $0xa4] ss:$16 sps:$4 sm:$0xff]  }
0x1aed   :  { %8108 = vmatpush1.bf16.msra.mxu0 %v12169_v60  ;;  %v12253_v60 = vld [vmem:[#allocation21 + $0xa0] ss:$16 sps:$4 sm:$0xff]  }
0x1aee   :  { %8149 = vmatpush1.bf16.msra.mxu1 %v12172_v18  ;;  %8109 = vmatprep.subr.bf16.mxu0 %v12177_v49  ;;  %v12258_v18 = vld [vmem:[#allocation21 + $0x84] ss:$16 sps:$4 sm:$0xff]   ;;  %v12256_v49 = vld [vmem:[#allocation21 + $0x80] ss:$16 sps:$4 sm:$0xff]  }
0x1aef   :  { %8150 = vmatprep.subr.bf16.mxu1 %v12180_v41  ;;  %v12261_v41 = vld [vmem:[#allocation21 + $0x64] ss:$16 sps:$4 sm:$0xff]  }
0x1af1   :  { %8110 = vmatpush1.bf16.msra.mxu0 %v12175_v56  ;;  %v12262_v56 = vld [vmem:[#allocation21 + $0x40] ss:$16 sps:$4 sm:$0xff]  }
0x1af2   :  { %8151 = vmatpush1.bf16.msra.mxu1 %v12178_v31  ;;  %8111 = vmatprep.subr.bf16.mxu0 %v12183_v52  ;;  %v12267_v31 = vld [vmem:[#allocation21 + $0x24] ss:$16 sps:$4 sm:$0xff]   ;;  %v12265_v52 = vld [vmem:[#allocation21 + $0x20] ss:$16 sps:$4 sm:$0xff]  }
0x1af3   :  { %8152 = vmatprep.subr.bf16.mxu1 %v12186_v26  ;;  %v12270_v26 = vld [vmem:[#allocation21 + $0x4] ss:$16 sps:$4 sm:$0xff]  }
0x1af5   :  { %8112 = vmatpush1.bf16.msra.mxu0 %v12181_v4  ;;  %v12268_v4 = vld [vmem:[#allocation21] ss:$16 sps:$4 sm:$0xff]  }
0x1af6   :  { %8153 = vmatpush1.bf16.msra.mxu1 %v12184_v62  ;;  %8113 = vmatprep.subr.bf16.mxu0 %v12189_v21  ;;  %v12273_v62 = vld [vmem:[#allocation21 + $0x1e4] ss:$16 sps:$4 sm:$0xff]   ;;  %v12271_v21 = vld [vmem:[#allocation21 + $0x1e0] ss:$16 sps:$4 sm:$0xff]  }
0x1af7   :  { %8154 = vmatprep.subr.bf16.mxu1 %v12192_v3  ;;  %v12276_v3 = vld [vmem:[#allocation21 + $0x1c4] ss:$16 sps:$4 sm:$0xff]  }
0x1af9   :  { %8114 = vmatpush1.bf16.msra.mxu0 %v12187_v51  ;;  %v12274_v51 = vld [vmem:[#allocation21 + $0x1c0] ss:$16 sps:$4 sm:$0xff]  }
0x1afa   :  { %8155 = vmatpush1.bf16.msra.mxu1 %v12190_v0  ;;  %8115 = vmatprep.subr.bf16.mxu0 %v12195_v16  ;;  %v12279_v0 = vld [vmem:[#allocation21 + $0x1a4] ss:$16 sps:$4 sm:$0xff]   ;;  %v12277_v16 = vld [vmem:[#allocation21 + $0x1a0] ss:$16 sps:$4 sm:$0xff]  }
0x1afb   :  { %8156 = vmatprep.subr.bf16.mxu1 %v12198_v19  ;;  %v12282_v19 = vld [vmem:[#allocation21 + $0x184] ss:$16 sps:$4 sm:$0xff]  }
0x1afd   :  { %8116 = vmatpush1.bf16.msra.mxu0 %v12193_v48  ;;  %v12280_v48 = vld [vmem:[#allocation21 + $0x180] ss:$16 sps:$4 sm:$0xff]  }
0x1afe   :  { %8157 = vmatpush1.bf16.msra.mxu1 %v12196_v37  ;;  %8117 = vmatprep.subr.bf16.mxu0 %v12201_v32  ;;  %v12285_v37 = vld [vmem:[#allocation21 + $0x164] ss:$16 sps:$4 sm:$0xff]   ;;  %v12283_v32 = vld [vmem:[#allocation21 + $0x160] ss:$16 sps:$4 sm:$0xff]  }
0x1aff   :  { %8158 = vmatprep.subr.bf16.mxu1 %v12204_v10  ;;  %v12288_v10 = vld [vmem:[#allocation21 + $0x144] ss:$16 sps:$4 sm:$0xff]  }
0x1b01   :  { %8118 = vmatpush2.bf16.msra.mxu0 %v12199_v22  ;;  %v12286_v22 = vld [vmem:[#allocation21 + $0x140] ss:$16 sps:$4 sm:$0xff]  }
0x1b02   :  { %8159 = vmatpush2.bf16.msra.mxu1 %v12202_v59  ;;  %8119 = vmatprep.subr.bf16.mxu0 %v12207_v29  ;;  %v12291_v59 = vld [vmem:[#allocation21 + $0x124] ss:$16 sps:$4 sm:$0xff]   ;;  %v12289_v29 = vld [vmem:[#allocation21 + $0x120] ss:$16 sps:$4 sm:$0xff]  }
0x1b03   :  { %8160 = vmatprep.subr.bf16.mxu1 %v12210_v43  ;;  %v12294_v43 = vld [vmem:[#allocation21 + $0x104] ss:$16 sps:$4 sm:$0xff]  }
0x1b05   :  { %8120 = vmatpush2.bf16.msra.mxu0 %v12205_v54  ;;  %v12292_v54 = vld [vmem:[#allocation21 + $0x100] ss:$16 sps:$4 sm:$0xff]  }
0x1b06   :  { %8161 = vmatpush2.bf16.msra.mxu1 %v12208_v36  ;;  %8121 = vmatprep.subr.bf16.mxu0 %v12213_v40  ;;  %v12297_v36 = vld [vmem:[#allocation21 + $0x2e4] ss:$16 sps:$4 sm:$0xff]   ;;  %v12295_v40 = vld [vmem:[#allocation21 + $0x2e0] ss:$16 sps:$4 sm:$0xff]  }
0x1b07   :  { %8162 = vmatprep.subr.bf16.mxu1 %v12216_v14  ;;  %v12300_v14 = vld [vmem:[#allocation21 + $0xec] ss:$16 sps:$4 sm:$0xff]  }
0x1b09   :  { %8122 = vmatpush2.bf16.msra.mxu0 %v12211_v5  ;;  %v12303_v5 = vld [vmem:[#allocation21 + $0x2c4] ss:$16 sps:$4 sm:$0xff]  }
0x1b0a   :  { %8163 = vmatpush2.bf16.msra.mxu1 %v12214_v28  ;;  %8123 = vmatprep.subr.bf16.mxu0 %v12219_v7  ;;  %v12301_v28 = vld [vmem:[#allocation21 + $0x2c0] ss:$16 sps:$4 sm:$0xff]   ;;  %v12309_v7 = vld [vmem:[#allocation21 + $0x2a4] ss:$16 sps:$4 sm:$0xff]  }
0x1b0b   :  { %8164 = vmatprep.subr.bf16.mxu1 %v12222_v2  ;;  %v12307_v2 = vld [vmem:[#allocation21 + $0x2a0] ss:$16 sps:$4 sm:$0xff]  }
0x1b0d   :  { %8124 = vmatpush2.bf16.msra.mxu0 %v12217_v53  ;;  %v12315_v53 = vld [vmem:[#allocation21 + $0x284] ss:$16 sps:$4 sm:$0xff]  }
0x1b0e   :  { %8165 = vmatpush2.bf16.msra.mxu1 %v12220_v30  ;;  %8125 = vmatprep.subr.bf16.mxu0 %v12225_v24  ;;  %v12313_v30 = vld [vmem:[#allocation21 + $0x280] ss:$16 sps:$4 sm:$0xff]   ;;  %v12321_v24 = vld [vmem:[#allocation21 + $0x264] ss:$16 sps:$4 sm:$0xff]  }
0x1b0f   :  { %8166 = vmatprep.subr.bf16.mxu1 %v12228_v45  ;;  %v12319_v45 = vld [vmem:[#allocation21 + $0x260] ss:$16 sps:$4 sm:$0xff]  }
0x1b11   :  { %8126 = vmatpush2.bf16.msra.mxu0 %v12223_v11  ;;  %v12327_v11 = vld [vmem:[#allocation21 + $0x244] ss:$16 sps:$4 sm:$0xff]  }
0x1b12   :  { %8167 = vmatpush2.bf16.msra.mxu1 %v12226_v25  ;;  %8127 = vmatprep.subr.bf16.mxu0 %v12231_v46  ;;  %v12325_v25 = vld [vmem:[#allocation21 + $0x240] ss:$16 sps:$4 sm:$0xff]   ;;  %v12333_v46 = vld [vmem:[#allocation21 + $0x224] ss:$16 sps:$4 sm:$0xff]  }
0x1b13   :  { %8168 = vmatprep.subr.bf16.mxu1 %v12234_v35  ;;  %v12331_v35 = vld [vmem:[#allocation21 + $0x220] ss:$16 sps:$4 sm:$0xff]  }
0x1b15   :  { %8128 = vmatpush2.bf16.msra.mxu0 %v12229_v15  ;;  %v12339_v15 = vld [vmem:[#allocation21 + $0x204] ss:$16 sps:$4 sm:$0xff]  }
0x1b16   :  { %8169 = vmatpush2.bf16.msra.mxu1 %v12232_v58  ;;  %8129 = vmatprep.subr.bf16.mxu0 %v12237_v33  ;;  %v12337_v58 = vld [vmem:[#allocation21 + $0x200] ss:$16 sps:$4 sm:$0xff]   ;;  %v12345_v33 = vld [vmem:[#allocation21 + $0x3e4] ss:$16 sps:$4 sm:$0xff]  }
0x1b17   :  { %8170 = vmatprep.subr.bf16.mxu1 %v12240_v17  ;;  %v12343_v17 = vld [vmem:[#allocation21 + $0x3e0] ss:$16 sps:$4 sm:$0xff]  }
0x1b19   :  { %8130 = vmatpush2.bf16.msra.mxu0 %v12235_v44  ;;  %v12351_v44 = vld [vmem:[#allocation21 + $0x3c4] ss:$16 sps:$4 sm:$0xff]  }
0x1b1a   :  { %8171 = vmatpush2.bf16.msra.mxu1 %v12238_v13  ;;  %8131 = vmatprep.subr.bf16.mxu0 %v12243_v6  ;;  %v12349_v13 = vld [vmem:[#allocation21 + $0x3c0] ss:$16 sps:$4 sm:$0xff]   ;;  %v12357_v6 = vld [vmem:[#allocation21 + $0x3a4] ss:$16 sps:$4 sm:$0xff]  }
0x1b1b   :  { %8172 = vmatprep.subr.bf16.mxu1 %v12246_v38  ;;  %v12355_v38 = vld [vmem:[#allocation21 + $0x3a0] ss:$16 sps:$4 sm:$0xff]  }
0x1b1d   :  { %8132 = vmatpush2.bf16.msra.mxu0 %v12241_v12  ;;  %v15920_v12 = vld [vmem:[#allocation39_spill] sm:$0xff] }
0x1b1e   :  { %8173 = vmatpush2.bf16.msra.mxu1 %v12244_v20  ;;  %9095 = vmatprep.subr.bf16.mxu0 %v12249_v63  ;;  %v7366_v20 = vrot.slane %v15528_v42, %v15920_v12  ;;  %v12363_v63 = vld [vmem:[#allocation21 + $0x384] ss:$16 sps:$4 sm:$0xff]  }
0x1b1f   :  { %9136 = vmatprep.subr.bf16.mxu1 %v12297_v36 }
0x1b20   :  { %8134 = vmatmul.mubr.bf16.vlgmr.msra.gmra.mxu0 %v15563_v23  ;;  %v12259_v23 = vld [vmem:[#allocation21 + $0x60] ss:$16 sps:$4 sm:$0xff]  }
0x1b21   :  { %8175 = vmatmul.mubr.bf16.vlgmr.msra.gmra.mxu1 %v15565_v34  ;;  %9096 = vmatpush1.bf16.msra.mxu0 %v12247_v27  ;;  %v12264_v34 = vld [vmem:[#allocation21 + $0x44] ss:$16 sps:$4 sm:$0xff]   ;;  %v7370_v27 = vrot.slane %v15532_v8, %v15920_v12 }
0x1b22   :  { %9097 = vmatprep.subr.bf16.mxu0 %v12252_v47  ;;  %9137 = vmatpush1.bf16.msra.mxu1 %v12295_v40  ;;  %v12385_v40 = vld [vmem:[#allocation21 + $0x300] ss:$16 sps:$4 sm:$0xff]  }
0x1b23   :  { %9138 = vmatprep.subr.bf16.mxu1 %v12303_v5 }
0x1b25   :  { %9098 = vmatpush1.bf16.msra.mxu0 %v12250_v50  ;;  %v12361_v50 = vld [vmem:[#allocation21 + $0x380] ss:$16 sps:$4 sm:$0xff]  }
0x1b26   :  { %9099 = vmatprep.subr.bf16.mxu0 %v12255_v55  ;;  %9139 = vmatpush1.bf16.msra.mxu1 %v12301_v28  ;;  %v12393_v28 = vld [vmem:[#allocation21 + $0x2ec] ss:$16 sps:$4 sm:$0xff]  }
0x1b27   :  { %9140 = vmatprep.subr.bf16.mxu1 %v12309_v7 }
0x1b29   :  { %9100 = vmatpush1.bf16.msra.mxu0 %v12253_v60 }
0x1b2a   :  { %9101 = vmatprep.subr.bf16.mxu0 %v12258_v18  ;;  %9141 = vmatpush1.bf16.msra.mxu1 %v12307_v2  ;;  %v12369_v18 = vld [vmem:[#allocation21 + $0x364] ss:$16 sps:$4 sm:$0xff]  }
0x1b2b   :  { %9142 = vmatprep.subr.bf16.mxu1 %v12315_v53 }
0x1b2d   :  { %9102 = vmatpush1.bf16.msra.mxu0 %v12256_v49 }
0x1b2e   :  { %9103 = vmatprep.subr.bf16.mxu0 %v12261_v41  ;;  %9143 = vmatpush1.bf16.msra.mxu1 %v12313_v30 }
0x1b2f   :  { %9144 = vmatprep.subr.bf16.mxu1 %v12321_v24 }
0x1b31   :  { %9104 = vmatpush1.bf16.msra.mxu0 %v12259_v23 }
0x1b32   :  { %9105 = vmatprep.subr.bf16.mxu0 %v12264_v34  ;;  %9145 = vmatpush1.bf16.msra.mxu1 %v12319_v45 }
0x1b33   :  { %9146 = vmatprep.subr.bf16.mxu1 %v12327_v11 }
0x1b35   :  { %9106 = vmatpush1.bf16.msra.mxu0 %v12262_v56 }
0x1b36   :  { %9107 = vmatprep.subr.bf16.mxu0 %v12267_v31  ;;  %9147 = vmatpush1.bf16.msra.mxu1 %v12325_v25  ;;  %v12367_v31 = vld [vmem:[#allocation21 + $0x360] ss:$16 sps:$4 sm:$0xff]  }
0x1b37   :  { %9148 = vmatprep.subr.bf16.mxu1 %v12333_v46 }
0x1b39   :  { %9108 = vmatpush1.bf16.msra.mxu0 %v12265_v52 }
0x1b3a   :  { %9109 = vmatprep.subr.bf16.mxu0 %v12270_v26  ;;  %9149 = vmatpush1.bf16.msra.mxu1 %v12331_v35 }
0x1b3b   :  { %9150 = vmatprep.subr.bf16.mxu1 %v12339_v15 }
0x1b3d   :  { %9110 = vmatpush1.bf16.msra.mxu0 %v12268_v4 }
0x1b3e   :  { %9111 = vmatprep.subr.bf16.mxu0 %v12273_v62  ;;  %9151 = vmatpush1.bf16.msra.mxu1 %v12337_v58  ;;  %v12375_v62 = vld [vmem:[#allocation21 + $0x344] ss:$16 sps:$4 sm:$0xff]  }
0x1b3f   :  { %9152 = vmatprep.subr.bf16.mxu1 %v12345_v33 }
0x1b41   :  { %9112 = vmatpush2.bf16.msra.mxu0 %v12271_v21 }
0x1b42   :  { %9113 = vmatprep.subr.bf16.mxu0 %v12276_v3  ;;  %9153 = vmatpush2.bf16.msra.mxu1 %v12343_v17 }
0x1b43   :  { %9154 = vmatprep.subr.bf16.mxu1 %v12351_v44 }
0x1b45   :  { %9114 = vmatpush2.bf16.msra.mxu0 %v12274_v51 }
0x1b46   :  { %9115 = vmatprep.subr.bf16.mxu0 %v12279_v0  ;;  %9155 = vmatpush2.bf16.msra.mxu1 %v12349_v13 }
0x1b47   :  { %9156 = vmatprep.subr.bf16.mxu1 %v12357_v6 }
0x1b49   :  { %9116 = vmatpush2.bf16.msra.mxu0 %v12277_v16  ;;  %v12373_v16 = vld [vmem:[#allocation21 + $0x340] ss:$16 sps:$4 sm:$0xff]  }
0x1b4a   :  { %9117 = vmatprep.subr.bf16.mxu0 %v12282_v19  ;;  %9157 = vmatpush2.bf16.msra.mxu1 %v12355_v38 }
0x1b4b   :  { %9158 = vmatprep.subr.bf16.mxu1 %v12363_v63 }
0x1b4d   :  { %9118 = vmatpush2.bf16.msra.mxu0 %v12280_v48 }
0x1b4e   :  { %9119 = vmatprep.subr.bf16.mxu0 %v12285_v37  ;;  %9159 = vmatpush2.bf16.msra.mxu1 %v12361_v50  ;;  %v12381_v37 = vld [vmem:[#allocation21 + $0x324] ss:$16 sps:$4 sm:$0xff]  }
0x1b4f   :  { %9160 = vmatprep.subr.bf16.mxu1 %v12369_v18 }
0x1b51   :  { %9120 = vmatpush2.bf16.msra.mxu0 %v12283_v32 }
0x1b52   :  { %9121 = vmatprep.subr.bf16.mxu0 %v12288_v10  ;;  %9161 = vmatpush2.bf16.msra.mxu1 %v12367_v31 }
0x1b53   :  { %9162 = vmatprep.subr.bf16.mxu1 %v12375_v62  ;;  %v7374_v62 = vrot.slane %v15530_v1, %v15920_v12 }
0x1b55   :  { %9122 = vmatpush2.bf16.msra.mxu0 %v12286_v22  ;;  %v12379_v22 = vld [vmem:[#allocation21 + $0x320] ss:$16 sps:$4 sm:$0xff]  }
0x1b56   :  { %9123 = vmatprep.subr.bf16.mxu0 %v12291_v59  ;;  %9163 = vmatpush2.bf16.msra.mxu1 %v12373_v16 }
0x1b57   :  { %9164 = vmatprep.subr.bf16.mxu1 %v12381_v37 }
0x1b59   :  { %9124 = vmatpush2.bf16.msra.mxu0 %v12289_v29 }
0x1b5a   :  { %9125 = vmatprep.subr.bf16.mxu0 %v12294_v43  ;;  %v12387_v43 = vld [vmem:[#allocation21 + $0x304] ss:$16 sps:$4 sm:$0xff]   ;;  %9165 = vmatpush2.bf16.msra.mxu1 %v12379_v22  ;;  %v12306_v22 = vld [vmem:[#allocation21 + $0xcc] ss:$16 sps:$4 sm:$0xff]  }
0x1b5b   :  { %9166 = vmatprep.subr.bf16.mxu1 %v12387_v43 }
0x1b5d   :  { %9126 = vmatpush2.bf16.msra.mxu0 %v12292_v54 }
0x1b5e   :  { %9177 = vmatprep.subr.bf16.mxu0 %v12300_v14  ;;  %9167 = vmatpush2.bf16.msra.mxu1 %v12385_v40 }
0x1b5f   :  { %9218 = vmatprep.subr.bf16.mxu1 %v12393_v28 }
0x1ba0   :  { %v8053_v47 = vpop.f32.mrf.mxu0 }
0x1ba1   :  { %v8054_v55 = vadd.f32 %v8053_v47, %v7366_v20  ;;  %v8094_v60 = vpop.f32.mrf.mxu1  ;;  %v15921_v47 = vld [vmem:[#allocation40_spill] sm:$0xff] }
0x1ba2   :  { %v8055_v49 = vpop.f32.mrf.mxu0  ;;  %v8262_v50 = vrot.slane %v15528_v42, %v15921_v47  ;;  %v8266_v18 = vrot.slane %v15532_v8, %v15921_v47 }
0x1ba3   :  { %v8095_v41 = vadd.f32 %v8094_v60, %v8054_v55  ;;  %v8056_v23 = vadd.f32 %v8055_v49, %v7370_v27  ;;  %v8096_v34 = vpop.f32.mrf.mxu1  ;;  %v8282_v49 = vrot.slane %v15528_v42, %v13500_v39 }
0x1ba4   :  { %v8057_v56 = vpop.f32.mrf.mxu0 }
0x1ba5   :  { %v8183_v52 = vrot.slane %v8095_v41, 4  ;;  %v8097_v26 = vadd.f32 %v8096_v34, %v8056_v23  ;;  %v8098_v4 = vpop.f32.mrf.mxu1  ;;  %v8286_v56 = vrot.slane %v15532_v8, %v13500_v39  ;;  %v12298_v8 = vld [vmem:[#allocation21 + $0xe8] ss:$16 sps:$4 sm:$0xff]  }
0x1ba6   :  { %v8058_v21 = vpop.f32.mrf.mxu0 }
0x1ba7   :  { %v8184_v3 = vadd.f32 %v8183_v52, %v8095_v41  ;;  %v8189_v51 = vrot.slane %v8097_v26, 4  ;;  %v8099_v0 = vpop.f32.mrf.mxu1 }
0x1ba8   :  { %v7378_v0 = vrot.slane %v15538_v61, %v15920_v12 }
0x1ba9   :  { %v8185_v19 = vrot.slane %v8184_v3, 2  ;;  %v8190_v48 = vadd.f32 %v8189_v51, %v8097_v26 }
0x1bab   :  { %v8186_v32 = vadd.f32 %v8185_v19, %v8184_v3  ;;  %v8191_v10 = vrot.slane %v8190_v48, 2  ;;  %v15922_v3 = vld [vmem:[#allocation44_spill] sm:$0xff] }
0x1bad   :  { %v8187_v59 = vrot.slane %v8186_v32, 1  ;;  %v8192_v29 = vadd.f32 %v8191_v10, %v8190_v48 }
0x1baf   :  { %v8188_v54 = vadd.f32 %v8187_v59, %v8186_v32  ;;  %v8193_v36 = vrot.slane %v8192_v29, 1 }
0x1bb1   :  { %v8207_v14 = vmul.f32 0.125, %v8188_v54  ;;  %v8194_v5 = vadd.f32 %v8193_v36, %v8192_v29  ;;  %v12304_v36 = vld [vmem:[#allocation21 + $0xc8] ss:$16 sps:$4 sm:$0xff]  }
0x1bb3   :  { %v8211_v7 = vsub.f32 %v8095_v41, %v8207_v14  ;;  %v8208_v2 = vmul.f32 0.125, %v8194_v5  ;;  %v12312_v14 = vld [vmem:[#allocation21 + $0xac] ss:$16 sps:$4 sm:$0xff]  }
0x1bb5   :  { %v8215_v53 = vmul.f32 %v8211_v7, %v8211_v7  ;;  %v8212_v30 = vsub.f32 %v8097_v26, %v8208_v2 }
0x1bb7   :  { %v8219_v24 = vrot.slane %v8215_v53, 4  ;;  %v8216_v45 = vmul.f32 %v8212_v30, %v8212_v30 }
0x1bb9   :  { %v8220_v11 = vadd.f32 %v8219_v24, %v8215_v53  ;;  %v8225_v25 = vrot.slane %v8216_v45, 4  ;;  %v12318_v24 = vld [vmem:[#allocation21 + $0x8c] ss:$16 sps:$4 sm:$0xff]  }
0x1bbb   :  { %v8221_v46 = vrot.slane %v8220_v11, 2  ;;  %v8226_v35 = vadd.f32 %v8225_v25, %v8216_v45 }
0x1bbd   :  { %v8222_v15 = vadd.f32 %v8221_v46, %v8220_v11  ;;  %v8227_v58 = vrot.slane %v8226_v35, 2 }
0x1bbf   :  { %v8223_v33 = vrot.slane %v8222_v15, 1  ;;  %v8228_v17 = vadd.f32 %v8227_v58, %v8226_v35  ;;  %v12316_v35 = vld [vmem:[#allocation21 + $0x88] ss:$16 sps:$4 sm:$0xff]  }
0x1bc1   :  { %v8224_v44 = vadd.f32 %v8223_v33, %v8222_v15  ;;  %v8229_v13 = vrot.slane %v8228_v17, 1  ;;  %v12324_v15 = vld [vmem:[#allocation21 + $0x6c] ss:$16 sps:$4 sm:$0xff]  }
0x1bc3   :  { %v8243_v6 = vmul.f32 0.125, %v8224_v44  ;;  %v8230_v38 = vadd.f32 %v8229_v13, %v8228_v17  ;;  %v12322_v13 = vld [vmem:[#allocation21 + $0x68] ss:$16 sps:$4 sm:$0xff]  }
0x1bc5   :  { %v8247_v20 = vadd.f32 1e-05, %v8243_v6  ;;  %v8244_v63 = vmul.f32 0.125, %v8230_v38  ;;  %v12330_v6 = vld [vmem:[#allocation21 + $0x4c] ss:$16 sps:$4 sm:$0xff]  }
0x1bc7   :  { %12859 = vrsqrt.f32 %v8247_v20  ;;  %v8248_v27 = vadd.f32 1e-05, %v8244_v63 }
0x1bc9   :  { %12861 = vrsqrt.f32 %v8248_v27 }
0x1bd4   :  { %v12860_v55 = vpop.eup %12859 }
0x1bd5   :  { %v8255_v60 = vmul.f32 %v12860_v55, %v8211_v7  ;;  %v12336_v55 = vld [vmem:[#allocation21 + $0x2c] ss:$16 sps:$4 sm:$0xff]  }
0x1bd6   :  { %v12862_v41 = vpop.eup %12861 }
0x1bd7   :  { %v8275_v23 = vmul.f32 %v8262_v50, %v8255_v60  ;;  %v8256_v34 = vmul.f32 %v12862_v41, %v8212_v30  ;;  %v12310_v30 = vld [vmem:[#allocation21 + $0xa8] ss:$16 sps:$4 sm:$0xff]  }
0x1bd8   :  { %v12328_v50 = vld [vmem:[#allocation21 + $0x48] ss:$16 sps:$4 sm:$0xff]  }
0x1bd9   :  { %v8276_v31 = vmul.f32 %v8266_v18, %v8256_v34  ;;  %v8295_v52 = vadd.f32 %v8282_v49, %v8275_v23  ;;  %v12334_v23 = vld [vmem:[#allocation21 + $0x28] ss:$16 sps:$4 sm:$0xff]   ;;  %v12342_v34 = vld [vmem:[#allocation21 + $0xc] ss:$16 sps:$4 sm:$0xff]  }
0x1bdb   :  { %v8296_v26 = vadd.f32 %v8286_v56, %v8276_v31  ;;  %v8299_v4 = vmax.f32 %v8295_v52, 0.0 }
0x1bdd   :  { %v8300_v21 = vmax.f32 %v8296_v26, 0.0  ;;  %v8303_v51 = vadd.f32 %v8299_v4, %v15922_v3  ;;  %v12340_v4 = vld [vmem:[#allocation21 + $0x8] ss:$16 sps:$4 sm:$0xff]  }
0x1bdf   :  { %v8304_v42 = vadd.f32 %v8300_v21, %v15922_v3  ;;  %v15589_v10 = vpack.c.bf16 %v8303_v51, %v8303_v51 }
0x1be0   :  { %v8135_v16 = vpop.f32.mrf.mxu0 }
0x1be1   :  { %v8136_v19 = vadd.f32 %v8135_v16, %v7374_v62  ;;  %v8176_v48 = vpop.f32.mrf.mxu1  ;;  %v8308_v37 = vpack.c.bf16 %v8304_v42, %v8304_v42  ;;  %v12348_v62 = vld [vmem:[#allocation21 + $0x1ec] ss:$16 sps:$4 sm:$0xff]   ;;  %v12346_v16 = vld [vmem:[#allocation21 + $0x1e8] ss:$16 sps:$4 sm:$0xff]  }
0x1be2   :  { %v8137_v32 = vpop.f32.mrf.mxu0 }
0x1be3   :  { %v8177_v59 = vadd.f32 %v8176_v48, %v8136_v19  ;;  %v8138_v29 = vadd.f32 %v8137_v32, %v7378_v0  ;;  %v8178_v1 = vpop.f32.mrf.mxu1  ;;  %9127 = vmatprep.mubr.bf16.mxu0 %v8308_v37  ;;  %v12354_v19 = vld [vmem:[#allocation21 + $0x1cc] ss:$16 sps:$4 sm:$0xff]  }
0x1be4   :  { %v8139_v43 = vpop.f32.mrf.mxu0  ;;  %9128 = vmatmul.mubr.bf16.vlgmr.msra.gmra.mxu0 %v15589_v10 }
0x1be5   :  { %v8195_v54 = vrot.slane %v8177_v59, 4  ;;  %v8179_v61 = vadd.f32 %v8178_v1, %v8138_v29  ;;  %v8180_v12 = vpop.f32.mrf.mxu1  ;;  %9178 = vmatpush1.bf16.msra.mxu0 %v12298_v8  ;;  %9209 = vmatprep.mubr.bf16.mxu0 %v8308_v37  ;;  %v12358_v1 = vld [vmem:[#allocation21 + $0x1a8] ss:$16 sps:$4 sm:$0xff]   ;;  %v12366_v43 = vld [vmem:[#allocation21 + $0x18c] ss:$16 sps:$4 sm:$0xff]  }
0x1be6   :  { %v8140_v40 = vpop.f32.mrf.mxu0  ;;  %9179 = vmatprep.subr.bf16.mxu0 %v12306_v22  ;;  %v12352_v22 = vld [vmem:[#allocation21 + $0x1c8] ss:$16 sps:$4 sm:$0xff]  }
0x1be7   :  { %v8196_v5 = vadd.f32 %v8195_v54, %v8177_v59  ;;  %v8201_v28 = vrot.slane %v8179_v61, 4  ;;  %v8181_v7 = vpop.f32.mrf.mxu1  ;;  %v12364_v54 = vld [vmem:[#allocation21 + $0x188] ss:$16 sps:$4 sm:$0xff]   ;;  %v15596_v40 = vld [vmem:[#allocation24 + $0x10] sm:$0xff] }
0x1be8   :  { %v12370_v12 = vld [vmem:[#allocation21 + $0x168] ss:$16 sps:$4 sm:$0xff]  }
0x1be9   :  { %v8197_v2 = vrot.slane %v8196_v5, 2  ;;  %v8202_v53 = vadd.f32 %v8201_v28, %v8179_v61  ;;  %9180 = vmatpush1.bf16.msra.mxu0 %v12304_v36  ;;  %v12378_v36 = vld [vmem:[#allocation21 + $0x14c] ss:$16 sps:$4 sm:$0xff]   ;;  %v12376_v7 = vld [vmem:[#allocation21 + $0x148] ss:$16 sps:$4 sm:$0xff]  }
0x1bea   :  { %9181 = vmatprep.subr.bf16.mxu0 %v12312_v14  ;;  %v8270_v14 = vrot.slane %v15596_v40, %v15921_v47 }
0x1beb   :  { %v8198_v45 = vadd.f32 %v8197_v2, %v8196_v5  ;;  %v8203_v11 = vrot.slane %v8202_v53, 2  ;;  %v15600_v2 = vld [vmem:[#allocation24 + $0x18] sm:$0xff] }
0x1bed   :  { %v8199_v25 = vrot.slane %v8198_v45, 1  ;;  %v8204_v46 = vadd.f32 %v8203_v11, %v8202_v53  ;;  %9182 = vmatpush1.bf16.msra.mxu0 %v12310_v30  ;;  %v8274_v53 = vrot.slane %v15600_v2, %v15921_v47  ;;  %v8290_v30 = vrot.slane %v15596_v40, %v13500_v39 }
0x1bee   :  { %9183 = vmatprep.subr.bf16.mxu0 %v12318_v24 }
0x1bef   :  { %v8200_v58 = vadd.f32 %v8199_v25, %v8198_v45  ;;  %v8205_v33 = vrot.slane %v8204_v46, 1  ;;  %v12384_v45 = vld [vmem:[#allocation21 + $0x12c] ss:$16 sps:$4 sm:$0xff]  }
0x1bf1   :  { %v8209_v17 = vmul.f32 0.125, %v8200_v58  ;;  %v8206_v44 = vadd.f32 %v8205_v33, %v8204_v46  ;;  %9184 = vmatpush1.bf16.msra.mxu0 %v12316_v35  ;;  %v8294_v46 = vrot.slane %v15600_v2, %v13500_v39  ;;  %v12382_v35 = vld [vmem:[#allocation21 + $0x128] ss:$16 sps:$4 sm:$0xff]   ;;  %v12390_v33 = vld [vmem:[#allocation21 + $0x10c] ss:$16 sps:$4 sm:$0xff]  }
0x1bf2   :  { %9185 = vmatprep.subr.bf16.mxu0 %v12324_v15 }
0x1bf3   :  { %v8213_v38 = vsub.f32 %v8177_v59, %v8209_v17  ;;  %v8210_v20 = vmul.f32 0.125, %v8206_v44  ;;  %v12360_v59 = vld [vmem:[#allocation21 + $0x1ac] ss:$16 sps:$4 sm:$0xff]   ;;  %v12388_v44 = vld [vmem:[#allocation21 + $0x108] ss:$16 sps:$4 sm:$0xff]  }
0x1bf5   :  { %v8217_v63 = vmul.f32 %v8213_v38, %v8213_v38  ;;  %v15592_v27 = vsub.f32 %v8179_v61, %v8210_v20  ;;  %9186 = vmatpush1.bf16.msra.mxu0 %v12322_v13  ;;  %v12372_v61 = vld [vmem:[#allocation21 + $0x16c] ss:$16 sps:$4 sm:$0xff]  }
0x1bf6   :  { %9187 = vmatprep.subr.bf16.mxu0 %v12330_v6 }
0x1bf7   :  { %v8231_v60 = vrot.slane %v8217_v63, 4  ;;  %v8218_v18 = vmul.f32 %v15592_v27, %v15592_v27 }
0x1bf9   :  { %v8232_v49 = vadd.f32 %v8231_v60, %v8217_v63  ;;  %v8237_v41 = vrot.slane %v8218_v18, 4  ;;  %9188 = vmatpush1.bf16.msra.mxu0 %v12328_v50  ;;  %v12391_v63 = vld [vmem:[#allocation21 + $0x2e8] ss:$16 sps:$4 sm:$0xff]  }
0x1bfa   :  { %9189 = vmatprep.subr.bf16.mxu0 %v12336_v55  ;;  %v12394_v50 = vld [vmem:[#allocation21 + $0x2c8] ss:$16 sps:$4 sm:$0xff]   ;;  %v12399_v55 = vld [vmem:[#allocation21 + $0x2ac] ss:$16 sps:$4 sm:$0xff]  }
0x1bfb   :  { %v8233_v56 = vrot.slane %v8232_v49, 2  ;;  %v8238_v31 = vadd.f32 %v8237_v41, %v8218_v18  ;;  %v12397_v60 = vld [vmem:[#allocation21 + $0x2a8] ss:$16 sps:$4 sm:$0xff]   ;;  %v12439_v18 = vld [vmem:[#allocation22 + $0xe0] ss:$16 sps:$4 sm:$0xff]  }
0x1bfc   :  { %v12444_v41 = vld [vmem:[#allocation22 + $0xc4] ss:$16 sps:$4 sm:$0xff]  }
0x1bfd   :  { %v8234_v52 = vadd.f32 %v8233_v56, %v8232_v49  ;;  %v8239_v26 = vrot.slane %v8238_v31, 2  ;;  %9190 = vmatpush1.bf16.msra.mxu0 %v12334_v23  ;;  %v12441_v49 = vld [vmem:[#allocation22 + $0xe4] ss:$16 sps:$4 sm:$0xff]   ;;  %v12400_v23 = vld [vmem:[#allocation21 + $0x288] ss:$16 sps:$4 sm:$0xff]  }
0x1bfe   :  { %9191 = vmatprep.subr.bf16.mxu0 %v12342_v34  ;;  %v12442_v34 = vld [vmem:[#allocation22 + $0xc0] ss:$16 sps:$4 sm:$0xff]   ;;  %v12405_v56 = vld [vmem:[#allocation21 + $0x26c] ss:$16 sps:$4 sm:$0xff]  }
0x1bff   :  { %v8235_v21 = vrot.slane %v8234_v52, 1  ;;  %v8240_v51 = vadd.f32 %v8239_v26, %v8238_v31  ;;  %v12403_v31 = vld [vmem:[#allocation21 + $0x268] ss:$16 sps:$4 sm:$0xff]   ;;  %v12408_v26 = vld [vmem:[#allocation21 + $0x24c] ss:$16 sps:$4 sm:$0xff]  }
0x1c01   :  { %v8236_v0 = vadd.f32 %v8235_v21, %v8234_v52  ;;  %v8241_v42 = vrot.slane %v8240_v51, 1  ;;  %9192 = vmatpush1.bf16.msra.mxu0 %v12340_v4  ;;  %v12445_v52 = vld [vmem:[#allocation22 + $0xa0] ss:$16 sps:$4 sm:$0xff]   ;;  %v12450_v4 = vld [vmem:[#allocation22 + $0x84] ss:$16 sps:$4 sm:$0xff]  }
0x1c02   :  { %9193 = vmatprep.subr.bf16.mxu0 %v12348_v62  ;;  %v12406_v62 = vld [vmem:[#allocation21 + $0x248] ss:$16 sps:$4 sm:$0xff]   ;;  %v12448_v21 = vld [vmem:[#allocation22 + $0x80] ss:$16 sps:$4 sm:$0xff]  }
0x1c03   :  { %v8245_v48 = vmul.f32 0.125, %v8236_v0  ;;  %v8242_v37 = vadd.f32 %v8241_v42, %v8240_v51  ;;  %v12411_v51 = vld [vmem:[#allocation21 + $0x22c] ss:$16 sps:$4 sm:$0xff]   ;;  %v12453_v0 = vld [vmem:[#allocation22 + $0x64] ss:$16 sps:$4 sm:$0xff]  }
0x1c04   :  { %v12409_v42 = vld [vmem:[#allocation21 + $0x228] ss:$16 sps:$4 sm:$0xff]  }
0x1c05   :  { %v8249_v8 = vadd.f32 1e-05, %v8245_v48  ;;  %v8246_v32 = vmul.f32 0.125, %v8242_v37  ;;  %9194 = vmatpush2.bf16.msra.mxu0 %v12346_v16  ;;  %v12451_v16 = vld [vmem:[#allocation22 + $0x60] ss:$16 sps:$4 sm:$0xff]  }
0x1c06   :  { %9195 = vmatprep.subr.bf16.mxu0 %v12354_v19  ;;  %v12414_v19 = vld [vmem:[#allocation21 + $0x20c] ss:$16 sps:$4 sm:$0xff]   ;;  %v12456_v48 = vld [vmem:[#allocation22 + $0x44] ss:$16 sps:$4 sm:$0xff]   ;;  %v12412_v37 = vld [vmem:[#allocation21 + $0x208] ss:$16 sps:$4 sm:$0xff]  }
0x1c07   :  { %12863 = vrsqrt.f32 %v8249_v8  ;;  %v8250_v29 = vadd.f32 1e-05, %v8246_v32  ;;  %v12454_v8 = vld [vmem:[#allocation22 + $0x40] ss:$16 sps:$4 sm:$0xff]   ;;  %v12417_v32 = vld [vmem:[#allocation21 + $0x3ec] ss:$16 sps:$4 sm:$0xff]  }
0x1c09   :  { %12865 = vrsqrt.f32 %v8250_v29  ;;  %9196 = vmatpush2.bf16.msra.mxu0 %v12352_v22  ;;  %v12459_v22 = vld [vmem:[#allocation22 + $0x24] ss:$16 sps:$4 sm:$0xff]   ;;  %v12457_v29 = vld [vmem:[#allocation22 + $0x20] ss:$16 sps:$4 sm:$0xff]  }
0x1c0a   :  { %9197 = vmatprep.subr.bf16.mxu0 %v12360_v59  ;;  %v12415_v59 = vld [vmem:[#allocation21 + $0x3e8] ss:$16 sps:$4 sm:$0xff]  }
0x1c0d   :  { %9198 = vmatpush2.bf16.msra.mxu0 %v12358_v1  ;;  %v12420_v1 = vld [vmem:[#allocation21 + $0x3cc] ss:$16 sps:$4 sm:$0xff]  }
0x1c0e   :  { %9199 = vmatprep.subr.bf16.mxu0 %v12366_v43  ;;  %v12462_v43 = vld [vmem:[#allocation22 + $0x4] ss:$16 sps:$4 sm:$0xff]  }
0x1c11   :  { %9200 = vmatpush2.bf16.msra.mxu0 %v12364_v54  ;;  %v12418_v54 = vld [vmem:[#allocation21 + $0x3c8] ss:$16 sps:$4 sm:$0xff]  }
0x1c12   :  { %9201 = vmatprep.subr.bf16.mxu0 %v12372_v61  ;;  %v12460_v61 = vld [vmem:[#allocation22] ss:$16 sps:$4 sm:$0xff]  }
0x1c14   :  { %v12864_v5 = vpop.eup %12863 }
0x1c15   :  { %v8257_v28 = vmul.f32 %v12864_v5, %v8213_v38  ;;  %9202 = vmatpush2.bf16.msra.mxu0 %v12370_v12  ;;  %v12423_v12 = vld [vmem:[#allocation21 + $0x3ac] ss:$16 sps:$4 sm:$0xff]   ;;  %v12463_v5 = vld [vmem:[#allocation22 + $0x1e0] ss:$16 sps:$4 sm:$0xff]  }
0x1c16   :  { %v12866_v24 = vpop.eup %12865  ;;  %9203 = vmatprep.subr.bf16.mxu0 %v12378_v36  ;;  %v12465_v36 = vld [vmem:[#allocation22 + $0x1e4] ss:$16 sps:$4 sm:$0xff]  }
0x1c17   :  { %v8277_v11 = vmul.f32 %v8270_v14, %v8257_v28  ;;  %v8258_v25 = vmul.f32 %v12866_v24, %v15592_v27  ;;  %v12396_v27 = vld [vmem:[#allocation21 + $0x2cc] ss:$16 sps:$4 sm:$0xff]   ;;  %v12421_v14 = vld [vmem:[#allocation21 + $0x3a8] ss:$16 sps:$4 sm:$0xff]  }
0x1c18   :  { %v12426_v28 = vld [vmem:[#allocation21 + $0x38c] ss:$16 sps:$4 sm:$0xff]  }
0x1c19   :  { %9204 = vmatpush2.bf16.msra.mxu0 %v12376_v7  ;;  %v8278_v15 = vmul.f32 %v8274_v53, %v8258_v25  ;;  %v8297_v58 = vadd.f32 %v8290_v30, %v8277_v11  ;;  %v12468_v7 = vld [vmem:[#allocation22 + $0x1c4] ss:$16 sps:$4 sm:$0xff]   ;;  %v12424_v53 = vld [vmem:[#allocation21 + $0x388] ss:$16 sps:$4 sm:$0xff]   ;;  %v12466_v30 = vld [vmem:[#allocation22 + $0x1c0] ss:$16 sps:$4 sm:$0xff]  }
0x1c1a   :  { %9205 = vmatprep.subr.bf16.mxu0 %v12384_v45  ;;  %v12429_v24 = vld [vmem:[#allocation21 + $0x36c] ss:$16 sps:$4 sm:$0xff]   ;;  %v12471_v45 = vld [vmem:[#allocation22 + $0x1a4] ss:$16 sps:$4 sm:$0xff]   ;;  %v12427_v11 = vld [vmem:[#allocation21 + $0x368] ss:$16 sps:$4 sm:$0xff]  }
0x1c1b   :  { %v8298_v17 = vadd.f32 %v8294_v46, %v8278_v15  ;;  %v8301_v47 = vmax.f32 %v8297_v58, 0.0  ;;  %v12469_v25 = vld [vmem:[#allocation22 + $0x1a0] ss:$16 sps:$4 sm:$0xff]   ;;  %v12432_v46 = vld [vmem:[#allocation21 + $0x34c] ss:$16 sps:$4 sm:$0xff]  }
0x1c1c   :  { %v12430_v15 = vld [vmem:[#allocation21 + $0x348] ss:$16 sps:$4 sm:$0xff]   ;;  %v12472_v58 = vld [vmem:[#allocation22 + $0x180] ss:$16 sps:$4 sm:$0xff]  }
0x1c1d   :  { %9206 = vmatpush2.bf16.msra.mxu0 %v12382_v35  ;;  %v8302_v13 = vmax.f32 %v8298_v17, 0.0  ;;  %v8305_v6 = vadd.f32 %v8301_v47, %v15922_v3  ;;  %v12474_v35 = vld [vmem:[#allocation22 + $0x184] ss:$16 sps:$4 sm:$0xff]   ;;  %v12433_v47 = vld [vmem:[#allocation21 + $0x328] ss:$16 sps:$4 sm:$0xff]  }
0x1c1e   :  { %9207 = vmatprep.subr.bf16.mxu0 %v12390_v33  ;;  %v12435_v33 = vld [vmem:[#allocation21 + $0x32c] ss:$16 sps:$4 sm:$0xff]   ;;  %v12477_v17 = vld [vmem:[#allocation22 + $0x164] ss:$16 sps:$4 sm:$0xff]  }
0x1c1f   :  { %v8306_v38 = vadd.f32 %v8302_v13, %v15922_v3  ;;  %v15611_v39 = vpack.c.bf16 %v8305_v6, %v8305_v6  ;;  %v12402_v3 = vld [vmem:[#allocation21 + $0x28c] ss:$16 sps:$4 sm:$0xff]   ;;  %v12480_v6 = vld [vmem:[#allocation22 + $0x144] ss:$16 sps:$4 sm:$0xff]  }
0x1c20   :  { %v12438_v13 = vld [vmem:[#allocation21 + $0x30c] ss:$16 sps:$4 sm:$0xff]  }
0x1c21   :  { %9208 = vmatpush2.bf16.msra.mxu0 %v12388_v44  ;;  %v8310_v20 = vpack.c.bf16 %v8306_v38, %v8306_v38  ;;  %v12475_v44 = vld [vmem:[#allocation22 + $0x160] ss:$16 sps:$4 sm:$0xff]   ;;  %v12436_v38 = vld [vmem:[#allocation21 + $0x308] ss:$16 sps:$4 sm:$0xff]  }
0x1c22   :  { %10047 = vmatprep.subr.bf16.mxu0 %v12441_v49  ;;  %v12493_v49 = vld [vmem:[#allocation22 + $0x2c0] ss:$16 sps:$4 sm:$0xff]  }
0x1c23   :  { %9168 = vmatprep.mubr.bf16.mxu1 %v8310_v20 }
0x1c24   :  { %9169 = vmatmul.mubr.bf16.vlgmr.msra.gmra.mxu1 %v15611_v39  ;;  %9210 = vmatmul.mubr.bf16.vlgmr.msra.gmra.mxu0 %v15589_v10  ;;  %v12447_v10 = vld [vmem:[#allocation22 + $0xa4] ss:$16 sps:$4 sm:$0xff]  }
0x1c25   :  { %9219 = vmatpush1.bf16.msra.mxu1 %v12391_v63  ;;  %9250 = vmatprep.mubr.bf16.mxu1 %v8310_v20  ;;  %v12478_v20 = vld [vmem:[#allocation22 + $0x140] ss:$16 sps:$4 sm:$0xff]   ;;  %v12483_v63 = vld [vmem:[#allocation22 + $0x124] ss:$16 sps:$4 sm:$0xff]  }
0x1c26   :  { %9220 = vmatprep.subr.bf16.mxu1 %v12396_v27  ;;  %10048 = vmatpush1.bf16.msra.mxu0 %v12439_v18  ;;  %v12481_v27 = vld [vmem:[#allocation22 + $0x120] ss:$16 sps:$4 sm:$0xff]   ;;  %v12492_v18 = vld [vmem:[#allocation22 + $0xec] ss:$16 sps:$4 sm:$0xff]  }
0x1c27   :  { %10049 = vmatprep.subr.bf16.mxu0 %v12444_v41  ;;  %v12495_v41 = vld [vmem:[#allocation22 + $0x2c4] ss:$16 sps:$4 sm:$0xff]  }
0x1c29   :  { %9221 = vmatpush1.bf16.msra.mxu1 %v12394_v50  ;;  %v12484_v50 = vld [vmem:[#allocation22 + $0x100] ss:$16 sps:$4 sm:$0xff]  }
0x1c2a   :  { %9222 = vmatprep.subr.bf16.mxu1 %v12399_v55  ;;  %10050 = vmatpush1.bf16.msra.mxu0 %v12442_v34  ;;  %v12486_v55 = vld [vmem:[#allocation22 + $0x104] ss:$16 sps:$4 sm:$0xff]  }
0x1c2b   :  { %10051 = vmatprep.subr.bf16.mxu0 %v12447_v10  ;;  %v12501_v34 = vld [vmem:[#allocation22 + $0x2a4] ss:$16 sps:$4 sm:$0xff]   ;;  %v12511_v10 = vld [vmem:[#allocation22 + $0x260] ss:$16 sps:$4 sm:$0xff]  }
0x1c2d   :  { %9223 = vmatpush1.bf16.msra.mxu1 %v12397_v60  ;;  %v12487_v60 = vld [vmem:[#allocation22 + $0x2e0] ss:$16 sps:$4 sm:$0xff]  }
0x1c2e   :  { %9224 = vmatprep.subr.bf16.mxu1 %v12402_v3  ;;  %10052 = vmatpush1.bf16.msra.mxu0 %v12445_v52  ;;  %v12489_v3 = vld [vmem:[#allocation22 + $0x2e4] ss:$16 sps:$4 sm:$0xff]   ;;  %v12517_v52 = vld [vmem:[#allocation22 + $0x240] ss:$16 sps:$4 sm:$0xff]  }
0x1c2f   :  { %10053 = vmatprep.subr.bf16.mxu0 %v12450_v4  ;;  %v12523_v4 = vld [vmem:[#allocation22 + $0x220] ss:$16 sps:$4 sm:$0xff]  }
0x1c31   :  { %9225 = vmatpush1.bf16.msra.mxu1 %v12400_v23  ;;  %v12499_v23 = vld [vmem:[#allocation22 + $0x2a0] ss:$16 sps:$4 sm:$0xff]  }
0x1c32   :  { %9226 = vmatprep.subr.bf16.mxu1 %v12405_v56  ;;  %10054 = vmatpush1.bf16.msra.mxu0 %v12448_v21  ;;  %v12507_v56 = vld [vmem:[#allocation22 + $0x284] ss:$16 sps:$4 sm:$0xff]   ;;  %v12529_v21 = vld [vmem:[#allocation22 + $0x200] ss:$16 sps:$4 sm:$0xff]  }
0x1c33   :  { %10055 = vmatprep.subr.bf16.mxu0 %v12453_v0  ;;  %v12535_v0 = vld [vmem:[#allocation22 + $0x3e0] ss:$16 sps:$4 sm:$0xff]  }
0x1c35   :  { %9227 = vmatpush1.bf16.msra.mxu1 %v12403_v31  ;;  %v12513_v31 = vld [vmem:[#allocation22 + $0x264] ss:$16 sps:$4 sm:$0xff]  }
0x1c36   :  { %9228 = vmatprep.subr.bf16.mxu1 %v12408_v26  ;;  %10056 = vmatpush1.bf16.msra.mxu0 %v12451_v16  ;;  %v12519_v26 = vld [vmem:[#allocation22 + $0x244] ss:$16 sps:$4 sm:$0xff]   ;;  %v12541_v16 = vld [vmem:[#allocation22 + $0x3c0] ss:$16 sps:$4 sm:$0xff]  }
0x1c37   :  { %10057 = vmatprep.subr.bf16.mxu0 %v12456_v48  ;;  %v12547_v48 = vld [vmem:[#allocation22 + $0x3a0] ss:$16 sps:$4 sm:$0xff]  }
0x1c39   :  { %9229 = vmatpush1.bf16.msra.mxu1 %v12406_v62  ;;  %v12525_v62 = vld [vmem:[#allocation22 + $0x224] ss:$16 sps:$4 sm:$0xff]  }
0x1c3a   :  { %9230 = vmatprep.subr.bf16.mxu1 %v12411_v51  ;;  %10058 = vmatpush1.bf16.msra.mxu0 %v12454_v8  ;;  %v12531_v51 = vld [vmem:[#allocation22 + $0x204] ss:$16 sps:$4 sm:$0xff]   ;;  %v12553_v8 = vld [vmem:[#allocation22 + $0x380] ss:$16 sps:$4 sm:$0xff]  }
0x1c3b   :  { %10059 = vmatprep.subr.bf16.mxu0 %v12459_v22  ;;  %v12559_v22 = vld [vmem:[#allocation22 + $0x360] ss:$16 sps:$4 sm:$0xff]  }
0x1c3d   :  { %9231 = vmatpush1.bf16.msra.mxu1 %v12409_v42  ;;  %v12537_v42 = vld [vmem:[#allocation22 + $0x3e4] ss:$16 sps:$4 sm:$0xff]  }
0x1c3e   :  { %9232 = vmatprep.subr.bf16.mxu1 %v12414_v19  ;;  %10060 = vmatpush1.bf16.msra.mxu0 %v12457_v29  ;;  %v12543_v19 = vld [vmem:[#allocation22 + $0x3c4] ss:$16 sps:$4 sm:$0xff]   ;;  %v12565_v29 = vld [vmem:[#allocation22 + $0x340] ss:$16 sps:$4 sm:$0xff]  }
0x1c3f   :  { %10061 = vmatprep.subr.bf16.mxu0 %v12462_v43  ;;  %v12571_v43 = vld [vmem:[#allocation22 + $0x320] ss:$16 sps:$4 sm:$0xff]  }
0x1c41   :  { %9233 = vmatpush1.bf16.msra.mxu1 %v12412_v37  ;;  %v12549_v37 = vld [vmem:[#allocation22 + $0x3a4] ss:$16 sps:$4 sm:$0xff]  }
0x1c42   :  { %9234 = vmatprep.subr.bf16.mxu1 %v12417_v32  ;;  %10062 = vmatpush1.bf16.msra.mxu0 %v12460_v61  ;;  %v12555_v32 = vld [vmem:[#allocation22 + $0x384] ss:$16 sps:$4 sm:$0xff]  }
0x1c43   :  { %10063 = vmatprep.subr.bf16.mxu0 %v12465_v36 }
0x1c45   :  { %9235 = vmatpush2.bf16.msra.mxu1 %v12415_v59  ;;  %v12561_v59 = vld [vmem:[#allocation22 + $0x364] ss:$16 sps:$4 sm:$0xff]  }
0x1c46   :  { %9236 = vmatprep.subr.bf16.mxu1 %v12420_v1  ;;  %10064 = vmatpush2.bf16.msra.mxu0 %v12463_v5  ;;  %v12567_v1 = vld [vmem:[#allocation22 + $0x344] ss:$16 sps:$4 sm:$0xff]  }
0x1c47   :  { %10065 = vmatprep.subr.bf16.mxu0 %v12468_v7  ;;  %v12579_v5 = vld [vmem:[#allocation22 + $0x304] ss:$16 sps:$4 sm:$0xff]   ;;  %v12585_v7 = vld [vmem:[#allocation22 + $0x2ec] ss:$16 sps:$4 sm:$0xff]  }
0x1c49   :  { %9237 = vmatpush2.bf16.msra.mxu1 %v12418_v54  ;;  %v12573_v54 = vld [vmem:[#allocation22 + $0x324] ss:$16 sps:$4 sm:$0xff]  }
0x1c4a   :  { %9238 = vmatprep.subr.bf16.mxu1 %v12423_v12  ;;  %10066 = vmatpush2.bf16.msra.mxu0 %v12466_v30  ;;  %v15923_v30 = vld [vmem:[#allocation41_spill] sm:$0xff] }
0x1c4b   :  { %10067 = vmatprep.subr.bf16.mxu0 %v12471_v45  ;;  %v15620_v45 = vld [vmem:[#allocation24 + $0x8] sm:$0xff] }
0x1c4d   :  { %9239 = vmatpush2.bf16.msra.mxu1 %v12421_v14  ;;  %v12577_v14 = vld [vmem:[#allocation22 + $0x300] ss:$16 sps:$4 sm:$0xff]  }
0x1c4e   :  { %9240 = vmatprep.subr.bf16.mxu1 %v12426_v28  ;;  %10068 = vmatpush2.bf16.msra.mxu0 %v12469_v25 }
0x1c4f   :  { %10069 = vmatprep.subr.bf16.mxu0 %v12474_v35 }
0x1c51   :  { %9241 = vmatpush2.bf16.msra.mxu1 %v12424_v53  ;;  %v15616_v53 = vld [vmem:[#allocation24] sm:$0xff] }
0x1c52   :  { %9242 = vmatprep.subr.bf16.mxu1 %v12429_v24  ;;  %10070 = vmatpush2.bf16.msra.mxu0 %v12472_v58  ;;  %v8442_v24 = vrot.slane %v15616_v53, %v15923_v30 }
0x1c53   :  { %10071 = vmatprep.subr.bf16.mxu0 %v12477_v17 }
0x1c55   :  { %9243 = vmatpush2.bf16.msra.mxu1 %v12427_v11  ;;  %v8446_v11 = vrot.slane %v15620_v45, %v15923_v30 }
0x1c56   :  { %9244 = vmatprep.subr.bf16.mxu1 %v12432_v46  ;;  %10072 = vmatpush2.bf16.msra.mxu0 %v12475_v44 }
0x1c57   :  { %10073 = vmatprep.subr.bf16.mxu0 %v12480_v6 }
0x1c59   :  { %9245 = vmatpush2.bf16.msra.mxu1 %v12430_v15 }
0x1c5a   :  { %9246 = vmatprep.subr.bf16.mxu1 %v12435_v33  ;;  %10074 = vmatpush2.bf16.msra.mxu0 %v12478_v20 }
0x1c5b   :  { %10075 = vmatprep.subr.bf16.mxu0 %v12483_v63 }
0x1c5d   :  { %9247 = vmatpush2.bf16.msra.mxu1 %v12433_v47 }
0x1c5e   :  { %9248 = vmatprep.subr.bf16.mxu1 %v12438_v13  ;;  %10076 = vmatpush2.bf16.msra.mxu0 %v12481_v27 }
0x1c5f   :  { %10077 = vmatprep.subr.bf16.mxu0 %v12486_v55  ;;  %v12496_v55 = vld [vmem:[#allocation22 + $0xc8] ss:$16 sps:$4 sm:$0xff]  }
0x1c61   :  { %9249 = vmatpush2.bf16.msra.mxu1 %v12436_v38  ;;  %v12490_v38 = vld [vmem:[#allocation22 + $0xe8] ss:$16 sps:$4 sm:$0xff]  }
0x1c62   :  { %10078 = vmatpush2.bf16.msra.mxu0 %v12484_v50  ;;  %10088 = vmatprep.subr.bf16.mxu1 %v12489_v3  ;;  %v12498_v50 = vld [vmem:[#allocation22 + $0xcc] ss:$16 sps:$4 sm:$0xff]   ;;  %v12502_v3 = vld [vmem:[#allocation22 + $0xa8] ss:$16 sps:$4 sm:$0xff]  }
0x1c63   :  { %10129 = vmatprep.subr.bf16.mxu0 %v12492_v18  ;;  %v12510_v18 = vld [vmem:[#allocation22 + $0x8c] ss:$16 sps:$4 sm:$0xff]  }
0x1c64   :  { %9251 = vmatmul.mubr.bf16.vlgmr.msra.gmra.mxu1 %v15611_v39  ;;  %v12505_v39 = vld [vmem:[#allocation22 + $0x280] ss:$16 sps:$4 sm:$0xff]  }
0x1c65   :  { %10089 = vmatpush1.bf16.msra.mxu1 %v12487_v60  ;;  %v12504_v60 = vld [vmem:[#allocation22 + $0xac] ss:$16 sps:$4 sm:$0xff]  }
0x1c66   :  { %10090 = vmatprep.subr.bf16.mxu1 %v12495_v41  ;;  %v12516_v41 = vld [vmem:[#allocation22 + $0x6c] ss:$16 sps:$4 sm:$0xff]  }
0x1c69   :  { %10091 = vmatpush1.bf16.msra.mxu1 %v12493_v49  ;;  %v12508_v49 = vld [vmem:[#allocation22 + $0x88] ss:$16 sps:$4 sm:$0xff]  }
0x1c6a   :  { %10092 = vmatprep.subr.bf16.mxu1 %v12501_v34  ;;  %v12522_v34 = vld [vmem:[#allocation22 + $0x4c] ss:$16 sps:$4 sm:$0xff]  }
0x1c6d   :  { %10093 = vmatpush1.bf16.msra.mxu1 %v12499_v23  ;;  %v12514_v23 = vld [vmem:[#allocation22 + $0x68] ss:$16 sps:$4 sm:$0xff]  }
0x1c6e   :  { %10094 = vmatprep.subr.bf16.mxu1 %v12507_v56  ;;  %v12528_v56 = vld [vmem:[#allocation22 + $0x2c] ss:$16 sps:$4 sm:$0xff]  }
0x1c71   :  { %10095 = vmatpush1.bf16.msra.mxu1 %v12505_v39  ;;  %v12520_v39 = vld [vmem:[#allocation22 + $0x48] ss:$16 sps:$4 sm:$0xff]  }
0x1c72   :  { %10096 = vmatprep.subr.bf16.mxu1 %v12513_v31  ;;  %v12534_v31 = vld [vmem:[#allocation22 + $0xc] ss:$16 sps:$4 sm:$0xff]  }
0x1c75   :  { %10097 = vmatpush1.bf16.msra.mxu1 %v12511_v10  ;;  %v12526_v10 = vld [vmem:[#allocation22 + $0x28] ss:$16 sps:$4 sm:$0xff]  }
0x1c76   :  { %10098 = vmatprep.subr.bf16.mxu1 %v12519_v26  ;;  %v12540_v26 = vld [vmem:[#allocation22 + $0x1ec] ss:$16 sps:$4 sm:$0xff]  }
0x1c79   :  { %10099 = vmatpush1.bf16.msra.mxu1 %v12517_v52  ;;  %v12532_v52 = vld [vmem:[#allocation22 + $0x8] ss:$16 sps:$4 sm:$0xff]  }
0x1c7a   :  { %10100 = vmatprep.subr.bf16.mxu1 %v12525_v62  ;;  %v12546_v62 = vld [vmem:[#allocation22 + $0x1cc] ss:$16 sps:$4 sm:$0xff]  }
0x1c7d   :  { %10101 = vmatpush1.bf16.msra.mxu1 %v12523_v4  ;;  %v12538_v4 = vld [vmem:[#allocation22 + $0x1e8] ss:$16 sps:$4 sm:$0xff]  }
0x1c7e   :  { %10102 = vmatprep.subr.bf16.mxu1 %v12531_v51  ;;  %v12552_v51 = vld [vmem:[#allocation22 + $0x1ac] ss:$16 sps:$4 sm:$0xff]  }
0x1c81   :  { %10103 = vmatpush1.bf16.msra.mxu1 %v12529_v21  ;;  %v12544_v21 = vld [vmem:[#allocation22 + $0x1c8] ss:$16 sps:$4 sm:$0xff]  }
0x1c82   :  { %10104 = vmatprep.subr.bf16.mxu1 %v12537_v42  ;;  %v12558_v42 = vld [vmem:[#allocation22 + $0x18c] ss:$16 sps:$4 sm:$0xff]  }
0x1c85   :  { %10105 = vmatpush2.bf16.msra.mxu1 %v12535_v0  ;;  %v12550_v0 = vld [vmem:[#allocation22 + $0x1a8] ss:$16 sps:$4 sm:$0xff]  }
0x1c86   :  { %10106 = vmatprep.subr.bf16.mxu1 %v12543_v19  ;;  %v12564_v19 = vld [vmem:[#allocation22 + $0x16c] ss:$16 sps:$4 sm:$0xff]  }
0x1c89   :  { %10107 = vmatpush2.bf16.msra.mxu1 %v12541_v16  ;;  %v12556_v16 = vld [vmem:[#allocation22 + $0x188] ss:$16 sps:$4 sm:$0xff]  }
0x1c8a   :  { %10108 = vmatprep.subr.bf16.mxu1 %v12549_v37  ;;  %v12570_v37 = vld [vmem:[#allocation22 + $0x14c] ss:$16 sps:$4 sm:$0xff]  }
0x1c8d   :  { %10109 = vmatpush2.bf16.msra.mxu1 %v12547_v48  ;;  %v12562_v48 = vld [vmem:[#allocation22 + $0x168] ss:$16 sps:$4 sm:$0xff]  }
0x1c8e   :  { %10110 = vmatprep.subr.bf16.mxu1 %v12555_v32  ;;  %v12576_v32 = vld [vmem:[#allocation22 + $0x12c] ss:$16 sps:$4 sm:$0xff]  }
0x1c91   :  { %10111 = vmatpush2.bf16.msra.mxu1 %v12553_v8  ;;  %v12568_v8 = vld [vmem:[#allocation22 + $0x148] ss:$16 sps:$4 sm:$0xff]  }
0x1c92   :  { %10112 = vmatprep.subr.bf16.mxu1 %v12561_v59  ;;  %v8454_v59 = vrot.slane %v15600_v2, %v15923_v30 }
0x1c95   :  { %10113 = vmatpush2.bf16.msra.mxu1 %v12559_v22  ;;  %v8450_v22 = vrot.slane %v15596_v40, %v15923_v30 }
0x1c96   :  { %10114 = vmatprep.subr.bf16.mxu1 %v12567_v1  ;;  %v12582_v1 = vld [vmem:[#allocation22 + $0x10c] ss:$16 sps:$4 sm:$0xff]  }
0x1c99   :  { %10115 = vmatpush2.bf16.msra.mxu1 %v12565_v29  ;;  %v12574_v29 = vld [vmem:[#allocation22 + $0x128] ss:$16 sps:$4 sm:$0xff]  }
0x1c9a   :  { %10116 = vmatprep.subr.bf16.mxu1 %v12573_v54 }
0x1c9d   :  { %10117 = vmatpush2.bf16.msra.mxu1 %v12571_v43 }
0x1c9e   :  { %10118 = vmatprep.subr.bf16.mxu1 %v12579_v5 }
0x1ca1   :  { %10119 = vmatpush2.bf16.msra.mxu1 %v12577_v14 }
0x1ca2   :  { %10170 = vmatprep.subr.bf16.mxu1 %v12585_v7 }
0x1ca4   :  { %v9129_v61 = vpop.f32.mrf.mxu0 }
0x1ca5   :  { %v9130_v25 = vadd.f32 %v9129_v61, %v8442_v24  ;;  %v12583_v24 = vld [vmem:[#allocation22 + $0x2e8] ss:$16 sps:$4 sm:$0xff]  }
0x1ca6   :  { %v9131_v12 = vpop.f32.mrf.mxu0 }
0x1ca7   :  { %v9132_v15 = vadd.f32 %v9131_v12, %v8446_v11  ;;  %v12580_v12 = vld [vmem:[#allocation22 + $0x108] ss:$16 sps:$4 sm:$0xff]  }
0x1ca8   :  { %v9133_v36 = vpop.f32.mrf.mxu0 }
0x1caa   :  { %v9134_v28 = vpop.f32.mrf.mxu0 }
0x1ce4   :  { %v9170_v46 = vpop.f32.mrf.mxu1  ;;  %v15624_v35 = vpop.f32.mrf.mxu0 }
0x1ce5   :  { %v9171_v58 = vadd.f32 %v9170_v46, %v9130_v25  ;;  %v9212_v43 = vadd.f32 %v15624_v35, %v8450_v22  ;;  %v12588_v25 = vld [vmem:[#allocation22 + $0x2cc] ss:$16 sps:$4 sm:$0xff]   ;;  %v12586_v46 = vld [vmem:[#allocation22 + $0x2c8] ss:$16 sps:$4 sm:$0xff]  }
0x1ce6   :  { %v9172_v33 = vpop.f32.mrf.mxu1  ;;  %v15626_v17 = vpop.f32.mrf.mxu0  ;;  %v12591_v35 = vld [vmem:[#allocation22 + $0x2ac] ss:$16 sps:$4 sm:$0xff]  }
0x1ce7   :  { %v9173_v47 = vadd.f32 %v9172_v33, %v9132_v15  ;;  %v15628_v20 = vpack.c.bf16 %v9171_v58, %v9171_v58  ;;  %v9214_v61 = vadd.f32 %v15626_v17, %v8454_v59  ;;  %v15924_v15 = vmov 0.0   ;;  %v12589_v58 = vld [vmem:[#allocation22 + $0x2a8] ss:$16 sps:$4 sm:$0xff]   ;;  %v12594_v33 = vld [vmem:[#allocation22 + $0x28c] ss:$16 sps:$4 sm:$0xff]  }
0x1ce8   :  { %v9174_v44 = vpop.f32.mrf.mxu1  ;;  %v9215_v13 = vpop.f32.mrf.mxu0  ;;  %v12592_v17 = vld [vmem:[#allocation22 + $0x288] ss:$16 sps:$4 sm:$0xff]   ;;  %v10211_v59 = vld [vmem:[%s15717_s18] sm:$0xff] }
0x1ce9   :  { %v9260_v6 = vpack.c.bf16 %v9173_v47, %v9173_v47  ;;  %v12597_v47 = vld [vmem:[#allocation22 + $0x26c] ss:$16 sps:$4 sm:$0xff]   ;;  %v12595_v44 = vld [vmem:[#allocation22 + $0x268] ss:$16 sps:$4 sm:$0xff]  }
0x1cea   :  { %v9175_v63 = vpop.f32.mrf.mxu1  ;;  %v9216_v27 = vpop.f32.mrf.mxu0  ;;  %v12600_v13 = vld [vmem:[#allocation22 + $0x24c] ss:$16 sps:$4 sm:$0xff]  }
0x1ceb   :  { %10079 = vmatprep.mubr.bf16.mxu0 %v9260_v6  ;;  %v12606_v63 = vld [vmem:[#allocation22 + $0x20c] ss:$16 sps:$4 sm:$0xff]   ;;  %v12604_v27 = vld [vmem:[#allocation22 + $0x208] ss:$16 sps:$4 sm:$0xff]  }
0x1cec   :  { %10080 = vmatmul.mubr.bf16.vlgmr.msra.gmra.mxu0 %v15628_v20 }
0x1ced   :  { %10130 = vmatpush1.bf16.msra.mxu0 %v12490_v38  ;;  %10161 = vmatprep.mubr.bf16.mxu0 %v9260_v6  ;;  %v12598_v6 = vld [vmem:[#allocation22 + $0x248] ss:$16 sps:$4 sm:$0xff]   ;;  %v12603_v38 = vld [vmem:[#allocation22 + $0x22c] ss:$16 sps:$4 sm:$0xff]  }
0x1cee   :  { %10131 = vmatprep.subr.bf16.mxu0 %v12498_v50  ;;  %v12609_v50 = vld [vmem:[#allocation22 + $0x3ec] ss:$16 sps:$4 sm:$0xff]  }
0x1cf1   :  { %10132 = vmatpush1.bf16.msra.mxu0 %v12496_v55  ;;  %v12607_v55 = vld [vmem:[#allocation22 + $0x3e8] ss:$16 sps:$4 sm:$0xff]  }
0x1cf2   :  { %10133 = vmatprep.subr.bf16.mxu0 %v12504_v60  ;;  %v12612_v60 = vld [vmem:[#allocation22 + $0x3cc] ss:$16 sps:$4 sm:$0xff]  }
0x1cf5   :  { %10134 = vmatpush1.bf16.msra.mxu0 %v12502_v3  ;;  %v12610_v3 = vld [vmem:[#allocation22 + $0x3c8] ss:$16 sps:$4 sm:$0xff]  }
0x1cf6   :  { %10135 = vmatprep.subr.bf16.mxu0 %v12510_v18  ;;  %v12615_v18 = vld [vmem:[#allocation22 + $0x3ac] ss:$16 sps:$4 sm:$0xff]  }
0x1cf9   :  { %10136 = vmatpush1.bf16.msra.mxu0 %v12508_v49  ;;  %v12613_v49 = vld [vmem:[#allocation22 + $0x3a8] ss:$16 sps:$4 sm:$0xff]  }
0x1cfa   :  { %10137 = vmatprep.subr.bf16.mxu0 %v12516_v41  ;;  %v12618_v41 = vld [vmem:[#allocation22 + $0x38c] ss:$16 sps:$4 sm:$0xff]  }
0x1cfd   :  { %10138 = vmatpush1.bf16.msra.mxu0 %v12514_v23  ;;  %v12616_v23 = vld [vmem:[#allocation22 + $0x388] ss:$16 sps:$4 sm:$0xff]  }
0x1cfe   :  { %10139 = vmatprep.subr.bf16.mxu0 %v12522_v34  ;;  %v12621_v34 = vld [vmem:[#allocation22 + $0x36c] ss:$16 sps:$4 sm:$0xff]  }
0x1d01   :  { %10140 = vmatpush1.bf16.msra.mxu0 %v12520_v39  ;;  %v12619_v39 = vld [vmem:[#allocation22 + $0x368] ss:$16 sps:$4 sm:$0xff]  }
0x1d02   :  { %10141 = vmatprep.subr.bf16.mxu0 %v12528_v56  ;;  %v12624_v56 = vld [vmem:[#allocation22 + $0x34c] ss:$16 sps:$4 sm:$0xff]  }
0x1d05   :  { %10142 = vmatpush1.bf16.msra.mxu0 %v12526_v10  ;;  %v12622_v10 = vld [vmem:[#allocation22 + $0x348] ss:$16 sps:$4 sm:$0xff]  }
0x1d06   :  { %10143 = vmatprep.subr.bf16.mxu0 %v12534_v31  ;;  %v12627_v31 = vld [vmem:[#allocation22 + $0x32c] ss:$16 sps:$4 sm:$0xff]  }
0x1d09   :  { %10144 = vmatpush1.bf16.msra.mxu0 %v12532_v52  ;;  %v12625_v52 = vld [vmem:[#allocation22 + $0x328] ss:$16 sps:$4 sm:$0xff]  }
0x1d0a   :  { %10145 = vmatprep.subr.bf16.mxu0 %v12540_v26  ;;  %v12630_v26 = vld [vmem:[#allocation22 + $0x30c] ss:$16 sps:$4 sm:$0xff]  }
0x1d0d   :  { %10146 = vmatpush2.bf16.msra.mxu0 %v12538_v4  ;;  %v12628_v4 = vld [vmem:[#allocation22 + $0x308] ss:$16 sps:$4 sm:$0xff]  }
0x1d0e   :  { %10147 = vmatprep.subr.bf16.mxu0 %v12546_v62 }
0x1d11   :  { %10148 = vmatpush2.bf16.msra.mxu0 %v12544_v21 }
0x1d12   :  { %10149 = vmatprep.subr.bf16.mxu0 %v12552_v51 }
0x1d15   :  { %10150 = vmatpush2.bf16.msra.mxu0 %v12550_v0 }
0x1d16   :  { %10151 = vmatprep.subr.bf16.mxu0 %v12558_v42  ;;  %v15925_v42 = vld [vmem:[#allocation42_spill] sm:$0xff] }
0x1d19   :  { %10152 = vmatpush2.bf16.msra.mxu0 %v12556_v16  ;;  %v9394_v16 = vrot.slane %v15616_v53, %v15925_v42  ;;  %v9402_v53 = vrot.slane %v15596_v40, %v15925_v42 }
0x1d1a   :  { %10153 = vmatprep.subr.bf16.mxu0 %v12564_v19 }
0x1d1d   :  { %10154 = vmatpush2.bf16.msra.mxu0 %v12562_v48 }
0x1d1e   :  { %10155 = vmatprep.subr.bf16.mxu0 %v12570_v37 }
0x1d21   :  { %10156 = vmatpush2.bf16.msra.mxu0 %v12568_v8 }
0x1d22   :  { %10157 = vmatprep.subr.bf16.mxu0 %v12576_v32 }
0x1d24   :  { %v9252_v54 = vpop.f32.mrf.mxu1 }
0x1d25   :  { %10158 = vmatpush2.bf16.msra.mxu0 %v12574_v29  ;;  %v9253_v36 = vadd.f32 %v9252_v54, %v9212_v43 }
0x1d26   :  { %v9254_v14 = vpop.f32.mrf.mxu1  ;;  %10159 = vmatprep.subr.bf16.mxu0 %v12582_v1 }
0x1d27   :  { %v9255_v5 = vadd.f32 %v9254_v14, %v9214_v61  ;;  %v15637_v30 = vpack.c.bf16 %v9253_v36, %v9253_v36  ;;  %v9398_v61 = vrot.slane %v15620_v45, %v15925_v42  ;;  %v10679_v45 = vld [vmem:[#allocation27 + $0xf8] sm:$0xff] }
0x1d28   :  { %v9256_v28 = vpop.f32.mrf.mxu1 }
0x1d29   :  { %v9262_v7 = vpack.c.bf16 %v9255_v5, %v9255_v5  ;;  %10160 = vmatpush2.bf16.msra.mxu0 %v12580_v12  ;;  %v9406_v12 = vrot.slane %v15600_v2, %v15925_v42  ;;  %v10212_v2 = vld [vmem:[%s15717_s18 + $0x8] sm:$0xff]  ;;  %v10670_v42 = vld [vmem:[#allocation27 + $0xb0] sm:$0xff] }
0x1d2a   :  { %v9257_v11 = vpop.f32.mrf.mxu1 }
0x1d2b   :  { %10120 = vmatprep.mubr.bf16.mxu1 %v9262_v7 }
0x1d2c   :  { %10121 = vmatmul.mubr.bf16.vlgmr.msra.gmra.mxu1 %v15637_v30  ;;  %10162 = vmatmul.mubr.bf16.vlgmr.msra.gmra.mxu0 %v15628_v20  ;;  %v12601_v20 = vld [vmem:[#allocation22 + $0x228] ss:$16 sps:$4 sm:$0xff]  }
0x1d2d   :  { %10171 = vmatpush1.bf16.msra.mxu1 %v12583_v24  ;;  %10202 = vmatprep.mubr.bf16.mxu1 %v9262_v7 }
0x1d2e   :  { %10172 = vmatprep.subr.bf16.mxu1 %v12588_v25  ;;  %10280 = vmatprep.mubr.f32.mxu0 %v15924_v15 }
0x1d31   :  { %10173 = vmatpush1.bf16.msra.mxu1 %v12586_v46  ;;  %v10711_v46 = vld [vmem:[#allocation27 + $0x1f8] sm:$0xff] }
0x1d32   :  { %10174 = vmatprep.subr.bf16.mxu1 %v12591_v35  ;;  %v10663_v35 = vld [vmem:[#allocation27 + $0x78] sm:$0xff] }
0x1d35   :  { %10175 = vmatpush1.bf16.msra.mxu1 %v12589_v58  ;;  %v10695_v58 = vld [vmem:[#allocation27 + $0x178] sm:$0xff] }
0x1d36   :  { %10176 = vmatprep.subr.bf16.mxu1 %v12594_v33  ;;  %v10662_v33 = vld [vmem:[#allocation27 + $0x70] sm:$0xff] }
0x1d39   :  { %10177 = vmatpush1.bf16.msra.mxu1 %v12592_v17  ;;  %v10710_v17 = vld [vmem:[#allocation27 + $0x1f0] sm:$0xff] }
0x1d3a   :  { %10178 = vmatprep.subr.bf16.mxu1 %v12597_v47  ;;  %v10677_v47 = vld [vmem:[#allocation27 + $0xe8] sm:$0xff] }
0x1d3d   :  { %10179 = vmatpush1.bf16.msra.mxu1 %v12595_v44  ;;  %v10694_v44 = vld [vmem:[#allocation27 + $0x170] sm:$0xff] }
0x1d3e   :  { %10180 = vmatprep.subr.bf16.mxu1 %v12600_v13  ;;  %v10661_v13 = vld [vmem:[#allocation27 + $0x68] sm:$0xff] }
0x1d41   :  { %10181 = vmatpush1.bf16.msra.mxu1 %v12598_v6  ;;  %v10709_v6 = vld [vmem:[#allocation27 + $0x1e8] sm:$0xff] }
0x1d42   :  { %10182 = vmatprep.subr.bf16.mxu1 %v12603_v38  ;;  %v10676_v38 = vld [vmem:[#allocation27 + $0xe0] sm:$0xff] }
0x1d45   :  { %10183 = vmatpush1.bf16.msra.mxu1 %v12601_v20  ;;  %v10693_v20 = vld [vmem:[#allocation27 + $0x168] sm:$0xff] }
0x1d46   :  { %10184 = vmatprep.subr.bf16.mxu1 %v12606_v63  ;;  %v10660_v63 = vld [vmem:[#allocation27 + $0x60] sm:$0xff] }
0x1d49   :  { %10185 = vmatpush1.bf16.msra.mxu1 %v12604_v27  ;;  %v10708_v27 = vld [vmem:[#allocation27 + $0x1e0] sm:$0xff] }
0x1d4a   :  { %10186 = vmatprep.subr.bf16.mxu1 %v12609_v50  ;;  %v10675_v50 = vld [vmem:[#allocation27 + $0xd8] sm:$0xff] }
0x1d4d   :  { %10187 = vmatpush2.bf16.msra.mxu1 %v12607_v55  ;;  %v10692_v55 = vld [vmem:[#allocation27 + $0x160] sm:$0xff] }
0x1d4e   :  { %10188 = vmatprep.subr.bf16.mxu1 %v12612_v60  ;;  %v10659_v60 = vld [vmem:[#allocation27 + $0x58] sm:$0xff] }
0x1d51   :  { %10189 = vmatpush2.bf16.msra.mxu1 %v12610_v3  ;;  %v10707_v3 = vld [vmem:[#allocation27 + $0x1d8] sm:$0xff] }
0x1d52   :  { %10190 = vmatprep.subr.bf16.mxu1 %v12615_v18  ;;  %v10674_v18 = vld [vmem:[#allocation27 + $0xd0] sm:$0xff] }
0x1d55   :  { %10191 = vmatpush2.bf16.msra.mxu1 %v12613_v49  ;;  %v10691_v49 = vld [vmem:[#allocation27 + $0x158] sm:$0xff] }
0x1d56   :  { %10192 = vmatprep.subr.bf16.mxu1 %v12618_v41  ;;  %v10658_v41 = vld [vmem:[#allocation27 + $0x50] sm:$0xff] }
0x1d59   :  { %10193 = vmatpush2.bf16.msra.mxu1 %v12616_v23  ;;  %v10706_v23 = vld [vmem:[#allocation27 + $0x1d0] sm:$0xff] }
0x1d5a   :  { %10194 = vmatprep.subr.bf16.mxu1 %v12621_v34  ;;  %v10673_v34 = vld [vmem:[#allocation27 + $0xc8] sm:$0xff] }
0x1d5d   :  { %10195 = vmatpush2.bf16.msra.mxu1 %v12619_v39  ;;  %v10690_v39 = vld [vmem:[#allocation27 + $0x150] sm:$0xff] }
0x1d5e   :  { %10196 = vmatprep.subr.bf16.mxu1 %v12624_v56  ;;  %v10657_v56 = vld [vmem:[#allocation27 + $0x48] sm:$0xff] }
0x1d61   :  { %10197 = vmatpush2.bf16.msra.mxu1 %v12622_v10  ;;  %v10705_v10 = vld [vmem:[#allocation27 + $0x1c8] sm:$0xff] }
0x1d62   :  { %10198 = vmatprep.subr.bf16.mxu1 %v12627_v31  ;;  %v10672_v31 = vld [vmem:[#allocation27 + $0xc0] sm:$0xff] }
0x1d65   :  { %10199 = vmatpush2.bf16.msra.mxu1 %v12625_v52  ;;  %v10689_v52 = vld [vmem:[#allocation27 + $0x148] sm:$0xff] }
0x1d66   :  { %10200 = vmatprep.subr.bf16.mxu1 %v12630_v26  ;;  %v10656_v26 = vld [vmem:[#allocation27 + $0x40] sm:$0xff] }
0x1d69   :  { %10201 = vmatpush2.bf16.msra.mxu1 %v12628_v4  ;;  %v10704_v4 = vld [vmem:[#allocation27 + $0x1c0] sm:$0xff] }
0x1d6a   :  { %11725 = vmatprep.subr.mxu1 %v15924_v15 }
0x1d6c   :  { %10203 = vmatmul.mubr.bf16.vlgmr.msra.gmra.mxu1 %v15637_v30 }
0x1d6d   :  { %11727 = vmatprep.mubr.msk.f32.mxu1 %vm13259_vm9, %v15924_v15 }
0x1dac   :  { %v10081_v62 = vpop.f32.mrf.mxu0 }
0x1dad   :  { %v10082_v19 = vadd.f32 %v10081_v62, %v9394_v16  ;;  %v10671_v62 = vld [vmem:[#allocation27 + $0xb8] sm:$0xff] }
0x1dae   :  { %v10083_v21 = vpop.f32.mrf.mxu0  ;;  %v10687_v16 = vld [vmem:[#allocation27 + $0x138] sm:$0xff] }
0x1daf   :  { %v10084_v14 = vadd.f32 %v10083_v21, %v9398_v61  ;;  %v10688_v21 = vld [vmem:[#allocation27 + $0x140] sm:$0xff] }
0x1db0   :  { %v10085_v51 = vpop.f32.mrf.mxu0  ;;  %v10684_v61 = vld [vmem:[#allocation27 + $0x120] sm:$0xff] }
0x1db1   :  { %v10655_v51 = vld [vmem:[#allocation27 + $0x38] sm:$0xff] }
0x1db2   :  { %v10086_v0 = vpop.f32.mrf.mxu0 }
0x1db3   :  { %v10703_v0 = vld [vmem:[#allocation27 + $0x1b8] sm:$0xff] }
0x1dec   :  { %v10122_v48 = vpop.f32.mrf.mxu1  ;;  %v10163_v37 = vpop.f32.mrf.mxu0 }
0x1ded   :  { %v10123_v8 = vadd.f32 %v10122_v48, %v10082_v19  ;;  %v10164_v36 = vadd.f32 %v10163_v37, %v9402_v53  ;;  %v10654_v19 = vld [vmem:[#allocation27 + $0x30] sm:$0xff]  ;;  %v10669_v37 = vld [vmem:[#allocation27 + $0xa8] sm:$0xff]  ;;  %v10651_v53 = vld [vmem:[#allocation27 + $0x18] sm:$0xff] }
0x1dee   :  { %v10124_v32 = vpop.f32.mrf.mxu1  ;;  %v10165_v22 = vpop.f32.mrf.mxu0  ;;  %v10702_v48 = vld [vmem:[#allocation27 + $0x1b0] sm:$0xff] }
0x1def   :  { %10246 = vmatprep.subr.mxu0 %v10123_v8  ;;  %v10166_v28 = vadd.f32 %v10165_v22, %v9406_v12  ;;  %v10125_v24 = vadd.f32 %v10124_v32, %v10084_v14  ;;  %v10653_v32 = vld [vmem:[#allocation27 + $0x28] sm:$0xff]  ;;  %v10666_v12 = vld [vmem:[#allocation27 + $0x90] sm:$0xff] }
0x1df0   :  { %v10126_v29 = vpop.f32.mrf.mxu1  ;;  %v10167_v1 = vpop.f32.mrf.mxu0  ;;  %10247 = vmatpush1.msra.mxu0 %v15545_v9  ;;  %v10701_v22 = vld [vmem:[#allocation27 + $0x1a8] sm:$0xff]  ;;  %v10650_v14 = vld [vmem:[#allocation27 + $0x10] sm:$0xff] }
0x1df1   :  { %11530 = vmatmul.mubr.msk.f32.vlgmr.msra.gmra.mxu0 %vm4909_vm12, %v10211_v59  ;;  %v10652_v29 = vld [vmem:[#allocation27 + $0x20] sm:$0xff]  ;;  %v10685_v1 = vld [vmem:[#allocation27 + $0x128] sm:$0xff] }
0x1df2   :  { %v10127_v43 = vpop.f32.mrf.mxu1  ;;  %v10168_v54 = vpop.f32.mrf.mxu0  ;;  %10351 = vmatprep.mubr.f32.mxu0 %v15924_v15 }
0x1df3   :  { %v10667_v43 = vld [vmem:[#allocation27 + $0x98] sm:$0xff]  ;;  %v10700_v54 = vld [vmem:[#allocation27 + $0x1a0] sm:$0xff] }
0x1e2c   :  { %v10204_v5 = vpop.f32.mrf.mxu1 }
0x1e2d   :  { %v10205_v7 = vadd.f32 %v10204_v5, %v10164_v36  ;;  %v10699_v36 = vld [vmem:[#allocation27 + $0x198] sm:$0xff] }
0x1e2e   :  { %v10206_v30 = vpop.f32.mrf.mxu1  ;;  %v10683_v5 = vld [vmem:[#allocation27 + $0x118] sm:$0xff] }
0x1e2f   :  { %v10207_v11 = vadd.f32 %v10206_v30, %v10166_v28  ;;  %10317 = vmatprep.subr.mxu0 %v10205_v7  ;;  %v10665_v28 = vld [vmem:[#allocation27 + $0x88] sm:$0xff]  ;;  %v10682_v30 = vld [vmem:[#allocation27 + $0x110] sm:$0xff] }
0x1e30   :  { %v10208_v25 = vpop.f32.mrf.mxu1  ;;  %10318 = vmatpush1.msra.mxu0 %v10125_v24 }
0x1e31   :  { %11531 = vmatmul.mubr.msk.f32.vlgmr.msra.gmra.mxu0 %vm4909_vm12, %v10211_v59  ;;  %11726 = vmatpush3.msra.mxu1 %v10207_v11  ;;  %v10697_v25 = vld [vmem:[#allocation27 + $0x188] sm:$0xff] }
0x1e32   :  { %10461 = vmatprep.subr.mxu0 %v10123_v8  ;;  %v10209_v40 = vpop.f32.mrf.mxu1  ;;  %11728 = vmatmul.mubr.msk.f32.vlgmr.msra.gmra.mxu1 %vm4909_vm12, %v10211_v59  ;;  %v10686_v8 = vld [vmem:[#allocation27 + $0x130] sm:$0xff]  ;;  %v10668_v59 = vld [vmem:[#allocation27 + $0xa0] sm:$0xff] }
0x1e33   :  { %10462 = vmatpush1.msra.mxu0 %v15545_v9  ;;  %10532 = vmatprep.subr.mxu1 %v10205_v7  ;;  %v10678_v9 = vld [vmem:[#allocation27 + $0xf0] sm:$0xff]  ;;  %v10648_v40 = vld [vmem:[#allocation27] sm:$0xff] }
0x1e34   :  { %10533 = vmatpush1.msra.mxu1 %v10125_v24  ;;  %10495 = vmatprep.mubr.f32.mxu0 %v15924_v15  ;;  %v10698_v7 = vld [vmem:[#allocation27 + $0x190] sm:$0xff]  ;;  %v10649_v24 = vld [vmem:[#allocation27 + $0x8] sm:$0xff] }
0x1e35   :  { %11730 = vmatprep.subr.mxu0 %v15924_v15  ;;  %11533 = vmatmul.mubr.msk.f32.vlgmr.msra.gmra.mxu0 %vm4909_vm12, %v10212_v2 }
0x1e36   :  { %10566 = vmatprep.mubr.f32.mxu1 %v15924_v15  ;;  %11731 = vmatpush3.msra.mxu0 %v10207_v11  ;;  %v10664_v11 = vld [vmem:[#allocation27 + $0x80] sm:$0xff] }
0x1e37   :  { %11534 = vmatmul.mubr.msk.f32.vlgmr.msra.gmra.mxu1 %vm4909_vm12, %v10212_v2  ;;  %11732 = vmatprep.mubr.msk.f32.mxu0 %vm13259_vm9, %v15924_v15 }
0x1e38   :  { %11568 = vmatprep.subr.mxu1 %v10679_v45  ;;  %11603 = vmatprep.subr.mxu0 %v10711_v46  ;;  %v10696_v45 = vld [vmem:[#allocation27 + $0x180] sm:$0xff] }
0x1e39   :  { %11733 = vmatmul.mubr.msk.f32.vlgmr.msra.gmra.mxu0 %vm4909_vm12, %v10212_v2  ;;  %11569 = vmatpush3.msra.mxu1 %v10663_v35  ;;  %v10681_v2 = vld [vmem:[#allocation27 + $0x108] sm:$0xff]  ;;  %v10680_v46 = vld [vmem:[#allocation27 + $0x100] sm:$0xff] }
0x1e3a   :  { %11570 = vmatprep.subr.mxu1 %v10678_v9  ;;  %11604 = vmatpush3.msra.mxu0 %v10695_v58 }
0x1e3b   :  { %11571 = vmatpush3.msra.mxu1 %v10662_v33  ;;  %11605 = vmatprep.subr.mxu0 %v10710_v17 }
0x1e3c   :  { %11572 = vmatprep.subr.mxu1 %v10677_v47  ;;  %11606 = vmatpush3.msra.mxu0 %v10694_v44 }
0x1e3d   :  { %11573 = vmatpush3.msra.mxu1 %v10661_v13  ;;  %11607 = vmatprep.subr.mxu0 %v10709_v6 }
0x1e3e   :  { %11574 = vmatprep.subr.mxu1 %v10676_v38  ;;  %11608 = vmatpush3.msra.mxu0 %v10693_v20 }
0x1e3f   :  { %11575 = vmatpush3.msra.mxu1 %v10660_v63  ;;  %11609 = vmatprep.subr.mxu0 %v10708_v27  ;;  %v10727_v27 = vld [vmem:[#allocation27 + $0x278] sm:$0xff] }
0x1e40   :  { %11576 = vmatprep.subr.mxu1 %v10675_v50  ;;  %11610 = vmatpush3.msra.mxu0 %v10692_v55 }
0x1e41   :  { %11577 = vmatpush3.msra.mxu1 %v10659_v60  ;;  %11611 = vmatprep.subr.mxu0 %v10707_v3  ;;  %v10726_v3 = vld [vmem:[#allocation27 + $0x270] sm:$0xff] }
0x1e42   :  { %11578 = vmatprep.subr.mxu1 %v10674_v18  ;;  %11612 = vmatpush3.msra.mxu0 %v10691_v49  ;;  %v10725_v49 = vld [vmem:[#allocation27 + $0x268] sm:$0xff] }
0x1e43   :  { %11579 = vmatpush3.msra.mxu1 %v10658_v41  ;;  %11613 = vmatprep.subr.mxu0 %v10706_v23  ;;  %v10724_v41 = vld [vmem:[#allocation27 + $0x260] sm:$0xff]  ;;  %v10723_v23 = vld [vmem:[#allocation27 + $0x258] sm:$0xff] }
0x1e44   :  { %11580 = vmatprep.subr.mxu1 %v10673_v34  ;;  %11614 = vmatpush3.msra.mxu0 %v10690_v39  ;;  %v10722_v34 = vld [vmem:[#allocation27 + $0x250] sm:$0xff]  ;;  %v10721_v39 = vld [vmem:[#allocation27 + $0x248] sm:$0xff] }
0x1e45   :  { %11581 = vmatpush3.msra.mxu1 %v10657_v56  ;;  %11615 = vmatprep.subr.mxu0 %v10705_v10  ;;  %v10720_v56 = vld [vmem:[#allocation27 + $0x240] sm:$0xff]  ;;  %v10719_v10 = vld [vmem:[#allocation27 + $0x238] sm:$0xff] }
0x1e46   :  { %11582 = vmatprep.subr.mxu1 %v10672_v31  ;;  %11616 = vmatpush3.msra.mxu0 %v10689_v52  ;;  %v10718_v31 = vld [vmem:[#allocation27 + $0x230] sm:$0xff]  ;;  %v10717_v52 = vld [vmem:[#allocation27 + $0x228] sm:$0xff] }
0x1e47   :  { %11583 = vmatpush3.msra.mxu1 %v10656_v26  ;;  %11617 = vmatprep.subr.mxu0 %v10704_v4  ;;  %v10716_v26 = vld [vmem:[#allocation27 + $0x220] sm:$0xff]  ;;  %v10715_v4 = vld [vmem:[#allocation27 + $0x218] sm:$0xff] }
0x1e48   :  { %11584 = vmatprep.subr.mxu1 %v10671_v62  ;;  %11618 = vmatpush3.msra.mxu0 %v10688_v21  ;;  %v10714_v62 = vld [vmem:[#allocation27 + $0x210] sm:$0xff]  ;;  %v10713_v21 = vld [vmem:[#allocation27 + $0x208] sm:$0xff] }
0x1e49   :  { %11585 = vmatpush3.msra.mxu1 %v10655_v51  ;;  %11619 = vmatprep.subr.mxu0 %v10703_v0  ;;  %v10712_v51 = vld [vmem:[#allocation27 + $0x200] sm:$0xff] }
0x1e4a   :  { %11586 = vmatprep.subr.mxu1 %v10670_v42  ;;  %11620 = vmatpush3.msra.mxu0 %v10687_v16 }
0x1e4b   :  { %11587 = vmatpush3.msra.mxu1 %v10654_v19  ;;  %11621 = vmatprep.subr.mxu0 %v10702_v48  ;;  %v12874_v48 = vld [vmem:[#allocation25] sm:$0x77] }
0x1e4c   :  { %11588 = vmatprep.subr.mxu1 %v10669_v37  ;;  %11622 = vmatpush3.msra.mxu0 %v10686_v8  ;;  %v10731_v37 = vrot.slane %v12874_v48, %v15919_v57 }
0x1e4d   :  { %11589 = vmatpush3.msra.mxu1 %v10653_v32  ;;  %11623 = vmatprep.subr.mxu0 %v10701_v22 }
0x1e4e   :  { %11590 = vmatprep.subr.mxu1 %v10668_v59  ;;  %11624 = vmatpush3.msra.mxu0 %v10685_v1 }
0x1e4f   :  { %11591 = vmatpush3.msra.mxu1 %v10652_v29  ;;  %11625 = vmatprep.subr.mxu0 %v10700_v54 }
0x1e50   :  { %11592 = vmatprep.subr.mxu1 %v10667_v43  ;;  %11626 = vmatpush3.msra.mxu0 %v10684_v61 }
0x1e51   :  { %11593 = vmatpush3.msra.mxu1 %v10651_v53  ;;  %11627 = vmatprep.subr.mxu0 %v10699_v36 }
0x1e52   :  { %11594 = vmatprep.subr.mxu1 %v10666_v12  ;;  %11628 = vmatpush3.msra.mxu0 %v10683_v5 }
0x1e53   :  { %11595 = vmatpush3.msra.mxu1 %v10650_v14  ;;  %11629 = vmatprep.subr.mxu0 %v10698_v7 }
0x1e54   :  { %11596 = vmatprep.subr.mxu1 %v10665_v28  ;;  %11630 = vmatpush3.msra.mxu0 %v10682_v30 }
0x1e55   :  { %11597 = vmatpush3.msra.mxu1 %v10649_v24  ;;  %11631 = vmatprep.subr.mxu0 %v10697_v25 }
0x1e56   :  { %11598 = vmatprep.subr.mxu1 %v10664_v11  ;;  %11632 = vmatpush3.msra.mxu0 %v10681_v2 }
0x1e57   :  { %11599 = vmatpush3.msra.mxu1 %v10648_v40  ;;  %11633 = vmatprep.subr.mxu0 %v10696_v45 }
0x1e58   :  { %11735 = vmatprep.subr.mxu1 %v15924_v15  ;;  %11634 = vmatpush3.msra.mxu0 %v10680_v46 }
0x1eb1   :  { %v10282_v35 = vpop.f32.mrf.mxu0 }
0x1eb3   :  { %v10284_v9 = vpop.f32.mrf.mxu0 }
0x1ef1   :  { %v10353_v58 = vpop.f32.mrf.mxu0 }
0x1ef2   :  { %v15675_v33 = vpop.f32.mrf.mxu1 }
0x1ef3   :  { %v10355_v17 = vpop.f32.mrf.mxu0 }
0x1ef4   :  { %v11729_v47 = vpop.f32.mrf.mxu1 }
0x1ef5   :  { %v10497_v44 = vpop.f32.mrf.mxu0 }
0x1ef6   :  { %v10643_v20 = vmul.f32 %v10497_v44, %v10282_v35 }
0x1ef7   :  { %v10568_v13 = vpop.f32.mrf.mxu1  ;;  %v10499_v6 = vpop.f32.mrf.mxu0 }
0x1ef8   :  { %v10644_v38 = vmul.f32 %v10499_v6, %v10284_v9  ;;  %v10645_v60 = vmul.f32 %v10568_v13, %v10353_v58 }
0x1ef9   :  { %v10570_v63 = vpop.f32.mrf.mxu1  ;;  %v10639_v50 = vpop.f32.mrf.mxu0 }
0x1efa   :  { %v10646_v55 = vmul.f32 %v10570_v63, %v10355_v17  ;;  %10796 = vmatprep.mubr.f32.mxu1 %v10644_v38  ;;  %v10647_v0 = vmul.f32 %v10639_v50, %v15675_v33 }
0x1efb   :  { %10797 = vmatmul.mubr.f32.vlgmr.msra.gmra.mxu1 %v10643_v20  ;;  %v11734_v18 = vpop.f32.mrf.mxu0 }
0x1efc   :  { %10866 = vmatprep.mubr.f32.mxu0 %v10646_v55  ;;  %11736 = vmatpush3.msra.mxu1 %v10727_v27 }
0x1efd   :  { %10867 = vmatmul.mubr.f32.vlgmr.msra.gmra.mxu0 %v10645_v60  ;;  %11737 = vmatprep.subr.mxu1 %v15924_v15 }
0x1efe   :  { %11738 = vmatpush3.msra.mxu1 %v10726_v3  ;;  %11767 = vmatprep.mubr.msk.f32.mxu1 %vm13259_vm9, %v15924_v15 }
0x1eff   :  { %11739 = vmatprep.subr.mxu1 %v15924_v15 }
0x1f00   :  { %11740 = vmatpush3.msra.mxu1 %v10725_v49 }
0x1f01   :  { %11741 = vmatprep.subr.mxu1 %v15924_v15 }
0x1f02   :  { %11742 = vmatpush3.msra.mxu1 %v10724_v41 }
0x1f03   :  { %11743 = vmatprep.subr.mxu1 %v15924_v15 }
0x1f04   :  { %11744 = vmatpush3.msra.mxu1 %v10723_v23 }
0x1f05   :  { %11745 = vmatprep.subr.mxu1 %v15924_v15 }
0x1f06   :  { %11746 = vmatpush3.msra.mxu1 %v10722_v34 }
0x1f07   :  { %11747 = vmatprep.subr.mxu1 %v15924_v15 }
0x1f08   :  { %11748 = vmatpush3.msra.mxu1 %v10721_v39 }
0x1f09   :  { %11749 = vmatprep.subr.mxu1 %v15924_v15 }
0x1f0a   :  { %11750 = vmatpush3.msra.mxu1 %v10720_v56 }
0x1f0b   :  { %11751 = vmatprep.subr.mxu1 %v15924_v15 }
0x1f0c   :  { %11752 = vmatpush3.msra.mxu1 %v10719_v10 }
0x1f0d   :  { %11753 = vmatprep.subr.mxu1 %v15924_v15 }
0x1f0e   :  { %11754 = vmatpush3.msra.mxu1 %v10718_v31 }
0x1f0f   :  { %11755 = vmatprep.subr.mxu1 %v15924_v15 }
0x1f10   :  { %11756 = vmatpush3.msra.mxu1 %v10717_v52 }
0x1f11   :  { %11757 = vmatprep.subr.mxu1 %v15924_v15 }
0x1f12   :  { %11758 = vmatpush3.msra.mxu1 %v10716_v26 }
0x1f13   :  { %11759 = vmatprep.subr.mxu1 %v15924_v15 }
0x1f14   :  { %11760 = vmatpush3.msra.mxu1 %v10715_v4 }
0x1f15   :  { %11761 = vmatprep.subr.mxu1 %v15924_v15 }
0x1f16   :  { %11762 = vmatpush3.msra.mxu1 %v10714_v62 }
0x1f17   :  { %11763 = vmatprep.subr.mxu1 %v15924_v15 }
0x1f18   :  { %11764 = vmatpush3.msra.mxu1 %v10713_v21 }
0x1f19   :  { %11765 = vmatprep.subr.mxu1 %v15924_v15 }
0x1f1a   :  { %11766 = vmatpush3.msra.mxu1 %v10712_v51 }
0x1f1b   :  { %11768 = vmatmul.mubr.f32.vlgmr.msra.gmra.mxu1 %v10647_v0 }
0x1fbb   :  { %v11600_v42 = vpop.f32.mrf.mxu1 }
0x1fbd   :  { %v11635_v16 = vpop.f32.mrf.mxu0  ;;  %v11601_v19 = vpop.f32.mrf.mxu1 }
0x1fbe   :  { %v11602_v8 = vadd.f32 %v11601_v19, %v11600_v42 }
0x1fbf   :  { %v11636_v32 = vpop.f32.mrf.mxu0 }
0x1fc0   :  { %v10799_v22 = vadd.f32 %v11602_v8, %v10731_v37  ;;  %v11637_v59 = vadd.f32 %v11636_v32, %v11635_v16 }
0x1fc2   :  { %v10869_v29 = vadd.f32 %v11637_v59, %v10799_v22 }
0x1fdb   :  { %v10938_v1 = vpop.f32.mrf.mxu1 }
0x1fdc   :  { %v10939_v43 = vadd.f32 %v10938_v1, %v10869_v29 }
0x1fdd   :  { %v11769_v54 = vpop.f32.mrf.mxu1 }
0x1fde   :  { %10942 = vst [vmem:[%s15718_s19] sm:$0xff] %v10939_v43 }
0x1fdf   :  { %10947 = vsyncpa [#allocation3], 1 }
0x1fe0   :  { %10948 = vsyncpa [#allocation5], 1 }
0x1fe1   :  { %10949 = vsyncpa [#allocation8], 1 }
0x1fe2   :  { %10950 = vsyncpa [#allocation11], 1 }
0x1fe3   :  { %10951 = vsyncpa [#allocation14], 1 }
0x1fe4   :  { %10952 = vsyncpa [#allocation17], 1 }
0x1fe5   :  { %10953 = vsyncpa [#allocation20], 1 }
0x1fe6   :  { %10954 = vsyncpa [#allocation23], 1 }
0x1fe7   :  { %10955 = vsyncpa [#allocation26], 1 }

</bundles_post_ra>
